<compile_context>
chip_gen: v5e
topology: v5e:2x2
jax: 0.10.0
libtpu: 0.0.40
codegen_flags: <defaults>
</compile_context>

<pallas_src>
import jax
import jax.numpy as jnp
from jax.experimental import pallas as pl
from jax.experimental.pallas import tpu as pltpu

_VMEM_LIMIT = 48 * 1024 * 1024  # explicit scoped-VMEM limit (safe on v5e/v6e/v7x)


# ---------------------------------------------------------------------------
# Bilinear x2 upsample (align_corners=True), separable, NHWC in / NHWC out.
#   Stage 1: W-interp as one MXU matmul on the small input.
#   Stage 2: H-interp as one MXU matmul; channels stay on lanes so the output
#            store is NHWC / lane-dense (no wrapper transpose of the 4x tensor).
# ---------------------------------------------------------------------------
def _bilinear_matrix(n_in, n_out):
    # align_corners=True mapping: src = i * (n_in - 1) / (n_out - 1)
    i = jnp.arange(n_out, dtype=jnp.float32)
    src = i * (n_in - 1) / (n_out - 1)
    i0 = jnp.clip(jnp.floor(src).astype(jnp.int32), 0, n_in - 1)
    i1 = jnp.clip(i0 + 1, 0, n_in - 1)
    frac = src - i0.astype(jnp.float32)
    m = jnp.zeros((n_out, n_in), jnp.float32)
    m = m.at[jnp.arange(n_out), i0].add(1.0 - frac)
    m = m.at[jnp.arange(n_out), i1].add(frac)
    return m


def _upsample_kernel(x_ref, ah_ref, awt_ref, o_ref):
    # x_ref: (H, W, C) bf16   ah_ref: (H2, H) bf16   awt_ref: (W, W2) bf16
    # o_ref: (H2, W2, C) bf16
    H, W, C = x_ref.shape
    H2, W2 = o_ref.shape[0], o_ref.shape[1]

    # Stage 1 -- W interpolation on the (small) input:
    #   (H*C, W) @ (W, W2) -> (H*C, W2), f32 accumulation.
    xt = jnp.transpose(x_ref[...].astype(jnp.float32), (0, 2, 1))        # (H, C, W)
    r = jnp.dot(xt.reshape(H * C, W).astype(jnp.bfloat16), awt_ref[...],
                preferred_element_type=jnp.float32)                       # (H*C, W2)
    r = jnp.transpose(r.reshape(H, C, W2), (0, 2, 1))                     # (H, W2, C)

    # Stage 2 -- H interpolation, channels on lanes all the way to the store:
    #   (H2, H) @ (H, W2*C) -> (H2, W2*C)
    out = jnp.dot(ah_ref[...], r.reshape(H, W2 * C).astype(jnp.bfloat16),
                  preferred_element_type=jnp.float32)                     # (H2, W2*C)
    o_ref[...] = out.reshape(H2, W2, C).astype(o_ref.dtype)


def bilinear_upsample_x2_nhwc(x):  # x: (N, H, W, C) bf16
    N, H, W, C = x.shape
    H2, W2 = 2 * H, 2 * W
    ah = _bilinear_matrix(H, H2).astype(jnp.bfloat16)       # (H2, H)
    awt = _bilinear_matrix(W, W2).T.astype(jnp.bfloat16)    # (W, W2)
    return pl.pallas_call(
        _upsample_kernel,
        out_shape=jax.ShapeDtypeStruct((N, H2, W2, C), jnp.bfloat16),
        grid=(N,),
        in_specs=[
            pl.BlockSpec((None, H, W, C), lambda n: (n, 0, 0, 0)),
            pl.BlockSpec((H2, H), lambda n: (0, 0)),
            pl.BlockSpec((W, W2), lambda n: (0, 0)),
        ],
        out_specs=pl.BlockSpec((None, H2, W2, C), lambda n: (n, 0, 0, 0)),
        compiler_params=pltpu.CompilerParams(
            dimension_semantics=("parallel",),
            vmem_limit_bytes=_VMEM_LIMIT),
    )(x, ah, awt)


# ---------------------------------------------------------------------------
# Fused DoubleConv: conv3x3(pad=1)+BN+ReLU -> conv3x3(pad=1)+BN+ReLU, NHWC.
#   * the two concat sources are merged into ONE padded VMEM scratch (no HBM
#     concat, single matmul per tap with K = Ca+Cb)
#   * the F.pad(diffY/diffX) of the upsampled branch is folded into the halo
#     write offset
#   * im2col per dy: 3 matmuls per conv with K = 3*Cin
#   * only the 1-pixel halo border is re-zeroed per step
#   * bf16 MXU operands, f32 accumulation + BN/ReLU, mid activation stays VMEM
# ---------------------------------------------------------------------------
def _double_conv_kernel(xa_ref, xb_ref, w1_ref, s1_ref, b1_ref,
                        w2_ref, s2_ref, b2_ref, o_ref, p1_ref, pm_ref):
    H, W, Co = o_ref.shape
    Ca = xa_ref.shape[-1]
    Hu, Wu, Cb = xb_ref.shape
    Cin = p1_ref.shape[-1]          # Ca + Cb
    Cm = pm_ref.shape[-1]

    # --- zero only the 1-pixel halo ring (interior is fully overwritten).
    # Re-zeroed every step so the kernel stays correct if the batch axis is
    # sharded across TensorCores (each core owns its own scratch instance).
    p1_ref[0:1, :, :] = jnp.zeros((1, W + 2, Cin), p1_ref.dtype)
    p1_ref[H + 1:H + 2, :, :] = jnp.zeros((1, W + 2, Cin), p1_ref.dtype)
    p1_ref[:, 0:1, :] = jnp.zeros((H + 2, 1, Cin), p1_ref.dtype)
    p1_ref[:, W + 1:W + 2, :] = jnp.zeros((H + 2, 1, Cin), p1_ref.dtype)
    pm_ref[0:1, :, :] = jnp.zeros((1, W + 2, Cm), pm_ref.dtype)
    pm_ref[H + 1:H + 2, :, :] = jnp.zeros((1, W + 2, Cm), pm_ref.dtype)
    pm_ref[:, 0:1, :] = jnp.zeros((H + 2, 1, Cm), pm_ref.dtype)
    pm_ref[:, W + 1:W + 2, :] = jnp.zeros((H + 2, 1, Cm), pm_ref.dtype)

    # --- write the two (virtually concatenated) sources into the halo scratch.
    # xa = skip connection (x2, first in torch.cat), xb = upsampled branch.
    p1_ref[1:H + 1, 1:W + 1, :Ca] = xa_ref[...].astype(p1_ref.dtype)
    if (Hu != H) or (Wu != W):
        # F.pad(diffY/diffX) folded in: clear the xb interior, then write xb at
        # its (top, left) offset; the rest of the xb channel block stays zero.
        p1_ref[1:H + 1, 1:W + 1, Ca:] = jnp.zeros((H, W, Cb), p1_ref.dtype)
    pt = (H - Hu) // 2
    pw = (W - Wu) // 2
    p1_ref[1 + pt:1 + pt + Hu, 1 + pw:1 + pw + Wu, Ca:] = \
        xb_ref[...].astype(p1_ref.dtype)

    # --- conv1 + BN1 + ReLU, im2col per dy (3 matmuls, K = 3*Cin).
    # TODO(synk): the dx-shifted slices still pay a sublane-shift relayout each;
    #             on v7x a single long-K contraction would keep sums in the MRB.
    acc1 = jnp.zeros((H * W, Cm), jnp.float32)
    for dy in range(3):
        cols = jnp.concatenate(
            [p1_ref[dy:dy + H, dx:dx + W, :] for dx in range(3)], axis=-1)
        acc1 = acc1 + jnp.dot(cols.reshape(H * W, 3 * Cin), w1_ref[dy],
                              preferred_element_type=jnp.float32)
    h1 = jnp.maximum(acc1 * s1_ref[...] + b1_ref[...], 0.0)       # f32 (H*W, Cm)

    # Mid activation never leaves VMEM.
    pm_ref[1:H + 1, 1:W + 1, :] = h1.reshape(H, W, Cm).astype(pm_ref.dtype)

    # --- conv2 + BN2 + ReLU.
    acc2 = jnp.zeros((H * W, Co), jnp.float32)
    for dy in range(3):
        cols = jnp.concatenate(
            [pm_ref[dy:dy + H, dx:dx + W, :] for dx in range(3)], axis=-1)
        acc2 = acc2 + jnp.dot(cols.reshape(H * W, 3 * Cm), w2_ref[dy],
                              preferred_element_type=jnp.float32)
    out = jnp.maximum(acc2 * s2_ref[...] + b2_ref[...], 0.0)
    o_ref[...] = out.reshape(H, W, Co).astype(o_ref.dtype)


def double_conv_fused(xa_nhwc, xb_nhwc, p, eps=1e-5):
    # TODO(synk): BatchNorm is eval-mode only (running stats folded into an
    # affine scale/bias); training-mode batch statistics are not reproduced.
    N, H, W, Ca = xa_nhwc.shape
    _, Hu, Wu, Cb = xb_nhwc.shape
    Cin = Ca + Cb
    Cm = p["w1"].shape[0]
    Co = p["w2"].shape[0]

    # Fold BN (eval) + conv bias into per-channel scale / bias (f32).
    s1 = p["g1"] / jnp.sqrt(p["v1"] + eps)
    bb1 = p["be1"] + (p["b1"] - p["m1"]) * s1
    s2 = p["g2"] / jnp.sqrt(p["v2"] + eps)
    bb2 = p["be2"] + (p["b2"] - p["m2"]) * s2

    # PyTorch (Cout, Cin, 3, 3) -> (ky, 3*Cin, Cout): per-dy weight blocks whose
    # row order [dx=0 chans, dx=1 chans, dx=2 chans] matches the kernel's
    # per-dy channel concat.  Cin order is [x2, x1] = [xa, xb] like torch.cat.
    w1 = jnp.transpose(p["w1"], (2, 3, 1, 0)).reshape(3, 3 * Cin, Cm).astype(jnp.bfloat16)
    w2 = jnp.transpose(p["w2"], (2, 3, 1, 0)).reshape(3, 3 * Cm, Co).astype(jnp.bfloat16)

    return pl.pallas_call(
        _double_conv_kernel,
        out_shape=jax.ShapeDtypeStruct((N, H, W, Co), jnp.float32),
        grid=(N,),
        in_specs=[
            pl.BlockSpec((None, H, W, Ca), lambda n: (n, 0, 0, 0)),
            pl.BlockSpec((None, Hu, Wu, Cb), lambda n: (n, 0, 0, 0)),
            pl.BlockSpec((3, 3 * Cin, Cm), lambda n: (0, 0, 0)),
            pl.BlockSpec((1, Cm), lambda n: (0, 0)),
            pl.BlockSpec((1, Cm), lambda n: (0, 0)),
            pl.BlockSpec((3, 3 * Cm, Co), lambda n: (0, 0, 0)),
            pl.BlockSpec((1, Co), lambda n: (0, 0)),
            pl.BlockSpec((1, Co), lambda n: (0, 0)),
        ],
        out_specs=pl.BlockSpec((None, H, W, Co), lambda n: (n, 0, 0, 0)),
        scratch_shapes=[
            pltpu.VMEM((H + 2, W + 2, Cin), jnp.bfloat16),   # merged concat + halo
            pltpu.VMEM((H + 2, W + 2, Cm), jnp.bfloat16),    # mid activation + halo
        ],
        compiler_params=pltpu.CompilerParams(
            dimension_semantics=("parallel",),
            vmem_limit_bytes=_VMEM_LIMIT),
    )(xa_nhwc, xb_nhwc, w1,
      s1.reshape(1, Cm), bb1.reshape(1, Cm),
      w2, s2.reshape(1, Co), bb2.reshape(1, Co))


# ---------------------------------------------------------------------------
# Up.forward : upsample x1, pad to x2, (virtual) cat([x2, x1], dim=1), DoubleConv.
# Public API is NCHW for PyTorch parity; everything runs NHWC internally.
# ---------------------------------------------------------------------------
def up_forward(x1, x2, params):
    # x1: (N, C1, H, W), x2: (N, C2, 2H, 2W)  -- NCHW like PyTorch
    # Boundary transposes touch only the small x1 and the skip x2; the big
    # upsampled tensor is produced / consumed in NHWC bf16 with no HBM pad.
    # TODO(synk): in a full UNet keep activations NHWC end-to-end and drop them.
    x1_nhwc = jnp.transpose(x1, (0, 2, 3, 1)).astype(jnp.bfloat16)
    x1u = bilinear_upsample_x2_nhwc(x1_nhwc)                 # (N, 2H, 2W, C1) bf16
    xa = jnp.transpose(x2, (0, 2, 3, 1)).astype(jnp.bfloat16)  # skip (first in cat)
    y = double_conv_fused(xa, x1u, params)                   # diff-pad folded in-kernel
    return jnp.transpose(y, (0, 3, 1, 2))                    # back to NCHW f32


def init_up_params(key, in_channels, out_channels):
    # bilinear=True branch: DoubleConv(in_channels, out_channels, in_channels // 2)
    mid = in_channels // 2
    k1, k2, k3, k4 = jax.random.split(key, 4)
    w1 = 0.1 * jax.random.normal(k1, (mid, in_channels, 3, 3), jnp.float32)
    b1 = 0.1 * jax.random.normal(k2, (mid,), jnp.float32)
    w2 = 0.1 * jax.random.normal(k3, (out_channels, mid, 3, 3), jnp.float32)
    b2 = 0.1 * jax.random.normal(k4, (out_channels,), jnp.float32)
    return dict(
        w1=w1, b1=b1,
        g1=jnp.ones((mid,), jnp.float32), be1=jnp.zeros((mid,), jnp.float32),
        m1=jnp.zeros((mid,), jnp.float32), v1=jnp.ones((mid,), jnp.float32),
        w2=w2, b2=b2,
        g2=jnp.ones((out_channels,), jnp.float32), be2=jnp.zeros((out_channels,), jnp.float32),
        m2=jnp.zeros((out_channels,), jnp.float32), v2=jnp.ones((out_channels,), jnp.float32),
    )


if __name__ == "__main__":
    key = jax.random.PRNGKey(0)
    kx1, kx2, kp = jax.random.split(key, 3)

    in_channels, out_channels = 8, 4          # cat(x2, x1) must have in_channels channels
    N, H, W = 2, 8, 8
    x1 = jax.random.normal(kx1, (N, in_channels // 2, H, W), jnp.float32)          # low-res
    x2 = jax.random.normal(kx2, (N, in_channels // 2, 2 * H, 2 * W), jnp.float32)  # skip

    params = init_up_params(kp, in_channels, out_channels)

    out = jax.jit(up_forward)(x1, x2, params)
    jax.block_until_ready(out)
    assert out.shape == (N, out_channels, 2 * H, 2 * W)
    assert out.dtype == jnp.float32
    assert bool(jnp.all(jnp.isfinite(out)))
    print("KERNEL_OK")
</pallas_src>

<mosaic_0001>
module attributes {stable_mosaic.version = 11 : i64} {
  func.func @_upsample_kernel(%arg0: i32, %arg1: memref<1x8x8x4xbf16, #tpu.memory_space<vmem>>, %arg2: memref<16x8xbf16, #tpu.memory_space<vmem>>, %arg3: memref<8x16xbf16, #tpu.memory_space<vmem>>, %arg4: memref<1x16x16x4xbf16, #tpu.memory_space<vmem>>) attributes {dimension_semantics = [#tpu.dimension_semantics<parallel>], iteration_bounds = array<i64: 2>, scalar_prefetch = 0 : i64, scratch_operands = 0 : i64, tpu.core_type = #tpu.core_type<tc>, window_params = [{transform_indices = @transform_0, window_bounds = array<i64: 1, 8, 8, 4>}, {pipeline_mode = #tpu.pipeline_mode<synchronous>, transform_indices = @transform_1, window_bounds = array<i64: 16, 8>}, {pipeline_mode = #tpu.pipeline_mode<synchronous>, transform_indices = @transform_2, window_bounds = array<i64: 8, 16>}, {transform_indices = @transform_3, window_bounds = array<i64: 1, 16, 16, 4>}]} {
    %c0 = arith.constant 0 : index
    %c0_0 = arith.constant 0 : index
    %c0_1 = arith.constant 0 : index
    %c0_2 = arith.constant 0 : index
    %0 = vector.load %arg1[%c0, %c0_0, %c0_1, %c0_2] : memref<1x8x8x4xbf16, #tpu.memory_space<vmem>>, vector<1x8x8x4xbf16>
    %1 = vector.shape_cast %0 : vector<1x8x8x4xbf16> to vector<8x8x4xbf16>
    %2 = arith.extf %1 : vector<8x8x4xbf16> to vector<8x8x4xf32>
    %3 = tpu.transpose %2, [0, 2, 1] : vector<8x8x4xf32> -> vector<8x4x8xf32>
    %4 = vector.shape_cast %3 : vector<8x4x8xf32> to vector<32x8xf32>
    %5 = arith.truncf %4 : vector<32x8xf32> to vector<32x8xbf16>
    %c0_3 = arith.constant 0 : index
    %c0_4 = arith.constant 0 : index
    %6 = vector.load %arg3[%c0_3, %c0_4] : memref<8x16xbf16, #tpu.memory_space<vmem>>, vector<8x16xbf16>
    %cst = arith.constant dense<0.000000e+00> : vector<32x16xf32>
    %7 = tpu.matmul %5, %6, %cst {dimension_numbers = #tpu.dot_dimension_numbers<[1], [0], [0], [1], [0, 0, 1, 1], [], []>} : vector<32x8xbf16>, vector<8x16xbf16>, vector<32x16xf32> -> vector<32x16xf32>
    %8 = vector.shape_cast %7 : vector<32x16xf32> to vector<8x4x16xf32>
    %9 = tpu.transpose %8, [0, 2, 1] : vector<8x4x16xf32> -> vector<8x16x4xf32>
    %c0_5 = arith.constant 0 : index
    %c0_6 = arith.constant 0 : index
    %10 = vector.load %arg2[%c0_5, %c0_6] : memref<16x8xbf16, #tpu.memory_space<vmem>>, vector<16x8xbf16>
    %11 = vector.shape_cast %9 : vector<8x16x4xf32> to vector<8x64xf32>
    %12 = arith.truncf %11 : vector<8x64xf32> to vector<8x64xbf16>
    %cst_7 = arith.constant dense<0.000000e+00> : vector<16x64xf32>
    %13 = tpu.matmul %10, %12, %cst_7 {dimension_numbers = #tpu.dot_dimension_numbers<[1], [0], [0], [1], [0, 0, 1, 1], [], []>} : vector<16x8xbf16>, vector<8x64xbf16>, vector<16x64xf32> -> vector<16x64xf32>
    %14 = vector.shape_cast %13 : vector<16x64xf32> to vector<16x16x4xf32>
    %15 = arith.truncf %14 : vector<16x16x4xf32> to vector<16x16x4xbf16>
    %c0_8 = arith.constant 0 : index
    %c0_9 = arith.constant 0 : index
    %c0_10 = arith.constant 0 : index
    %c0_11 = arith.constant 0 : index
    %16 = vector.load %arg4[%c0_8, %c0_9, %c0_10, %c0_11] : memref<1x16x16x4xbf16, #tpu.memory_space<vmem>>, vector<1x16x16x4xbf16>
    %17 = vector.shape_cast %16 : vector<1x16x16x4xbf16> to vector<16x16x4xbf16>
    %18 = vector.shape_cast %15 : vector<16x16x4xbf16> to vector<1x16x16x4xbf16>
    tpu.vector_store %arg4[%c0_8, %c0_9, %c0_10, %c0_11], %18 {strides = array<i32>} : memref<1x16x16x4xbf16, #tpu.memory_space<vmem>>, vector<1x16x16x4xbf16>,
    return
  }
  func.func @transform_0(%arg0: i32) -> (i32, i32, i32, i32) {
    %c0_i32 = arith.constant 0 : i32
    %c0_i32_0 = arith.constant 0 : i32
    %c0_i32_1 = arith.constant 0 : i32
    %c0_i32_2 = arith.constant 0 : i32
    return %arg0, %c0_i32, %c0_i32_0, %c0_i32_1 : i32, i32, i32, i32
  }
  func.func @transform_1(%arg0: i32) -> (i32, i32) {
    %c0_i32 = arith.constant 0 : i32
    %c0_i32_0 = arith.constant 0 : i32
    %c0_i32_1 = arith.constant 0 : i32
    return %c0_i32, %c0_i32_0 : i32, i32
  }
  func.func @transform_2(%arg0: i32) -> (i32, i32) {
    %c0_i32 = arith.constant 0 : i32
    %c0_i32_0 = arith.constant 0 : i32
    %c0_i32_1 = arith.constant 0 : i32
    return %c0_i32, %c0_i32_0 : i32, i32
  }
  func.func @transform_3(%arg0: i32) -> (i32, i32, i32, i32) {
    %c0_i32 = arith.constant 0 : i32
    %c0_i32_0 = arith.constant 0 : i32
    %c0_i32_1 = arith.constant 0 : i32
    %c0_i32_2 = arith.constant 0 : i32
    return %arg0, %c0_i32, %c0_i32_0, %c0_i32_1 : i32, i32, i32, i32
  }
}

module attributes {stable_mosaic.version = 11 : i64} {
  func.func @_double_conv_kernel(%arg0: i32, %arg1: memref<1x16x16x4xbf16, #tpu.memory_space<vmem>>, %arg2: memref<1x16x16x4xbf16, #tpu.memory_space<vmem>>, %arg3: memref<3x24x4xbf16, #tpu.memory_space<vmem>>, %arg4: memref<1x4xf32, #tpu.memory_space<vmem>>, %arg5: memref<1x4xf32, #tpu.memory_space<vmem>>, %arg6: memref<3x12x4xbf16, #tpu.memory_space<vmem>>, %arg7: memref<1x4xf32, #tpu.memory_space<vmem>>, %arg8: memref<1x4xf32, #tpu.memory_space<vmem>>, %arg9: memref<1x16x16x4xf32, #tpu.memory_space<vmem>>, %arg10: memref<18x18x8xbf16, #tpu.memory_space<vmem>>, %arg11: memref<18x18x4xbf16, #tpu.memory_space<vmem>>) attributes {dimension_semantics = [#tpu.dimension_semantics<parallel>], iteration_bounds = array<i64: 2>, scalar_prefetch = 0 : i64, scratch_operands = 2 : i64, tpu.core_type = #tpu.core_type<tc>, window_params = [{transform_indices = @transform_0, window_bounds = array<i64: 1, 16, 16, 4>}, {transform_indices = @transform_1, window_bounds = array<i64: 1, 16, 16, 4>}, {pipeline_mode = #tpu.pipeline_mode<synchronous>, transform_indices = @transform_2, window_bounds = array<i64: 3, 24, 4>}, {pipeline_mode = #tpu.pipeline_mode<synchronous>, transform_indices = @transform_3, window_bounds = array<i64: 1, 4>}, {pipeline_mode = #tpu.pipeline_mode<synchronous>, transform_indices = @transform_4, window_bounds = array<i64: 1, 4>}, {pipeline_mode = #tpu.pipeline_mode<synchronous>, transform_indices = @transform_5, window_bounds = array<i64: 3, 12, 4>}, {pipeline_mode = #tpu.pipeline_mode<synchronous>, transform_indices = @transform_6, window_bounds = array<i64: 1, 4>}, {pipeline_mode = #tpu.pipeline_mode<synchronous>, transform_indices = @transform_7, window_bounds = array<i64: 1, 4>}, {transform_indices = @transform_8, window_bounds = array<i64: 1, 16, 16, 4>}]} {
    %cst = arith.constant 0.000000e+00 : bf16
    %0 = vector.broadcast %cst : bf16 to vector<1x18x8xbf16>
    %c0 = arith.constant 0 : index
    %c0_0 = arith.constant 0 : index
    %c0_1 = arith.constant 0 : index
    %1 = vector.load %arg10[%c0, %c0_0, %c0_1] : memref<18x18x8xbf16, #tpu.memory_space<vmem>>, vector<1x18x8xbf16>
    tpu.vector_store %arg10[%c0, %c0_0, %c0_1], %0 {strides = array<i32>} : memref<18x18x8xbf16, #tpu.memory_space<vmem>>, vector<1x18x8xbf16>,
    %cst_2 = arith.constant 0.000000e+00 : bf16
    %2 = vector.broadcast %cst_2 : bf16 to vector<1x18x8xbf16>
    %c17 = arith.constant 17 : index
    %c0_3 = arith.constant 0 : index
    %c0_4 = arith.constant 0 : index
    %3 = vector.load %arg10[%c17, %c0_3, %c0_4] : memref<18x18x8xbf16, #tpu.memory_space<vmem>>, vector<1x18x8xbf16>
    tpu.vector_store %arg10[%c17, %c0_3, %c0_4], %2 {strides = array<i32>} : memref<18x18x8xbf16, #tpu.memory_space<vmem>>, vector<1x18x8xbf16>,
    %cst_5 = arith.constant 0.000000e+00 : bf16
    %4 = vector.broadcast %cst_5 : bf16 to vector<18x1x8xbf16>
    %c0_6 = arith.constant 0 : index
    %c0_7 = arith.constant 0 : index
    %c0_8 = arith.constant 0 : index
    %5 = vector.load %arg10[%c0_6, %c0_7, %c0_8] : memref<18x18x8xbf16, #tpu.memory_space<vmem>>, vector<18x1x8xbf16>
    tpu.vector_store %arg10[%c0_6, %c0_7, %c0_8], %4 {strides = array<i32>} : memref<18x18x8xbf16, #tpu.memory_space<vmem>>, vector<18x1x8xbf16>,
    %cst_9 = arith.constant 0.000000e+00 : bf16
    %6 = vector.broadcast %cst_9 : bf16 to vector<18x1x8xbf16>
    %c0_10 = arith.constant 0 : index
    %c17_11 = arith.constant 17 : index
    %c0_12 = arith.constant 0 : index
    %7 = vector.load %arg10[%c0_10, %c17_11, %c0_12] : memref<18x18x8xbf16, #tpu.memory_space<vmem>>, vector<18x1x8xbf16>
    tpu.vector_store %arg10[%c0_10, %c17_11, %c0_12], %6 {strides = array<i32>} : memref<18x18x8xbf16, #tpu.memory_space<vmem>>, vector<18x1x8xbf16>,
    %cst_13 = arith.constant 0.000000e+00 : bf16
    %8 = vector.broadcast %cst_13 : bf16 to vector<1x18x4xbf16>
    %c0_14 = arith.constant 0 : index
    %c0_15 = arith.constant 0 : index
    %c0_16 = arith.constant 0 : index
    %9 = vector.load %arg11[%c0_14, %c0_15, %c0_16] : memref<18x18x4xbf16, #tpu.memory_space<vmem>>, vector<1x18x4xbf16>
    tpu.vector_store %arg11[%c0_14, %c0_15, %c0_16], %8 {strides = array<i32>} : memref<18x18x4xbf16, #tpu.memory_space<vmem>>, vector<1x18x4xbf16>,
    %cst_17 = arith.constant 0.000000e+00 : bf16
    %10 = vector.broadcast %cst_17 : bf16 to vector<1x18x4xbf16>
    %c17_18 = arith.constant 17 : index
    %c0_19 = arith.constant 0 : index
    %c0_20 = arith.constant 0 : index
    %11 = vector.load %arg11[%c17_18, %c0_19, %c0_20] : memref<18x18x4xbf16, #tpu.memory_space<vmem>>, vector<1x18x4xbf16>
    tpu.vector_store %arg11[%c17_18, %c0_19, %c0_20], %10 {strides = array<i32>} : memref<18x18x4xbf16, #tpu.memory_space<vmem>>, vector<1x18x4xbf16>,
    %cst_21 = arith.constant 0.000000e+00 : bf16
    %12 = vector.broadcast %cst_21 : bf16 to vector<18x1x4xbf16>
    %c0_22 = arith.constant 0 : index
    %c0_23 = arith.constant 0 : index
    %c0_24 = arith.constant 0 : index
    %13 = vector.load %arg11[%c0_22, %c0_23, %c0_24] : memref<18x18x4xbf16, #tpu.memory_space<vmem>>, vector<18x1x4xbf16>
    tpu.vector_store %arg11[%c0_22, %c0_23, %c0_24], %12 {strides = array<i32>} : memref<18x18x4xbf16, #tpu.memory_space<vmem>>, vector<18x1x4xbf16>,
    %cst_25 = arith.constant 0.000000e+00 : bf16
    %14 = vector.broadcast %cst_25 : bf16 to vector<18x1x4xbf16>
    %c0_26 = arith.constant 0 : index
    %c17_27 = arith.constant 17 : index
    %c0_28 = arith.constant 0 : index
    %15 = vector.load %arg11[%c0_26, %c17_27, %c0_28] : memref<18x18x4xbf16, #tpu.memory_space<vmem>>, vector<18x1x4xbf16>
    tpu.vector_store %arg11[%c0_26, %c17_27, %c0_28], %14 {strides = array<i32>} : memref<18x18x4xbf16, #tpu.memory_space<vmem>>, vector<18x1x4xbf16>,
    %c0_29 = arith.constant 0 : index
    %c0_30 = arith.constant 0 : index
    %c0_31 = arith.constant 0 : index
    %c0_32 = arith.constant 0 : index
    %16 = vector.load %arg1[%c0_29, %c0_30, %c0_31, %c0_32] : memref<1x16x16x4xbf16, #tpu.memory_space<vmem>>, vector<1x16x16x4xbf16>
    %17 = vector.shape_cast %16 : vector<1x16x16x4xbf16> to vector<16x16x4xbf16>
    %c1 = arith.constant 1 : index
    %c1_33 = arith.constant 1 : index
    %c0_34 = arith.constant 0 : index
    %18 = vector.load %arg10[%c1, %c1_33, %c0_34] : memref<18x18x8xbf16, #tpu.memory_space<vmem>>, vector<16x16x4xbf16>
    tpu.vector_store %arg10[%c1, %c1_33, %c0_34], %17 {strides = array<i32>} : memref<18x18x8xbf16, #tpu.memory_space<vmem>>, vector<16x16x4xbf16>,
    %c0_35 = arith.constant 0 : index
    %c0_36 = arith.constant 0 : index
    %c0_37 = arith.constant 0 : index
    %c0_38 = arith.constant 0 : index
    %19 = vector.load %arg2[%c0_35, %c0_36, %c0_37, %c0_38] : memref<1x16x16x4xbf16, #tpu.memory_space<vmem>>, vector<1x16x16x4xbf16>
    %20 = vector.shape_cast %19 : vector<1x16x16x4xbf16> to vector<16x16x4xbf16>
    %c1_39 = arith.constant 1 : index
    %c1_40 = arith.constant 1 : index
    %c4 = arith.constant 4 : index
    %21 = vector.load %arg10[%c1_39, %c1_40, %c4] : memref<18x18x8xbf16, #tpu.memory_space<vmem>>, vector<16x16x4xbf16>
    tpu.vector_store %arg10[%c1_39, %c1_40, %c4], %20 {strides = array<i32>} : memref<18x18x8xbf16, #tpu.memory_space<vmem>>, vector<16x16x4xbf16>,
    %cst_41 = arith.constant 0.000000e+00 : f32
    %22 = vector.broadcast %cst_41 : f32 to vector<256x4xf32>
    %c0_42 = arith.constant 0 : index
    %c0_43 = arith.constant 0 : index
    %c0_44 = arith.constant 0 : index
    %23 = vector.load %arg10[%c0_42, %c0_43, %c0_44] : memref<18x18x8xbf16, #tpu.memory_space<vmem>>, vector<16x16x8xbf16>
    %c0_45 = arith.constant 0 : index
    %c1_46 = arith.constant 1 : index
    %c0_47 = arith.constant 0 : index
    %24 = vector.load %arg10[%c0_45, %c1_46, %c0_47] : memref<18x18x8xbf16, #tpu.memory_space<vmem>>, vector<16x16x8xbf16>
    %c0_48 = arith.constant 0 : index
    %c2 = arith.constant 2 : index
    %c0_49 = arith.constant 0 : index
    %25 = vector.load %arg10[%c0_48, %c2, %c0_49] : memref<18x18x8xbf16, #tpu.memory_space<vmem>>, vector<16x16x8xbf16>
    %26 = tpu.concatenate %23, %24, %25 in 2 : vector<16x16x8xbf16>, vector<16x16x8xbf16>, vector<16x16x8xbf16> -> vector<16x16x24xbf16>
    %27 = vector.shape_cast %26 : vector<16x16x24xbf16> to vector<256x24xbf16>
    %c0_50 = arith.constant 0 : index
    %c0_51 = arith.constant 0 : index
    %c0_52 = arith.constant 0 : index
    %28 = vector.load %arg3[%c0_50, %c0_51, %c0_52] : memref<3x24x4xbf16, #tpu.memory_space<vmem>>, vector<1x24x4xbf16>
    %29 = vector.shape_cast %28 : vector<1x24x4xbf16> to vector<24x4xbf16>
    %cst_53 = arith.constant dense<0.000000e+00> : vector<256x4xf32>
    %30 = tpu.matmul %27, %29, %cst_53 {dimension_numbers = #tpu.dot_dimension_numbers<[1], [0], [0], [1], [0, 0, 1, 1], [], []>} : vector<256x24xbf16>, vector<24x4xbf16>, vector<256x4xf32> -> vector<256x4xf32>
    %31 = arith.addf %22, %30 : vector<256x4xf32>
    %c1_54 = arith.constant 1 : index
    %c0_55 = arith.constant 0 : index
    %c0_56 = arith.constant 0 : index
    %32 = vector.load %arg10[%c1_54, %c0_55, %c0_56] : memref<18x18x8xbf16, #tpu.memory_space<vmem>>, vector<16x16x8xbf16>
    %c1_57 = arith.constant 1 : index
    %c1_58 = arith.constant 1 : index
    %c0_59 = arith.constant 0 : index
    %33 = vector.load %arg10[%c1_57, %c1_58, %c0_59] : memref<18x18x8xbf16, #tpu.memory_space<vmem>>, vector<16x16x8xbf16>
    %c1_60 = arith.constant 1 : index
    %c2_61 = arith.constant 2 : index
    %c0_62 = arith.constant 0 : index
    %34 = vector.load %arg10[%c1_60, %c2_61, %c0_62] : memref<18x18x8xbf16, #tpu.memory_space<vmem>>, vector<16x16x8xbf16>
    %35 = tpu.concatenate %32, %33, %34 in 2 : vector<16x16x8xbf16>, vector<16x16x8xbf16>, vector<16x16x8xbf16> -> vector<16x16x24xbf16>
    %36 = vector.shape_cast %35 : vector<16x16x24xbf16> to vector<256x24xbf16>
    %c1_63 = arith.constant 1 : index
    %c0_64 = arith.constant 0 : index
    %c0_65 = arith.constant 0 : index
    %37 = vector.load %arg3[%c1_63, %c0_64, %c0_65] : memref<3x24x4xbf16, #tpu.memory_space<vmem>>, vector<1x24x4xbf16>
    %38 = vector.shape_cast %37 : vector<1x24x4xbf16> to vector<24x4xbf16>
    %cst_66 = arith.constant dense<0.000000e+00> : vector<256x4xf32>
    %39 = tpu.matmul %36, %38, %cst_66 {dimension_numbers = #tpu.dot_dimension_numbers<[1], [0], [0], [1], [0, 0, 1, 1], [], []>} : vector<256x24xbf16>, vector<24x4xbf16>, vector<256x4xf32> -> vector<256x4xf32>
    %40 = arith.addf %31, %39 : vector<256x4xf32>
    %c2_67 = arith.constant 2 : index
    %c0_68 = arith.constant 0 : index
    %c0_69 = arith.constant 0 : index
    %41 = vector.load %arg10[%c2_67, %c0_68, %c0_69] : memref<18x18x8xbf16, #tpu.memory_space<vmem>>, vector<16x16x8xbf16>
    %c2_70 = arith.constant 2 : index
    %c1_71 = arith.constant 1 : index
    %c0_72 = arith.constant 0 : index
    %42 = vector.load %arg10[%c2_70, %c1_71, %c0_72] : memref<18x18x8xbf16, #tpu.memory_space<vmem>>, vector<16x16x8xbf16>
    %c2_73 = arith.constant 2 : index
    %c2_74 = arith.constant 2 : index
    %c0_75 = arith.constant 0 : index
    %43 = vector.load %arg10[%c2_73, %c2_74, %c0_75] : memref<18x18x8xbf16, #tpu.memory_space<vmem>>, vector<16x16x8xbf16>
    %44 = tpu.concatenate %41, %42, %43 in 2 : vector<16x16x8xbf16>, vector<16x16x8xbf16>, vector<16x16x8xbf16> -> vector<16x16x24xbf16>
    %45 = vector.shape_cast %44 : vector<16x16x24xbf16> to vector<256x24xbf16>
    %c2_76 = arith.constant 2 : index
    %c0_77 = arith.constant 0 : index
    %c0_78 = arith.constant 0 : index
    %46 = vector.load %arg3[%c2_76, %c0_77, %c0_78] : memref<3x24x4xbf16, #tpu.memory_space<vmem>>, vector<1x24x4xbf16>
    %47 = vector.shape_cast %46 : vector<1x24x4xbf16> to vector<24x4xbf16>
    %cst_79 = arith.constant dense<0.000000e+00> : vector<256x4xf32>
    %48 = tpu.matmul %45, %47, %cst_79 {dimension_numbers = #tpu.dot_dimension_numbers<[1], [0], [0], [1], [0, 0, 1, 1], [], []>} : vector<256x24xbf16>, vector<24x4xbf16>, vector<256x4xf32> -> vector<256x4xf32>
    %49 = arith.addf %40, %48 : vector<256x4xf32>
    %c0_80 = arith.constant 0 : index
    %c0_81 = arith.constant 0 : index
    %50 = vector.load %arg4[%c0_80, %c0_81] : memref<1x4xf32, #tpu.memory_space<vmem>>, vector<1x4xf32>
    %51 = vector.broadcast %50 : vector<1x4xf32> to vector<256x4xf32>
    %52 = arith.mulf %49, %51 : vector<256x4xf32>
    %c0_82 = arith.constant 0 : index
    %c0_83 = arith.constant 0 : index
    %53 = vector.load %arg5[%c0_82, %c0_83] : memref<1x4xf32, #tpu.memory_space<vmem>>, vector<1x4xf32>
    %54 = vector.broadcast %53 : vector<1x4xf32> to vector<256x4xf32>
    %55 = arith.addf %52, %54 : vector<256x4xf32>
    %cst_84 = arith.constant 0.000000e+00 : f32
    %56 = vector.broadcast %cst_84 : f32 to vector<256x4xf32>
    %57 = arith.maximumf %55, %56 : vector<256x4xf32>
    %58 = vector.shape_cast %57 : vector<256x4xf32> to vector<16x16x4xf32>
    %59 = arith.truncf %58 : vector<16x16x4xf32> to vector<16x16x4xbf16>
    %c1_85 = arith.constant 1 : index
    %c1_86 = arith.constant 1 : index
    %c0_87 = arith.constant 0 : index
    %60 = vector.load %arg11[%c1_85, %c1_86, %c0_87] : memref<18x18x4xbf16, #tpu.memory_space<vmem>>, vector<16x16x4xbf16>
    tpu.vector_store %arg11[%c1_85, %c1_86, %c0_87], %59 {strides = array<i32>} : memref<18x18x4xbf16, #tpu.memory_space<vmem>>, vector<16x16x4xbf16>,
    %cst_88 = arith.constant 0.000000e+00 : f32
    %61 = vector.broadcast %cst_88 : f32 to vector<256x4xf32>
    %c0_89 = arith.constant 0 : index
    %c0_90 = arith.constant 0 : index
    %c0_91 = arith.constant 0 : index
    %62 = vector.load %arg11[%c0_89, %c0_90, %c0_91] : memref<18x18x4xbf16, #tpu.memory_space<vmem>>, vector<16x16x4xbf16>
    %c0_92 = arith.constant 0 : index
    %c1_93 = arith.constant 1 : index
    %c0_94 = arith.constant 0 : index
    %63 = vector.load %arg11[%c0_92, %c1_93, %c0_94] : memref<18x18x4xbf16, #tpu.memory_space<vmem>>, vector<16x16x4xbf16>
    %c0_95 = arith.constant 0 : index
    %c2_96 = arith.constant 2 : index
    %c0_97 = arith.constant 0 : index
    %64 = vector.load %arg11[%c0_95, %c2_96, %c0_97] : memref<18x18x4xbf16, #tpu.memory_space<vmem>>, vector<16x16x4xbf16>
    %65 = tpu.concatenate %62, %63, %64 in 2 : vector<16x16x4xbf16>, vector<16x16x4xbf16>, vector<16x16x4xbf16> -> vector<16x16x12xbf16>
    %66 = vector.shape_cast %65 : vector<16x16x12xbf16> to vector<256x12xbf16>
    %c0_98 = arith.constant 0 : index
    %c0_99 = arith.constant 0 : index
    %c0_100 = arith.constant 0 : index
    %67 = vector.load %arg6[%c0_98, %c0_99, %c0_100] : memref<3x12x4xbf16, #tpu.memory_space<vmem>>, vector<1x12x4xbf16>
    %68 = vector.shape_cast %67 : vector<1x12x4xbf16> to vector<12x4xbf16>
    %cst_101 = arith.constant dense<0.000000e+00> : vector<256x4xf32>
    %69 = tpu.matmul %66, %68, %cst_101 {dimension_numbers = #tpu.dot_dimension_numbers<[1], [0], [0], [1], [0, 0, 1, 1], [], []>} : vector<256x12xbf16>, vector<12x4xbf16>, vector<256x4xf32> -> vector<256x4xf32>
    %70 = arith.addf %61, %69 : vector<256x4xf32>
    %c1_102 = arith.constant 1 : index
    %c0_103 = arith.constant 0 : index
    %c0_104 = arith.constant 0 : index
    %71 = vector.load %arg11[%c1_102, %c0_103, %c0_104] : memref<18x18x4xbf16, #tpu.memory_space<vmem>>, vector<16x16x4xbf16>
    %c1_105 = arith.constant 1 : index
    %c1_106 = arith.constant 1 : index
    %c0_107 = arith.constant 0 : index
    %72 = vector.load %arg11[%c1_105, %c1_106, %c0_107] : memref<18x18x4xbf16, #tpu.memory_space<vmem>>, vector<16x16x4xbf16>
    %c1_108 = arith.constant 1 : index
    %c2_109 = arith.constant 2 : index
    %c0_110 = arith.constant 0 : index
    %73 = vector.load %arg11[%c1_108, %c2_109, %c0_110] : memref<18x18x4xbf16, #tpu.memory_space<vmem>>, vector<16x16x4xbf16>
    %74 = tpu.concatenate %71, %72, %73 in 2 : vector<16x16x4xbf16>, vector<16x16x4xbf16>, vector<16x16x4xbf16> -> vector<16x16x12xbf16>
    %75 = vector.shape_cast %74 : vector<16x16x12xbf16> to vector<256x12xbf16>
    %c1_111 = arith.constant 1 : index
    %c0_112 = arith.constant 0 : index
    %c0_113 = arith.constant 0 : index
    %76 = vector.load %arg6[%c1_111, %c0_112, %c0_113] : memref<3x12x4xbf16, #tpu.memory_space<vmem>>, vector<1x12x4xbf16>
    %77 = vector.shape_cast %76 : vector<1x12x4xbf16> to vector<12x4xbf16>
    %cst_114 = arith.constant dense<0.000000e+00> : vector<256x4xf32>
    %78 = tpu.matmul %75, %77, %cst_114 {dimension_numbers = #tpu.dot_dimension_numbers<[1], [0], [0], [1], [0, 0, 1, 1], [], []>} : vector<256x12xbf16>, vector<12x4xbf16>, vector<256x4xf32> -> vector<256x4xf32>
    %79 = arith.addf %70, %78 : vector<256x4xf32>
    %c2_115 = arith.constant 2 : index
    %c0_116 = arith.constant 0 : index
    %c0_117 = arith.constant 0 : index
    %80 = vector.load %arg11[%c2_115, %c0_116, %c0_117] : memref<18x18x4xbf16, #tpu.memory_space<vmem>>, vector<16x16x4xbf16>
    %c2_118 = arith.constant 2 : index
    %c1_119 = arith.constant 1 : index
    %c0_120 = arith.constant 0 : index
    %81 = vector.load %arg11[%c2_118, %c1_119, %c0_120] : memref<18x18x4xbf16, #tpu.memory_space<vmem>>, vector<16x16x4xbf16>
    %c2_121 = arith.constant 2 : index
    %c2_122 = arith.constant 2 : index
    %c0_123 = arith.constant 0 : index
    %82 = vector.load %arg11[%c2_121, %c2_122, %c0_123] : memref<18x18x4xbf16, #tpu.memory_space<vmem>>, vector<16x16x4xbf16>
    %83 = tpu.concatenate %80, %81, %82 in 2 : vector<16x16x4xbf16>, vector<16x16x4xbf16>, vector<16x16x4xbf16> -> vector<16x16x12xbf16>
    %84 = vector.shape_cast %83 : vector<16x16x12xbf16> to vector<256x12xbf16>
    %c2_124 = arith.constant 2 : index
    %c0_125 = arith.constant 0 : index
    %c0_126 = arith.constant 0 : index
    %85 = vector.load %arg6[%c2_124, %c0_125, %c0_126] : memref<3x12x4xbf16, #tpu.memory_space<vmem>>, vector<1x12x4xbf16>
    %86 = vector.shape_cast %85 : vector<1x12x4xbf16> to vector<12x4xbf16>
    %cst_127 = arith.constant dense<0.000000e+00> : vector<256x4xf32>
    %87 = tpu.matmul %84, %86, %cst_127 {dimension_numbers = #tpu.dot_dimension_numbers<[1], [0], [0], [1], [0, 0, 1, 1], [], []>} : vector<256x12xbf16>, vector<12x4xbf16>, vector<256x4xf32> -> vector<256x4xf32>
    %88 = arith.addf %79, %87 : vector<256x4xf32>
    %c0_128 = arith.constant 0 : index
    %c0_129 = arith.constant 0 : index
    %89 = vector.load %arg7[%c0_128, %c0_129] : memref<1x4xf32, #tpu.memory_space<vmem>>, vector<1x4xf32>
    %90 = vector.broadcast %89 : vector<1x4xf32> to vector<256x4xf32>
    %91 = arith.mulf %88, %90 : vector<256x4xf32>
    %c0_130 = arith.constant 0 : index
    %c0_131 = arith.constant 0 : index
    %92 = vector.load %arg8[%c0_130, %c0_131] : memref<1x4xf32, #tpu.memory_space<vmem>>, vector<1x4xf32>
    %93 = vector.broadcast %92 : vector<1x4xf32> to vector<256x4xf32>
    %94 = arith.addf %91, %93 : vector<256x4xf32>
    %cst_132 = arith.constant 0.000000e+00 : f32
    %95 = vector.broadcast %cst_132 : f32 to vector<256x4xf32>
    %96 = arith.maximumf %94, %95 : vector<256x4xf32>
    %97 = vector.shape_cast %96 : vector<256x4xf32> to vector<16x16x4xf32>
    %c0_133 = arith.constant 0 : index
    %c0_134 = arith.constant 0 : index
    %c0_135 = arith.constant 0 : index
    %c0_136 = arith.constant 0 : index
    %98 = vector.load %arg9[%c0_133, %c0_134, %c0_135, %c0_136] : memref<1x16x16x4xf32, #tpu.memory_space<vmem>>, vector<1x16x16x4xf32>
    %99 = vector.shape_cast %98 : vector<1x16x16x4xf32> to vector<16x16x4xf32>
    %100 = vector.shape_cast %97 : vector<16x16x4xf32> to vector<1x16x16x4xf32>
    tpu.vector_store %arg9[%c0_133, %c0_134, %c0_135, %c0_136], %100 {strides = array<i32>} : memref<1x16x16x4xf32, #tpu.memory_space<vmem>>, vector<1x16x16x4xf32>,
    return
  }
  func.func @transform_0(%arg0: i32) -> (i32, i32, i32, i32) {
    %c0_i32 = arith.constant 0 : i32
    %c0_i32_0 = arith.constant 0 : i32
    %c0_i32_1 = arith.constant 0 : i32
    %c0_i32_2 = arith.constant 0 : i32
    return %arg0, %c0_i32, %c0_i32_0, %c0_i32_1 : i32, i32, i32, i32
  }
  func.func @transform_1(%arg0: i32) -> (i32, i32, i32, i32) {
    %c0_i32 = arith.constant 0 : i32
    %c0_i32_0 = arith.constant 0 : i32
    %c0_i32_1 = arith.constant 0 : i32
    %c0_i32_2 = arith.constant 0 : i32
    return %arg0, %c0_i32, %c0_i32_0, %c0_i32_1 : i32, i32, i32, i32
  }
  func.func @transform_2(%arg0: i32) -> (i32, i32, i32) {
    %c0_i32 = arith.constant 0 : i32
    %c0_i32_0 = arith.constant 0 : i32
    %c0_i32_1 = arith.constant 0 : i32
    %c0_i32_2 = arith.constant 0 : i32
    return %c0_i32, %c0_i32_0, %c0_i32_1 : i32, i32, i32
  }
  func.func @transform_3(%arg0: i32) -> (i32, i32) {
    %c0_i32 = arith.constant 0 : i32
    %c0_i32_0 = arith.constant 0 : i32
    %c0_i32_1 = arith.constant 0 : i32
    return %c0_i32, %c0_i32_0 : i32, i32
  }
  func.func @transform_4(%arg0: i32) -> (i32, i32) {
    %c0_i32 = arith.constant 0 : i32
    %c0_i32_0 = arith.constant 0 : i32
    %c0_i32_1 = arith.constant 0 : i32
    return %c0_i32, %c0_i32_0 : i32, i32
  }
  func.func @transform_5(%arg0: i32) -> (i32, i32, i32) {
    %c0_i32 = arith.constant 0 : i32
    %c0_i32_0 = arith.constant 0 : i32
    %c0_i32_1 = arith.constant 0 : i32
    %c0_i32_2 = arith.constant 0 : i32
    return %c0_i32, %c0_i32_0, %c0_i32_1 : i32, i32, i32
  }
  func.func @transform_6(%arg0: i32) -> (i32, i32) {
    %c0_i32 = arith.constant 0 : i32
    %c0_i32_0 = arith.constant 0 : i32
    %c0_i32_1 = arith.constant 0 : i32
    return %c0_i32, %c0_i32_0 : i32, i32
  }
  func.func @transform_7(%arg0: i32) -> (i32, i32) {
    %c0_i32 = arith.constant 0 : i32
    %c0_i32_0 = arith.constant 0 : i32
    %c0_i32_1 = arith.constant 0 : i32
    return %c0_i32, %c0_i32_0 : i32, i32
  }
  func.func @transform_8(%arg0: i32) -> (i32, i32, i32, i32) {
    %c0_i32 = arith.constant 0 : i32
    %c0_i32_0 = arith.constant 0 : i32
    %c0_i32_1 = arith.constant 0 : i32
    %c0_i32_2 = arith.constant 0 : i32
    return %arg0, %c0_i32, %c0_i32_0, %c0_i32_1 : i32, i32, i32, i32
  }
}

</mosaic_0001>

<bundles_post_ra>
// kernel: up_forward.2
= control target key start
LH: loop header
LB: loop body
LE: loop exit
PB: predicated region body
PF: predicated region fallthrough
CT: control target
= control target key end

     0   :  { %s2071_s12 = smov 0   ;;  %s2581_s0 = inlined_call_operand.vmem [shape: bf16[2,8,8,4], index: 0, kind: input, shape index: {}]   ;;  %s2582_s1 = inlined_call_operand.vmem [shape: bf16[16,8], index: 1, kind: input, shape index: {}]   ;;  %s2583_s2 = inlined_call_operand.vmem [shape: bf16[8,16], index: 2, kind: input, shape index: {}]   ;;  %s2584_s3 = inlined_call_operand.vmem [shape: bf16[2,16,16,4], index: 3, kind: output, shape index: {}]  }
   0x1 LB: > { %s1778_s13 = sadd.s32 4294967295, %s2017_s12   ;;  %p1782_p0 = scmp.ge.s32.totalorder %s2017_s12, 1  ;;  %s2017_s12 = sphi %s2071_s12, %s13_s12  }
   0x2   : > { %p137_p1 = scmp.lt.s32.totalorder %s2017_s12, 3 }
   0x4   : > { %p138_p2 = pnand %p1782_p0, %p137_p1 }
   0x5   : > { %p161_p3 = scmp.lt.s32.totalorder (!%p138_p2), %s1778_s13, 1  ;;  %s2021_s20 = smov (!%p138_p2), 12  }
   0x6   : > { %141 = sbr.rel (%p138_p2) target bundleno = 1032 (0x408), region = 32  ;;  %s2022_s21 = smov (!%p138_p2), 28  }
   0x7   : > { %s2023_s22 = smov (!%p138_p2), 4   ;;  %s2024_s23 = smov (!%p138_p2), 24  }
   0x8   : > { %s2025_s24 = smov (!%p138_p2), 20   ;;  %s2026_s25 = smov (!%p138_p2), 44  }
   0x9   : > { %s2027_s26 = smov (!%p138_p2), 36   ;;  %s2028_s27 = smov (!%p138_p2), 8  }
   0xa   : > { %s2029_s28 = smov (!%p138_p2), 32   ;;  %s2030_s29 = smov (!%p138_p2), 48  }
   0xb   : > { %s2586_s13 = smov (!%p161_p3, %s1778_s13), 1  ;;  %v477_v16 = vld [vmem:[%s2583_s2] sm:$0xf]  ;;  %vm485_vm0 = vcmask 1043456   ;;  %vm478_vm1 = vcmask 64512   ;;  %vm779_vm2 = vcmask 1047556  }
   0xc   : > { %s1796_s14 = sshll.u32 %s2586_s13, 5  ;;  %v487_v17 = vsel %vm485_vm0, %v477_v16, 0  ;;  %v2019_v51 = vmov 1983009808   ;;  %v2020_v16 = vmov 1934713408  }
   0xd   : > { %s165_s17 = scalar_lea.vmem %s2581_s0, %s1796_s14  ;;  %496 = vmatpush.bf16.msra.mxu0 %v487_v17  ;;  %1818 = vmatpush.bf16.msra.mxu2 %v487_v17  ;;  %v784_v52 = vunpack.c.l.s4 %v2019_v51  ;;  %v832_v17 = vunpack.c.l.s4 %v2020_v16  ;;  %s2031_s30 = smov 16   ;;  %vm1063_vm3 = vcmask 31744   ;;  %vm1066_vm4 = vcmask 97280  }
   0xe   : > { %v1816_v0 = vld [vmem:[%s165_s17 + $0x10] sm:$0xff]   ;;  %v1800_v1 = vld [vmem:[%s165_s17] sm:$0xff]   ;;  %v1817_v6 = vld [vmem:[%s165_s17 + $0x18] sm:$0xff]   ;;  %s2032_s4 = smov 56   ;;  %s2033_s5 = smov 60   ;;  %vm1068_vm5 = vcmask 130048  }
   0xf   : > { %v1809_v2 = vunpack.c.l.bf16 %v1816_v0  ;;  %v1810_v3 = vunpack.c.h.bf16 %v1816_v0  ;;  %v1801_v4 = vunpack.c.l.bf16 %v1800_v1  ;;  %v1802_v5 = vunpack.c.h.bf16 %v1800_v1  ;;  %v1815_v7 = vld [vmem:[%s165_s17 + $0x8] sm:$0xff]   ;;  %s2034_s6 = smov 40   ;;  %s2035_s7 = smov 52  }
  0x10   : > { %v1813_v10 = vunpack.c.l.bf16 %v1817_v6  ;;  %v1814_v11 = vunpack.c.h.bf16 %v1817_v6  ;;  %v1805_v12 = vunpack.c.l.bf16 %v1815_v7  ;;  %v1806_v13 = vunpack.c.h.bf16 %v1815_v7  ;;  %s2036_s10 = smov 116   ;;  %s2037_s11 = smov 120  }
  0x11   : > { %v1860_v8 = vpack.i.bf16 %v1810_v3, %v1809_v2  ;;  %v1874_v9 = vpack.i.bf16 %v1802_v5, %v1801_v4  ;;  %v2093_v57 = vunpack.c.0.s8 %v784_v52  ;;  %vm1070_vm6 = vcmask 162816   ;;  %s2038_s14 = smov 124   ;;  %s2039_s15 = smov 104  }
  0x12   : > { %v1867_v14 = vpack.i.bf16 %v1814_v11, %v1813_v10  ;;  %v1881_v15 = vpack.i.bf16 %v1806_v13, %v1805_v12  ;;  %vm1072_vm7 = vcmask 195584   ;;  %vm1074_vm8 = vcmask 228352   ;;  %s2040_s16 = smov 108   ;;  %s2041_s17 = smov 112  }
  0x13   : > { %1861 = vxpose.xlu0.b32.start.end [1/1] (short) (narrow) %v1860_v8, 8  ;;  %1875 = vxpose.xlu1.b32.start.end [1/1] (short) (narrow) %v1874_v9, 8  ;;  %vm1076_vm9 = vcmask 261120   ;;  %vm1078_vm10 = vcmask 293888   ;;  %vm1080_vm11 = vcmask 326656   ;;  %vm1082_vm12 = vcmask 359424  }
  0x14   : > { %vm1084_vm13 = vcmask 392192   ;;  %vm1086_vm14 = vcmask 424960   ;;  %vm1088_vm15 = vcmask 457728   ;;  %s2042_s18 = smov 92   ;;  %s2043_s19 = smov 96  }
  0x1b   : > { %1868 = vxpose.xlu0.b32.start.end [1/1] (short) (narrow) %v1867_v14, 8  ;;  %1882 = vxpose.xlu1.b32.start.end [1/1] (short) (narrow) %v1881_v15, 8 }
  0xb7   : > { %v1862_v18 = vpop.trf.xlu0  ;;  %v1876_v19 = vpop.trf.xlu1 }
  0xb8   : > { %v1866_v20 = vunpack.i.h.bf16 %v1862_v18  ;;  %v1863_v21 = vunpack.i.l.bf16 %v1862_v18  ;;  %v1880_v22 = vunpack.i.h.bf16 %v1876_v19  ;;  %v1877_v23 = vunpack.i.l.bf16 %v1876_v19 }
  0xba   : > { %462 = vst [vmem:[#allocation1 + $0x21] ss:$2 sm:$0xff] %v1866_v20 }
  0xbb   : > { %460 = vst [vmem:[#allocation1 + $0x20] ss:$2 sm:$0xff] %v1863_v21 }
  0xbc   : > { %454 = vst [vmem:[#allocation1 + $0x1] ss:$2 sm:$0xff] %v1880_v22 }
  0xbd   : > { %452 = vst [vmem:[#allocation1] ss:$2 sm:$0xff] %v1877_v23 }
  0xbf   : > { %v1869_v24 = vpop.trf.xlu0  ;;  %v1883_v25 = vpop.trf.xlu1 }
  0xc0   : > { %v1873_v26 = vunpack.i.h.bf16 %v1869_v24  ;;  %v1870_v27 = vunpack.i.l.bf16 %v1869_v24  ;;  %v1887_v28 = vunpack.i.h.bf16 %v1883_v25  ;;  %v1884_v29 = vunpack.i.l.bf16 %v1883_v25 }
  0xc2   : > { %466 = vst [vmem:[#allocation1 + $0x31] ss:$2 sm:$0xff] %v1873_v26  ;;  %v469_v30 = vld.sshfl [vmem:[#allocation1 + $0x20] sm:$0xff pattern:$0x75316420] }
  0xc3   : > { %464 = vst [vmem:[#allocation1 + $0x30] ss:$2 sm:$0xff] %v1870_v27 }
  0xc4   : > { %458 = vst [vmem:[#allocation1 + $0x11] ss:$2 sm:$0xff] %v1887_v28  ;;  %v467_v33 = vld.sshfl [vmem:[#allocation1] sm:$0xff pattern:$0x75316420] }
  0xc5   : > { %456 = vst [vmem:[#allocation1 + $0x10] ss:$2 sm:$0xff] %v1884_v29 }
  0xca   : > { %v470_v31 = vld.sshfl [vmem:[#allocation1 + $0x30] sm:$0xff pattern:$0x75316420] }
  0xcb   : > { %v476_v32 = vpack.c.bf16 %v470_v31, %v469_v30 }
  0xcc   : > { %v468_v34 = vld.sshfl [vmem:[#allocation1 + $0x10] sm:$0xff pattern:$0x75316420] }
  0xcd   : > { %v475_v35 = vpack.c.bf16 %v468_v34, %v467_v33  ;;  %1788 = vmatmul.msk.bf16.vlgmr.msra.gmra.mxu2 %vm478_vm1, %v476_v32 }
  0xcf   : > { %1787 = vmatmul.msk.bf16.vlgmr.msra.gmra.mxu0 %vm478_vm1, %v475_v35 }
 0x14c   : > { %v498_v36 = vpop.f32.mrf.mxu0 }
 0x14d   : > { %v512_v39 = vrot.slane %v498_v36, 4 }
 0x150   : > { %v503_v37 = vpop.f32.mrf.mxu2 }
 0x151   : > { %v514_v38 = vrot.slane %v503_v37, 4 }
 0x153   : > { %v1900_v40 = vpack.i.bf16 %v498_v36, %v514_v38 }
 0x154   : > { %v500_v41 = vpop.f32.mrf.mxu0 }
 0x155   : > { %1901 = vxpose.xlu1.b32.start.end [1/1] (short) (narrow) %v1900_v40, 16  ;;  %v1888_v42 = vpack.i.bf16 %v500_v41, %v512_v39  ;;  %v513_v46 = vrot.slane %v500_v41, 4 }
 0x157   : > { %1889 = vxpose.xlu2.b32.start.end [1/1] (short) (narrow) %v1888_v42, 16 }
 0x158   : > { %v505_v43 = vpop.f32.mrf.mxu2 }
 0x159   : > { %v515_v44 = vrot.slane %v505_v43, 4  ;;  %v1912_v47 = vpack.i.bf16 %v505_v43, %v513_v46 }
 0x15b   : > { %v1924_v45 = vpack.i.bf16 %v503_v37, %v515_v44  ;;  %v2137_v44 = vunpack.c.0.s8 %v832_v17 }
 0x15d   : > { %1925 = vxpose.xlu0.b32.start.end [1/1] (short) (narrow) %v1924_v45, 16 }
 0x167   : > { %1913 = vxpose.xlu2.b32.start.end [1/1] (short) (narrow) %v1912_v47, 16 }
 0x1f0   : > { %v1890_v48 = vpop.trf.xlu2 }
 0x1f1   : > { %v1894_v49 = vunpack.i.h.bf16 %v1890_v48  ;;  %v1891_v56 = vunpack.i.l.bf16 %v1890_v48 }
 0x1f3   : > { %v778_v55 = vrot.slane %v1894_v49, 4  ;;  %v793_v61 = vrot.slane %v1891_v56, 4 }
 0x1f8   : > { %v2091_v50 = vpop.trf.xlu2 }
 0x1f9   : > { %v1902_v53 = vpop.trf.xlu1  ;;  %v1899_v62 = vunpack.i.h.bf16 %v2091_v50  ;;  %v1896_v19 = vunpack.i.l.bf16 %v2091_v50 }
 0x1fa   : > { %v1906_v54 = vunpack.i.h.bf16 %v1902_v53  ;;  %v1903_v60 = vunpack.i.l.bf16 %v1902_v53 }
 0x1fb   : > { %v891_v18 = vrot.slane %v1899_v62, 4 }
 0x1fc   : > { %v780_v58 = vsel %vm779_vm2, %v778_v55, %v1906_v54  ;;  %v781_v59 = vrot.slane %v1906_v54, 4  ;;  %v817_v8 = vrot.slane %v1903_v60, 4 }
 0x1fd   : > { %v2098_v63 = vperm.slane %v780_v58, %v2093_v57 }
 0x1fe   : > { %v782_v7 = vsel %vm779_vm2, %v1894_v49, %v781_v59 }
 0x1ff   : > { %v790_v20 = vperm.slane %v782_v7, %v2093_v57  ;;  %v829_v21 = vrot.slane %v2098_v63, 4 }
 0x200   : > { %v1914_v0 = vpop.trf.xlu2 }
 0x201   : > { %v1918_v1 = vunpack.i.h.bf16 %v1914_v0  ;;  %v1915_v2 = vunpack.i.l.bf16 %v1914_v0  ;;  %v1926_v3 = vpop.trf.xlu0  ;;  %v2100_v4 = vpop.trf.xlu1  ;;  %v841_v55 = vrot.slane %v790_v20, 4 }
 0x202   : > { %v1930_v5 = vunpack.i.h.bf16 %v1926_v3  ;;  %v1927_v6 = vunpack.i.l.bf16 %v1926_v3  ;;  %v1911_v13 = vunpack.i.h.bf16 %v2100_v4  ;;  %v1908_v32 = vunpack.i.l.bf16 %v2100_v4 }
 0x203   : > { %v791_v9 = vrot.slane %v1915_v2, 4  ;;  %v803_v10 = vrot.slane %v1918_v1, 4  ;;  %v794_v11 = vsel %vm779_vm2, %v1915_v2, %v793_v61 }
 0x204   : > { %v805_v12 = vrot.slane %v1930_v5, 4  ;;  %v815_v15 = vrot.slane %v1927_v6, 4  ;;  %v802_v22 = vperm.slane %v794_v11, %v2093_v57  ;;  %v818_v23 = vsel %vm779_vm2, %v1927_v6, %v817_v8 }
 0x205   : > { %v792_v14 = vsel %vm779_vm2, %v791_v9, %v1891_v56  ;;  %v804_v25 = vsel %vm779_vm2, %v803_v10, %v1930_v5  ;;  %v892_v27 = vsel %vm779_vm2, %v891_v18, %v1911_v13  ;;  %v826_v45 = vperm.slane %v818_v23, %v2093_v57 }
 0x206   : > { %v798_v24 = vperm.slane %v792_v14, %v2093_v57  ;;  %v806_v26 = vsel %vm779_vm2, %v1918_v1, %v805_v12  ;;  %v816_v29 = vsel %vm779_vm2, %v815_v15, %v1903_v60  ;;  %v2126_v35 = vperm.slane %v892_v27, %v2093_v57 }
 0x207   : > { %v810_v38 = vperm.slane %v804_v25, %v2093_v57  ;;  %v814_v39 = vperm.slane %v806_v26, %v2093_v57  ;;  %v822_v43 = vperm.slane %v816_v29, %v2093_v57  ;;  %v839_v48 = vrot.slane %v802_v22, 4 }
 0x208   : > { %v2119_v28 = vpop.trf.xlu2  ;;  %v830_v41 = vsel %vm779_vm2, %v798_v24, %v829_v21  ;;  %v929_v49 = vrot.slane %v1908_v32, 4  ;;  %v941_v51 = vrot.slane %v2126_v35, 4  ;;  %v827_v60 = vrot.slane %v798_v24, 4 }
 0x209   : > { %v1923_v30 = vunpack.i.h.bf16 %v2119_v28  ;;  %v1931_v31 = vpop.trf.xlu0  ;;  %v1920_v33 = vunpack.i.l.bf16 %v2119_v28  ;;  %v2145_v52 = vperm.slane %v830_v41, %v2137_v44  ;;  %v853_v54 = vrot.slane %v810_v38, 4 }
 0x20a   : > { %v1935_v34 = vunpack.i.h.bf16 %v1931_v31  ;;  %v1932_v37 = vunpack.i.l.bf16 %v1931_v31  ;;  %v865_v56 = vrot.slane %v814_v39, 4  ;;  %v851_v61 = vrot.slane %v822_v43, 4 }
 0x20b   : > { %v915_v36 = vrot.slane %v1923_v30, 4  ;;  %v903_v40 = vrot.slane %v1920_v33, 4  ;;  %v881_v59 = vrot.slane %v2145_v52, 4  ;;  %v854_v1 = vsel %vm779_vm2, %v822_v43, %v853_v54 }
 0x20c   : > { %v927_v47 = vrot.slane %v1932_v37, 4  ;;  %v842_v2 = vsel %vm779_vm2, %v802_v22, %v841_v55  ;;  %v866_v3 = vsel %vm779_vm2, %v826_v45, %v865_v56  ;;  %v2155_v5 = vperm.slane %v854_v1, %v2137_v44 }
 0x20d   : > { %v916_v42 = vsel %vm779_vm2, %v915_v36, %v1935_v34  ;;  %v904_v46 = vsel %vm779_vm2, %v903_v40, %v1896_v19  ;;  %v850_v6 = vperm.slane %v842_v2, %v2137_v44  ;;  %v874_v7 = vperm.slane %v866_v3, %v2137_v44 }
 0x20e   : > { %v922_v53 = vperm.slane %v916_v42, %v2093_v57  ;;  %v910_v58 = vperm.slane %v904_v46, %v2093_v57  ;;  %v928_v0 = vsel %vm779_vm2, %v927_v47, %v1908_v32  ;;  %v828_v8 = vsel %vm779_vm2, %v827_v60, %v2098_v63 }
 0x20f   : > { %v834_v9 = vperm.slane %v828_v8, %v2137_v44  ;;  %v852_v10 = vsel %vm779_vm2, %v851_v61, %v810_v38  ;;  %v840_v11 = vsel %vm779_vm2, %v839_v48, %v790_v20  ;;  %v863_v12 = vrot.slane %v826_v45, 4 }
 0x210   : > { %v882_v14 = vsel %vm779_vm2, %v2155_v5, %v881_v59  ;;  %v889_v15 = vrot.slane %v850_v6, 4  ;;  %v858_v16 = vperm.slane %v852_v10, %v2137_v44  ;;  %v917_v17 = vrot.slane %v1935_v34, 4 }
 0x211   : > { %1012 = vrot.lane.b32.xlu2 %v882_v14, %s2021_s20  ;;  %v877_v18 = vrot.slane %v834_v9, 4  ;;  %v934_v21 = vperm.slane %v928_v0, %v2093_v57  ;;  %v942_v63 = vsel %vm779_vm2, %v910_v58, %v941_v51  ;;  %v930_v22 = vsel %vm779_vm2, %v1932_v37, %v929_v49  ;;  %s2044_s20 = smov 100  }
 0x212   : > { %v890_v23 = vsel %vm779_vm2, %v874_v7, %v889_v15  ;;  %v2172_v20 = vperm.slane %v840_v11, %v2137_v44  ;;  %v864_v24 = vsel %vm779_vm2, %v863_v12, %v814_v39  ;;  %v2177_v26 = vperm.slane %v942_v63, %v2137_v44 }
 0x213   : > { %1028 = vrot.lane.b32.xlu1 %v890_v23, %s2022_s21  ;;  %v878_v25 = vsel %vm779_vm2, %v858_v16, %v877_v18  ;;  %v965_v27 = vrot.slane %v922_v53, 4  ;;  %v939_v29 = vrot.slane %v910_v58, 4  ;;  %v905_v31 = vrot.slane %v1896_v19, 4  ;;  %s2045_s21 = smov 80  }
 0x214   : > { %1004 = vrot.lane.b32.xlu0 %v878_v25, %s2023_s22  ;;  %v887_v32 = vrot.slane %v874_v7, 4  ;;  %v963_v34 = vrot.slane %v934_v21, 4  ;;  %v918_v36 = vsel %vm779_vm2, %v1923_v30, %v917_v17  ;;  %v938_v37 = vperm.slane %v930_v22, %v2093_v57  ;;  %s2046_s22 = smov 84  }
 0x215   : > { %v966_v38 = vsel %vm779_vm2, %v934_v21, %v965_v27  ;;  %v940_v39 = vsel %vm779_vm2, %v939_v29, %v2126_v35  ;;  %v893_v40 = vrot.slane %v1911_v13, 4  ;;  %v870_v19 = vperm.slane %v864_v24, %v2137_v44 }
 0x216   : > { %v885_v41 = vrot.slane %v2172_v20, 4  ;;  %v906_v42 = vsel %vm779_vm2, %v1920_v33, %v905_v31  ;;  %v875_v43 = vrot.slane %v858_v16, 4  ;;  %v974_v30 = vperm.slane %v966_v38, %v2137_v44 }
 0x217   : > { %v993_v45 = vrot.slane %v2177_v26, 4  ;;  %v926_v46 = vperm.slane %v918_v36, %v2093_v57  ;;  %v888_v35 = vsel %vm779_vm2, %v887_v32, %v850_v6  ;;  %v946_v4 = vperm.slane %v940_v39, %v2137_v44 }
 0x218   : > { %v964_v13 = vsel %vm779_vm2, %v963_v34, %v922_v53  ;;  %v975_v47 = vrot.slane %v938_v37, 4  ;;  %v894_v28 = vsel %vm779_vm2, %v1899_v62, %v893_v40  ;;  %v886_v33 = vsel %vm779_vm2, %v870_v19, %v885_v41 }
 0x219   : > { %1024 = vrot.lane.b32.xlu2 %v888_v35, %s2024_s23  ;;  %v914_v48 = vperm.slane %v906_v42, %v2093_v57  ;;  %v994_v49 = vsel %vm779_vm2, %v974_v30, %v993_v45  ;;  %v970_v51 = vperm.slane %v964_v13, %v2137_v44  ;;  %v876_v54 = vsel %vm779_vm2, %v875_v43, %v834_v9  ;;  %s2047_s23 = smov 88  }
 0x21a   : > { %v989_v53 = vrot.slane %v946_v4, 4  ;;  %v977_v55 = vrot.slane %v926_v46, 4  ;;  %v976_v50 = vsel %vm779_vm2, %v975_v47, %v926_v46  ;;  %v879_v62 = vrot.slane %v2155_v5, 4 }
 0x21b   : > { %1020 = vrot.lane.b32.xlu1 %v886_v33, %s2025_s24  ;;  %v902_v56 = vperm.slane %v894_v28, %v2093_v57  ;;  %v987_v58 = vrot.slane %v970_v51, 4  ;;  %v951_v59 = vrot.slane %v914_v48, 4  ;;  %v982_v61 = vperm.slane %v976_v50, %v2137_v44  ;;  %s2048_s24 = smov 68  }
 0x21c   : > { %1044 = vrot.lane.b32.xlu0 %v994_v49, %s2026_s25  ;;  %v990_v60 = vsel %vm779_vm2, %v970_v51, %v989_v53  ;;  %v978_v0 = vsel %vm779_vm2, %v938_v37, %v977_v55  ;;  %v880_v1 = vsel %vm779_vm2, %v879_v62, %v2145_v52  ;;  %v883_v9 = vrot.slane %v870_v19, 4  ;;  %v1798_v53 = vld [vmem:[%s2582_s1] sm:$0xff]  ;;  %s2049_s25 = smov 72  }
 0x21d   : > { %v953_v2 = vrot.slane %v902_v56, 4  ;;  %v988_v3 = vsel %vm779_vm2, %v987_v58, %v946_v4  ;;  %v952_v5 = vsel %vm779_vm2, %v951_v59, %v902_v56  ;;  %v986_v6 = vperm.slane %v978_v0, %v2137_v44 }
 0x21e   : > { %v995_v7 = vrot.slane %v982_v61, 4  ;;  %v958_v8 = vperm.slane %v952_v5, %v2137_v44  ;;  %v884_v14 = vsel %vm779_vm2, %v883_v9, %v2172_v20  ;;  %v991_v17 = vrot.slane %v974_v30, 4 }
 0x21f   : > { %v954_v10 = vsel %vm779_vm2, %v914_v48, %v953_v2  ;;  %v999_v11 = vrot.slane %v986_v6, 4 }
 0x220   : > { %v996_v52 = vsel %vm779_vm2, %v995_v7, %v958_v8  ;;  %v962_v12 = vperm.slane %v954_v10, %v2137_v44  ;;  %v992_v21 = vsel %vm779_vm2, %v991_v17, %v2177_v26  ;;  %v997_v63 = vrot.slane %v958_v8, 4 }
 0x221   : > { %1036 = vrot.lane.b32.xlu2 %v990_v60, %s2027_s26  ;;  %s2050_s26 = smov 76  }
 0x222   : > { %v1000_v15 = vsel %vm779_vm2, %v999_v11, %v962_v12  ;;  %v1001_v16 = vrot.slane %v962_v12, 4  ;;  %v998_v22 = vsel %vm779_vm2, %v982_v61, %v997_v63 }
 0x223   : > { %1008 = vrot.lane.b32.xlu1 %v880_v1, %s2028_s27  ;;  %s1797_s27 = sshll.u32 %s2586_s13, 7 }
 0x224   : > { %1032 = vrot.lane.b32.xlu0 %v988_v3, %s2029_s28  ;;  %v1002_v18 = vsel %vm779_vm2, %v986_v6, %v1001_v16 }
 0x229   : > { %1048 = vrot.lane.b32.xlu2 %v996_v52, %s2030_s29  ;;  %s2368_s29 = scalar_lea.vmem %s2584_s3, %s1797_s27 }
 0x22b   : > { %1016 = vrot.lane.b32.xlu1 %v884_v14, %s2031_s30 }
 0x22c   : > { %1056 = vrot.lane.b32.xlu0 %v1000_v15, %s2032_s4 }
 0x231   : > { %1060 = vrot.lane.b32.xlu2 %v1002_v18, %s2033_s5 }
 0x233   : > { %1040 = vrot.lane.b32.xlu1 %v992_v21, %s2034_s6 }
 0x23b   : > { %1052 = vrot.lane.b32.xlu1 %v998_v22, %s2035_s7 }
 0x26b   : > { %v1013_v20 = vpop.permute.xlu2 %1012 }
 0x273   : > { %v1025_v27 = vpop.permute.xlu2 %1024 }
 0x27b   : > { %v1037_v26 = vpop.permute.xlu2 %1036 }
 0x283   : > { %v1049_v43 = vpop.permute.xlu2 %1048 }
 0x285   : > { %v1029_v23 = vpop.permute.xlu1 %1028 }
 0x286   : > { %v1005_v25 = vpop.permute.xlu0 %1004 }
 0x287   : > { %v1064_v32 = vsel %vm1063_vm3, %v876_v54, %v1005_v25  ;;  %vm1090_vm3 = vcmask 490496  }
 0x28b   : > { %v1061_v33 = vpop.permute.xlu2 %1060 }
 0x28d   : > { %v1021_v24 = vpop.permute.xlu1 %1020 }
 0x28e   : > { %v1045_v31 = vpop.permute.xlu0 %1044 }
 0x295   : > { %v1009_v29 = vpop.permute.xlu1 %1008 }
 0x296   : > { %v1065_v34 = vsel %vm478_vm1, %v1064_v32, %v1009_v29  ;;  %v1033_v41 = vpop.permute.xlu0 %1032 }
 0x297   : > { %v1067_v37 = vsel %vm1066_vm4, %v1065_v34, %v1013_v20 }
 0x29d   : > { %v1017_v36 = vpop.permute.xlu1 %1016 }
 0x29e   : > { %v1069_v38 = vsel %vm1068_vm5, %v1067_v37, %v1017_v36  ;;  %v1057_v47 = vpop.permute.xlu0 %1056 }
 0x29f   : > { %v1071_v39 = vsel %vm1070_vm6, %v1069_v38, %v1021_v24 }
 0x2a0   : > { %v1073_v40 = vsel %vm1072_vm7, %v1071_v39, %v1025_v27 }
 0x2a1   : > { %v1075_v19 = vsel %vm1074_vm8, %v1073_v40, %v1029_v23 }
 0x2a2   : > { %v1077_v42 = vsel %vm1076_vm9, %v1075_v19, %v1033_v41 }
 0x2a3   : > { %v1079_v45 = vsel %vm1078_vm10, %v1077_v42, %v1037_v26 }
 0x2a5   : > { %v1041_v30 = vpop.permute.xlu1 %1040 }
 0x2a6   : > { %v1081_v46 = vsel %vm1080_vm11, %v1079_v45, %v1041_v30 }
 0x2a7   : > { %v1083_v35 = vsel %vm1082_vm12, %v1081_v46, %v1045_v31 }
 0x2a8   : > { %v1085_v13 = vsel %vm1084_vm13, %v1083_v35, %v1049_v43 }
 0x2ad   : > { %v1053_v4 = vpop.permute.xlu1 %1052 }
 0x2ae   : > { %v1087_v28 = vsel %vm1086_vm14, %v1085_v13, %v1053_v4 }
 0x2af   : > { %v1089_v48 = vsel %vm1088_vm15, %v1087_v28, %v1057_v47 }
 0x2b0   : > { %v1091_v49 = vsel %vm1090_vm3, %v1089_v48, %v1061_v33 }
 0x2b1   : > { %v1092_v51 = vpack.c.bf16 %v1091_v49, %v1091_v49 }
 0x2b3   : > { %v1102_v54 = vsel %vm485_vm0, %v1092_v51, 0  ;;  %vm1690_vm0 = vcmask 27648  }
 0x2b4   : > { %1111 = vmatpush.bf16.msra.mxu1 %v1102_v54 }
 0x2b7   : > { %1793 = vmatmul.msk.bf16.vlgmr.msra.gmra.mxu1 %vm478_vm1, %v1798_v53 }
 0x334   : > { %v2237_v55 = vpop.f32.mrf.mxu1 }
 0x335   : > { %v1212_v23 = vrot.slane %v2237_v55, 4 }
 0x33c   : > { %v1115_v50 = vpop.f32.mrf.mxu1 }
 0x33d   : > { %v1946_v62 = vpack.i.bf16 %v1115_v50, %v2237_v55  ;;  %v1436_v6 = vrot.slane %v1115_v50, 4 }
 0x33f   : > { %1947 = vrot.lane.b32.xlu2 %v1946_v62, %s2036_s10  ;;  %1942 = vrot.lane.b32.xlu0 %v1946_v62, %s2037_s11 }
 0x340   : > { %1937 = vrot.lane.b32.xlu1 %v1946_v62, %s2038_s14 }
 0x347   : > { %1962 = vrot.lane.b32.xlu2 %v1946_v62, %s2039_s15  ;;  %1957 = vrot.lane.b32.xlu0 %v1946_v62, %s2040_s16 }
 0x348   : > { %1952 = vrot.lane.b32.xlu1 %v1946_v62, %s2041_s17 }
 0x34f   : > { %1977 = vrot.lane.b32.xlu2 %v1946_v62, %s2042_s18  ;;  %1972 = vrot.lane.b32.xlu0 %v1946_v62, %s2043_s19 }
 0x350   : > { %1967 = vrot.lane.b32.xlu1 %v1946_v62, %s2044_s20 }
 0x357   : > { %1992 = vrot.lane.b32.xlu2 %v1946_v62, %s2045_s21  ;;  %1987 = vrot.lane.b32.xlu0 %v1946_v62, %s2046_s22 }
 0x358   : > { %1982 = vrot.lane.b32.xlu1 %v1946_v62, %s2047_s23 }
 0x35f   : > { %2007 = vrot.lane.b32.xlu2 %v1946_v62, %s2048_s24  ;;  %2002 = vrot.lane.b32.xlu0 %v1946_v62, %s2049_s25 }
 0x360   : > { %1997 = vrot.lane.b32.xlu1 %v1946_v62, %s2050_s26 }
 0x399   : > { %v1948_v56 = vpop.permute.xlu2 %1947 }
 0x39a   : > { %v1950_v60 = vunpack.i.h.bf16 %v1948_v56  ;;  %v1949_v0 = vunpack.i.l.bf16 %v1948_v56 }
 0x39c   : > { %v1446_v5 = vrot.slane %v1950_v60, 4  ;;  %v1222_v15 = vrot.slane %v1949_v0, 4 }
 0x3a1   : > { %v2240_v58 = vpop.permute.xlu2 %1962 }
 0x3a2   : > { %v1965_v27 = vunpack.i.h.bf16 %v2240_v58  ;;  %v1964_v37 = vunpack.i.l.bf16 %v2240_v58 }
 0x3a4   : > { %v1458_v42 = vrot.slane %v1965_v27, 4  ;;  %v1234_v28 = vrot.slane %v1964_v37, 4 }
 0x3a9   : > { %v2242_v59 = vpop.permute.xlu2 %1977 }
 0x3aa   : > { %v1980_v38 = vunpack.i.h.bf16 %v2242_v59  ;;  %v1979_v19 = vunpack.i.l.bf16 %v2242_v59 }
 0x3ac   : > { %v2279_v33 = vrot.slane %v1980_v38, 4  ;;  %v2286_v51 = vrot.slane %v1979_v19, 4 }
 0x3b1   : > { %v1943_v61 = vpop.permute.xlu0 %1942  ;;  %v2244_v8 = vpop.permute.xlu2 %1992 }
 0x3b2   : > { %v1945_v1 = vunpack.i.h.bf16 %v1943_v61  ;;  %v1944_v2 = vunpack.i.l.bf16 %v1943_v61  ;;  %v1938_v3 = vpop.permute.xlu1 %1937  ;;  %v1995_v54 = vunpack.i.h.bf16 %v2244_v8 }
 0x3b3   : > { %v1940_v7 = vunpack.i.h.bf16 %v1938_v3  ;;  %v1939_v11 = vunpack.i.l.bf16 %v1938_v3 }
 0x3b4   : > { %v1434_v9 = vrot.slane %v1945_v1, 4  ;;  %v1210_v10 = vrot.slane %v1944_v2, 4  ;;  %v1437_v52 = vsel %vm779_vm2, %v1945_v1, %v1436_v6  ;;  %v1213_v32 = vsel %vm779_vm2, %v1944_v2, %v1212_v23 }
 0x3b5   : > { %v1447_v12 = vsel %vm779_vm2, %v1446_v5, %v1940_v7  ;;  %v1448_v14 = vrot.slane %v1940_v7, 4  ;;  %v1445_v17 = vperm.slane %v1437_v52, %v2093_v57  ;;  %v1223_v25 = vsel %vm779_vm2, %v1222_v15, %v1939_v11 }
 0x3b6   : > { %v1435_v16 = vsel %vm779_vm2, %v1434_v9, %v1115_v50  ;;  %v1211_v21 = vsel %vm779_vm2, %v1210_v10, %v2237_v55  ;;  %v1453_v22 = vperm.slane %v1447_v12, %v2093_v57  ;;  %v1224_v26 = vrot.slane %v1939_v11, 4 }
 0x3b7   : > { %v1441_v18 = vperm.slane %v1435_v16, %v2093_v57  ;;  %v1449_v63 = vsel %vm779_vm2, %v1950_v60, %v1448_v14  ;;  %v1496_v20 = vrot.slane %v1445_v17, 4  ;;  %v1217_v34 = vperm.slane %v1211_v21, %v2093_v57 }
 0x3b8   : > { %v1457_v24 = vperm.slane %v1449_v63, %v2093_v57  ;;  %v1482_v31 = vrot.slane %v1453_v22, 4  ;;  %v1229_v39 = vperm.slane %v1223_v25, %v2093_v57  ;;  %v2268_v43 = vperm.slane %v1213_v32, %v2093_v57 }
 0x3b9   : > { %v1484_v29 = vrot.slane %v1441_v18, 4  ;;  %v1958_v45 = vpop.permute.xlu0 %1957  ;;  %v1260_v46 = vrot.slane %v1217_v34, 4  ;;  %v1225_v4 = vsel %vm779_vm2, %v1949_v0, %v1224_v26  ;;  %v2275_v47 = vpop.permute.xlu2 %2007  ;;  %v1994_v50 = vunpack.i.l.bf16 %v2244_v8 }
 0x3ba   : > { %v1953_v36 = vpop.permute.xlu1 %1952  ;;  %v1497_v40 = vsel %vm779_vm2, %v1457_v24, %v1496_v20  ;;  %v1483_v41 = vsel %vm779_vm2, %v1482_v31, %v1441_v18  ;;  %v1494_v35 = vrot.slane %v1457_v24, 4  ;;  %v1258_v49 = vrot.slane %v1229_v39, 4 }
 0x3bb   : > { %v1485_v30 = vsel %vm779_vm2, %v1453_v22, %v1484_v29  ;;  %v2273_v13 = vperm.slane %v1497_v40, %v2137_v44  ;;  %v2282_v48 = vperm.slane %v1483_v41, %v2137_v44  ;;  %v1960_v55 = vunpack.i.h.bf16 %v1958_v45 }
 0x3bc   : > { %v2290_v53 = vperm.slane %v1485_v30, %v2137_v44  ;;  %v1272_v62 = vrot.slane %v2268_v43, 4  ;;  %v1233_v56 = vperm.slane %v1225_v4, %v2093_v57  ;;  %v2010_v58 = vunpack.i.h.bf16 %v2275_v47 }
 0x3bd   : > { %v1261_v60 = vsel %vm779_vm2, %v1229_v39, %v1260_v46  ;;  %v1495_v61 = vsel %vm779_vm2, %v1494_v35, %v1445_v17  ;;  %v1544_v0 = vrot.slane %v2273_v13, 4  ;;  %v1959_v1 = vunpack.i.l.bf16 %v1958_v45 }
 0x3be   : > { %v1532_v3 = vrot.slane %v2282_v48, 4  ;;  %v1259_v5 = vsel %vm779_vm2, %v1258_v49, %v1217_v34  ;;  %v1955_v6 = vunpack.i.h.bf16 %v1953_v36  ;;  %v1954_v7 = vunpack.i.l.bf16 %v1953_v36 }
 0x3bf   : > { %v1536_v9 = vrot.slane %v2290_v53, 4  ;;  %v1472_v10 = vrot.slane %v1960_v55, 4  ;;  %v2305_v17 = vperm.slane %v1259_v5, %v2137_v44  ;;  %v2308_v18 = vperm.slane %v1261_v60, %v2137_v44 }
 0x3c0   : > { %v1459_v12 = vsel %vm779_vm2, %v1458_v42, %v1955_v6  ;;  %v1460_v14 = vrot.slane %v1955_v6, 4  ;;  %v1235_v15 = vsel %vm779_vm2, %v1234_v28, %v1954_v7  ;;  %v1236_v16 = vrot.slane %v1954_v7, 4 }
 0x3c1   : > { %v1270_v21 = vrot.slane %v1233_v56, 4  ;;  %v1248_v63 = vrot.slane %v1959_v1, 4  ;;  %v1241_v23 = vperm.slane %v1235_v15, %v2093_v57  ;;  %v2312_v20 = vpop.permute.xlu0 %1972  ;;  %v1273_v29 = vsel %vm779_vm2, %v1233_v56, %v1272_v62 }
 0x3c2   : > { %v1968_v2 = vpop.permute.xlu1 %1967  ;;  %v1237_v22 = vsel %vm779_vm2, %v1964_v37, %v1236_v16  ;;  %v1461_v31 = vsel %vm779_vm2, %v1965_v27, %v1460_v14  ;;  %v1465_v32 = vperm.slane %v1459_v12, %v2093_v57  ;;  %v2323_v40 = vperm.slane %v1495_v61, %v2137_v44 }
 0x3c3   : > { %v1970_v11 = vunpack.i.h.bf16 %v1968_v2  ;;  %v1969_v52 = vunpack.i.l.bf16 %v1968_v2  ;;  %v1245_v34 = vperm.slane %v1237_v22, %v2093_v57  ;;  %v1281_v27 = vperm.slane %v1273_v29, %v2137_v44 }
 0x3c4   : > { %v1469_v45 = vperm.slane %v1461_v31, %v2093_v57  ;;  %v1284_v46 = vrot.slane %v1241_v23, 4  ;;  %v1271_v62 = vsel %vm779_vm2, %v1270_v21, %v2268_v43  ;;  %v1312_v56 = vrot.slane %v2308_v18, 4 }
 0x3c5   : > { %v1470_v24 = vrot.slane %v1970_v11, 4  ;;  %v1473_v25 = vsel %vm779_vm2, %v1970_v11, %v1472_v10  ;;  %v1246_v37 = vrot.slane %v1969_v52, 4  ;;  %v1249_v39 = vsel %vm779_vm2, %v1969_v52, %v1248_v63 }
 0x3c6   : > { %v1481_v36 = vperm.slane %v1473_v25, %v2093_v57  ;;  %v1296_v41 = vrot.slane %v1245_v34, 4  ;;  %v1257_v30 = vperm.slane %v1249_v39, %v2093_v57  ;;  %v1508_v60 = vrot.slane %v1465_v32, 4 }
 0x3c7   : > { %v1471_v26 = vsel %vm779_vm2, %v1470_v24, %v1960_v55  ;;  %v1247_v35 = vsel %vm779_vm2, %v1246_v37, %v1959_v1  ;;  %v1308_v7 = vrot.slane %v2305_v17, 4  ;;  %v1277_v52 = vperm.slane %v1271_v62, %v2137_v44 }
 0x3c8   : > { %v1477_v42 = vperm.slane %v1471_v26, %v2093_v57  ;;  %v1253_v28 = vperm.slane %v1247_v35, %v2093_v57  ;;  %v1294_v49 = vrot.slane %v1257_v30, 4  ;;  %v1297_v55 = vsel %vm779_vm2, %v1257_v30, %v1296_v41 }
 0x3c9   : > { %v1518_v61 = vrot.slane %v1481_v36, 4  ;;  %v1305_v43 = vperm.slane %v1297_v55, %v2137_v44  ;;  %v1520_v12 = vrot.slane %v1469_v45, 4  ;;  %v2347_v24 = vpop.permute.xlu0 %1987  ;;  %v1320_v25 = vrot.slane %v1281_v27, 4 }
 0x3ca   : > { %v1506_v4 = vrot.slane %v1477_v42, 4  ;;  %v1282_v2 = vrot.slane %v1253_v28, 4  ;;  %v1285_v5 = vsel %vm779_vm2, %v1253_v28, %v1284_v46  ;;  %v1295_v6 = vsel %vm779_vm2, %v1294_v49, %v1245_v34 }
 0x3cb   : > { %v1293_v10 = vperm.slane %v1285_v5, %v2137_v44  ;;  %v1301_v11 = vperm.slane %v1295_v6, %v2137_v44  ;;  %v1509_v15 = vsel %vm779_vm2, %v1477_v42, %v1508_v60  ;;  %v1975_v29 = vunpack.i.h.bf16 %v2312_v20 }
 0x3cc   : > { %v1507_v1 = vsel %vm779_vm2, %v1506_v4, %v1465_v32  ;;  %v1283_v14 = vsel %vm779_vm2, %v1282_v2, %v1241_v23  ;;  %v1519_v31 = vsel %vm779_vm2, %v1518_v61, %v1469_v45  ;;  %v1521_v32 = vsel %vm779_vm2, %v1481_v36, %v1520_v12 }
 0x3cd   : > { %v1289_v16 = vperm.slane %v1283_v14, %v2137_v44  ;;  %v1310_v21 = vrot.slane %v1293_v10, 4  ;;  %v1314_v63 = vrot.slane %v1301_v11, 4  ;;  %v1513_v22 = vperm.slane %v1507_v1, %v2137_v44 }
 0x3ce   : > { %v1318_v26 = vrot.slane %v1305_v43, 4  ;;  %v1517_v37 = vperm.slane %v1509_v15, %v2137_v44  ;;  %v1316_v39 = vrot.slane %v1277_v52, 4  ;;  %v1313_v42 = vsel %vm779_vm2, %v1293_v10, %v1312_v56  ;;  %v1983_v10 = vpop.permute.xlu1 %1982 }
 0x3cf   : > { %v1306_v34 = vrot.slane %v1289_v16, 4  ;;  %v1309_v23 = vsel %vm779_vm2, %v1289_v16, %v1308_v7  ;;  %v1311_v41 = vsel %vm779_vm2, %v1310_v21, %v2308_v18  ;;  %v1990_v30 = vunpack.i.h.bf16 %v2347_v24 }
 0x3d0   : > { %v1315_v36 = vsel %vm779_vm2, %v1314_v63, %v1277_v52  ;;  %v1525_v46 = vperm.slane %v1519_v31, %v2137_v44  ;;  %v1530_v35 = vrot.slane %v1513_v22, 4  ;;  %v1317_v4 = vsel %vm779_vm2, %v1301_v11, %v1316_v39 }
 0x3d1   : > { %v1307_v45 = vsel %vm779_vm2, %v1306_v34, %v2305_v17  ;;  %v1529_v28 = vperm.slane %v1521_v32, %v2137_v44  ;;  %v1660_v55 = vpack.c.bf16 %v1309_v23, %v1309_v23  ;;  %v1319_v17 = vsel %vm779_vm2, %v1318_v26, %v1281_v27  ;;  %v2003_v31 = vpop.permute.xlu0 %2002 }
 0x3d2   : > { %v1658_v49 = vpack.c.bf16 %v1307_v45, %v1307_v45  ;;  %v1534_v18 = vrot.slane %v1517_v37, 4  ;;  %v1662_v62 = vpack.c.bf16 %v1311_v41, %v1311_v41  ;;  %v1664_v56 = vpack.c.bf16 %v1313_v42, %v1313_v42 }
 0x3d3   : > { %v1540_v60 = vrot.slane %v2323_v40, 4  ;;  %v1974_v61 = vunpack.i.l.bf16 %v2312_v20  ;;  %v1321_v2 = vsel %vm779_vm2, %v1305_v43, %v1320_v25  ;;  %v1666_v5 = vpack.c.bf16 %v1315_v36, %v1315_v36  ;;  %1693 = vst.msk [vmem:[%s2368_s29 + $0x8] sm:$0xf] %vm1690_vm0, %v1660_v55 }
 0x3d4   : > { %1691 = vst.msk [vmem:[%s2368_s29] sm:$0xf] %vm1690_vm0, %v1658_v49  ;;  %v1531_v6 = vsel %vm779_vm2, %v1530_v35, %v2282_v48  ;;  %v1538_v1 = vrot.slane %v1525_v46, 4  ;;  %v1668_v7 = vpack.c.bf16 %v1317_v4, %v1317_v4  ;;  %v1989_v27 = vunpack.i.l.bf16 %v2347_v24 }
 0x3d5   : > { %v1548_v11 = vrot.slane %v1975_v29, 4  ;;  %v1533_v43 = vsel %vm779_vm2, %v1513_v22, %v1532_v3  ;;  %v1542_v52 = vrot.slane %v1529_v28, 4  ;;  %v1670_v12 = vpack.c.bf16 %v1319_v17, %v1319_v17  ;;  %1695 = vst.msk [vmem:[%s2368_s29 + $0x10] sm:$0xf] %vm1690_vm0, %v1662_v62 }
 0x3d6   : > { %v1535_v14 = vsel %vm779_vm2, %v1534_v18, %v2290_v53  ;;  %v1537_v15 = vsel %vm779_vm2, %v1517_v37, %v1536_v9  ;;  %v1672_v16 = vpack.c.bf16 %v1321_v2, %v1321_v2  ;;  %1697 = vst.msk [vmem:[%s2368_s29 + $0x18] sm:$0xf] %vm1690_vm0, %v1664_v56  ;;  %v1558_v21 = vrot.slane %v1990_v30, 4 }
 0x3d7   : > { %v1541_v48 = vsel %vm779_vm2, %v1525_v46, %v1540_v60  ;;  %v1674_v3 = vpack.c.bf16 %v1531_v6, %v1531_v6  ;;  %1699 = vst.msk [vmem:[%s2368_s29 + $0x20] sm:$0xf] %vm1690_vm0, %v1666_v5  ;;  %v1985_v63 = vunpack.i.h.bf16 %v1983_v10  ;;  %v1984_v22 = vunpack.i.l.bf16 %v1983_v10 }
 0x3d8   : > { %v1539_v24 = vsel %vm779_vm2, %v1538_v1, %v2323_v40  ;;  %v1676_v25 = vpack.c.bf16 %v1533_v43, %v1533_v43  ;;  %1701 = vst.msk [vmem:[%s2368_s29 + $0x28] sm:$0xf] %vm1690_vm0, %v1668_v7  ;;  %v1561_v53 = vsel %vm779_vm2, %v1990_v30, %v2279_v33  ;;  %v1334_v9 = vrot.slane %v1989_v27, 4 }
 0x3d9   : > { %v1543_v32 = vsel %vm779_vm2, %v1542_v52, %v2273_v13  ;;  %v1545_v34 = vsel %vm779_vm2, %v1529_v28, %v1544_v0  ;;  %v1678_v23 = vpack.c.bf16 %v1535_v14, %v1535_v14  ;;  %1703 = vst.msk [vmem:[%s2368_s29 + $0x30] sm:$0xf] %vm1690_vm0, %v1670_v12  ;;  %v1337_v40 = vsel %vm779_vm2, %v1989_v27, %v2286_v51  ;;  %v1998_v27 = vpop.permute.xlu1 %1997 }
 0x3da   : > { %v1680_v26 = vpack.c.bf16 %v1537_v15, %v1537_v15  ;;  %1705 = vst.msk [vmem:[%s2368_s29 + $0x38] sm:$0xf] %vm1690_vm0, %v1672_v16  ;;  %v1559_v33 = vsel %vm779_vm2, %v1558_v21, %v1980_v38  ;;  %v1546_v37 = vrot.slane %v1985_v63, 4  ;;  %v1322_v39 = vrot.slane %v1984_v22, 4 }
 0x3db   : > { %v1682_v13 = vpack.c.bf16 %v1539_v24, %v1539_v24  ;;  %1707 = vst.msk [vmem:[%s2368_s29 + $0x40] sm:$0xf] %vm1690_vm0, %v1674_v3  ;;  %v1569_v0 = vperm.slane %v1561_v53, %v2093_v57  ;;  %v1549_v41 = vsel %vm779_vm2, %v1985_v63, %v1548_v11  ;;  %v2005_v42 = vunpack.i.h.bf16 %v2003_v31 }
 0x3dc   : > { %v1324_v51 = vrot.slane %v1974_v61, 4  ;;  %v1684_v30 = vpack.c.bf16 %v1541_v48, %v1541_v48  ;;  %1709 = vst.msk [vmem:[%s2368_s29 + $0x48] sm:$0xf] %vm1690_vm0, %v1676_v25  ;;  %v1335_v38 = vsel %vm779_vm2, %v1334_v9, %v1979_v19  ;;  %v2428_v45 = vperm.slane %v1337_v40, %v2093_v57 }
 0x3dd   : > { %v1686_v36 = vpack.c.bf16 %v1543_v32, %v1543_v32  ;;  %1711 = vst.msk [vmem:[%s2368_s29 + $0x50] sm:$0xf] %vm1690_vm0, %v1678_v23  ;;  %v1565_v46 = vperm.slane %v1559_v33, %v2093_v57  ;;  %v1547_v35 = vsel %vm779_vm2, %v1546_v37, %v1975_v29  ;;  %v1323_v4 = vsel %vm779_vm2, %v1322_v39, %v1974_v61 }
 0x3de   : > { %v2009_v59 = vunpack.i.l.bf16 %v2275_v47  ;;  %v1688_v28 = vpack.c.bf16 %v1545_v34, %v1545_v34  ;;  %1713 = vst.msk [vmem:[%s2368_s29 + $0x58] sm:$0xf] %vm1690_vm0, %v1680_v26  ;;  %v1557_v19 = vperm.slane %v1549_v41, %v2093_v57  ;;  %v1325_v49 = vsel %vm779_vm2, %v1984_v22, %v1324_v51 }
 0x3df   : > { %1715 = vst.msk [vmem:[%s2368_s29 + $0x60] sm:$0xf] %vm1690_vm0, %v1682_v13  ;;  %v1606_v55 = vrot.slane %v1569_v0, 4  ;;  %v1341_v20 = vperm.slane %v1335_v38, %v2093_v57  ;;  %v1570_v17 = vrot.slane %v2005_v42, 4  ;;  %v1382_v29 = vrot.slane %v2428_v45, 4 }
 0x3e0   : > { %1717 = vst.msk [vmem:[%s2368_s29 + $0x68] sm:$0xf] %vm1690_vm0, %v1684_v30  ;;  %v1553_v18 = vperm.slane %v1547_v35, %v2093_v57  ;;  %v1329_v62 = vperm.slane %v1323_v4, %v2093_v57  ;;  %v2004_v56 = vunpack.i.l.bf16 %v2003_v31  ;;  %v1572_v60 = vrot.slane %v1995_v54, 4 }
 0x3e1   : > { %1719 = vst.msk [vmem:[%s2368_s29 + $0x70] sm:$0xf] %vm1690_vm0, %v1686_v36  ;;  %v1594_v61 = vrot.slane %v1565_v46, 4  ;;  %v1333_v2 = vperm.slane %v1325_v49, %v2093_v57  ;;  %v1348_v5 = vrot.slane %v1994_v50, 4  ;;  %v1582_v6 = vrot.slane %v2010_v58, 4 }
 0x3e2   : > { %v1358_v1 = vrot.slane %v2009_v59, 4  ;;  %1721 = vst.msk [vmem:[%s2368_s29 + $0x78] sm:$0xf] %vm1690_vm0, %v1688_v28  ;;  %v1608_v7 = vrot.slane %v1557_v19, 4  ;;  %v1370_v10 = vrot.slane %v1341_v20, 4  ;;  %v2462_v11 = vsel %vm779_vm2, %v1606_v55, %v1557_v19 }
 0x3e3   : > { %v1571_v43 = vsel %vm779_vm2, %v1570_v17, %v1995_v54  ;;  %v1573_v52 = vsel %vm779_vm2, %v2005_v42, %v1572_v60  ;;  %v1596_v12 = vrot.slane %v1553_v18, 4  ;;  %v1372_v14 = vrot.slane %v1329_v62, 4 }
 0x3e4   : > { %v1383_v15 = vsel %vm779_vm2, %v1382_v29, %v1333_v2  ;;  %v1346_v16 = vrot.slane %v2004_v56, 4  ;;  %v1595_v21 = vsel %vm779_vm2, %v1594_v61, %v1553_v18  ;;  %v1384_v48 = vrot.slane %v1333_v2, 4 }
 0x3e5   : > { %v1349_v3 = vsel %vm779_vm2, %v2004_v56, %v1348_v5  ;;  %v2000_v63 = vunpack.i.h.bf16 %v1998_v27  ;;  %v2472_v22 = vsel %vm779_vm2, %v1569_v0, %v1608_v7  ;;  %v1577_v24 = vperm.slane %v1571_v43, %v2093_v57 }
 0x3e6   : > { %v1347_v54 = vsel %vm779_vm2, %v1346_v16, %v1994_v50  ;;  %v1357_v25 = vperm.slane %v1349_v3, %v2093_v57  ;;  %v1999_v32 = vunpack.i.l.bf16 %v1998_v27  ;;  %v1597_v34 = vsel %vm779_vm2, %v1565_v46, %v1596_v12 }
 0x3e7   : > { %v1353_v53 = vperm.slane %v1347_v54, %v2093_v57  ;;  %v1583_v9 = vsel %vm779_vm2, %v1582_v6, %v2000_v63  ;;  %v1584_v31 = vrot.slane %v2000_v63, 4  ;;  %v1371_v23 = vsel %vm779_vm2, %v1370_v10, %v1329_v62 }
 0x3e8   : > { %v1373_v40 = vsel %vm779_vm2, %v1341_v20, %v1372_v14  ;;  %v1589_v26 = vperm.slane %v1583_v9, %v2093_v57  ;;  %v1408_v33 = vrot.slane %v1357_v25, 4  ;;  %v1359_v50 = vsel %vm779_vm2, %v1358_v1, %v1999_v32 }
 0x3e9   : > { %v1585_v8 = vsel %vm779_vm2, %v2010_v58, %v1584_v31  ;;  %v1360_v37 = vrot.slane %v1999_v32, 4  ;;  %v1396_v39 = vrot.slane %v1353_v53, 4  ;;  %v1365_v41 = vperm.slane %v1359_v50, %v2093_v57 }
 0x3ea   : > { %v1593_v13 = vperm.slane %v1585_v8, %v2093_v57  ;;  %v1618_v0 = vrot.slane %v1589_v26, 4  ;;  %v2492_v42 = vperm.slane %v1595_v21, %v2137_v44  ;;  %v1581_v51 = vperm.slane %v1573_v52, %v2093_v57 }
 0x3eb   : > { %v1620_v30 = vrot.slane %v1577_v24, 4  ;;  %v1361_v38 = vsel %vm779_vm2, %v2009_v59, %v1360_v37  ;;  %v1377_v47 = vperm.slane %v1371_v23, %v2137_v44  ;;  %v1385_v58 = vsel %vm779_vm2, %v2428_v45, %v1384_v48 }
 0x3ec   : > { %v1389_v36 = vperm.slane %v1383_v15, %v2137_v44  ;;  %v1369_v46 = vperm.slane %v1361_v38, %v2093_v57  ;;  %v2502_v35 = vperm.slane %v1597_v34, %v2137_v44  ;;  %v1381_v4 = vperm.slane %v1373_v40, %v2137_v44 }
 0x3ed   : > { %v1619_v28 = vsel %vm779_vm2, %v1618_v0, %v1577_v24  ;;  %v1394_v19 = vrot.slane %v1365_v41, 4  ;;  %v1630_v49 = vrot.slane %v1593_v13, 4  ;;  %v1397_v59 = vsel %vm779_vm2, %v1365_v41, %v1396_v39 }
 0x3ee   : > { %v1406_v55 = vrot.slane %v1369_v46, 4  ;;  %v1409_v20 = vsel %vm779_vm2, %v1369_v46, %v1408_v33  ;;  %v1393_v45 = vperm.slane %v1385_v58, %v2137_v44  ;;  %v1632_v17 = vrot.slane %v1581_v51, 4 }
 0x3ef   : > { %v1621_v29 = vsel %vm779_vm2, %v1589_v26, %v1620_v30  ;;  %v1395_v57 = vsel %vm779_vm2, %v1394_v19, %v1353_v53  ;;  %v1405_v62 = vperm.slane %v1397_v59, %v2137_v44  ;;  %v1417_v60 = vperm.slane %v1409_v20, %v2137_v44 }
 0x3f0   : > { %v1401_v18 = vperm.slane %v1395_v57, %v2137_v44  ;;  %v1407_v56 = vsel %vm779_vm2, %v1406_v55, %v1357_v25  ;;  %v1420_v61 = vrot.slane %v1377_v47, 4  ;;  %v1424_v2 = vrot.slane %v1381_v4, 4 }
 0x3f1   : > { %v1625_v5 = vperm.slane %v1619_v28, %v2137_v44  ;;  %v1413_v6 = vperm.slane %v1407_v56, %v2137_v44  ;;  %v1629_v1 = vperm.slane %v1621_v29, %v2137_v44  ;;  %v1631_v7 = vsel %vm779_vm2, %v1630_v49, %v1581_v51 }
 0x3f2   : > { %v1418_v27 = vrot.slane %v1401_v18, 4  ;;  %v1422_v10 = vrot.slane %v1405_v62, 4  ;;  %v1633_v43 = vsel %vm779_vm2, %v1593_v13, %v1632_v17  ;;  %v1421_v52 = vsel %vm779_vm2, %v1401_v18, %v1420_v61 }
 0x3f3   : > { %v1426_v12 = vrot.slane %v1413_v6, 4  ;;  %v1430_v14 = vrot.slane %v1417_v60, 4  ;;  %v1428_v15 = vrot.slane %v1389_v36, 4  ;;  %v1425_v48 = vsel %vm779_vm2, %v1405_v62, %v1424_v2 }
 0x3f4   : > { %v1419_v16 = vsel %vm779_vm2, %v1418_v27, %v1377_v47  ;;  %v1423_v21 = vsel %vm779_vm2, %v1422_v10, %v1381_v4  ;;  %v1432_v3 = vrot.slane %v1393_v45, 4  ;;  %v1637_v63 = vperm.slane %v1631_v7, %v2137_v44 }
 0x3f5   : > { %v1642_v24 = vrot.slane %v1625_v5, 4  ;;  %v1427_v54 = vsel %vm779_vm2, %v1426_v12, %v1389_v36  ;;  %v1641_v25 = vperm.slane %v1633_v43, %v2137_v44  ;;  %v1429_v53 = vsel %vm779_vm2, %v1413_v6, %v1428_v15 }
 0x3f6   : > { %v1659_v9 = vpack.c.bf16 %v1419_v16, %v1419_v16  ;;  %v1661_v31 = vpack.c.bf16 %v1421_v52, %v1421_v52  ;;  %v1646_v32 = vrot.slane %v1629_v1, 4  ;;  %v1431_v34 = vsel %vm779_vm2, %v1430_v14, %v1393_v45 }
 0x3f7   : > { %v1663_v23 = vpack.c.bf16 %v1423_v21, %v1423_v21  ;;  %v1665_v40 = vpack.c.bf16 %v1425_v48, %v1425_v48  ;;  %v1613_v26 = vperm.slane %v2462_v11, %v2137_v44  ;;  %v1644_v33 = vrot.slane %v2492_v42, 4 }
 0x3f8   : > { %v1433_v8 = vsel %vm779_vm2, %v1417_v60, %v1432_v3  ;;  %v1667_v50 = vpack.c.bf16 %v1427_v54, %v1427_v54  ;;  %1692 = vst.msk [vmem:[%s2368_s29 + $0x4] sm:$0xf] %vm1690_vm0, %v1659_v9  ;;  %v1650_v37 = vrot.slane %v1637_v63, 4  ;;  %v1643_v39 = vsel %vm779_vm2, %v1642_v24, %v2492_v42 }
 0x3f9   : > { %v1669_v13 = vpack.c.bf16 %v1429_v53, %v1429_v53  ;;  %1694 = vst.msk [vmem:[%s2368_s29 + $0xc] sm:$0xf] %vm1690_vm0, %v1661_v31  ;;  %v1617_v11 = vperm.slane %v2472_v22, %v2137_v44  ;;  %v1648_v0 = vrot.slane %v2502_v35, 4  ;;  %v1645_v41 = vsel %vm779_vm2, %v1625_v5, %v1644_v33 }
 0x3fa   : > { %v1671_v51 = vpack.c.bf16 %v1431_v34, %v1431_v34  ;;  %1696 = vst.msk [vmem:[%s2368_s29 + $0x14] sm:$0xf] %vm1690_vm0, %v1663_v23  ;;  %v1654_v30 = vrot.slane %v1641_v25, 4  ;;  %v1647_v38 = vsel %vm779_vm2, %v1646_v32, %v2502_v35  ;;  %v1673_v42 = vpack.c.bf16 %v1433_v8, %v1433_v8 }
 0x3fb   : > { %1698 = vst.msk [vmem:[%s2368_s29 + $0x1c] sm:$0xf] %vm1690_vm0, %v1665_v40  ;;  %v1652_v47 = vrot.slane %v1613_v26, 4  ;;  %v1649_v44 = vsel %vm779_vm2, %v1629_v1, %v1648_v0  ;;  %v1675_v22 = vpack.c.bf16 %v1643_v39, %v1643_v39  ;;  %v1651_v58 = vsel %vm779_vm2, %v1650_v37, %v1613_v26 }
 0x3fc   : > { %1700 = vst.msk [vmem:[%s2368_s29 + $0x24] sm:$0xf] %vm1690_vm0, %v1667_v50  ;;  %v1677_v36 = vpack.c.bf16 %v1645_v41, %v1645_v41  ;;  %v1656_v46 = vrot.slane %v1617_v11, 4  ;;  %v1679_v4 = vpack.c.bf16 %v1647_v38, %v1647_v38  ;;  %v1655_v28 = vsel %vm779_vm2, %v1654_v30, %v1617_v11 }
 0x3fd   : > { %1702 = vst.msk [vmem:[%s2368_s29 + $0x2c] sm:$0xf] %vm1690_vm0, %v1669_v13  ;;  %v1653_v35 = vsel %vm779_vm2, %v1637_v63, %v1652_v47  ;;  %v1681_v19 = vpack.c.bf16 %v1649_v44, %v1649_v44  ;;  %v1683_v59 = vpack.c.bf16 %v1651_v58, %v1651_v58  ;;  %v1687_v20 = vpack.c.bf16 %v1655_v28, %v1655_v28 }
 0x3fe   : > { %1704 = vst.msk [vmem:[%s2368_s29 + $0x34] sm:$0xf] %vm1690_vm0, %v1671_v51  ;;  %v1657_v49 = vsel %vm779_vm2, %v1641_v25, %v1656_v46  ;;  %v1685_v55 = vpack.c.bf16 %v1653_v35, %v1653_v35 }
 0x3ff   : > { %1706 = vst.msk [vmem:[%s2368_s29 + $0x3c] sm:$0xf] %vm1690_vm0, %v1673_v42  ;;  %v1689_v45 = vpack.c.bf16 %v1657_v49, %v1657_v49 }
 0x400   : > { %1708 = vst.msk [vmem:[%s2368_s29 + $0x44] sm:$0xf] %vm1690_vm0, %v1675_v22 }
 0x401   : > { %1710 = vst.msk [vmem:[%s2368_s29 + $0x4c] sm:$0xf] %vm1690_vm0, %v1677_v36 }
 0x402   : > { %1712 = vst.msk [vmem:[%s2368_s29 + $0x54] sm:$0xf] %vm1690_vm0, %v1679_v4 }
 0x403   : > { %1714 = vst.msk [vmem:[%s2368_s29 + $0x5c] sm:$0xf] %vm1690_vm0, %v1681_v19 }
 0x404   : > { %1716 = vst.msk [vmem:[%s2368_s29 + $0x64] sm:$0xf] %vm1690_vm0, %v1683_v59 }
 0x405   : > { %1718 = vst.msk [vmem:[%s2368_s29 + $0x6c] sm:$0xf] %vm1690_vm0, %v1685_v55 }
 0x406   : > { %1720 = vst.msk [vmem:[%s2368_s29 + $0x74] sm:$0xf] %vm1690_vm0, %v1687_v20 }
 0x407   : > { %1722 = vst.msk [vmem:[%s2368_s29 + $0x7c] sm:$0xf] %vm1690_vm0, %v1689_v45 }
 0x408 PF: > { %s13_s12 = sadd.s32 1, %s2017_s12  }
 0x409   : > { %p10_p4 = scmp.ge.s32.totalorder %s13_s12, 4  }
 0x40b   :  { %12 = sbr.rel (!%p10_p4) target bundleno = 1 (0x1), region = 69 }

// kernel: up_forward.3
= control target key start
LH: loop header
LB: loop body
LE: loop exit
PB: predicated region body
PF: predicated region fallthrough
CT: control target
= control target key end

     0   :  { %s7672_s27 = smov 0   ;;  %s10527_s0 = inlined_call_operand.vmem [shape: bf16[2,16,16,4], index: 0, kind: input, shape index: {}]   ;;  %s10528_s1 = inlined_call_operand.vmem [shape: bf16[2,16,16,4], index: 1, kind: input, shape index: {}]   ;;  %s10529_s2 = inlined_call_operand.vmem [shape: bf16[3,24,4], index: 2, kind: input, shape index: {}]   ;;  %s10530_s3 = inlined_call_operand.vmem [shape: f32[1,4], index: 3, kind: input, shape index: {}]   ;;  %s10531_s4 = inlined_call_operand.vmem [shape: f32[1,4], index: 4, kind: input, shape index: {}]   ;;  %s10532_s5 = inlined_call_operand.vmem [shape: bf16[3,12,4], index: 5, kind: input, shape index: {}]   ;;  %s10533_s6 = inlined_call_operand.vmem [shape: f32[1,4], index: 6, kind: input, shape index: {}]   ;;  %s10534_s7 = inlined_call_operand.vmem [shape: f32[1,4], index: 7, kind: input, shape index: {}]   ;;  %s10535_s8 = inlined_call_operand.vmem [shape: f32[2,16,16,4], index: 8, kind: output, shape index: {}]  }
   0x1 LB: > { %s6903_s28 = sadd.s32 4294967295, %s7621_s27   ;;  %p6907_p0 = scmp.ge.s32.totalorder %s7621_s27, 1  ;;  %s7621_s27 = sphi %s7672_s27, %s18_s27  }
   0x2   : > { %p272_p1 = scmp.lt.s32.totalorder %s7621_s27, 3 }
   0x4   : > { %p273_p2 = pnand %p6907_p0, %p272_p1 }
   0x6   : > { %276 = sbr.rel (%p273_p2) target bundleno = 1568 (0x620), region = 52 }
   0xb   : > { %p311_p3 = scmp.lt.s32.totalorder %s6903_s28, 1  ;;  %vm337_vm0 = vsmask.f32 256  ;;  %vm601_vm1 = vsmask.f32 4368  ;;  %s7623_s11 = smov 4  }
   0xc   : > { %vm7699_vm2 = vmor %vm337_vm0, %vm601_vm1  ;;  %v369_v33 = vld [vmem:[#allocation2 + $0x78] sm:$0x1]  ;;  %vm330_vm3 = vcmask 57344   ;;  %vm10536_vm5 = vsmask.f32 7938  ;;  %vm449_vm7 = vcmask 27648  }
   0xd   : > { %s10591_s28 = smov (!%p311_p3, %s6903_s28), 1  ;;  %vm7708_vm4 = vmand %vm330_vm3, %vm337_vm0  ;;  %vm10538_vm9 = vcmask 24576   ;;  %vm1486_vm11 = vcmask 60448   ;;  %vm1493_vm13 = vcmask 57376   ;;  %vm2068_vm15 = vcmask 1046528   ;;  %s7624_s15 = smov 16  }
   0xe   : > { %s7046_s29 = sshll.u32 %s10591_s28, 7  ;;  %v370_v38 = vsel %vm7708_vm4, 0, %v369_v33  ;;  %vm7747_vm6 = vmand %vm330_vm3, %vm10536_vm5  ;;  %s7625_s16 = smov 8   ;;  %vm10537_vm1 = vcmask 1043456  }
   0xf   : > { %s7688_s10 = scalar_lea.vmem %s10528_s1, %s7046_s29  ;;  %371 = vst [vmem:[#allocation2 + $0x78] sm:$0x1] %v370_v38  ;;  %s7743_s14 = scalar_lea.vmem %s10527_s0, %s7046_s29  ;;  %vm7756_vm8 = vmand %vm449_vm7, %vm10536_vm5 }
  0x10   : > { %v1055_v0 = vld [vmem:[%s7688_s10 + $0x44] sm:$0xf]  ;;  %v1054_v1 = vld [vmem:[%s7688_s10 + $0x40] sm:$0xf]  ;;  %v1057_v2 = vld [vmem:[%s7688_s10 + $0x4c] sm:$0xf] }
  0x11   : > { %v1215_v3 = vshrl.u32 %v1055_v0, 16  ;;  %v1207_v4 = vshrl.u32 %v1054_v1, 16  ;;  %v1210_v5 = vshll.u32 %v1054_v1, 16  ;;  %v1056_v6 = vld [vmem:[%s7688_s10 + $0x48] sm:$0xf]  ;;  %v1232_v9 = vshrl.u32 %v1057_v2, 16  ;;  %vm7767_vm10 = vmand %vm10538_vm9, %vm337_vm0 }
  0x12   : > { %v1224_v10 = vshrl.u32 %v1056_v6, 16  ;;  %v1218_v11 = vshll.u32 %v1055_v0, 16  ;;  %v1058_v12 = vld [vmem:[%s7688_s10 + $0x50] sm:$0xf]  ;;  %v1227_v13 = vshll.u32 %v1056_v6, 16  ;;  %v1235_v20 = vshll.u32 %v1057_v2, 16  ;;  %vm7797_vm12 = vmand %vm1486_vm11, %vm10536_vm5 }
  0x13   : > { %v1217_v7 = vrot.slane %v1215_v3, 7  ;;  %v1209_v8 = vrot.slane %v1207_v4, 7  ;;  %v1059_v16 = vld [vmem:[%s7688_s10 + $0x54] sm:$0xf]  ;;  %v1234_v18 = vrot.slane %v1232_v9, 7  ;;  %v1241_v19 = vshrl.u32 %v1058_v12, 16  ;;  %vm7835_vm14 = vmand %vm1493_vm13, %vm337_vm0 }
  0x14   : > { %v1226_v17 = vrot.slane %v1224_v10, 7  ;;  %v1249_v24 = vshrl.u32 %v1059_v16, 16  ;;  %v1252_v32 = vshll.u32 %v1059_v16, 16  ;;  %v1244_v35 = vshll.u32 %v1058_v12, 16  ;;  %v1061_v36 = vld [vmem:[%s7688_s10 + $0x5c] sm:$0xf] }
  0x15   : > { %v1222_v14 = vrot.slane %v1217_v7, 4  ;;  %v1212_v15 = vor.u32 %v1210_v5, %v1209_v8  ;;  %v1220_v21 = vor.u32 %v1218_v11, %v1217_v7  ;;  %v1213_v22 = vrot.slane %v1209_v8, 4  ;;  %v1060_v41 = vld [vmem:[%s7688_s10 + $0x58] sm:$0xf]  ;;  %v1063_v46 = vld [vmem:[%s7688_s10 + $0x64] sm:$0xf] }
  0x16   : > { %v1229_v23 = vor.u32 %v1227_v13, %v1226_v17  ;;  %v1239_v26 = vrot.slane %v1234_v18, 4  ;;  %v1230_v27 = vrot.slane %v1226_v17, 4  ;;  %v1237_v28 = vor.u32 %v1235_v20, %v1234_v18  ;;  %v1062_v47 = vld [vmem:[%s7688_s10 + $0x60] sm:$0xf]  ;;  %v587_v6 = vld [vmem:[%s7743_s14 + $0x48] sm:$0xf] }
  0x17   : > { %1394 = vrot.lane.b32.xlu1 %v1222_v14, %s7623_s11  ;;  %1390 = vrot.lane.b32.xlu0 %v1212_v15, %s7623_s11  ;;  %v1221_v29 = vsel %vm7699_vm2, %v1213_v22, %v1220_v21  ;;  %v1243_v30 = vrot.slane %v1241_v19, 7  ;;  %v1251_v31 = vrot.slane %v1249_v24, 7  ;;  %v1266_v43 = vshrl.u32 %v1061_v36, 16  ;;  %v422_v9 = vld [vmem:[#allocation2 + $0x74] sm:$0x1]  ;;  %s7048_s19 = sshll.u32 %s10591_s28, 8 }
  0x18   : > { %1396 = vrot.lane.b32.xlu2 %v1229_v23, %s7623_s11  ;;  %v1238_v37 = vsel %vm7699_vm2, %v1230_v27, %v1237_v28  ;;  %v1258_v44 = vshrl.u32 %v1060_v41, 16  ;;  %v1261_v51 = vshll.u32 %v1060_v41, 16  ;;  %v1269_v52 = vshll.u32 %v1061_v36, 16  ;;  %v989_v13 = vld [vmem:[#allocation2 + $0x78] sm:$0xf]  ;;  %s10339_s22 = scalar_lea.vmem %s10535_s8, %s7048_s19 }
  0x19   : > { %v1247_v39 = vrot.slane %v1243_v30, 4  ;;  %v1254_v40 = vor.u32 %v1252_v32, %v1251_v31  ;;  %v1246_v42 = vor.u32 %v1244_v35, %v1243_v30  ;;  %v1256_v48 = vrot.slane %v1251_v31, 4  ;;  %v586_v15 = vld [vmem:[%s7743_s14 + $0x44] sm:$0xf]  ;;  %v366_v18 = vld [vmem:[#allocation2 + $0x6c] sm:$0x1] }
  0x1a   : > { %v1268_v49 = vrot.slane %v1266_v43, 7  ;;  %v1260_v50 = vrot.slane %v1258_v44, 7  ;;  %v1283_v53 = vshrl.u32 %v1063_v46, 16  ;;  %v1275_v54 = vshrl.u32 %v1062_v47, 16  ;;  %v585_v24 = vld [vmem:[%s7743_s14 + $0x40] sm:$0xf] }
  0x1b   : > { %v1255_v45 = vsel %vm7699_vm2, %v1247_v39, %v1254_v40  ;;  %v1286_v61 = vshll.u32 %v1063_v46, 16  ;;  %v1278_v1 = vshll.u32 %v1062_v47, 16  ;;  %v757_v7 = vshrl.u32 %v587_v6, 16  ;;  %v425_v27 = vld [vmem:[#allocation2 + $0x80] sm:$0x1] }
  0x1c   : > { %v1273_v55 = vrot.slane %v1268_v49, 4  ;;  %v1263_v56 = vor.u32 %v1261_v51, %v1260_v50  ;;  %v1264_v57 = vrot.slane %v1260_v50, 4  ;;  %v1271_v58 = vor.u32 %v1269_v52, %v1268_v49  ;;  %v588_v32 = vld [vmem:[%s7743_s14 + $0x4c] sm:$0xf]  ;;  %v372_v43 = vld [vmem:[#allocation2 + $0x84] sm:$0x1] }
  0x1d   : > { %v1285_v59 = vrot.slane %v1283_v53, 7  ;;  %v1277_v60 = vrot.slane %v1275_v54, 7  ;;  %v760_v8 = vshll.u32 %v587_v6, 16  ;;  %v759_v10 = vrot.slane %v757_v7, 7  ;;  %v428_v44 = vld [vmem:[#allocation2 + $0x8c] sm:$0x1] }
  0x1e   : > { %v1272_v62 = vsel %vm7699_vm2, %v1264_v57, %v1271_v58  ;;  %v423_v11 = vsel %vm7747_vm6, 0, %v422_v9  ;;  %v748_v17 = vshrl.u32 %v586_v15, 16  ;;  %v367_v20 = vsel %vm7708_vm4, 0, %v366_v18  ;;  %v589_v51 = vld [vmem:[%s7743_s14 + $0x50] sm:$0xf] }
  0x1f   : > { %1400 = vrot.lane.b32.xlu1 %v1239_v26, %s7623_s11  ;;  %1392 = vrot.lane.b32.xlu0 %v1221_v29, %s7623_s11  ;;  %v1281_v63 = vrot.slane %v1277_v60, 4  ;;  %v1288_v0 = vor.u32 %v1286_v61, %v1285_v59  ;;  %v1290_v2 = vrot.slane %v1285_v59, 4  ;;  %v1280_v4 = vor.u32 %v1278_v1, %v1277_v60  ;;  %424 = vst [vmem:[#allocation2 + $0x74] sm:$0x1] %v423_v11  ;;  %v590_v53 = vld [vmem:[%s7743_s14 + $0x54] sm:$0xf] }
  0x20   : > { %1398 = vrot.lane.b32.xlu2 %v1238_v37, %s7623_s11  ;;  %v762_v14 = vor.u32 %v760_v8, %v759_v10  ;;  %v750_v19 = vrot.slane %v748_v17, 7  ;;  %368 = vst [vmem:[#allocation2 + $0x6c] sm:$0x1] %v367_v20  ;;  %v740_v26 = vshrl.u32 %v585_v24, 16  ;;  %v426_v29 = vsel %vm7747_vm6, 0, %v425_v27 }
  0x21   : > { %v1289_v3 = vsel %vm7699_vm2, %v1281_v63, %v1288_v0  ;;  %v743_v31 = vshll.u32 %v585_v24, 16  ;;  %v765_v33 = vshrl.u32 %v588_v32, 16  ;;  %427 = vst [vmem:[#allocation2 + $0x80] sm:$0x1] %v426_v29  ;;  %v768_v39 = vshll.u32 %v588_v32, 16 }
  0x22   : > { %v990_v16 = vsel %vm7756_vm8, %v762_v14, %v989_v13  ;;  %v755_v23 = vrot.slane %v750_v19, 4  ;;  %v742_v30 = vrot.slane %v740_v26, 7  ;;  %v763_v41 = vrot.slane %v759_v10, 4  ;;  %v431_v59 = vld [vmem:[#allocation2 + $0x98] sm:$0x1] }
  0x23   : > { %991 = vst [vmem:[#allocation2 + $0x78] sm:$0xf] %v990_v16  ;;  %v767_v37 = vrot.slane %v765_v33, 7  ;;  %v373_v47 = vsel %vm7708_vm4, 0, %v372_v43  ;;  %v429_v49 = vsel %vm7747_vm6, 0, %v428_v44  ;;  %v751_v50 = vshll.u32 %v586_v15, 16 }
  0x24   : > { %v745_v35 = vor.u32 %v743_v31, %v742_v30  ;;  %374 = vst [vmem:[#allocation2 + $0x84] sm:$0x1] %v373_v47  ;;  %v774_v52 = vshrl.u32 %v589_v51, 16  ;;  %v746_v54 = vrot.slane %v742_v30, 4  ;;  %v777_v58 = vshll.u32 %v589_v51, 16 }
  0x25   : > { %v772_v40 = vrot.slane %v767_v37, 4  ;;  %430 = vst [vmem:[#allocation2 + $0x8c] sm:$0x1] %v429_v49  ;;  %v375_v1 = vld [vmem:[#allocation2 + $0x90] sm:$0x1]  ;;  %v785_v24 = vshll.u32 %v590_v53, 16 }
  0x26   : > { %v986_v22 = vld [vmem:[#allocation2 + $0x74] sm:$0x1]  ;;  %v776_v57 = vrot.slane %v774_v52, 7  ;;  %v376_v6 = vsel %vm7708_vm4, 0, %v375_v1  ;;  %v592_v8 = vld [vmem:[%s7743_s14 + $0x5c] sm:$0xf] }
  0x27   : > { %1402 = vrot.lane.b32.xlu0 %v1246_v42, %s7623_s11  ;;  %1404 = vrot.lane.b32.xlu1 %v1255_v45, %s7623_s11  ;;  %v987_v28 = vsel %vm7767_vm10, %v755_v23, %v986_v22  ;;  %v982_v36 = vld [vmem:[#allocation2 + $0x6c] sm:$0xf]  ;;  %v770_v42 = vor.u32 %v768_v39, %v767_v37  ;;  %v799_v11 = vshrl.u32 %v592_v8, 16  ;;  %377 = vst [vmem:[#allocation2 + $0x90] sm:$0x1] %v376_v6  ;;  %v802_v43 = vshll.u32 %v592_v8, 16 }
  0x28   : > { %1406 = vrot.lane.b32.xlu2 %v1256_v48, %s7623_s11  ;;  %988 = vst [vmem:[#allocation2 + $0x74] sm:$0x1] %v987_v28  ;;  %v983_v38 = vsel %vm7756_vm8, %v745_v35, %v982_v36  ;;  %v993_v46 = vld [vmem:[#allocation2 + $0x80] sm:$0x1]  ;;  %v779_v0 = vor.u32 %v777_v58, %v776_v57  ;;  %v1064_v17 = vld [vmem:[%s7688_s10 + $0x68] sm:$0xf] }
  0x29   : > { %984 = vst [vmem:[#allocation2 + $0x6c] sm:$0xf] %v983_v38  ;;  %v771_v45 = vsel %vm7699_vm2, %v763_v41, %v770_v42  ;;  %v994_v48 = vsel %vm7767_vm10, %v772_v40, %v993_v46  ;;  %v801_v20 = vrot.slane %v799_v11, 7  ;;  %v591_v22 = vld [vmem:[%s7743_s14 + $0x58] sm:$0xf]  ;;  %v1295_v29 = vshll.u32 %v1064_v17, 16 }
  0x2a   : > { %992 = vst.msk [vmem:[#allocation2 + $0x7c] sm:$0xf] %vm449_vm7, %v771_v45  ;;  %v1554_v63 = vld [vmem:[#allocation2 + $0x78] sm:$0xf]  ;;  %v791_v26 = vshrl.u32 %v591_v22, 16  ;;  %v794_v27 = vshll.u32 %v591_v22, 16 }
  0x2b   : > { %995 = vst [vmem:[#allocation2 + $0x80] sm:$0x1] %v994_v48  ;;  %v996_v10 = vld [vmem:[#allocation2 + $0x84] sm:$0xf]  ;;  %v806_v30 = vrot.slane %v801_v20, 4  ;;  %v780_v31 = vrot.slane %v776_v57, 4  ;;  %v804_v45 = vor.u32 %v802_v43, %v801_v20 }
  0x2c   : > { %v997_v15 = vsel %vm7756_vm8, %v779_v0, %v996_v10  ;;  %v1000_v16 = vld [vmem:[#allocation2 + $0x8c] sm:$0x1]  ;;  %v793_v35 = vrot.slane %v791_v26, 7  ;;  %v7850_v0 = vld [vmem:[%s7688_s10 + $0x70] sm:$0xf]  ;;  %vm2149_vm13 = vcmask 64512  }
  0x2d   : > { %998 = vst [vmem:[#allocation2 + $0x84] sm:$0xf] %v997_v15  ;;  %v7858_v6 = vld [vmem:[%s7688_s10 + $0x74] sm:$0xf]  ;;  %v1309_v11 = vshrl.u32 %v7850_v0, 16  ;;  %vm2839_vm5 = vcmask 195584  }
  0x2e   : > { %v1003_v39 = vld [vmem:[#allocation2 + $0x90] sm:$0xf]  ;;  %v796_v40 = vor.u32 %v794_v27, %v793_v35  ;;  %v797_v44 = vrot.slane %v793_v35, 4  ;;  %vm1795_vm0 = vsmask.f32 7424  ;;  %vm327_vm9 = vcmask 60416  }
  0x2f   : > { %1412 = vrot.lane.b32.xlu0 %v1273_v55, %s7623_s11  ;;  %1408 = vrot.lane.b32.xlu1 %v1263_v56, %s7623_s11  ;;  %v753_v55 = vor.u32 %v751_v50, %v750_v19  ;;  %v782_v56 = vshrl.u32 %v590_v53, 16  ;;  %v1292_v19 = vshrl.u32 %v1064_v17, 16  ;;  %v1551_v51 = vld [vmem:[#allocation2 + $0x74] sm:$0x1] }
  0x30   : > { %1410 = vrot.lane.b32.xlu2 %v1272_v62, %s7623_s11  ;;  %v432_v62 = vsel %vm7747_vm6, 0, %v431_v59  ;;  %v1004_v42 = vsel %vm7756_vm8, %v796_v40, %v1003_v39  ;;  %v805_v47 = vsel %vm7699_vm2, %v797_v44, %v804_v45  ;;  %v1547_v52 = vld [vmem:[#allocation2 + $0x6c] sm:$0xf]  ;;  %v378_v59 = vld [vmem:[#allocation2 + $0x9c] sm:$0x1]  ;;  %v1320_v39 = vshll.u32 %v7858_v6, 16 }
  0x31   : > { %v754_v60 = vsel %vm7699_vm2, %v746_v54, %v753_v55  ;;  %v784_v61 = vrot.slane %v782_v56, 7  ;;  %433 = vst [vmem:[#allocation2 + $0x98] sm:$0x1] %v432_v62  ;;  %v7819_v28 = vrot.slane %v1292_v19, 7 }
  0x32   : > { %985 = vst.msk [vmem:[#allocation2 + $0x70] sm:$0xf] %vm449_vm7, %v754_v60  ;;  %v1558_v58 = vld [vmem:[#allocation2 + $0x80] sm:$0x1]  ;;  %v434_v60 = vld [vmem:[#allocation2 + $0xa4] sm:$0x1] }
  0x33   : > { %v787_v32 = vor.u32 %v785_v24, %v784_v61  ;;  %v1297_v36 = vor.u32 %v1295_v29, %v7819_v28  ;;  %1005 = vst [vmem:[#allocation2 + $0x90] sm:$0xf] %v1004_v42  ;;  %v435_v1 = vsel %vm7747_vm6, 0, %v434_v60 }
  0x34   : > { %1006 = vst.msk [vmem:[#allocation2 + $0x94] sm:$0xf] %vm449_vm7, %v805_v47 }
  0x35   : > { %v788_v38 = vsel %vm7699_vm2, %v780_v31, %v787_v32  ;;  %436 = vst [vmem:[#allocation2 + $0xa4] sm:$0x1] %v435_v1 }
  0x36   : > { %999 = vst.msk [vmem:[#allocation2 + $0x88] sm:$0xf] %vm449_vm7, %v788_v38 }
  0x37   : > { %1418 = vrot.lane.b32.xlu1 %v1290_v2, %s7623_s11  ;;  %1416 = vrot.lane.b32.xlu0 %v1289_v3, %s7623_s11  ;;  %v7802_v3 = vld [vmem:[%s7688_s10 + $0x6c] sm:$0xf] }
  0x38   : > { %1414 = vrot.lane.b32.xlu2 %v1280_v4, %s7623_s11  ;;  %v789_v4 = vrot.slane %v784_v61, 4  ;;  %v1300_v7 = vshrl.u32 %v7802_v3, 16  ;;  %v1007_v33 = vld [vmem:[#allocation2 + $0x98] sm:$0x1]  ;;  %v379_v61 = vsel %vm7708_vm4, 0, %v378_v59 }
  0x39   : > { %v1008_v37 = vsel %vm7767_vm10, %v806_v30, %v1007_v33  ;;  %380 = vst [vmem:[#allocation2 + $0x9c] sm:$0x1] %v379_v61  ;;  %v7868_v30 = vrot.slane %v1309_v11, 7 }
  0x3a   : > { %v7810_v14 = vrot.slane %v1300_v7, 7  ;;  %v1001_v18 = vsel %vm7767_vm10, %v789_v4, %v1000_v16  ;;  %1009 = vst [vmem:[#allocation2 + $0x98] sm:$0x1] %v1008_v37  ;;  %v1317_v16 = vshrl.u32 %v7858_v6, 16  ;;  %v1568_v1 = vld [vmem:[#allocation2 + $0x90] sm:$0xf] }
  0x3b   : > { %1002 = vst [vmem:[#allocation2 + $0x8c] sm:$0x1] %v1001_v18  ;;  %v594_v18 = vld [vmem:[%s7743_s14 + $0x64] sm:$0xf]  ;;  %v1315_v6 = vrot.slane %v7868_v30, 4 }
  0x3c   : > { %v1307_v23 = vrot.slane %v7810_v14, 4  ;;  %v816_v26 = vshrl.u32 %v594_v18, 16  ;;  %v7872_v38 = vrot.slane %v1317_v16, 7 }
  0x3e   : > { %v818_v40 = vrot.slane %v816_v26, 7 }
  0x3f   : > { %1424 = vrot.lane.b32.xlu1 %v1307_v23, %s7623_s11  ;;  %v1561_v23 = vld [vmem:[#allocation2 + $0x84] sm:$0xf] }
  0x40   : > { %1420 = vrot.lane.b32.xlu2 %v1297_v36, %s7623_s11  ;;  %v1010_v31 = vld [vmem:[#allocation2 + $0x9c] sm:$0xf] }
  0x42   : > { %v1565_v46 = vld [vmem:[#allocation2 + $0x8c] sm:$0x1] }
  0x72   : > { %v1397_v9 = vpop.permute.xlu2 %1396 }
  0x73   : > { %v1555_v13 = vsel %vm7797_vm12, %v1397_v9, %v1554_v63  ;;  %v593_v9 = vld [vmem:[%s7743_s14 + $0x60] sm:$0xf] }
  0x74   : > { %1556 = vst [vmem:[#allocation2 + $0x78] sm:$0xf] %v1555_v13  ;;  %v808_v13 = vshrl.u32 %v593_v9, 16  ;;  %v811_v17 = vshll.u32 %v593_v9, 16  ;;  %v1322_v9 = vor.u32 %v1320_v39, %v7872_v38 }
  0x76   : > { %v810_v22 = vrot.slane %v808_v13, 7 }
  0x78   : > { %v813_v32 = vor.u32 %v811_v17, %v810_v22 }
  0x7a   : > { %v1399_v41 = vpop.permute.xlu2 %1398  ;;  %v1011_v47 = vsel %vm7756_vm8, %v813_v32, %v1010_v31 }
  0x7b   : > { %1557 = vst.msk [vmem:[#allocation2 + $0x7c] sm:$0xf] %vm1486_vm11, %v1399_v41  ;;  %v7299_v8 = vld [vmem:[#allocation2 + $0x78] sm:$0xe] }
  0x7c   : > { %1012 = vst [vmem:[#allocation2 + $0x9c] sm:$0xf] %v1011_v47 }
  0x82   : > { %v1407_v49 = vpop.permute.xlu2 %1406  ;;  %v7861_v10 = vld [vmem:[#allocation2 + $0x78] sm:$0xff]  }
  0x83   : > { %v1566_v50 = vsel %vm7835_vm14, %v1407_v49, %v1565_v46  ;;  %v7298_v15 = vld [vmem:[#allocation2 + $0x78] sm:$0xf0]  ;;  %v2521_v24 = vshll.u32 %v7861_v10, 16  ;;  %v2519_v29 = vshrl.u32 %v7861_v10, 16  ;;  %v1014_v49 = vld [vmem:[#allocation2 + $0xa4] sm:$0x1] }
  0x84   : > { %1567 = vst [vmem:[#allocation2 + $0x8c] sm:$0x1] %v1566_v50  ;;  %v7300_v27 = vor.u32 %v7299_v8, %v7298_v15  ;;  %v823_v50 = vrot.slane %v818_v40, 4 }
  0x85   : > { %v2523_v46 = vrot.slane %v2521_v24, 1 }
  0x87   : > { %v2524_v8 = vor.u32 %v2523_v46, %v2519_v29 }
  0x89   : > { %v1395_v53 = vpop.permute.xlu1 %1394  ;;  %v1391_v54 = vpop.permute.xlu0 %1390 }
  0x8a   : > { %v1552_v55 = vsel %vm7835_vm14, %v1395_v53, %v1551_v51  ;;  %v1548_v56 = vsel %vm7797_vm12, %v1391_v54, %v1547_v52  ;;  %v1411_v57 = vpop.permute.xlu2 %1410  ;;  %v814_v52 = vrot.slane %v810_v22, 4  ;;  %v819_v53 = vshll.u32 %v594_v18, 16  ;;  %v1572_v54 = vld [vmem:[#allocation2 + $0x98] sm:$0x1] }
  0x8b   : > { %1553 = vst [vmem:[#allocation2 + $0x74] sm:$0x1] %v1552_v55  ;;  %v2260_v44 = vld [vmem:[#allocation2 + $0x8c] sm:$0x1] }
  0x8c   : > { %1549 = vst [vmem:[#allocation2 + $0x6c] sm:$0xf] %v1548_v56  ;;  %v2388_v56 = vunpack.c.l.b16 %v2260_v44  ;;  %v821_v61 = vor.u32 %v819_v53, %v818_v40  ;;  %v1298_v53 = vrot.slane %v7819_v28, 4 }
  0x8d   : > { %1571 = vst.msk [vmem:[#allocation2 + $0x94] sm:$0xf] %vm1486_vm11, %v1411_v57  ;;  %v1015_v57 = vsel %vm7767_vm10, %v823_v50, %v1014_v49 }
  0x8e   : > { %1016 = vst [vmem:[#allocation2 + $0xa4] sm:$0x1] %v1015_v57  ;;  %v822_v13 = vsel %vm7699_vm2, %v814_v52, %v821_v61 }
  0x8f   : > { %1013 = vst.msk [vmem:[#allocation2 + $0xa0] sm:$0xf] %vm449_vm7, %v822_v13 }
  0x91   : > { %v1401_v62 = vpop.permute.xlu1 %1400  ;;  %v1393_v63 = vpop.permute.xlu0 %1392 }
  0x92   : > { %v1559_v4 = vsel %vm7835_vm14, %v1401_v62, %v1558_v58  ;;  %1550 = vst.msk [vmem:[#allocation2 + $0x70] sm:$0xf] %vm1486_vm11, %v1393_v63  ;;  %v2258_v7 = vld [vmem:[#allocation2 + $0x74] sm:$0x1]  ;;  %v2709_v62 = vrot.slane %v7300_v27, 1  ;;  %v1415_v11 = vpop.permute.xlu2 %1414 }
  0x93   : > { %1560 = vst [vmem:[#allocation2 + $0x80] sm:$0x1] %v1559_v4  ;;  %v7563_v19 = vld [vmem:[#allocation2 + $0x6c] sm:$0xe]  ;;  %v2386_v20 = vunpack.c.l.b16 %v2258_v7 }
  0x94   : > { %v7301_v49 = vld [vmem:[#allocation2 + $0x90] sm:$0xf0] }
  0x95   : > { %v7878_v42 = vpack.c.b16 %v2386_v20, %v2386_v20  ;;  %v2404_v20 = vpack.c.b16 %v2388_v56, %v2388_v56 }
  0x97   : > { %v2707_v59 = vrot.slane %v7878_v42, 1  ;;  %v2514_v26 = vshll.u32 %v7878_v42, 16  ;;  %v2713_v40 = vrot.slane %v2404_v20, 1  ;;  %v1303_v42 = vshll.u32 %v7802_v3, 16 }
  0x99   : > { %v1403_v33 = vpop.permute.xlu0 %1402  ;;  %v1405_v35 = vpop.permute.xlu1 %1404  ;;  %v7870_v36 = vld [vmem:[#allocation2 + $0x6c] sm:$0xff]   ;;  %v1305_v3 = vor.u32 %v1303_v42, %v7810_v14 }
  0x9a   : > { %v7562_v37 = vld [vmem:[#allocation2 + $0x6c] sm:$0xf0]  ;;  %v1562_v41 = vsel %vm7797_vm12, %v1403_v33, %v1561_v23  ;;  %1564 = vst.msk [vmem:[#allocation2 + $0x88] sm:$0xf] %vm1486_vm11, %v1405_v35  ;;  %v2259_v43 = vld [vmem:[#allocation2 + $0x80] sm:$0x1] }
  0x9b   : > { %1563 = vst [vmem:[#allocation2 + $0x84] sm:$0xf] %v1562_v41  ;;  %v2387_v45 = vunpack.c.l.b16 %v2259_v43  ;;  %v7564_v51 = vor.u32 %v7563_v19, %v7562_v37  ;;  %v2509_v60 = vshll.u32 %v7870_v36, 16  ;;  %v2507_v24 = vshrl.u32 %v7870_v36, 16  ;;  %v1575_v33 = vld [vmem:[#allocation2 + $0x9c] sm:$0xf] }
  0x9c   : > { %v1576_v35 = vsel %vm7797_vm12, %v1415_v11, %v1575_v33  ;;  %v1323_v41 = vsel %vm7699_vm2, %v1315_v6, %v1322_v9  ;;  %v2516_v43 = vrot.slane %v2514_v26, 1  ;;  %v1306_v14 = vsel %vm7699_vm2, %v1298_v53, %v1305_v3  ;;  %v1039_v33 = vld [vmem:[%s7688_s10 + $0x4] sm:$0xf] }
  0x9d   : > { %v2403_v55 = vpack.c.b16 %v2387_v45, %v2387_v45  ;;  %v2706_v58 = vrot.slane %v7564_v51, 1  ;;  %v2511_v19 = vrot.slane %v2509_v60, 1  ;;  %1577 = vst [vmem:[#allocation2 + $0x9c] sm:$0xf] %v1576_v35  ;;  %v1579_v45 = vld [vmem:[#allocation2 + $0xa4] sm:$0x1] }
  0x9e   : > { %v1069_v60 = vld [vmem:[%s7688_s10 + $0x7c] sm:$0xf]  ;;  %v1324_v6 = vrot.slane %v7872_v38, 4  ;;  %v1312_v11 = vshll.u32 %v7850_v0, 16 }
  0x9f   : > { %v2710_v63 = vrot.slane %v2403_v55, 1  ;;  %v2526_v4 = vshll.u32 %v2403_v55, 16  ;;  %v2708_v7 = vsel %vm2068_vm15, %v2706_v58, %v2707_v59  ;;  %v2512_v37 = vor.u32 %v2511_v19, %v2507_v24 }
  0xa0   : > { %2746 = vrot.lane.b32.xlu1 %v2708_v7, %s7624_s15  ;;  %v1334_v7 = vshrl.u32 %v1069_v60, 16  ;;  %v1314_v19 = vor.u32 %v1312_v11, %v7868_v30 }
  0xa1   : > { %v1413_v15 = vpop.permute.xlu0 %1412  ;;  %v2711_v16 = vsel %vm2068_vm15, %v2709_v62, %v2710_v63  ;;  %v1409_v17 = vpop.permute.xlu1 %1408  ;;  %v2528_v18 = vrot.slane %v2526_v4, 1  ;;  %v7565_v29 = vld [vmem:[#allocation2 + $0x84] sm:$0xf0]  ;;  %v2517_v46 = vsel %vm1795_vm0, %v2512_v37, %v2516_v43  ;;  %v7926_v4 = vld [vmem:[%s7688_s10 + $0x78] sm:$0xf] }
  0xa2   : > { %v1573_v22 = vsel %vm7835_vm14, %v1413_v15, %v1572_v54  ;;  %2748 = vrot.lane.b32.xlu0 %v2711_v16, %s7624_s15  ;;  %v1569_v23 = vsel %vm7797_vm12, %v1409_v17, %v1568_v1  ;;  %v7901_v27 = vld [vmem:[#allocation2 + $0x84] sm:$0xff]   ;;  %v2538_v1 = vshll.u32 %v2404_v20, 16  ;;  %v1326_v13 = vshrl.u32 %v7926_v4, 16 }
  0xa3   : > { %v7566_v31 = vld [vmem:[#allocation2 + $0x84] sm:$0xe]  ;;  %1574 = vst [vmem:[#allocation2 + $0x98] sm:$0x1] %v1573_v22  ;;  %v2529_v32 = vsel %vm1795_vm0, %v2524_v8, %v2528_v18  ;;  %v2533_v57 = vshll.u32 %v7901_v27, 16  ;;  %v2531_v62 = vshrl.u32 %v7901_v27, 16 }
  0xa4   : > { %1570 = vst [vmem:[#allocation2 + $0x90] sm:$0xf] %v1569_v23  ;;  %2620 = vrot.lane.b32.xlu2 %v2529_v32, %s7625_s16  ;;  %v7567_v39 = vor.u32 %v7566_v31, %v7565_v29  ;;  %v2540_v16 = vrot.slane %v2538_v1, 1  ;;  %v1336_v38 = vrot.slane %v1334_v7, 7  ;;  %v1040_v18 = vld [vmem:[%s7688_s10 + $0x8] sm:$0xf] }
  0xa5   : > { %v2535_v63 = vrot.slane %v2533_v57, 1  ;;  %v1328_v20 = vrot.slane %v1326_v13, 7  ;;  %v1337_v22 = vshll.u32 %v1069_v60, 16  ;;  %v1088_v31 = vshrl.u32 %v1040_v18, 16  ;;  %v1038_v32 = vld [vmem:[%s7688_s10] sm:$0xf] }
  0xa6   : > { %v2712_v44 = vrot.slane %v7567_v39, 1  ;;  %v1341_v29 = vrot.slane %v1336_v38, 4  ;;  %v1091_v42 = vshll.u32 %v1040_v18, 16  ;;  %v1071_v43 = vshrl.u32 %v1038_v32, 16  ;;  %v1042_v1 = vld [vmem:[%s7688_s10 + $0x10] sm:$0xf] }
  0xa7   : > { %v2536_v15 = vor.u32 %v2535_v63, %v2531_v62  ;;  %v1332_v30 = vrot.slane %v1328_v20, 4  ;;  %v1339_v39 = vor.u32 %v1337_v22, %v1336_v38  ;;  %v1105_v13 = vshrl.u32 %v1042_v1, 16 }
  0xa8   : > { %1428 = vrot.lane.b32.xlu1 %v1323_v41, %s7623_s11  ;;  %v2714_v47 = vsel %vm2068_vm15, %v2712_v44, %v2713_v40  ;;  %v7947_v40 = vld [vmem:[%s7688_s10 + $0xc] sm:$0xf]  ;;  %v7950_v41 = vrot.slane %v1088_v31, 7  ;;  %v1079_v44 = vshrl.u32 %v1039_v33, 16  ;;  %v1073_v3 = vrot.slane %v1071_v43, 7 }
  0xa9   : > { %v1419_v50 = vpop.permute.xlu1 %1418  ;;  %v1417_v51 = vpop.permute.xlu0 %1416  ;;  %v2541_v23 = vsel %vm1795_vm0, %v2536_v15, %v2540_v16  ;;  %v1108_v22 = vshll.u32 %v1042_v1, 16  ;;  %v443_v1 = vld [vmem:[#allocation2 + $0xc8] sm:$0x1] }
  0xaa   : > { %2618 = vrot.lane.b32.xlu0 %v2517_v46, %s7625_s16  ;;  %v2261_v52 = vld [vmem:[#allocation2 + $0x98] sm:$0x1]  ;;  %v1580_v54 = vsel %vm7835_vm14, %v1419_v50, %v1579_v45  ;;  %1578 = vst.msk [vmem:[#allocation2 + $0xa0] sm:$0xf] %vm1486_vm11, %v1417_v51  ;;  %v1096_v45 = vshrl.u32 %v7947_v40, 16  ;;  %v1093_v50 = vor.u32 %v1091_v42, %v7950_v41  ;;  %v1077_v62 = vrot.slane %v1073_v3, 4 }
  0xab   : > { %v7302_v55 = vld [vmem:[#allocation2 + $0x90] sm:$0xe]  ;;  %v2389_v56 = vunpack.c.l.b16 %v2261_v52  ;;  %1581 = vst [vmem:[#allocation2 + $0xa4] sm:$0x1] %v1580_v54  ;;  %v1081_v54 = vrot.slane %v1079_v44, 7 }
  0xac   : > { %2750 = vrot.lane.b32.xlu2 %v2714_v47, %s7624_s15  ;;  %v7303_v58 = vor.u32 %v7302_v55, %v7301_v49  ;;  %v7929_v8 = vld [vmem:[#allocation2 + $0x90] sm:$0xff]   ;;  %v1340_v47 = vsel %vm7699_vm2, %v1332_v30, %v1339_v39  ;;  %v7569_v49 = vld [vmem:[#allocation2 + $0x9c] sm:$0xe]  ;;  %v1082_v55 = vshll.u32 %v1039_v33, 16  ;;  %v1098_v57 = vrot.slane %v1096_v45, 7 }
  0xad   : > { %v2405_v59 = vpack.c.b16 %v2389_v56, %v2389_v56  ;;  %v2545_v17 = vshll.u32 %v7929_v8, 16  ;;  %v2543_v0 = vshrl.u32 %v7929_v8, 16  ;;  %v1329_v56 = vshll.u32 %v7926_v4, 16 }
  0xae   : > { %v2715_v61 = vrot.slane %v7303_v58, 1  ;;  %v381_v58 = vld [vmem:[#allocation2 + $0xa8] sm:$0x1]  ;;  %v1084_v63 = vor.u32 %v1082_v55, %v1081_v54  ;;  %v1103_v7 = vrot.slane %v1098_v57, 4  ;;  %v598_v55 = vld [vmem:[%s7743_s14 + $0x74] sm:$0xf] }
  0xaf   : > { %v2716_v28 = vrot.slane %v2405_v59, 1  ;;  %v2547_v24 = vrot.slane %v2545_v17, 1  ;;  %v2550_v26 = vshll.u32 %v2405_v59, 16  ;;  %v595_v59 = vld [vmem:[%s7743_s14 + $0x68] sm:$0xf]  ;;  %v1331_v4 = vor.u32 %v1329_v56, %v1328_v20 }
  0xb0   : > { %v1085_v16 = vsel %vm7699_vm2, %v1077_v62, %v1084_v63  ;;  %v1074_v17 = vshll.u32 %v1038_v32, 16  ;;  %v7975_v20 = vrot.slane %v1105_v13, 7  ;;  %v850_v56 = vshrl.u32 %v598_v55, 16  ;;  %v6916_v62 = vld [vmem:[%s10529_s2 + $0x14] sm:$0xf] }
  0xb1   : > { %v2717_v9 = vsel %vm2068_vm15, %v2715_v61, %v2716_v28  ;;  %v2548_v35 = vor.u32 %v2547_v24, %v2543_v0  ;;  %v2552_v37 = vrot.slane %v2550_v26, 1  ;;  %v7957_v51 = vld [vmem:[#allocation2 + $0x9c] sm:$0xff]   ;;  %v382_v61 = vsel %vm7708_vm4, 0, %v381_v58 }
  0xb2   : > { %2752 = vrot.lane.b32.xlu1 %v2717_v9, %s7624_s15  ;;  %1422 = vrot.lane.b32.xlu0 %v1306_v14, %s7623_s11  ;;  %v7568_v52 = vld [vmem:[#allocation2 + $0x9c] sm:$0xf0]  ;;  %v2262_v53 = vld [vmem:[#allocation2 + $0xa4] sm:$0x1]  ;;  %v825_v14 = vshrl.u32 %v595_v59, 16  ;;  %v828_v28 = vshll.u32 %v595_v59, 16  ;;  %v1076_v24 = vor.u32 %v1074_v17, %v1073_v3  ;;  %v1110_v31 = vor.u32 %v1108_v22, %v7975_v20 }
  0xb3   : > { %v2553_v46 = vsel %vm1795_vm0, %v2548_v35, %v2552_v37  ;;  %v2390_v60 = vunpack.c.l.b16 %v2262_v53  ;;  %383 = vst [vmem:[#allocation2 + $0xa8] sm:$0x1] %v382_v61  ;;  %v7570_v11 = vor.u32 %v7569_v49, %v7568_v52  ;;  %v2557_v0 = vshll.u32 %v7957_v51, 16  ;;  %v7997_v49 = vld [vmem:[%s7743_s14 + $0x6c] sm:$0xf] }
  0xb4   : > { %1430 = vrot.lane.b32.xlu2 %v1324_v6, %s7623_s11  ;;  %v7967_v6 = vrot.slane %v825_v14, 7  ;;  %v2555_v32 = vshrl.u32 %v7957_v51, 16  ;;  %v1094_v37 = vrot.slane %v7950_v41, 4  ;;  %v1086_v41 = vrot.slane %v1081_v54, 4 }
  0xb5   : > { %v2406_v9 = vpack.c.b16 %v2390_v60, %v2390_v60  ;;  %v2718_v38 = vrot.slane %v7570_v11, 1  ;;  %v2559_v33 = vrot.slane %v2557_v0, 1  ;;  %v833_v53 = vshrl.u32 %v7997_v49, 16 }
  0xb6   : > { %v830_v15 = vor.u32 %v828_v28, %v7967_v6  ;;  %v852_v54 = vrot.slane %v850_v56, 7  ;;  %v2835_v63 = vunpack.c.l.b16 %v6916_v62 }
  0xb7   : > { %v2719_v18 = vrot.slane %v2406_v9, 1  ;;  %v2562_v35 = vshll.u32 %v2406_v9, 16  ;;  %v2560_v42 = vor.u32 %v2559_v33, %v2555_v32  ;;  %v345_v32 = vld [vmem:[#allocation2 + $0x18] sm:$0x1] }
  0xb8   : > { %v857_v59 = vrot.slane %v852_v54, 4  ;;  %v2837_v11 = vpack.c.b16 %v2835_v63, %v2835_v63  ;;  %v387_v63 = vld [vmem:[#allocation2 + $0xc0] sm:$0x1] }
  0xb9   : > { %v2720_v26 = vsel %vm2068_vm15, %v2718_v38, %v2719_v18  ;;  %v2564_v43 = vrot.slane %v2562_v35, 1  ;;  %v7050_v38 = vld [vmem:[%s10529_s2 + $0xc] sm:$0xff] }
  0xba   : > { %2622 = vrot.lane.b32.xlu1 %v2541_v23, %s7625_s16  ;;  %1426 = vrot.lane.b32.xlu0 %v1314_v19, %s7623_s11  ;;  %v1017_v19 = vld [vmem:[#allocation2 + $0xa8] sm:$0xf]  ;;  %v597_v18 = vld [vmem:[%s7743_s14 + $0x70] sm:$0xf] }
  0xbb   : > { %v1018_v23 = vsel %vm7756_vm8, %v830_v15, %v1017_v19  ;;  %v2874_v15 = vsel %vm10537_vm1, %v2837_v11, 0  ;;  %v853_v19 = vshll.u32 %v598_v55, 16  ;;  %v570_v55 = vld [vmem:[%s7743_s14 + $0x4] sm:$0xf]  ;;  %vm2182_vm1 = vcmask 130048  }
  0xbc   : > { %1436 = vrot.lane.b32.xlu2 %v1341_v29, %s7623_s11  ;;  %1019 = vst [vmem:[#allocation2 + $0xa8] sm:$0xf] %v1018_v23  ;;  %v1099_v29 = vshll.u32 %v7947_v40, 16  ;;  %v1421_v40 = vpop.permute.xlu2 %1420  ;;  %7435 = vmatpush.bf16.msra.mxu1 %v2874_v15  ;;  %v842_v23 = vshrl.u32 %v597_v18, 16  ;;  %v612_v56 = vshrl.u32 %v570_v55, 16 }
  0xbd   : > { %2882 = vmatpush.bf16.msra.mxu0 %v2874_v15 }
  0xbe   : > { %v1101_v30 = vor.u32 %v1099_v29, %v1098_v57  ;;  %v835_v57 = vrot.slane %v833_v53, 7 }
  0xc0   : > { %v1102_v44 = vsel %vm7699_vm2, %v1094_v37, %v1101_v30  ;;  %v840_v58 = vrot.slane %v835_v57, 4  ;;  %7436 = vmatpush.bf16.msra.mxu1 %v7050_v38  ;;  %v346_v37 = vsel %vm7708_vm4, 0, %v345_v32  ;;  %v571_v30 = vld [vmem:[%s7743_s14 + $0x8] sm:$0xf] }
  0xc1   : > { %2883 = vmatpush.bf16.msra.mxu0 %v7050_v38  ;;  %347 = vst [vmem:[#allocation2 + $0x18] sm:$0x1] %v346_v37 }
  0xc2   : > { %2624 = vrot.lane.b32.xlu0 %v2553_v46, %s7625_s16  ;;  %1434 = vrot.lane.b32.xlu1 %v1340_v47, %s7623_s11  ;;  %v2565_v46 = vsel %vm1795_vm0, %v2560_v42, %v2564_v43  ;;  %v437_v47 = vld [vmem:[#allocation2 + $0xb0] sm:$0x1]  ;;  %v621_v42 = vshrl.u32 %v571_v30, 16  ;;  %v624_v43 = vshll.u32 %v571_v30, 16  ;;  %v8082_v30 = vld [vmem:[%s7688_s10 + $0x14] sm:$0xf] }
  0xc3   : > { %v1582_v39 = vld [vmem:[#allocation2 + $0xa8] sm:$0xf]  ;;  %v438_v52 = vsel %vm7747_vm6, 0, %v437_v47 }
  0xc4   : > { %1348 = vrot.lane.b32.xlu2 %v1093_v50, %s7623_s11  ;;  %v1583_v45 = vsel %vm7797_vm12, %v1421_v40, %v1582_v39  ;;  %v440_v50 = vld [vmem:[#allocation2 + $0xbc] sm:$0x1]  ;;  %439 = vst [vmem:[#allocation2 + $0xb0] sm:$0x1] %v438_v52  ;;  %v836_v40 = vshll.u32 %v7997_v49, 16 }
  0xc5   : > { %1584 = vst [vmem:[#allocation2 + $0xa8] sm:$0xf] %v1583_v45  ;;  %v441_v3 = vsel %vm7747_vm6, 0, %v440_v50  ;;  %v831_v45 = vrot.slane %v7967_v6, 4  ;;  %v845_v50 = vshll.u32 %v597_v18, 16 }
  0xc6   : > { %442 = vst [vmem:[#allocation2 + $0xbc] sm:$0x1] %v441_v3  ;;  %v8051_v3 = vld [vmem:[%s7743_s14] sm:$0xf] }
  0xc7   : > { %v604_v6 = vshrl.u32 %v8051_v3, 16 }
  0xca   : > { %1432 = vrot.lane.b32.xlu0 %v1331_v4, %s7623_s11  ;;  %1352 = vrot.lane.b32.xlu1 %v1103_v7, %s7623_s11  ;;  %v8013_v4 = vld [vmem:[%s7743_s14 + $0x7c] sm:$0xf]  ;;  %v444_v7 = vsel %vm7747_vm6, 0, %v443_v1 }
  0xcb   : > { %v1021_v60 = vld [vmem:[#allocation2 + $0xb0] sm:$0x1]  ;;  %v867_v9 = vshrl.u32 %v8013_v4, 16  ;;  %445 = vst [vmem:[#allocation2 + $0xc8] sm:$0x1] %v444_v7 }
  0xcc   : > { %1344 = vrot.lane.b32.xlu2 %v1085_v16, %s7623_s11  ;;  %v1022_v61 = vsel %vm7767_vm10, %v840_v58, %v1021_v60  ;;  %v1425_v16 = vpop.permute.xlu1 %1424  ;;  %v933_v58 = vld [vmem:[#allocation2 + $0x18] sm:$0xf]  ;;  %v8057_v60 = vrot.slane %v604_v6, 7 }
  0xcd   : > { %v1028_v14 = vld [vmem:[#allocation2 + $0xbc] sm:$0x1]  ;;  %1023 = vst [vmem:[#allocation2 + $0xb0] sm:$0x1] %v1022_v61  ;;  %v8018_v13 = vrot.slane %v867_v9, 7  ;;  %v8059_v61 = vrot.slane %v612_v56, 7 }
  0xce   : > { %v1029_v28 = vsel %vm7767_vm10, %v857_v59, %v1028_v14  ;;  %v388_v9 = vsel %vm7708_vm4, 0, %v387_v63 }
  0xcf   : > { %1030 = vst [vmem:[#allocation2 + $0xbc] sm:$0x1] %v1029_v28  ;;  %v874_v0 = vrot.slane %v8018_v13, 4  ;;  %v610_v28 = vrot.slane %v8057_v60, 4 }
  0xd0   : > { %389 = vst [vmem:[#allocation2 + $0xc0] sm:$0x1] %v388_v9  ;;  %v8111_v9 = vld [vmem:[%s7688_s10 + $0x1c] sm:$0xf] }
  0xd2   : > { %2754 = vrot.lane.b32.xlu0 %v2720_v26, %s7624_s15  ;;  %1342 = vrot.lane.b32.xlu1 %v1076_v24, %s7623_s11  ;;  %v844_v24 = vrot.slane %v842_v23, 7  ;;  %v855_v26 = vor.u32 %v853_v19, %v852_v54  ;;  %v1035_v29 = vld [vmem:[#allocation2 + $0xc8] sm:$0x1] }
  0xd3   : > { %v1036_v35 = vsel %vm7767_vm10, %v874_v0, %v1035_v29 }
  0xd4   : > { %1354 = vrot.lane.b32.xlu2 %v1110_v31, %s7623_s11  ;;  %v1586_v17 = vld [vmem:[#allocation2 + $0xb0] sm:$0x1]  ;;  %v848_v31 = vrot.slane %v844_v24, 4  ;;  %1037 = vst [vmem:[#allocation2 + $0xc8] sm:$0x1] %v1036_v35  ;;  %v847_v54 = vor.u32 %v845_v50, %v844_v24  ;;  %v870_v50 = vshll.u32 %v8013_v4, 16 }
  0xd5   : > { %v1587_v22 = vsel %vm7835_vm14, %v1425_v16, %v1586_v17  ;;  %v348_v16 = vld [vmem:[#allocation2 + $0x24] sm:$0x1]  ;;  %v573_v17 = vld [vmem:[%s7743_s14 + $0x10] sm:$0xf] }
  0xd6   : > { %1588 = vst [vmem:[#allocation2 + $0xb0] sm:$0x1] %v1587_v22  ;;  %v856_v39 = vsel %vm7699_vm2, %v848_v31, %v855_v26  ;;  %v1593_v1 = vld [vmem:[#allocation2 + $0xbc] sm:$0x1]  ;;  %v349_v18 = vsel %vm7708_vm4, 0, %v348_v16  ;;  %v638_v19 = vshrl.u32 %v573_v17, 16 }
  0xd7   : > { %1027 = vst.msk [vmem:[#allocation2 + $0xb8] sm:$0xf] %vm449_vm7, %v856_v39  ;;  %v599_v22 = vld [vmem:[%s7743_s14 + $0x78] sm:$0xf]  ;;  %v641_v0 = vshll.u32 %v573_v17, 16 }
  0xd8   : > { %350 = vst [vmem:[#allocation2 + $0x24] sm:$0x1] %v349_v18  ;;  %v8076_v23 = vrot.slane %v638_v19, 7  ;;  %v859_v24 = vshrl.u32 %v599_v22, 16  ;;  %v862_v26 = vshll.u32 %v599_v22, 16  ;;  %v607_v19 = vshll.u32 %v8051_v3, 16 }
  0xd9   : > { %v342_v16 = vld [vmem:[#allocation2 + $0xc] sm:$0x1] }
  0xda   : > { %1350 = vrot.lane.b32.xlu0 %v1102_v44, %s7623_s11  ;;  %v8039_v44 = vrot.slane %v621_v42, 7  ;;  %v861_v31 = vrot.slane %v859_v24, 7  ;;  %v643_v37 = vor.u32 %v641_v0, %v8076_v23  ;;  %v343_v18 = vsel %vm7708_vm4, 0, %v342_v16  ;;  %v398_v0 = vld [vmem:[#allocation2 + $0x14] sm:$0x1] }
  0xdb   : > { %v1600_v35 = vld [vmem:[#allocation2 + $0xc8] sm:$0x1]  ;;  %344 = vst [vmem:[#allocation2 + $0xc] sm:$0x1] %v343_v18 }
  0xdc   : > { %2626 = vrot.lane.b32.xlu2 %v2565_v46, %s7625_s16  ;;  %v384_v46 = vld [vmem:[#allocation2 + $0xb4] sm:$0x1]  ;;  %v626_v53 = vor.u32 %v624_v43, %v8039_v44  ;;  %v864_v39 = vor.u32 %v862_v26, %v861_v31  ;;  %v1113_v43 = vshrl.u32 %v8082_v30, 16  ;;  %v865_v56 = vrot.slane %v861_v31, 4 }
  0xdd   : > { %v385_v47 = vsel %vm7708_vm4, 0, %v384_v46 }
  0xde   : > { %386 = vst [vmem:[#allocation2 + $0xb4] sm:$0x1] %v385_v47  ;;  %v934_v59 = vsel %vm7756_vm8, %v626_v53, %v933_v58  ;;  %v8092_v53 = vrot.slane %v1113_v43, 7 }
  0xdf   : > { %935 = vst [vmem:[#allocation2 + $0x18] sm:$0xf] %v934_v59 }
  0xe0   : > { %v1120_v59 = vrot.slane %v8092_v53, 4 }
  0xe2   : > { %1346 = vrot.lane.b32.xlu0 %v1086_v41, %s7623_s11  ;;  %v838_v41 = vor.u32 %v836_v40, %v835_v57  ;;  %v615_v57 = vshll.u32 %v570_v55, 16  ;;  %v1031_v40 = vld [vmem:[#allocation2 + $0xc0] sm:$0xf] }
  0xe3   : > { %v1032_v46 = vsel %vm7756_vm8, %v864_v39, %v1031_v40  ;;  %v7305_v39 = vld [vmem:[#allocation2 + $0xa8] sm:$0xe]  ;;  %v7626_v40 = vmov 0  }
  0xe4   : > { %v839_v52 = vsel %vm7699_vm2, %v831_v45, %v838_v41  ;;  %v617_v62 = vor.u32 %v615_v57, %v8059_v61  ;;  %v940_v41 = vld [vmem:[#allocation2 + $0x24] sm:$0xf]  ;;  %1033 = vst [vmem:[#allocation2 + $0xc0] sm:$0xf] %v1032_v46  ;;  %v872_v57 = vor.u32 %v870_v50, %v8018_v13  ;;  %1358 = vrot.lane.b32.xlu2 %v1120_v59, %s7623_s11  ;;  %v1044_v46 = vld [vmem:[%s7688_s10 + $0x18] sm:$0xf] }
  0xe5   : > { %1020 = vst.msk [vmem:[#allocation2 + $0xac] sm:$0xf] %vm449_vm7, %v839_v52  ;;  %v1024_v14 = vld [vmem:[#allocation2 + $0xb4] sm:$0xf]  ;;  %v941_v47 = vsel %vm7756_vm8, %v643_v37, %v940_v41  ;;  %v401_v52 = vld [vmem:[#allocation2 + $0x20] sm:$0x1]  ;;  %v609_v37 = vor.u32 %v607_v19, %v8057_v60 }
  0xe6   : > { %v1025_v7 = vsel %vm7756_vm8, %v847_v54, %v1024_v14  ;;  %v618_v11 = vsel %vm7699_vm2, %v610_v28, %v617_v62  ;;  %942 = vst [vmem:[#allocation2 + $0x24] sm:$0xf] %v941_v47  ;;  %v402_v55 = vsel %vm7747_vm6, 0, %v401_v52  ;;  %v572_v54 = vld [vmem:[%s7743_s14 + $0xc] sm:$0xf]  ;;  %v873_v62 = vsel %vm7699_vm2, %v865_v56, %v872_v57 }
  0xe7   : > { %1026 = vst [vmem:[#allocation2 + $0xb4] sm:$0xf] %v1025_v7  ;;  %v1498_v4 = vld [vmem:[#allocation2 + $0x18] sm:$0xf]  ;;  %v629_v14 = vshrl.u32 %v572_v54, 16  ;;  %v632_v43 = vshll.u32 %v572_v54, 16 }
  0xe8   : > { %929 = vst.msk [vmem:[#allocation2 + $0x10] sm:$0xf] %vm449_vm7, %v618_v11  ;;  %v627_v41 = vrot.slane %v8039_v44, 4  ;;  %v926_v50 = vld [vmem:[#allocation2 + $0xc] sm:$0xf]  ;;  %v619_v60 = vrot.slane %v8059_v61, 4 }
  0xe9   : > { %403 = vst [vmem:[#allocation2 + $0x20] sm:$0x1] %v402_v55  ;;  %v927_v55 = vsel %vm7756_vm8, %v609_v37, %v926_v50  ;;  %v1125_v19 = vshll.u32 %v1044_v46, 16 }
  0xea   : > { %1034 = vst.msk [vmem:[#allocation2 + $0xc4] sm:$0xf] %vm449_vm7, %v873_v62 }
  0xeb   : > { %328 = vst.msk [vmem:[#allocation2] sm:$0xf] %vm327_vm9, %v7626_v40 }
  0xec   : > { %329 = vst.msk [vmem:[#allocation2 + $0x4] sm:$0xf] %vm327_vm9, %v7626_v40 }
  0xed   : > { %331 = vst.msk [vmem:[#allocation2 + $0x8] sm:$0x1] %vm330_vm3, %v7626_v40  ;;  %v1505_v52 = vld [vmem:[#allocation2 + $0x24] sm:$0xf] }
  0xee   : > { %333 = vst.msk [vmem:[#allocation2 + $0xcc] sm:$0xf] %vm327_vm9, %v7626_v40 }
  0xef   : > { %928 = vst [vmem:[#allocation2 + $0xc] sm:$0xf] %v927_v55  ;;  %v1596_v55 = vld [vmem:[#allocation2 + $0xc0] sm:$0xf] }
  0xf0   : > { %334 = vst.msk [vmem:[#allocation2 + $0xd0] sm:$0xf] %vm327_vm9, %v7626_v40 }
  0xf1   : > { %335 = vst.msk [vmem:[#allocation2 + $0xd4] sm:$0x1] %vm330_vm3, %v7626_v40  ;;  %vm10553_vm3 = vcmask 24576  }
  0xf2   : > { %450 = vst.msk [vmem:[#allocation3] sm:$0xf] %vm449_vm7, %v7626_v40  ;;  %vm10554_vm9 = vmmov %vm10553_vm3 }
  0xf3   : > { %451 = vst.msk [vmem:[#allocation3 + $0x4] sm:$0xf] %vm449_vm7, %v7626_v40 }
  0xf4   : > { %453 = vst.msk [vmem:[#allocation3 + $0x8] sm:$0x1] %vm10553_vm3, %v7626_v40  ;;  %vm10555_vm3 = vcmask 1043456  }
  0xf5   : > { %455 = vst.msk [vmem:[#allocation3 + $0xcc] sm:$0xf] %vm449_vm7, %v7626_v40 }
  0xf6   : > { %456 = vst.msk [vmem:[#allocation3 + $0xd0] sm:$0xf] %vm449_vm7, %v7626_v40 }
  0xf7   : > { %457 = vst.msk [vmem:[#allocation3 + $0xd4] sm:$0x1] %vm10554_vm9, %v7626_v40  ;;  %vm10556_vm9 = vmmov %vm10555_vm3  ;;  %v9073_v5 = vld [vmem:[#allocation2 + $0xcc] sm:$0xf0] }
  0xfe   : > { %v8028_v33 = vpop.permute.xlu2 %2620 }
 0x106   : > { %v8048_v49 = vpop.permute.xlu2 %2750 }
 0x10e   : > { %v1431_v15 = vpop.permute.xlu2 %1430 }
 0x10f   : > { %v1594_v38 = vsel %vm7835_vm14, %v1431_v15, %v1593_v1  ;;  %v631_v1 = vrot.slane %v629_v14, 7  ;;  %v2263_v15 = vld [vmem:[#allocation2 + $0xb0] sm:$0x1] }
 0x110   : > { %1595 = vst [vmem:[#allocation2 + $0xbc] sm:$0x1] %v1594_v38  ;;  %v937_v38 = vld [vmem:[#allocation2 + $0x20] sm:$0x1] }
 0x111   : > { %v636_v11 = vrot.slane %v631_v1, 4  ;;  %v634_v47 = vor.u32 %v632_v43, %v631_v1 }
 0x112   : > { %v2747_v29 = vpop.permute.xlu1 %2746 }
 0x113   : > { %v938_v22 = vsel %vm7767_vm10, %v636_v11, %v937_v38  ;;  %v635_v61 = vsel %vm7699_vm2, %v627_v41, %v634_v47 }
 0x114   : > { %v8078_v32 = vpop.permute.xlu0 %2748  ;;  %939 = vst [vmem:[#allocation2 + $0x20] sm:$0x1] %v938_v22  ;;  %v395_v22 = vld [vmem:[#allocation2 + $0x8] sm:$0x1] }
 0x115   : > { %936 = vst.msk [vmem:[#allocation2 + $0x1c] sm:$0xf] %vm449_vm7, %v635_v61  ;;  %v8205_v61 = vld [vmem:[%s7688_s10 + $0x24] sm:$0xf] }
 0x116   : > { %v1437_v42 = vpop.permute.xlu2 %1436 }
 0x117   : > { %v1601_v45 = vsel %vm7835_vm14, %v1437_v42, %v1600_v35  ;;  %v399_v35 = vsel %vm7747_vm6, 0, %v398_v0 }
 0x118   : > { %1602 = vst [vmem:[#allocation2 + $0xc8] sm:$0x1] %v1601_v45  ;;  %v1589_v45 = vld [vmem:[#allocation2 + $0xb4] sm:$0xf] }
 0x119   : > { %400 = vst [vmem:[#allocation2 + $0x14] sm:$0x1] %v399_v35  ;;  %v2264_v35 = vld [vmem:[#allocation2 + $0xbc] sm:$0x1] }
 0x11a   : > { %v1429_v6 = vpop.permute.xlu1 %1428  ;;  %v2392_v50 = vunpack.c.l.b16 %v2264_v35 }
 0x11b   : > { %1592 = vst.msk [vmem:[#allocation2 + $0xb8] sm:$0xf] %vm1486_vm11, %v1429_v6  ;;  %v2781_v6 = vsel %vm2149_vm13, %v7861_v10, %v8028_v33 }
 0x11c   : > { %v2619_v58 = vpop.permute.xlu0 %2618  ;;  %v2813_v62 = vsel %vm2182_vm1, %v2781_v6, %v8078_v32  ;;  %v2408_v6 = vpack.c.b16 %v2392_v50, %v2392_v50 }
 0x11d   : > { %v2779_v28 = vsel %vm2149_vm13, %v7870_v36, %v2619_v58  ;;  %v1130_v36 = vshrl.u32 %v8111_v9, 16 }
 0x11e   : > { %v1349_v63 = vpop.permute.xlu2 %1348  ;;  %v2811_v13 = vsel %vm2182_vm1, %v2779_v28, %v2747_v29  ;;  %v2391_v29 = vunpack.c.l.b16 %v2263_v15  ;;  %v1122_v28 = vshrl.u32 %v1044_v46, 16 }
 0x11f   : > { %v1499_v7 = vsel %vm7797_vm12, %v1349_v63, %v1498_v4  ;;  %6929 = vmatmul.msk.bf16.vlgmr.msra.gmra.mxu1 %vm2839_vm5, %v2811_v13  ;;  %v8114_v17 = vrot.slane %v1130_v36, 7  ;;  %v339_v36 = vld [vmem:[#allocation2] sm:$0x1] }
 0x120   : > { %1500 = vst [vmem:[#allocation2 + $0x18] sm:$0xf] %v1499_v7  ;;  %v2407_v42 = vpack.c.b16 %v2391_v29, %v2391_v29  ;;  %v930_v10 = vld [vmem:[#allocation2 + $0x14] sm:$0x1]  ;;  %v340_v16 = vsel %vm7708_vm4, 0, %v339_v36  ;;  %v8169_v18 = vrot.slane %v1122_v28, 7 }
 0x121   : > { %v1137_v31 = vrot.slane %v8114_v17, 4  ;;  %v931_v7 = vsel %vm7767_vm10, %v619_v60, %v930_v10  ;;  %v1046_v29 = vld [vmem:[%s7688_s10 + $0x20] sm:$0xf]  ;;  %341 = vst [vmem:[#allocation2] sm:$0x1] %v340_v16 }
 0x122   : > { %v2574_v58 = vshll.u32 %v2407_v42, 16  ;;  %v2722_v14 = vrot.slane %v2407_v42, 1  ;;  %932 = vst [vmem:[#allocation2 + $0x14] sm:$0x1] %v931_v7  ;;  %v1139_v43 = vshrl.u32 %v1046_v29, 16  ;;  %v1142_v60 = vshll.u32 %v1046_v29, 16 }
 0x123   : > { %1364 = vrot.lane.b32.xlu2 %v1137_v31, %s7623_s11  ;;  %v396_v31 = vsel %vm7747_vm6, 0, %v395_v22  ;;  %v7571_v46 = vld [vmem:[#allocation2 + $0xb4] sm:$0xf0]  ;;  %v1488_v36 = vld [vmem:[#allocation2 + $0xc] sm:$0xf] }
 0x124   : > { %v8121_v24 = vpop.permute.xlu1 %2752  ;;  %v1423_v26 = vpop.permute.xlu0 %1422  ;;  %v2576_v15 = vrot.slane %v2574_v58, 1  ;;  %397 = vst [vmem:[#allocation2 + $0x8] sm:$0x1] %v396_v31 }
 0x125   : > { %1585 = vst.msk [vmem:[#allocation2 + $0xac] sm:$0xf] %vm1486_vm11, %v1423_v26  ;;  %v1116_v26 = vshll.u32 %v8082_v30, 16  ;;  %v1127_v30 = vor.u32 %v1125_v19, %v8169_v18 }
 0x126   : > { %v1345_v3 = vpop.permute.xlu2 %1344 }
 0x127   : > { %1492 = vst.msk [vmem:[#allocation2 + $0x10] sm:$0xf] %vm1486_vm11, %v1345_v3  ;;  %v1118_v47 = vor.u32 %v1116_v26, %v8092_v53 }
 0x12b   : > { %v1635_v16 = vld [vmem:[#allocation2 + $0x8] sm:$0x1] }
 0x12c   : > { %v8146_v56 = vpop.permute.xlu1 %2622  ;;  %v1427_v44 = vpop.permute.xlu0 %1426  ;;  %v7304_v57 = vld [vmem:[#allocation2 + $0xa8] sm:$0xf0] }
 0x12d   : > { %v8148_v54 = vld [vmem:[#allocation2 + $0xa8] sm:$0xff]   ;;  %v1590_v4 = vsel %vm7797_vm12, %v1427_v44, %v1589_v45  ;;  %v7306_v59 = vor.u32 %v7305_v39, %v7304_v57  ;;  %v1111_v39 = vrot.slane %v7975_v20, 4  ;;  %v8194_v20 = vrot.slane %v1139_v43, 7  ;;  %v1502_v57 = vld [vmem:[#allocation2 + $0x20] sm:$0x1] }
 0x12e   : > { %1591 = vst [vmem:[#allocation2 + $0xb4] sm:$0xf] %v1590_v4  ;;  %v1355_v33 = vpop.permute.xlu2 %1354  ;;  %v2569_v63 = vshll.u32 %v8148_v54, 16  ;;  %v2567_v11 = vshrl.u32 %v8148_v54, 16  ;;  %v2783_v58 = vsel %vm2149_vm13, %v7901_v27, %v8146_v56  ;;  %v8240_v43 = vld [vmem:[#allocation2] sm:$0xff]  }
 0x12f   : > { %v1506_v13 = vsel %vm7797_vm12, %v1355_v33, %v1505_v52  ;;  %6930 = vmatmul.msk.bf16.gmra.mxu1 %vm2839_vm5, %v2813_v62  ;;  %v2721_v1 = vrot.slane %v7306_v59, 1  ;;  %v2265_v52 = vld [vmem:[#allocation2 + $0xc8] sm:$0x1]  ;;  %v1119_v53 = vsel %vm7699_vm2, %v1111_v39, %v1118_v47  ;;  %v1144_v10 = vor.u32 %v1142_v60, %v8194_v20 }
 0x130   : > { %1507 = vst [vmem:[#allocation2 + $0x24] sm:$0xf] %v1506_v13  ;;  %v2571_v32 = vrot.slane %v2569_v63, 1  ;;  %v2815_v56 = vsel %vm2182_vm1, %v2783_v58, %v8048_v49  ;;  %v2725_v62 = vrot.slane %v2408_v6, 1  ;;  %v1147_v63 = vshrl.u32 %v8205_v61, 16 }
 0x131   : > { %v2723_v38 = vsel %vm2068_vm15, %v2721_v1, %v2722_v14  ;;  %v2393_v14 = vunpack.c.l.b16 %v2265_v52  ;;  %v1133_v13 = vshll.u32 %v8111_v9, 16 }
 0x132   : > { %2756 = vrot.lane.b32.xlu0 %v2723_v38, %s7624_s15  ;;  %v2572_v0 = vor.u32 %v2571_v32, %v2567_v11  ;;  %v1149_v7 = vrot.slane %v1147_v63, 7  ;;  %v1128_v38 = vrot.slane %v8169_v18, 4  ;;  %v1763_v18 = vunpack.c.l.b16 %v1635_v16  ;;  %v8266_v63 = vld [vmem:[#allocation2 + $0xc] sm:$0xf0] }
 0x133   : > { %v8221_v40 = vpack.c.b16 %v2393_v14, %v2393_v14  ;;  %v1135_v9 = vor.u32 %v1133_v13, %v8114_v17 }
 0x134   : > { %v2577_v3 = vsel %vm1795_vm0, %v2572_v0, %v2576_v15  ;;  %v8177_v37 = vpop.permute.xlu0 %2624  ;;  %v1435_v42 = vpop.permute.xlu1 %1434  ;;  %v2586_v0 = vshll.u32 %v2408_v6, 16  ;;  %v1154_v26 = vrot.slane %v1149_v7, 4  ;;  %v8249_v6 = vpack.c.b16 %v1763_v18, %v1763_v18 }
 0x135   : > { %2628 = vrot.lane.b32.xlu1 %v2577_v3, %s7625_s16  ;;  %1599 = vst.msk [vmem:[#allocation2 + $0xc4] sm:$0xf] %vm1486_vm11, %v1435_v42  ;;  %v8185_v45 = vld [vmem:[#allocation2 + $0xb4] sm:$0xff]   ;;  %v2598_v32 = vshll.u32 %v8221_v40, 16  ;;  %v2785_v50 = vsel %vm2149_vm13, %v7929_v8, %v8177_v37  ;;  %v2728_v8 = vrot.slane %v8221_v40, 1  ;;  %v1145_v37 = vrot.slane %v8194_v20, 4 }
 0x136   : > { %v7572_v41 = vld [vmem:[#allocation2 + $0xb4] sm:$0xe]  ;;  %v2581_v11 = vshll.u32 %v8185_v45, 16  ;;  %v2579_v35 = vshrl.u32 %v8185_v45, 16  ;;  %v2588_v47 = vrot.slane %v2586_v0, 1 }
 0x137   : > { %v7573_v44 = vor.u32 %v7572_v41, %v7571_v46  ;;  %v2600_v17 = vrot.slane %v2598_v32, 1  ;;  %v1136_v41 = vsel %vm7699_vm2, %v1128_v38, %v1135_v9  ;;  %v8269_v20 = vld [vmem:[%s7688_s10 + $0x2c] sm:$0xf]  ;;  %v1495_v40 = vld [vmem:[#allocation2 + $0x14] sm:$0x1] }
 0x138   : > { %v2583_v3 = vrot.slane %v2581_v11, 1  ;;  %v1164_v38 = vshrl.u32 %v8269_v20, 16 }
 0x139   : > { %v2724_v33 = vrot.slane %v7573_v44, 1  ;;  %v1799_v44 = vshll.u32 %v8240_v43, 16 }
 0x13a   : > { %1360 = vrot.lane.b32.xlu0 %v1127_v30, %s7623_s11 }
 0x13b   : > { %v2726_v1 = vsel %vm2068_vm15, %v2724_v33, %v2725_v62 }
 0x13c   : > { %v1433_v4 = vpop.permute.xlu0 %1432  ;;  %v1353_v59 = vpop.permute.xlu1 %1352  ;;  %v7307_v39 = vld [vmem:[#allocation2 + $0xc0] sm:$0xf0] }
 0x13d   : > { %1356 = vrot.lane.b32.xlu1 %v1119_v53, %s7623_s11  ;;  %v1597_v28 = vsel %vm7797_vm12, %v1433_v4, %v1596_v55  ;;  %v1503_v27 = vsel %vm7835_vm14, %v1353_v59, %v1502_v57  ;;  %v1150_v53 = vshll.u32 %v8205_v61, 16  ;;  %v2584_v55 = vor.u32 %v2583_v3, %v2579_v35  ;;  %v7255_v35 = vld [vmem:[#allocation2] sm:$0xe] }
 0x13e   : > { %1598 = vst [vmem:[#allocation2 + $0xc0] sm:$0xf] %v1597_v28  ;;  %v2817_v61 = vsel %vm2182_vm1, %v2785_v50, %v8121_v24  ;;  %v1797_v28 = vshrl.u32 %v8240_v43, 16 }
 0x13f   : > { %6931 = vmatmul.msk.bf16.gmra.mxu1 %vm2839_vm5, %v2815_v56  ;;  %1504 = vst [vmem:[#allocation2 + $0x20] sm:$0x1] %v1503_v27  ;;  %v1152_v14 = vor.u32 %v1150_v53, %v1149_v7  ;;  %v1801_v27 = vrot.slane %v1799_v44, 1  ;;  %v1804_v56 = vshll.u32 %v8249_v6, 16 }
 0x141   : > { %v1153_v13 = vsel %vm7699_vm2, %v1145_v37, %v1152_v14  ;;  %v1802_v7 = vor.u32 %v1801_v27, %v1797_v28 }
 0x142   : > { %1366 = vrot.lane.b32.xlu0 %v1144_v10, %s7623_s11  ;;  %v2589_v10 = vsel %vm1795_vm0, %v2584_v55, %v2588_v47  ;;  %v2627_v47 = vpop.permute.xlu2 %2626 }
 0x144   : > { %v8227_v49 = vpop.permute.xlu0 %2754  ;;  %v1343_v15 = vpop.permute.xlu1 %1342 }
 0x145   : > { %2758 = vrot.lane.b32.xlu1 %v2726_v1, %s7624_s15  ;;  %v8233_v19 = vld [vmem:[#allocation2 + $0xc0] sm:$0xff]   ;;  %v1489_v22 = vsel %vm7797_vm12, %v1343_v15, %v1488_v36  ;;  %v7318_v1 = vld [vmem:[#allocation2 + $0x18] sm:$0xe]  ;;  %v1806_v36 = vrot.slane %v1804_v56, 1  ;;  %v1167_v56 = vshll.u32 %v8269_v20, 16 }
 0x146   : > { %v2591_v29 = vshrl.u32 %v8233_v19, 16  ;;  %v2593_v31 = vshll.u32 %v8233_v19, 16  ;;  %1490 = vst [vmem:[#allocation2 + $0xc] sm:$0xf] %v1489_v22  ;;  %v7308_v42 = vld [vmem:[#allocation2 + $0xc0] sm:$0xe] }
 0x147   : > { %v3131_v46 = vld [vmem:[#allocation2 + $0x20] sm:$0x1]  ;;  %v7309_v52 = vor.u32 %v7308_v42, %v7307_v39  ;;  %v1807_v3 = vsel %vm1795_vm0, %v1802_v7, %v1806_v36 }
 0x148   : > { %v2595_v30 = vrot.slane %v2593_v31, 1  ;;  %v3259_v57 = vunpack.c.l.b16 %v3131_v46  ;;  %v1166_v46 = vrot.slane %v1164_v38, 7 }
 0x149   : > { %v2727_v59 = vrot.slane %v7309_v52, 1 }
 0x14a   : > { %1370 = vrot.lane.b32.xlu0 %v1154_v26, %s7623_s11  ;;  %v2596_v60 = vor.u32 %v2595_v30, %v2591_v29  ;;  %v3275_v33 = vpack.c.b16 %v3259_v57, %v3259_v57  ;;  %v7254_v29 = vld [vmem:[#allocation2] sm:$0xf0]  ;;  %v1169_v36 = vor.u32 %v1167_v56, %v1166_v46 }
 0x14b   : > { %v2729_v24 = vsel %vm2068_vm15, %v2727_v59, %v2728_v8 }
 0x14c   : > { %v1351_v58 = vpop.permute.xlu0 %1350  ;;  %v2601_v4 = vsel %vm1795_vm0, %v2596_v60, %v2600_v17  ;;  %v3299_v11 = vshll.u32 %v3275_v33, 16  ;;  %v3564_v31 = vrot.slane %v3275_v33, 1  ;;  %v8287_v17 = vld [vmem:[#allocation2 + $0xc] sm:$0xf0]  ;;  %v7256_v60 = vor.u32 %v7255_v35, %v7254_v29  ;;  %v1051_v29 = vld [vmem:[%s7688_s10 + $0x34] sm:$0xf] }
 0x14d   : > { %1362 = vrot.lane.b32.xlu1 %v1136_v41, %s7623_s11  ;;  %1501 = vst.msk [vmem:[#allocation2 + $0x1c] sm:$0xf] %vm1486_vm11, %v1351_v58  ;;  %2632 = vrot.lane.b32.xlu2 %v2601_v4, %s7625_s16  ;;  %v8264_v62 = vld [vmem:[#allocation2 + $0xc] sm:$0xff]   ;;  %v1048_v41 = vld [vmem:[%s7688_s10 + $0x28] sm:$0xf]  ;;  %v2787_v58 = vsel %vm2149_vm13, %v7957_v51, %v2627_v47  ;;  %v1171_v4 = vrot.slane %v1166_v46, 4 }
 0x14e   : > { %v3301_v42 = vrot.slane %v3299_v11, 1  ;;  %v8285_v30 = vld [vmem:[#allocation2 + $0xc] sm:$0xff]   ;;  %v2413_v53 = vshll.u32 %v8264_v62, 16  ;;  %v1156_v57 = vshrl.u32 %v1048_v41, 16  ;;  %v2819_v8 = vsel %vm2182_vm1, %v2787_v58, %v8227_v49  ;;  %v8328_v46 = vld [vmem:[%s7743_s14 + $0x14] sm:$0xf] }
 0x14f   : > { %6932 = vmatmul.msk.bf16.gmra.mxu1 %vm2839_vm5, %v2817_v61  ;;  %v7472_v55 = vld [vmem:[#allocation2 + $0xc] sm:$0xe]  ;;  %v2069_v37 = vrot.slane %v7256_v60, 1  ;;  %v2070_v61 = vrot.slane %v8249_v6, 1  ;;  %v1809_v38 = vshrl.u32 %v8285_v30, 16  ;;  %v1184_v58 = vshll.u32 %v1051_v29, 16 }
 0x150   : > { %v2415_v27 = vrot.slane %v2413_v53, 1  ;;  %v1158_v51 = vrot.slane %v1156_v57, 7  ;;  %v7473_v49 = vor.u32 %v7472_v55, %v8266_v63  ;;  %v646_v53 = vshrl.u32 %v8328_v46, 16 }
 0x152   : > { %2630 = vrot.lane.b32.xlu0 %v2589_v10, %s7625_s16  ;;  %v2411_v10 = vshrl.u32 %v8264_v62, 16  ;;  %v1162_v7 = vrot.slane %v1158_v51, 4  ;;  %v2682_v20 = vrot.slane %v7473_v49, 1 }
 0x154   : > { %v1347_v32 = vpop.permute.xlu0 %1346  ;;  %v8275_v15 = vld [vmem:[#allocation2 + $0x18] sm:$0xff]   ;;  %v2416_v6 = vor.u32 %v2415_v27, %v2411_v10  ;;  %v1637_v27 = vld [vmem:[#allocation2 + $0x20] sm:$0x1] }
 0x155   : > { %v7317_v16 = vld [vmem:[#allocation2 + $0x18] sm:$0xf0]  ;;  %2760 = vrot.lane.b32.xlu1 %v2729_v24, %s7624_s15  ;;  %v1496_v9 = vsel %vm7835_vm14, %v1347_v32, %v1495_v40  ;;  %1368 = vrot.lane.b32.xlu2 %v1153_v13, %s7623_s11  ;;  %v3292_v22 = vshrl.u32 %v8275_v15, 16  ;;  %v3294_v0 = vshll.u32 %v8275_v15, 16  ;;  %v2071_v40 = vsel %vm2068_vm15, %v2069_v37, %v2070_v61  ;;  %v7287_v10 = vld [vmem:[#allocation2 + $0x18] sm:$0xe] }
 0x156   : > { %v7319_v26 = vor.u32 %v7318_v1, %v7317_v16  ;;  %1497 = vst [vmem:[#allocation2 + $0x14] sm:$0x1] %v1496_v9  ;;  %v1811_v1 = vshll.u32 %v8285_v30, 16  ;;  %v1765_v49 = vunpack.c.l.b16 %v1637_v27 }
 0x157   : > { %v3296_v39 = vrot.slane %v3294_v0, 1 }
 0x158   : > { %v3563_v18 = vrot.slane %v7319_v26, 1  ;;  %v1813_v9 = vrot.slane %v1811_v1, 1  ;;  %v8321_v26 = vld [vmem:[%s7688_s10 + $0x30] sm:$0xf] }
 0x159   : > { %v8290_v50 = vor.u32 %v3296_v39, %v3292_v22  ;;  %v1170_v22 = vsel %vm7699_vm2, %v1162_v7, %v1169_v36  ;;  %v1173_v39 = vshrl.u32 %v8321_v26, 16  ;;  %v1359_v7 = vpop.permute.xlu2 %1358 }
 0x15a   : > { %1988 = vrot.lane.b32.xlu0 %v1807_v3, %s7625_s16  ;;  %v3565_v52 = vsel %vm2068_vm15, %v3563_v18, %v3564_v31  ;;  %v1159_v31 = vshll.u32 %v1048_v41, 16  ;;  %v1814_v3 = vor.u32 %v1813_v9, %v1809_v38  ;;  %v404_v18 = vld [vmem:[#allocation2 + $0x2c] sm:$0x1]  ;;  %v648_v41 = vrot.slane %v646_v53, 7 }
 0x15b   : > { %v3302_v44 = vsel %vm1795_vm0, %v8290_v50, %v3301_v42  ;;  %v1181_v42 = vshrl.u32 %v1051_v29, 16 }
 0x15c   : > { %v1161_v60 = vor.u32 %v1159_v31, %v1158_v51 }
 0x15d   : > { %3483 = vrot.lane.b32.xlu1 %v3302_v44, %s7625_s16  ;;  %3611 = vrot.lane.b32.xlu2 %v3565_v52, %s7624_s15  ;;  %v2250_v59 = vld [vmem:[#allocation2 + $0x14] sm:$0x1]  ;;  %v405_v52 = vsel %vm7747_vm6, 0, %v404_v18  ;;  %v8335_v44 = vrot.slane %v1173_v39, 7  ;;  %v8337_v57 = vrot.slane %v1181_v42, 7 }
 0x15e   : > { %v1636_v14 = vld [vmem:[#allocation2 + $0x14] sm:$0x1]  ;;  %v2378_v28 = vunpack.c.l.b16 %v2250_v59  ;;  %406 = vst [vmem:[#allocation2 + $0x2c] sm:$0x1] %v405_v52 }
 0x15f   : > { %6933 = vmatmul.msk.bf16.gmra.mxu1 %vm2839_vm5, %v2819_v8  ;;  %v1764_v33 = vunpack.c.l.b16 %v1636_v14  ;;  %v653_v8 = vrot.slane %v648_v41, 4  ;;  %v1179_v37 = vrot.slane %v8335_v44, 4  ;;  %v1186_v61 = vor.u32 %v1184_v58, %v8337_v57 }
 0x160   : > { %v2394_v24 = vpack.c.b16 %v2378_v28, %v2378_v28  ;;  %v7286_v28 = vld [vmem:[#allocation2 + $0x18] sm:$0xf0]  ;;  %v649_v58 = vshll.u32 %v8328_v46, 16 }
 0x161   : > { %v8311_v11 = vpack.c.b16 %v1764_v33, %v1764_v33  ;;  %v1187_v56 = vsel %vm7699_vm2, %v1179_v37, %v1186_v61  ;;  %v1053_v61 = vld [vmem:[%s7688_s10 + $0x3c] sm:$0xf] }
 0x162   : > { %1376 = vrot.lane.b32.xlu0 %v1171_v4, %s7623_s11  ;;  %v2418_v13 = vshll.u32 %v2394_v24, 16  ;;  %v2683_v16 = vrot.slane %v2394_v24, 1  ;;  %v2251_v4 = vld [vmem:[#allocation2 + $0x20] sm:$0x1]  ;;  %v7288_v24 = vor.u32 %v7287_v10, %v7286_v28  ;;  %v1198_v28 = vshrl.u32 %v1053_v61, 16 }
 0x163   : > { %v1816_v0 = vshll.u32 %v8311_v11, 16  ;;  %v2379_v59 = vunpack.c.l.b16 %v2251_v4  ;;  %v575_v4 = vld [vmem:[%s7743_s14 + $0x18] sm:$0xf] }
 0x164   : > { %v2420_v32 = vrot.slane %v2418_v13, 1  ;;  %v2684_v35 = vsel %vm2068_vm15, %v2682_v20, %v2683_v16  ;;  %v8348_v13 = vpack.c.b16 %v1765_v49, %v1765_v49  ;;  %v8351_v20 = vld [vmem:[%s7743_s14 + $0x1c] sm:$0xf]  ;;  %v655_v37 = vshrl.u32 %v575_v4, 16 }
 0x165   : > { %2117 = vrot.lane.b32.xlu1 %v2071_v40, %s7624_s15  ;;  %v1818_v47 = vrot.slane %v1816_v0, 1  ;;  %v944_v14 = vld [vmem:[#allocation2 + $0x2c] sm:$0x1]  ;;  %v2395_v33 = vpack.c.b16 %v2379_v59, %v2379_v59  ;;  %v2685_v40 = vrot.slane %v7288_v24, 1  ;;  %v663_v38 = vshrl.u32 %v8351_v20, 16 }
 0x166   : > { %v2421_v63 = vsel %vm1795_vm0, %v2416_v6, %v2420_v32  ;;  %v945_v51 = vsel %vm7767_vm10, %v653_v8, %v944_v14  ;;  %v407_v32 = vld [vmem:[#allocation2 + $0x38] sm:$0x1]  ;;  %v1828_v0 = vshll.u32 %v8348_v13, 16  ;;  %v651_v8 = vor.u32 %v649_v58, %v648_v41  ;;  %v577_v41 = vld [vmem:[%s7743_s14 + $0x20] sm:$0xf] }
 0x167   : > { %2602 = vrot.lane.b32.xlu2 %v2421_v63, %s7625_s16  ;;  %v1819_v55 = vsel %vm1795_vm0, %v1814_v3, %v1818_v47  ;;  %946 = vst [vmem:[#allocation2 + $0x2c] sm:$0x1] %v945_v51  ;;  %v2686_v6 = vrot.slane %v2395_v33, 1  ;;  %v2430_v1 = vshll.u32 %v2395_v33, 16  ;;  %v408_v16 = vsel %vm7747_vm6, 0, %v407_v32 }
 0x168   : > { %409 = vst [vmem:[#allocation2 + $0x38] sm:$0x1] %v408_v16  ;;  %v8360_v29 = vrot.slane %v663_v38, 7  ;;  %v1830_v3 = vrot.slane %v1828_v0, 1  ;;  %v658_v59 = vshll.u32 %v575_v4, 16  ;;  %v657_v27 = vrot.slane %v655_v37, 7 }
 0x169   : > { %v2432_v9 = vrot.slane %v2430_v1, 1  ;;  %v578_v51 = vld [vmem:[%s7743_s14 + $0x24] sm:$0xf]  ;;  %v672_v33 = vshrl.u32 %v577_v41, 16  ;;  %v354_v32 = vld [vmem:[#allocation2 + $0x3c] sm:$0x1] }
 0x16a   : > { %1374 = vrot.lane.b32.xlu0 %v1170_v22, %s7623_s11  ;;  %v2687_v22 = vsel %vm2068_vm15, %v2685_v40, %v2686_v6  ;;  %v670_v39 = vrot.slane %v8360_v29, 4  ;;  %v1831_v52 = vsel %vm1795_vm0, %v8290_v50, %v1830_v3  ;;  %v680_v24 = vshrl.u32 %v578_v51, 16 }
 0x16b   : > { %v8364_v31 = vsel %vm1795_vm0, %v8290_v50, %v2432_v9  ;;  %v660_v49 = vor.u32 %v658_v59, %v657_v27  ;;  %v683_v40 = vshll.u32 %v578_v51, 16  ;;  %v674_v1 = vrot.slane %v672_v33, 7  ;;  %v413_v33 = vld [vmem:[#allocation2 + $0x50] sm:$0x1] }
 0x16c   : > { %v355_v0 = vsel %vm7708_vm4, 0, %v354_v32  ;;  %v1201_v3 = vshll.u32 %v1053_v61, 16 }
 0x16d   : > { %2730 = vrot.lane.b32.xlu1 %v2684_v35, %s7624_s15  ;;  %v7475_v35 = vld [vmem:[#allocation2 + $0xc] sm:$0xe]  ;;  %v678_v38 = vrot.slane %v674_v1, 4  ;;  %356 = vst [vmem:[#allocation2 + $0x3c] sm:$0x1] %v355_v0 }
 0x16e   : > { %v1509_v36 = vld [vmem:[#allocation2 + $0x2c] sm:$0x1]  ;;  %v7476_v42 = vor.u32 %v7475_v35, %v8287_v17  ;;  %v351_v17 = vld [vmem:[#allocation2 + $0x30] sm:$0x1] }
 0x16f   : > { %1372 = vrot.lane.b32.xlu2 %v1161_v60, %s7623_s11  ;;  %v1510_v63 = vsel %vm7835_vm14, %v1359_v7, %v1509_v36  ;;  %v951_v18 = vld [vmem:[#allocation2 + $0x38] sm:$0x1]  ;;  %v2073_v60 = vrot.slane %v8311_v11, 1  ;;  %v644_v11 = vrot.slane %v8076_v23, 4  ;;  %v352_v50 = vsel %vm7708_vm4, 0, %v351_v17 }
 0x170   : > { %1511 = vst [vmem:[#allocation2 + $0x2c] sm:$0x1] %v1510_v63  ;;  %v2072_v47 = vrot.slane %v7476_v42, 1  ;;  %v952_v53 = vsel %vm7767_vm10, %v670_v39, %v951_v18  ;;  %v682_v7 = vrot.slane %v680_v24, 7  ;;  %v8392_v36 = vld [vmem:[%s7688_s10 + $0x38] sm:$0xf] }
 0x171   : > { %953 = vst [vmem:[#allocation2 + $0x38] sm:$0x1] %v952_v53  ;;  %v652_v14 = vsel %vm7699_vm2, %v644_v11, %v651_v8  ;;  %v1190_v63 = vshrl.u32 %v8392_v36, 16  ;;  %v666_v53 = vshll.u32 %v8351_v20, 16  ;;  %v661_v17 = vrot.slane %v657_v27, 4 }
 0x172   : > { %1990 = vrot.lane.b32.xlu0 %v1819_v55, %s7625_s16  ;;  %v8375_v55 = vsel %vm2068_vm15, %v2072_v47, %v2073_v60  ;;  %353 = vst [vmem:[#allocation2 + $0x30] sm:$0x1] %v352_v50  ;;  %v685_v9 = vor.u32 %v683_v40, %v682_v7  ;;  %v675_v47 = vshll.u32 %v577_v41, 16  ;;  %v687_v50 = vrot.slane %v682_v7, 4  ;;  %v580_v7 = vld [vmem:[%s7743_s14 + $0x2c] sm:$0xf] }
 0x173   : > { %943 = vst.msk [vmem:[#allocation2 + $0x28] sm:$0xf] %vm449_vm7, %v652_v14  ;;  %v8400_v35 = vrot.slane %v1190_v63, 7  ;;  %v668_v4 = vor.u32 %v666_v53, %v8360_v29  ;;  %v6959_v29 = vld [vmem:[%s10529_s2 + $0x20] sm:$0xf]  ;;  %v414_v40 = vsel %vm7747_vm6, 0, %v413_v33 }
 0x174   : > { %v686_v39 = vsel %vm7699_vm2, %v678_v38, %v685_v9  ;;  %v677_v11 = vor.u32 %v675_v47, %v674_v1  ;;  %v954_v37 = vld [vmem:[#allocation2 + $0x3c] sm:$0xf]  ;;  %415 = vst [vmem:[#allocation2 + $0x50] sm:$0x1] %v414_v40  ;;  %v357_v1 = vld [vmem:[#allocation2 + $0x48] sm:$0x1] }
 0x175   : > { %957 = vst.msk [vmem:[#allocation2 + $0x40] sm:$0xf] %vm449_vm7, %v686_v39  ;;  %v1196_v42 = vrot.slane %v8400_v35, 4  ;;  %v669_v8 = vsel %vm7699_vm2, %v661_v17, %v668_v4  ;;  %v358_v32 = vsel %vm7708_vm4, 0, %v357_v1  ;;  %v697_v38 = vshrl.u32 %v580_v7, 16 }
 0x176   : > { %950 = vst.msk [vmem:[#allocation2 + $0x34] sm:$0xf] %vm449_vm7, %v669_v8  ;;  %v955_v20 = vsel %vm7756_vm8, %v677_v11, %v954_v37  ;;  %v7478_v53 = vld [vmem:[#allocation2 + $0x24] sm:$0xe] }
 0x177   : > { %956 = vst [vmem:[#allocation2 + $0x3c] sm:$0xf] %v955_v20  ;;  %v1638_v9 = vld [vmem:[#allocation2 + $0x2c] sm:$0x1] }
 0x178   : > { %v1516_v46 = vld [vmem:[#allocation2 + $0x38] sm:$0x1]  ;;  %359 = vst [vmem:[#allocation2 + $0x48] sm:$0x1] %v358_v32 }
 0x179   : > { %v947_v16 = vld [vmem:[#allocation2 + $0x30] sm:$0xf] }
 0x17a   : > { %1380 = vrot.lane.b32.xlu0 %v1187_v56, %s7623_s11  ;;  %v1200_v56 = vrot.slane %v1198_v28, 7 }
 0x17c   : > { %v1205_v6 = vrot.slane %v1200_v56, 4  ;;  %v1203_v18 = vor.u32 %v1201_v3, %v1200_v56  ;;  %v699_v3 = vrot.slane %v697_v38, 7 }
 0x17d   : > { %v1365_v10 = vpop.permute.xlu2 %1364 }
 0x17e   : > { %v1517_v23 = vsel %vm7835_vm14, %v1365_v10, %v1516_v46  ;;  %v1204_v60 = vsel %vm7699_vm2, %v1196_v42, %v1203_v18  ;;  %v3716_v46 = vunpack.c.l.b16 %v6959_v29  ;;  %v1519_v42 = vld [vmem:[#allocation2 + $0x3c] sm:$0xf]  ;;  %v1766_v18 = vunpack.c.l.b16 %v1638_v9 }
 0x17f   : > { %1518 = vst [vmem:[#allocation2 + $0x38] sm:$0x1] %v1517_v23  ;;  %v704_v47 = vrot.slane %v699_v3, 4  ;;  %v961_v37 = vld [vmem:[#allocation2 + $0x48] sm:$0xf] }
 0x180   : > { %v3718_v41 = vpack.c.b16 %v3716_v46, %v3716_v46 }
 0x182   : > { %2732 = vrot.lane.b32.xlu0 %v2687_v22, %s7624_s15  ;;  %v948_v22 = vsel %vm7756_vm8, %v660_v49, %v947_v16  ;;  %v3753_v56 = vsel %vm10555_vm3, %v3718_v41, 0  ;;  %v3132_v49 = vld [vmem:[#allocation2 + $0x2c] sm:$0x1] }
 0x183   : > { %949 = vst [vmem:[#allocation2 + $0x30] sm:$0xf] %v948_v22  ;;  %3761 = vmatpush.bf16.msra.mxu2 %v3753_v56  ;;  %v579_v22 = vld [vmem:[%s7743_s14 + $0x28] sm:$0xf]  ;;  %v3260_v0 = vunpack.c.l.b16 %v3132_v49 }
 0x184   : > { %v689_v39 = vshrl.u32 %v579_v22, 16  ;;  %v692_v17 = vshll.u32 %v579_v22, 16 }
 0x185   : > { %v3276_v11 = vpack.c.b16 %v3260_v0, %v3260_v0 }
 0x186   : > { %v1639_v1 = vld [vmem:[#allocation2 + $0x38] sm:$0x1] }
 0x187   : > { %v3311_v29 = vshll.u32 %v3276_v11, 16 }
 0x18a   : > { %1992 = vrot.lane.b32.xlu0 %v1831_v52, %s7625_s16  ;;  %v410_v52 = vld [vmem:[#allocation2 + $0x44] sm:$0x1]  ;;  %v1512_v51 = vld [vmem:[#allocation2 + $0x30] sm:$0xf] }
 0x18b   : > { %v411_v58 = vsel %vm7747_vm6, 0, %v410_v52 }
 0x18c   : > { %412 = vst [vmem:[#allocation2 + $0x44] sm:$0x1] %v411_v58  ;;  %v965_v58 = vld [vmem:[#allocation2 + $0x50] sm:$0x1] }
 0x18d   : > { %v966_v8 = vsel %vm7767_vm10, %v704_v47, %v965_v58 }
 0x18e   : > { %967 = vst [vmem:[#allocation2 + $0x50] sm:$0x1] %v966_v8 }
 0x192   : > { %1388 = vrot.lane.b32.xlu0 %v1205_v6, %s7623_s11  ;;  %v7051_v6 = vld [vmem:[%s10529_s2 + $0x18] sm:$0xff] }
 0x193   : > { %v958_v61 = vld [vmem:[#allocation2 + $0x44] sm:$0x1]  ;;  %3762 = vmatpush.bf16.msra.mxu2 %v7051_v6  ;;  %v3313_v6 = vrot.slane %v3311_v29, 1  ;;  %v1176_v29 = vshll.u32 %v8321_v26, 16 }
 0x194   : > { %v959_v14 = vsel %vm7767_vm10, %v687_v50, %v958_v61  ;;  %v7049_v26 = vld [vmem:[%s10529_s2] sm:$0xff] }
 0x195   : > { %960 = vst [vmem:[#allocation2 + $0x44] sm:$0x1] %v959_v14 }
 0x19a   : > { %1386 = vrot.lane.b32.xlu0 %v1204_v60, %s7623_s11  ;;  %v691_v60 = vrot.slane %v689_v39, 7 }
 0x19c   : > { %v694_v50 = vor.u32 %v692_v17, %v691_v60  ;;  %v695_v38 = vrot.slane %v691_v60, 4 }
 0x19e   : > { %v962_v41 = vsel %vm7756_vm8, %v694_v50, %v961_v37  ;;  %v3133_v50 = vld [vmem:[#allocation2 + $0x38] sm:$0x1] }
 0x19f   : > { %963 = vst [vmem:[#allocation2 + $0x48] sm:$0xf] %v962_v41  ;;  %v2252_v41 = vld [vmem:[#allocation2 + $0x2c] sm:$0x1] }
 0x1a4   : > { %v2757_v59 = vpop.permute.xlu0 %2756 }
 0x1a7   : > { %v2629_v28 = vpop.permute.xlu1 %2628  ;;  %v8423_v10 = vpop.permute.xlu2 %2632 }
 0x1a8   : > { %v2789_v27 = vsel %vm2149_vm13, %v8148_v54, %v2629_v28 }
 0x1a9   : > { %v2821_v23 = vsel %vm2182_vm1, %v2789_v27, %v2757_v59  ;;  %v8457_v27 = vpack.c.b16 %v1766_v18, %v1766_v18 }
 0x1aa   : > { %6934 = vmatmul.msk.bf16.gmra.mxu1 %vm2839_vm5, %v2821_v23  ;;  %v3567_v23 = vrot.slane %v3276_v11, 1 }
 0x1ab   : > { %v1840_v33 = vshll.u32 %v8457_v27, 16 }
 0x1ac   : > { %v1361_v24 = vpop.permute.xlu0 %1360 }
 0x1ad   : > { %v1513_v54 = vsel %vm7797_vm12, %v1361_v24, %v1512_v51  ;;  %v1523_v51 = vld [vmem:[#allocation2 + $0x44] sm:$0x1]  ;;  %v700_v24 = vshll.u32 %v580_v7, 16  ;;  %v1842_v39 = vrot.slane %v1840_v33, 1 }
 0x1ae   : > { %1514 = vst [vmem:[#allocation2 + $0x30] sm:$0xf] %v1513_v54 }
 0x1af   : > { %v1357_v63 = vpop.permute.xlu1 %1356  ;;  %v1369_v16 = vpop.permute.xlu2 %1368  ;;  %v702_v9 = vor.u32 %v700_v24, %v699_v3  ;;  %v2217_v3 = vld [vmem:[%s10529_s2 + $0x8] sm:$0xf] }
 0x1b0   : > { %1508 = vst.msk [vmem:[#allocation2 + $0x28] sm:$0xf] %vm1486_vm11, %v1357_v63  ;;  %v2970_v17 = vunpack.c.l.b16 %v2217_v3 }
 0x1b1   : > { %1522 = vst.msk [vmem:[#allocation2 + $0x40] sm:$0xf] %vm1486_vm11, %v1369_v16  ;;  %v2253_v16 = vld [vmem:[#allocation2 + $0x38] sm:$0x1] }
 0x1b2   : > { %v2381_v58 = vunpack.c.l.b16 %v2253_v16  ;;  %v2972_v37 = vpack.c.b16 %v2970_v17, %v2970_v17 }
 0x1b4   : > { %v1367_v52 = vpop.permute.xlu0 %1366 }
 0x1b5   : > { %v1520_v4 = vsel %vm7797_vm12, %v1367_v52, %v1519_v42  ;;  %v1767_v52 = vunpack.c.l.b16 %v1639_v1 }
 0x1b6   : > { %1521 = vst [vmem:[#allocation2 + $0x3c] sm:$0xf] %v1520_v4 }
 0x1b7   : > { %v8447_v20 = vpop.permute.xlu1 %2758  ;;  %v8449_v61 = vpop.permute.xlu2 %3611  ;;  %v8451_v59 = vld [vmem:[#allocation2 + $0x24] sm:$0xff]  }
 0x1b8   : > { %v7477_v14 = vld [vmem:[#allocation2 + $0x24] sm:$0xf0]  ;;  %v3306_v54 = vshll.u32 %v8451_v59, 16  ;;  %v3304_v0 = vshrl.u32 %v8451_v59, 16 }
 0x1b9   : > { %v8453_v28 = vld [vmem:[#allocation2 + $0x24] sm:$0xff]   ;;  %v7479_v56 = vor.u32 %v7478_v53, %v7477_v14  ;;  %v703_v53 = vsel %vm7699_vm2, %v695_v38, %v702_v9 }
 0x1ba   : > { %v8455_v46 = vld [vmem:[#allocation2 + $0x24] sm:$0xf0]  ;;  %v1835_v63 = vshll.u32 %v8453_v28, 16  ;;  %v3308_v7 = vrot.slane %v3306_v54, 1  ;;  %v1833_v18 = vshrl.u32 %v8453_v28, 16 }
 0x1bb   : > { %v3566_v40 = vrot.slane %v7479_v56, 1  ;;  %964 = vst.msk [vmem:[#allocation2 + $0x4c] sm:$0xf] %vm449_vm7, %v703_v53  ;;  %v8486_v56 = vpack.c.b16 %v2381_v58, %v2381_v58  ;;  %v8488_v33 = vld [vmem:[#allocation2 + $0x24] sm:$0xff]   ;;  %v7290_v54 = vld [vmem:[#allocation2 + $0x30] sm:$0xe] }
 0x1bc   : > { %v1371_v49 = vpop.permute.xlu0 %1370  ;;  %v1837_v47 = vrot.slane %v1835_v63, 1  ;;  %v3309_v60 = vor.u32 %v3308_v7, %v3304_v0  ;;  %v8490_v24 = vld [vmem:[#allocation2 + $0x24] sm:$0xf0] }
 0x1bd   : > { %v1524_v32 = vsel %vm7835_vm14, %v1371_v49, %v1523_v51  ;;  %v3568_v22 = vsel %vm2068_vm15, %v3566_v40, %v3567_v23  ;;  %v8483_v23 = vpack.c.b16 %v1767_v52, %v1767_v52  ;;  %v3007_v49 = vsel %vm10556_vm9, %v2972_v37, 0  ;;  %v7574_v52 = vld [vmem:[#allocation2 + $0x3c] sm:$0xf0] }
 0x1be   : > { %1525 = vst [vmem:[#allocation2 + $0x44] sm:$0x1] %v1524_v32  ;;  %3613 = vrot.lane.b32.xlu2 %v3568_v22, %s7624_s15  ;;  %v1838_v11 = vor.u32 %v1837_v47, %v1833_v18  ;;  %v3314_v8 = vsel %vm1795_vm0, %v3309_v60, %v3313_v6  ;;  %v3261_v6 = vunpack.c.l.b16 %v3133_v50  ;;  %3015 = vmatpush.bf16.msrb.mxu1 %v3007_v49  ;;  %v2380_v32 = vunpack.c.l.b16 %v2252_v41  ;;  %v1526_v22 = vld [vmem:[#allocation2 + $0x48] sm:$0xf]  ;;  %v8512_v47 = vld [vmem:[#allocation2 + $0x3c] sm:$0xff]  }
 0x1bf   : > { %v1363_v42 = vpop.permute.xlu1 %1362  ;;  %3485 = vrot.lane.b32.xlu1 %v3314_v8, %s7625_s16  ;;  %v1852_v9 = vshll.u32 %v8483_v23, 16  ;;  %v2692_v7 = vrot.slane %v8486_v56, 1 }
 0x1c0   : > { %1515 = vst.msk [vmem:[#allocation2 + $0x34] sm:$0xf] %vm1486_vm11, %v1363_v42  ;;  %v1843_v14 = vsel %vm1795_vm0, %v1838_v11, %v1842_v39  ;;  %v7321_v39 = vld [vmem:[#allocation2 + $0x30] sm:$0xe]  ;;  %v1188_v42 = vrot.slane %v8337_v57, 4  ;;  %v8517_v11 = vld [vmem:[#allocation2 + $0x3c] sm:$0xff]   ;;  %v8522_v37 = vpack.c.b16 %v2380_v32, %v2380_v32 }
 0x1c1   : > { %v8476_v4 = vpop.permute.xlu2 %2602  ;;  %1994 = vrot.lane.b32.xlu0 %v1843_v14, %s7625_s16  ;;  %v8519_v57 = vld [vmem:[#allocation2 + $0x3c] sm:$0xf0]  ;;  %v1854_v8 = vrot.slane %v1852_v9, 1  ;;  %v1193_v14 = vshll.u32 %v8392_v36, 16 }
 0x1c2   : > { %3016 = vmatpush.bf16.msrb.mxu1 %v7049_v26 }
 0x1c4   : > { %v2631_v51 = vpop.permute.xlu0 %2630 }
 0x1c5   : > { %v2791_v40 = vsel %vm2149_vm13, %v8185_v45, %v2631_v51  ;;  %v1178_v45 = vor.u32 %v1176_v29, %v8335_v44  ;;  %v7575_v44 = vld [vmem:[#allocation2 + $0x3c] sm:$0xe]  ;;  %v2254_v50 = vld [vmem:[#allocation2 + $0x44] sm:$0x1] }
 0x1c6   : > { %v2823_v1 = vsel %vm2182_vm1, %v2791_v40, %v8447_v20  ;;  %2119 = vrot.lane.b32.xlu2 %v8375_v55, %s7624_s15  ;;  %v3277_v55 = vpack.c.b16 %v3261_v6, %v3261_v6  ;;  %v8530_v40 = vor.u32 %v1193_v14, %v8400_v35  ;;  %v582_v6 = vld [vmem:[%s7743_s14 + $0x34] sm:$0xf]  ;;  %v1640_v32 = vld [vmem:[#allocation2 + $0x44] sm:$0x1] }
 0x1c7   : > { %v8500_v63 = vpop.permute.xlu1 %2760  ;;  %6935 = vmatmul.msk.bf16.gmra.mxu1 %vm2839_vm5, %v2823_v1  ;;  %v7289_v16 = vld [vmem:[#allocation2 + $0x30] sm:$0xf0]  ;;  %1378 = vrot.lane.b32.xlu1 %v1178_v45, %s7623_s11  ;;  %v2382_v1 = vunpack.c.l.b16 %v2254_v50 }
 0x1c8   : > { %v8506_v38 = vld [vmem:[#allocation2 + $0x30] sm:$0xff]   ;;  %v7291_v0 = vor.u32 %v7290_v54, %v7289_v16  ;;  %v3570_v49 = vrot.slane %v3277_v55, 1  ;;  %v3323_v9 = vshll.u32 %v3277_v55, 16 }
 0x1c9   : > { %v1847_v20 = vshll.u32 %v8506_v38, 16  ;;  %v7320_v18 = vld [vmem:[#allocation2 + $0x30] sm:$0xf0]  ;;  %v1373_v53 = vpop.permute.xlu2 %1372  ;;  %v1845_v60 = vshrl.u32 %v8506_v38, 16  ;;  %v581_v54 = vld [vmem:[%s7743_s14 + $0x30] sm:$0xf] }
 0x1ca   : > { %v2691_v3 = vrot.slane %v7291_v0, 1  ;;  %v1527_v17 = vsel %vm7797_vm12, %v1373_v53, %v1526_v22  ;;  %v7322_v51 = vor.u32 %v7321_v39, %v7320_v18  ;;  %v706_v45 = vshrl.u32 %v581_v54, 16 }
 0x1cb   : > { %v1849_v58 = vrot.slane %v1847_v20, 1  ;;  %1528 = vst [vmem:[#allocation2 + $0x48] sm:$0xf] %v1527_v17  ;;  %v709_v16 = vshll.u32 %v581_v54, 16  ;;  %v2437_v22 = vshll.u32 %v8488_v33, 16  ;;  %v714_v0 = vshrl.u32 %v582_v6, 16  ;;  %v8538_v20 = vpop.f32.mrf.mxu1 }
 0x1cc   : > { %v8525_v29 = vpop.permute.xlu0 %1988  ;;  %v2693_v41 = vsel %vm2068_vm15, %v2691_v3, %v2692_v7  ;;  %v717_v7 = vshll.u32 %v582_v6, 16  ;;  %v3569_v39 = vrot.slane %v7322_v51, 1  ;;  %v7576_v18 = vor.u32 %v7575_v44, %v7574_v52 }
 0x1cd   : > { %2736 = vrot.lane.b32.xlu0 %v2693_v41, %s7624_s15  ;;  %v8534_v26 = vor.u32 %v1849_v58, %v1845_v60  ;;  %v708_v53 = vrot.slane %v706_v45, 7  ;;  %v1768_v60 = vunpack.c.l.b16 %v1640_v32  ;;  %v8544_v58 = vrot.slane %v714_v0, 7 }
 0x1ce   : > { %1382 = vrot.lane.b32.xlu2 %v1188_v42, %s7623_s11  ;;  %v1530_v42 = vld [vmem:[#allocation2 + $0x50] sm:$0x1]  ;;  %v8549_v17 = vpack.c.b16 %v2382_v1, %v2382_v1  ;;  %v3571_v14 = vsel %vm2068_vm15, %v3569_v39, %v3570_v49  ;;  %v3325_v41 = vrot.slane %v3323_v9, 1  ;;  %v2694_v54 = vrot.slane %v7576_v18, 1  ;;  %v7258_v1 = vld [vmem:[#allocation2 + $0x18] sm:$0xe] }
 0x1cf   : > { %v3484_v36 = vpop.permute.xlu1 %3483  ;;  %v1855_v55 = vsel %vm1795_vm0, %v8534_v26, %v1854_v8  ;;  %v8551_v50 = vor.u32 %v709_v16, %v708_v53  ;;  %2604 = vrot.lane.b32.xlu1 %v8364_v31, %s7625_s16  ;;  %v719_v52 = vor.u32 %v717_v7, %v8544_v58  ;;  %v2442_v8 = vshll.u32 %v8522_v37, 16  ;;  %v7257_v31 = vld [vmem:[#allocation2 + $0x18] sm:$0xf0] }
 0x1d0   : > { %v3644_v35 = vsel %vm2149_vm13, %v8275_v15, %v3484_v36  ;;  %v712_v15 = vrot.slane %v708_v53, 4  ;;  %v2439_v6 = vrot.slane %v2437_v22, 1  ;;  %v8569_v49 = vpack.c.b16 %v1768_v60, %v1768_v60  ;;  %v8578_v7 = vld [vmem:[#allocation2 + $0x3c] sm:$0xff]  }
 0x1d1   : > { %v3676_v3 = vsel %vm2182_vm1, %v3644_v35, %v8449_v61  ;;  %v2793_v61 = vsel %vm2149_vm13, %v8233_v19, %v8423_v10  ;;  %v2695_v10 = vrot.slane %v8549_v17, 1  ;;  %v1859_v45 = vshll.u32 %v8517_v11, 16  ;;  %v7483_v35 = vld [vmem:[#allocation2 + $0x3c] sm:$0xf0] }
 0x1d2   : > { %6964 = vmatmul.msk.bf16.vlgmr.msra.gmra.mxu2 %vm2839_vm5, %v3676_v3  ;;  %v720_v32 = vsel %vm7699_vm2, %v712_v15, %v719_v52  ;;  %v2825_v19 = vsel %vm2182_vm1, %v2793_v61, %v8500_v63  ;;  %v2435_v36 = vshrl.u32 %v8488_v33, 16  ;;  %v3326_v9 = vsel %vm1795_vm0, %v8534_v26, %v3325_v41  ;;  %v7481_v52 = vld [vmem:[#allocation2 + $0x24] sm:$0xe]  ;;  %v3134_v61 = vld [vmem:[#allocation2 + $0x44] sm:$0x1] }
 0x1d3   : > { %971 = vst.msk [vmem:[#allocation2 + $0x58] sm:$0xf] %vm449_vm7, %v720_v32  ;;  %v7259_v22 = vor.u32 %v7258_v1, %v7257_v31  ;;  %v2444_v0 = vrot.slane %v2442_v8, 1  ;;  %v8580_v39 = vpop.f32.mrf.mxu1  ;;  %v2696_v18 = vsel %vm2068_vm15, %v2694_v54, %v2695_v10  ;;  %v1857_v53 = vshrl.u32 %v8517_v11, 16 }
 0x1d4   : > { %v1377_v44 = vpop.permute.xlu0 %1376  ;;  %v2440_v63 = vor.u32 %v2439_v6, %v2435_v36  ;;  %v1861_v3 = vrot.slane %v1859_v45, 1  ;;  %v1864_v60 = vshll.u32 %v8569_v49, 16  ;;  %v2076_v15 = vrot.slane %v8348_v13, 1 }
 0x1d5   : > { %v1531_v51 = vsel %vm7835_vm14, %v1377_v44, %v1530_v42  ;;  %1996 = vrot.lane.b32.xlu0 %v1855_v55, %s7625_s16  ;;  %v2075_v55 = vrot.slane %v7259_v22, 1  ;;  %v2763_v6 = vsel %vm2149_vm13, %v8264_v62, %v8476_v4  ;;  %v3262_v13 = vunpack.c.l.b16 %v3134_v61  ;;  %v7293_v62 = vld [vmem:[#allocation2 + $0x48] sm:$0xe] }
 0x1d6   : > { %1532 = vst [vmem:[#allocation2 + $0x50] sm:$0x1] %v1531_v51  ;;  %3615 = vrot.lane.b32.xlu2 %v3571_v14, %s7624_s15  ;;  %v7484_v14 = vld [vmem:[#allocation2 + $0x3c] sm:$0xe]  ;;  %v2445_v41 = vsel %vm1795_vm0, %v2440_v63, %v2444_v0  ;;  %v1862_v8 = vor.u32 %v1861_v3, %v1857_v53  ;;  %v1866_v51 = vrot.slane %v1864_v60, 1  ;;  %v7482_v10 = vor.u32 %v7481_v52, %v8490_v24 }
 0x1d7   : > { %v2118_v16 = vpop.permute.xlu1 %2117  ;;  %6936 = vmatmul.msk.bf16.gmra.mxu1 %vm2839_vm5, %v2825_v19  ;;  %3487 = vrot.lane.b32.xlu1 %v3326_v9, %s7625_s16  ;;  %v2151_v19 = vsel %vm2149_vm13, %v8240_v43, %v8525_v29  ;;  %v2077_v45 = vsel %vm2068_vm15, %v2075_v55, %v2076_v15  ;;  %v3278_v22 = vpack.c.b16 %v3262_v13, %v3262_v13  ;;  %v3330_v24 = vshll.u32 %v8578_v7, 16 }
 0x1d8   : > { %v1867_v36 = vsel %vm1795_vm0, %v1862_v8, %v1866_v51  ;;  %v2184_v0 = vsel %vm2182_vm1, %v2151_v19, %v2118_v16  ;;  %v2688_v3 = vrot.slane %v7482_v10, 1  ;;  %v2689_v60 = vrot.slane %v8522_v37, 1  ;;  %v7490_v19 = vld [vmem:[#allocation2 + $0x24] sm:$0xe] }
 0x1d9   : > { %v3573_v52 = vrot.slane %v3278_v22, 1 }
 0x1da   : > { %v2690_v37 = vsel %vm2068_vm15, %v2688_v3, %v2689_v60  ;;  %v2085_v60 = vrot.slane %v8569_v49, 1  ;;  %v2079_v49 = vrot.slane %v8457_v27, 1 }
 0x1db   : > { %v8605_v63 = vpop.f32.mrf.mxu1 }
 0x1dc   : > { %v1375_v42 = vpop.permute.xlu0 %1374 }
 0x1dd   : > { %1529 = vst.msk [vmem:[#allocation2 + $0x4c] sm:$0xf] %vm1486_vm11, %v1375_v42  ;;  %2738 = vrot.lane.b32.xlu0 %v2696_v18, %s7624_s15  ;;  %v2255_v44 = vld [vmem:[#allocation2 + $0x50] sm:$0x1]  ;;  %v7485_v18 = vor.u32 %v7484_v14, %v7483_v35  ;;  %v3332_v14 = vrot.slane %v3330_v24, 1 }
 0x1de   : > { %v2383_v54 = vunpack.c.l.b16 %v2255_v44  ;;  %2606 = vrot.lane.b32.xlu2 %v2445_v41, %s7625_s16  ;;  %v1641_v1 = vld [vmem:[#allocation2 + $0x50] sm:$0x1]  ;;  %v3328_v44 = vshrl.u32 %v8578_v7, 16  ;;  %v3335_v41 = vshll.u32 %v3278_v22, 16  ;;  %v7324_v24 = vld [vmem:[#allocation2 + $0x48] sm:$0xe] }
 0x1df   : > { %v2731_v31 = vpop.permute.xlu1 %2730  ;;  %v1769_v9 = vunpack.c.l.b16 %v1641_v1  ;;  %2121 = vrot.lane.b32.xlu1 %v2077_v45, %s7624_s15  ;;  %v3572_v61 = vrot.slane %v7485_v18, 1  ;;  %v3135_v10 = vld [vmem:[#allocation2 + $0x50] sm:$0x1] }
 0x1e0   : > { %v2795_v32 = vsel %vm2182_vm1, %v2763_v6, %v2731_v31  ;;  %v8602_v4 = vpack.c.b16 %v2383_v54, %v2383_v54  ;;  %v3333_v13 = vor.u32 %v3332_v14, %v3328_v44  ;;  %v3337_v1 = vrot.slane %v3335_v41, 1 }
 0x1e1   : > { %6921 = vmatmul.msk.bf16.vlgmr.msra.gmra.mxu0 %vm2839_vm5, %v2795_v32  ;;  %v8616_v15 = vpack.c.b16 %v1769_v9, %v1769_v9  ;;  %v3574_v31 = vsel %vm2068_vm15, %v3572_v61, %v3573_v52  ;;  %v7487_v32 = vld [vmem:[#allocation2 + $0x3c] sm:$0xe]  ;;  %v2454_v9 = vshll.u32 %v8486_v56, 16 }
 0x1e2   : > { %v2698_v55 = vrot.slane %v8602_v4, 1  ;;  %v7488_v22 = vor.u32 %v7487_v32, %v8519_v57 }
 0x1e3   : > { %v1876_v6 = vshll.u32 %v8616_v15, 16  ;;  %v8631_v45 = vpop.f32.mrf.mxu1 }
 0x1e4   : > { %v8608_v43 = vpop.permute.xlu0 %1990  ;;  %v7292_v29 = vld [vmem:[#allocation2 + $0x48] sm:$0xf0]  ;;  %v2084_v3 = vrot.slane %v7488_v22, 1  ;;  %v419_v22 = vld [vmem:[#allocation2 + $0x68] sm:$0x1] }
 0x1e5   : > { %v8611_v53 = vld [vmem:[#allocation2 + $0x48] sm:$0xff]   ;;  %1998 = vrot.lane.b32.xlu0 %v1867_v36, %s7625_s16  ;;  %v7294_v42 = vor.u32 %v7293_v62, %v7292_v29  ;;  %v1878_v62 = vrot.slane %v1876_v6, 1  ;;  %v3263_v29 = vunpack.c.l.b16 %v3135_v10 }
 0x1e6   : > { %v1871_v16 = vshll.u32 %v8611_v53, 16  ;;  %1384 = vrot.lane.b32.xlu2 %v8530_v40, %s7623_s11  ;;  %v1869_v51 = vshrl.u32 %v8611_v53, 16  ;;  %v7323_v18 = vld [vmem:[#allocation2 + $0x48] sm:$0xf0]  ;;  %v8645_v56 = vsel %vm2068_vm15, %v2084_v3, %v2085_v60  ;;  %v2082_v3 = vrot.slane %v8483_v23, 1 }
 0x1e7   : > { %6941 = vmatmul.msk.bf16.vlgmr.msrb.gmra.mxu1 %vm2839_vm5, %v2184_v0  ;;  %v2697_v35 = vrot.slane %v7294_v42, 1  ;;  %2734 = vrot.lane.b32.xlu1 %v2690_v37, %s7624_s15  ;;  %v3338_v0 = vsel %vm1795_vm0, %v3333_v13, %v3337_v1  ;;  %v3279_v57 = vpack.c.b16 %v3263_v29, %v3263_v29  ;;  %v7261_v13 = vld [vmem:[#allocation2 + $0x30] sm:$0xe]  ;;  %v420_v29 = vsel %vm7747_vm6, 0, %v419_v22 }
 0x1e8   : > { %v1873_v54 = vrot.slane %v1871_v16, 1  ;;  %v7491_v16 = vor.u32 %v7490_v19, %v8455_v46  ;;  %421 = vst [vmem:[#allocation2 + $0x68] sm:$0x1] %v420_v29  ;;  %v363_v29 = vld [vmem:[#allocation2 + $0x60] sm:$0x1] }
 0x1e9   : > { %v2699_v8 = vsel %vm2068_vm15, %v2697_v35, %v2698_v55  ;;  %v2456_v55 = vrot.slane %v2454_v9, 1  ;;  %v7325_v35 = vor.u32 %v7324_v24, %v7323_v18  ;;  %v3576_v41 = vrot.slane %v3279_v57, 1 }
 0x1ea   : > { %v8633_v36 = vor.u32 %v1873_v54, %v1869_v51  ;;  %v2078_v61 = vrot.slane %v7491_v16, 1  ;;  %v3347_v37 = vshll.u32 %v3279_v57, 16 }
 0x1eb   : > { %v2457_v52 = vsel %vm1795_vm0, %v8534_v26, %v2456_v55  ;;  %v8654_v46 = vpop.f32.mrf.mxu1  ;;  %v3575_v14 = vrot.slane %v7325_v35, 1  ;;  %v2459_v26 = vshrl.u32 %v8512_v47, 16 }
 0x1ec   : > { %v1381_v40 = vpop.permute.xlu0 %1380  ;;  %v1879_v42 = vsel %vm1795_vm0, %v8633_v36, %v1878_v62  ;;  %v2080_v51 = vsel %vm2068_vm15, %v2078_v61, %v2079_v49  ;;  %v3349_v54 = vrot.slane %v3347_v37, 1 }
 0x1ed   : > { %2740 = vrot.lane.b32.xlu0 %v2699_v8, %s7624_s15  ;;  %1536 = vst.msk [vmem:[#allocation2 + $0x58] sm:$0xf] %vm1486_vm11, %v1381_v40  ;;  %v2461_v8 = vshll.u32 %v8512_v47, 16  ;;  %v3577_v27 = vsel %vm2068_vm15, %v3575_v14, %v3576_v41  ;;  %v2466_v40 = vshll.u32 %v8549_v17, 16  ;;  %v721_v41 = vrot.slane %v8544_v58, 4 }
 0x1ee   : > { %3617 = vrot.lane.b32.xlu2 %v3574_v31, %s7624_s15  ;;  %v7260_v31 = vld [vmem:[#allocation2 + $0x30] sm:$0xf0]  ;;  %v3350_v1 = vsel %vm1795_vm0, %v8633_v36, %v3349_v54 }
 0x1ef   : > { %3489 = vrot.lane.b32.xlu1 %v3338_v0, %s7625_s16  ;;  %v2463_v6 = vrot.slane %v2461_v8, 1  ;;  %v2468_v19 = vrot.slane %v2466_v40, 1  ;;  %v7262_v9 = vor.u32 %v7261_v13, %v7260_v31  ;;  %v584_v0 = vld [vmem:[%s7743_s14 + $0x3c] sm:$0xf]  ;;  %v979_v14 = vld [vmem:[#allocation2 + $0x68] sm:$0x1] }
 0x1f0   : > { %v731_v18 = vshrl.u32 %v584_v0, 16  ;;  %v734_v61 = vshll.u32 %v584_v0, 16  ;;  %v360_v13 = vld [vmem:[#allocation2 + $0x54] sm:$0x1] }
 0x1f1   : > { %v2464_v32 = vor.u32 %v2463_v6, %v2459_v26  ;;  %v2081_v24 = vrot.slane %v7262_v9, 1  ;;  %v2478_v6 = vshll.u32 %v8602_v4, 16 }
 0x1f2   : > { %v733_v60 = vrot.slane %v731_v18, 7 }
 0x1f3   : > { %v8667_v62 = vpop.f32.mrf.mxu1  ;;  %v2469_v17 = vsel %vm1795_vm0, %v2464_v32, %v2468_v19  ;;  %v2083_v35 = vsel %vm2068_vm15, %v2081_v24, %v2082_v3  ;;  %v2480_v31 = vrot.slane %v2478_v6, 1  ;;  %v361_v32 = vsel %vm7708_vm4, 0, %v360_v13 }
 0x1f4   : > { %v8651_v44 = vpop.permute.xlu0 %2732  ;;  %v738_v16 = vrot.slane %v733_v60, 4  ;;  %362 = vst [vmem:[#allocation2 + $0x54] sm:$0x1] %v361_v32  ;;  %v2153_v24 = vsel %vm2149_vm13, %v8285_v30, %v8608_v43 }
 0x1f5   : > { %2000 = vrot.lane.b32.xlu0 %v1879_v42, %s7625_s16  ;;  %v416_v42 = vld [vmem:[#allocation2 + $0x5c] sm:$0x1]  ;;  %v8697_v19 = vsel %vm1795_vm0, %v8633_v36, %v2480_v31  ;;  %v364_v36 = vsel %vm7708_vm4, 0, %v363_v29  ;;  %v463_v31 = vld [vmem:[#allocation3 + $0xc] sm:$0x1] }
 0x1f6   : > { %2608 = vrot.lane.b32.xlu2 %v2457_v52, %s7625_s16  ;;  %v417_v55 = vsel %vm7747_vm6, 0, %v416_v42  ;;  %v583_v52 = vld [vmem:[%s7743_s14 + $0x38] sm:$0xf]  ;;  %v980_v37 = vsel %vm7767_vm10, %v738_v16, %v979_v14  ;;  %365 = vst [vmem:[#allocation2 + $0x60] sm:$0x1] %v364_v36  ;;  %v464_v13 = vsel %vm7767_vm10, 0, %v463_v31 }
 0x1f7   : > { %2123 = vrot.lane.b32.xlu1 %v2080_v51, %s7624_s15  ;;  %418 = vst [vmem:[#allocation2 + $0x5c] sm:$0x1] %v417_v55  ;;  %v723_v23 = vshrl.u32 %v583_v52, 16  ;;  %v736_v51 = vor.u32 %v734_v61, %v733_v60  ;;  %v726_v60 = vshll.u32 %v583_v52, 16  ;;  %v7577_v36 = vld [vmem:[#allocation2 + $0x54] sm:$0xf0] }
 0x1f8   : > { %981 = vst [vmem:[#allocation2 + $0x68] sm:$0x1] %v980_v37 }
 0x1f9   : > { %v725_v8 = vrot.slane %v723_v23, 7  ;;  %465 = vst [vmem:[#allocation3 + $0xc] sm:$0x1] %v464_v13 }
 0x1fb   : > { %v8681_v49 = vpop.f32.mrf.mxu1  ;;  %v968_v0 = vld [vmem:[#allocation2 + $0x54] sm:$0xf]  ;;  %v728_v55 = vor.u32 %v726_v60, %v725_v8  ;;  %v7580_v60 = vld [vmem:[#allocation2 + $0x54] sm:$0xf0] }
 0x1fc   : > { %v8665_v10 = vpop.permute.xlu0 %1992 }
 0x1fd   : > { %v975_v16 = vld [vmem:[#allocation2 + $0x60] sm:$0xf] }
 0x1fe   : > { %3619 = vrot.lane.b32.xlu2 %v3577_v27, %s7624_s15  ;;  %v972_v26 = vld [vmem:[#allocation2 + $0x5c] sm:$0x1]  ;;  %v729_v27 = vrot.slane %v725_v8, 4 }
 0x1ff   : > { %3491 = vrot.lane.b32.xlu1 %v3350_v1, %s7625_s16  ;;  %v973_v54 = vsel %vm7767_vm10, %v721_v41, %v972_v26  ;;  %v1544_v1 = vld [vmem:[#allocation2 + $0x68] sm:$0x1] }
 0x200   : > { %974 = vst [vmem:[#allocation2 + $0x5c] sm:$0x1] %v973_v54  ;;  %v737_v40 = vsel %vm7699_vm2, %v729_v27, %v736_v51 }
 0x201   : > { %978 = vst.msk [vmem:[#allocation2 + $0x64] sm:$0xf] %vm449_vm7, %v737_v40 }
 0x203   : > { %v8699_v4 = vpop.f32.mrf.mxu1 }
 0x204   : > { %v1389_v57 = vpop.permute.xlu0 %1388  ;;  %10557 = vst [vmem:[#allocation4_spill] sm:$0xff] %v8699_v4  ;;  %v8879_v4 = vld [vmem:[#allocation2 + $0x84] sm:$0xff]  }
 0x205   : > { %v1545_v9 = vsel %vm7835_vm14, %v1389_v57, %v1544_v1 }
 0x206   : > { %2610 = vrot.lane.b32.xlu2 %v2469_v17, %s7625_s16  ;;  %1546 = vst [vmem:[#allocation2 + $0x68] sm:$0x1] %v1545_v9  ;;  %v969_v17 = vsel %vm7756_vm8, %v8551_v50, %v968_v0  ;;  %v7454_v0 = vld [vmem:[#allocation2 + $0x18] sm:$0xff]  }
 0x207   : > { %2125 = vrot.lane.b32.xlu1 %v2083_v35, %s7624_s15  ;;  %970 = vst [vmem:[#allocation2 + $0x54] sm:$0xf] %v969_v17  ;;  %v1537_v50 = vld [vmem:[#allocation2 + $0x5c] sm:$0x1]  ;;  %v976_v35 = vsel %vm7756_vm8, %v728_v55, %v975_v16  ;;  %v8748_v16 = vld [vmem:[#allocation2 + $0x54] sm:$0xf0] }
 0x208   : > { %977 = vst [vmem:[#allocation2 + $0x60] sm:$0xf] %v976_v35 }
 0x20b   : > { %v8706_v18 = vpop.f32.mrf.mxu1 }
 0x20c   : > { %v1387_v58 = vpop.permute.xlu0 %1386  ;;  %10558 = vst [vmem:[#allocation5_spill] sm:$0xff] %v8706_v18  ;;  %v1645_v18 = vld [vmem:[#allocation2 + $0x80] sm:$0x1] }
 0x20d   : > { %1543 = vst.msk [vmem:[#allocation2 + $0x64] sm:$0xf] %vm1486_vm11, %v1387_v58  ;;  %v3137_v13 = vld [vmem:[#allocation2 + $0x68] sm:$0x1]  ;;  %vm10565_vm11 = vsmask.f32 7938 }
 0x20e   : > { %v1533_v8 = vld [vmem:[#allocation2 + $0x54] sm:$0xf] }
 0x20f   : > { %v1540_v27 = vld [vmem:[#allocation2 + $0x60] sm:$0xf] }
 0x213   : > { %v8717_v61 = vpop.f32.mrf.mxu1 }
 0x214   : > { %10559 = vst [vmem:[#allocation6_spill] sm:$0xff] %v8717_v61 }
 0x218   : > { %v3614_v22 = vpop.permute.xlu2 %3613 }
 0x220   : > { %v2120_v3 = vpop.permute.xlu2 %2119 }
 0x221   : > { %v2186_v42 = vsel %vm2182_vm1, %v2153_v24, %v2120_v3 }
 0x222   : > { %6942 = vmatmul.msk.bf16.gmra.mxu1 %vm2839_vm5, %v2186_v42 }
 0x227   : > { %v8721_v43 = vpop.f32.mrf.mxu1 }
 0x228   : > { %v1383_v57 = vpop.permute.xlu2 %1382  ;;  %10560 = vst [vmem:[#allocation7_spill] sm:$0xff] %v8721_v43 }
 0x229   : > { %v1538_v14 = vsel %vm7835_vm14, %v1383_v57, %v1537_v50 }
 0x22a   : > { %1539 = vst [vmem:[#allocation2 + $0x5c] sm:$0x1] %v1538_v14 }
 0x22f   : > { %v8729_v51 = vpop.f32.mrf.mxu1 }
 0x230   : > { %v3616_v30 = vpop.permute.xlu2 %3615  ;;  %10561 = vst [vmem:[#allocation8_spill] sm:$0xff] %v8729_v51 }
 0x231   : > { %v3486_v52 = vpop.permute.xlu1 %3485  ;;  %v3136_v54 = vld [vmem:[#allocation2 + $0x5c] sm:$0x1] }
 0x232   : > { %v3646_v23 = vsel %vm2149_vm13, %v8451_v59, %v3486_v52  ;;  %v2256_v40 = vld [vmem:[#allocation2 + $0x5c] sm:$0x1]  ;;  %v3264_v58 = vunpack.c.l.b16 %v3136_v54 }
 0x233   : > { %v3678_v41 = vsel %vm2182_vm1, %v3646_v23, %v3614_v22  ;;  %v2384_v32 = vunpack.c.l.b16 %v2256_v40  ;;  %v1642_v22 = vld [vmem:[#allocation2 + $0x5c] sm:$0x1] }
 0x234   : > { %6965 = vmatmul.msk.bf16.gmra.mxu2 %vm2839_vm5, %v3678_v41  ;;  %v3280_v24 = vpack.c.b16 %v3264_v58, %v3264_v58  ;;  %v1770_v35 = vunpack.c.l.b16 %v1642_v22 }
 0x235   : > { %v8751_v57 = vpack.c.b16 %v2384_v32, %v2384_v32 }
 0x236   : > { %v3579_v52 = vrot.slane %v3280_v24, 1  ;;  %v8757_v54 = vpack.c.b16 %v1770_v35, %v1770_v35 }
 0x238   : > { %v8727_v37 = vpop.permute.xlu2 %2606 }
 0x239   : > { %v1379_v48 = vpop.permute.xlu1 %1378 }
 0x23a   : > { %v1534_v26 = vsel %vm7797_vm12, %v1379_v48, %v1533_v8  ;;  %v3359_v48 = vshll.u32 %v3280_v24, 16  ;;  %v2257_v24 = vld [vmem:[#allocation2 + $0x68] sm:$0x1] }
 0x23b   : > { %1535 = vst [vmem:[#allocation2 + $0x54] sm:$0xf] %v1534_v26 }
 0x240   : > { %v1385_v6 = vpop.permute.xlu2 %1384 }
 0x241   : > { %v1541_v59 = vsel %vm7797_vm12, %v1385_v6, %v1540_v27  ;;  %v2605_v9 = vpop.permute.xlu1 %2604  ;;  %v2701_v27 = vrot.slane %v8751_v57, 1  ;;  %vm10566_vm12 = vcmask 24576  }
 0x242   : > { %1542 = vst [vmem:[#allocation2 + $0x60] sm:$0xf] %v1541_v59  ;;  %v2765_v17 = vsel %vm2149_vm13, %v7454_v0, %v2605_v9  ;;  %v8740_v29 = vld [vmem:[#allocation2 + $0x54] sm:$0xff]   ;;  %vm8782_vm14 = vmand %vm10566_vm12, %vm10565_vm11 }
 0x243   : > { %v7578_v2 = vld [vmem:[#allocation2 + $0x54] sm:$0xe]  ;;  %v2797_v42 = vsel %vm2182_vm1, %v2765_v17, %v8651_v44  ;;  %v3354_v8 = vshll.u32 %v8740_v29, 16  ;;  %v3352_v59 = vshrl.u32 %v8740_v29, 16 }
 0x244   : > { %v8737_v1 = vpop.f32.mrf.mxu1  ;;  %v8742_v3 = vld [vmem:[#allocation2 + $0x54] sm:$0xff]   ;;  %6922 = vmatmul.msk.bf16.gmra.mxu0 %vm2839_vm5, %v2797_v42  ;;  %v7579_v14 = vor.u32 %v7578_v2, %v7577_v36  ;;  %v3361_v36 = vrot.slane %v3359_v48, 1  ;;  %v1888_v42 = vshll.u32 %v8757_v54, 16  ;;  %v7295_v48 = vld [vmem:[#allocation2 + $0x60] sm:$0xf0] }
 0x245   : > { %10562 = vst [vmem:[#allocation9_spill] sm:$0xff] %v8737_v1  ;;  %v7581_v55 = vld [vmem:[#allocation2 + $0x54] sm:$0xe]  ;;  %v3356_v58 = vrot.slane %v3354_v8, 1 }
 0x246   : > { %v8746_v50 = vld [vmem:[#allocation2 + $0x54] sm:$0xff]   ;;  %v7582_v23 = vor.u32 %v7581_v55, %v7580_v60  ;;  %v3578_v41 = vrot.slane %v7579_v14, 1  ;;  %v3265_v55 = vunpack.c.l.b16 %v3137_v13  ;;  %v1643_v14 = vld [vmem:[#allocation2 + $0x68] sm:$0x1] }
 0x247   : > { %v1883_v31 = vshll.u32 %v8746_v50, 16  ;;  %v3357_v17 = vor.u32 %v3356_v58, %v3352_v59  ;;  %v1881_v60 = vshrl.u32 %v8746_v50, 16 }
 0x248   : > { %v2700_v44 = vrot.slane %v7582_v23, 1  ;;  %v3580_v40 = vsel %vm2068_vm15, %v3578_v41, %v3579_v52  ;;  %v7326_v23 = vld [vmem:[#allocation2 + $0x60] sm:$0xf0]  ;;  %v3281_v59 = vpack.c.b16 %v3265_v55, %v3265_v55  ;;  %v8797_v55 = vld [vmem:[#allocation2 + $0x6c] sm:$0xf0] }
 0x249   : > { %v3488_v6 = vpop.permute.xlu1 %3487  ;;  %3621 = vrot.lane.b32.xlu2 %v3580_v40, %s7624_s15  ;;  %v1885_v2 = vrot.slane %v1883_v31, 1  ;;  %v3362_v35 = vsel %vm1795_vm0, %v3357_v17, %v3361_v36  ;;  %v7327_v41 = vld [vmem:[#allocation2 + $0x60] sm:$0xe]  ;;  %v1890_v40 = vrot.slane %v1888_v42, 1  ;;  %v8795_v42 = vld [vmem:[#allocation2 + $0x6c] sm:$0xff]  }
 0x24a   : > { %v3648_v32 = vsel %vm2149_vm13, %v8506_v38, %v3488_v6  ;;  %v2702_v9 = vsel %vm2068_vm15, %v2700_v44, %v2701_v27  ;;  %3493 = vrot.lane.b32.xlu1 %v3362_v35, %s7625_s16  ;;  %v8773_v8 = vld [vmem:[#allocation2 + $0x60] sm:$0xff]   ;;  %v2155_v27 = vsel %vm2149_vm13, %v7454_v0, %v8665_v10  ;;  %v7328_v31 = vor.u32 %v7327_v41, %v7326_v23 }
 0x24b   : > { %2742 = vrot.lane.b32.xlu0 %v2702_v9, %s7624_s15  ;;  %v3680_v22 = vsel %vm2182_vm1, %v3648_v32, %v3616_v30  ;;  %v1886_v52 = vor.u32 %v1885_v2, %v1881_v60  ;;  %v2385_v30 = vunpack.c.l.b16 %v2257_v24  ;;  %v7296_v44 = vld [vmem:[#allocation2 + $0x60] sm:$0xe]  ;;  %v3366_v13 = vshll.u32 %v8773_v8, 16  ;;  %v518_v60 = vld [vmem:[#allocation3 + $0x14] sm:$0x1] }
 0x24c   : > { %v8754_v26 = vpop.f32.mrf.mxu1  ;;  %6966 = vmatmul.msk.bf16.gmra.mxu2 %vm2839_vm5, %v3680_v22  ;;  %v1771_v32 = vunpack.c.l.b16 %v1643_v14  ;;  %v7297_v17 = vor.u32 %v7296_v44, %v7295_v48  ;;  %v3582_v36 = vrot.slane %v3281_v59, 1  ;;  %v3364_v2 = vshrl.u32 %v8773_v8, 16 }
 0x24d   : > { %10563 = vst [vmem:[#allocation10_spill] sm:$0xff] %v8754_v26  ;;  %v1891_v10 = vsel %vm1795_vm0, %v1886_v52, %v1890_v40  ;;  %v8790_v22 = vpack.c.b16 %v2385_v30, %v2385_v30  ;;  %v3371_v24 = vshll.u32 %v3281_v59, 16  ;;  %v3581_v35 = vrot.slane %v7328_v31, 1  ;;  %v3138_v40 = vld [vmem:[#allocation2 + $0x74] sm:$0x1] }
 0x24e   : > { %v3368_v14 = vrot.slane %v3366_v13, 1  ;;  %v2485_v52 = vshll.u32 %v8742_v3, 16  ;;  %v519_v23 = vsel %vm8782_vm14, 0, %v518_v60  ;;  %v2703_v41 = vrot.slane %v7297_v17, 1  ;;  %v7493_v59 = vld [vmem:[#allocation2 + $0x6c] sm:$0xe] }
 0x24f   : > { %v2704_v30 = vrot.slane %v8790_v22, 1  ;;  %v8807_v48 = vpack.c.b16 %v1771_v32, %v1771_v32  ;;  %520 = vst [vmem:[#allocation3 + $0x14] sm:$0x1] %v519_v23  ;;  %v2767_v44 = vsel %vm2149_vm13, %v8488_v33, %v8727_v37  ;;  %v3583_v31 = vsel %vm2068_vm15, %v3581_v35, %v3582_v36  ;;  %v7584_v17 = vld [vmem:[#allocation2 + $0x84] sm:$0xe] }
 0x250   : > { %v8815_v13 = vor.u32 %v3368_v14, %v3364_v2  ;;  %v7263_v37 = vld [vmem:[#allocation2 + $0x48] sm:$0xf0]  ;;  %v7264_v23 = vld [vmem:[#allocation2 + $0x48] sm:$0xe]  ;;  %v2483_v36 = vshrl.u32 %v8742_v3, 16  ;;  %v2490_v2 = vshll.u32 %v8751_v57, 16 }
 0x251   : > { %v2122_v58 = vpop.permute.xlu1 %2121  ;;  %2612 = vrot.lane.b32.xlu2 %v8697_v19, %s7625_s16  ;;  %v8799_v19 = vpop.permute.xlu2 %3617  ;;  %v2705_v32 = vsel %vm2068_vm15, %v2703_v41, %v2704_v30  ;;  %v1900_v33 = vshll.u32 %v8807_v48, 16  ;;  %v8825_v35 = vld [vmem:[#allocation2 + $0x84] sm:$0xff]   ;;  %v3141_v26 = vld [vmem:[#allocation2 + $0x98] sm:$0x1] }
 0x252   : > { %v2188_v0 = vsel %vm2182_vm1, %v2155_v27, %v2122_v58  ;;  %2127 = vrot.lane.b32.xlu1 %v8645_v56, %s7624_s15  ;;  %v3373_v56 = vrot.slane %v3371_v24, 1  ;;  %v3266_v24 = vunpack.c.l.b16 %v3138_v40  ;;  %v7583_v14 = vld [vmem:[#allocation2 + $0x84] sm:$0xf0]  ;;  %v1995_v41 = vpop.permute.xlu0 %1994  ;;  %v3378_v40 = vshll.u32 %v8795_v42, 16 }
 0x253   : > { %2002 = vrot.lane.b32.xlu0 %v1891_v10, %s7625_s16  ;;  %6943 = vmatmul.msk.bf16.gmra.mxu1 %vm2839_vm5, %v2188_v0  ;;  %v2487_v10 = vrot.slane %v2485_v52, 1  ;;  %v3140_v0 = vld [vmem:[#allocation2 + $0x8c] sm:$0x1]  ;;  %v7585_v43 = vor.u32 %v7584_v17, %v7583_v14  ;;  %v3269_v14 = vunpack.c.l.b16 %v3141_v26 }
 0x254   : > { %v8777_v6 = vpop.f32.mrf.mxu1  ;;  %v3268_v52 = vunpack.c.l.b16 %v3140_v0  ;;  %v3374_v30 = vsel %vm1795_vm0, %v8815_v13, %v3373_v56  ;;  %v3282_v57 = vpack.c.b16 %v3266_v24, %v3266_v24  ;;  %v8834_v56 = vld [vmem:[#allocation2 + $0x78] sm:$0xff]  }
 0x255   : > { %10564 = vst [vmem:[#allocation11_spill] sm:$0xff] %v8777_v6  ;;  %v2492_v6 = vrot.slane %v2490_v2, 1  ;;  %v3764_v1 = vpop.f32.mrf.mxu2 }
 0x256   : > { %v8832_v51 = vpack.c.b16 %v3268_v52, %v3268_v52  ;;  %v3139_v52 = vld [vmem:[#allocation2 + $0x80] sm:$0x1]  ;;  %v3585_v26 = vrot.slane %v3282_v57, 1 }
 0x259   : > { %v2735_v58 = vpop.permute.xlu1 %2734  ;;  %3623 = vrot.lane.b32.xlu2 %v3583_v31, %s7624_s15 }
 0x25a   : > { %v2799_v60 = vsel %vm2182_vm1, %v2767_v44, %v2735_v58  ;;  %v2488_v44 = vor.u32 %v2487_v10, %v2483_v36  ;;  %v7265_v58 = vor.u32 %v7264_v23, %v7263_v37  ;;  %3495 = vrot.lane.b32.xlu1 %v3374_v30, %s7625_s16  ;;  %v2088_v23 = vrot.slane %v8616_v15, 1  ;;  %v8843_v36 = vld [vmem:[#allocation2 + $0x78] sm:$0xf0]  ;;  %v8850_v30 = vld [vmem:[#allocation2 + $0x78] sm:$0xe] }
 0x25b   : > { %2744 = vrot.lane.b32.xlu0 %v2705_v32, %s7624_s15  ;;  %6923 = vmatmul.msk.bf16.gmra.mxu0 %vm2839_vm5, %v2799_v60  ;;  %v1902_v32 = vrot.slane %v1900_v33, 1  ;;  %v7494_v60 = vor.u32 %v7493_v59, %v8797_v55  ;;  %v8839_v33 = vld [vmem:[%s10530_s3] ss:$0 sm:$0xff] }
 0x25c   : > { %v8812_v27 = vpop.f32.mrf.mxu1  ;;  %v2493_v59 = vsel %vm1795_vm0, %v2488_v44, %v2492_v6  ;;  %v2087_v37 = vrot.slane %v7265_v58, 1  ;;  %v8855_v15 = vld [vmem:[%s10531_s4] ss:$0 sm:$0xff]  ;;  %v3380_v6 = vrot.slane %v3378_v40, 1  ;;  %v3383_v44 = vshll.u32 %v3282_v57, 16  ;;  %v7314_v58 = vld [vmem:[#allocation2 + $0x90] sm:$0xff]  }
 0x25d   : > { %10569 = vst [vmem:[#allocation12_spill] sm:$0xff] %v8812_v27  ;;  %v2609_v27 = vpop.permute.xlu2 %2608  ;;  %v1903_v17 = vsel %vm1795_vm0, %v8815_v13, %v1902_v32  ;;  %v3584_v24 = vrot.slane %v7494_v60, 1  ;;  %v3590_v32 = vrot.slane %v7585_v43, 1  ;;  %v3591_v60 = vrot.slane %v8832_v51, 1 }
 0x25e   : > { %v2885_v31 = vpop.f32.mrf.mxu0  ;;  %v8870_v57 = vpack.c.b16 %v3269_v14, %v3269_v14  ;;  %v3414_v43 = vshll.u32 %v7314_v58, 16 }
 0x25f   : > { %v3586_v40 = vsel %vm2068_vm15, %v3584_v24, %v3585_v26  ;;  %v3412_v24 = vshrl.u32 %v7314_v58, 16 }
 0x260   : > { %v3419_v58 = vshll.u32 %v8870_v57, 16 }
 0x261   : > { %v3490_v55 = vpop.permute.xlu1 %3489  ;;  %2614 = vrot.lane.b32.xlu2 %v2493_v59, %s7625_s16  ;;  %v3376_v59 = vshrl.u32 %v8795_v42, 16 }
 0x262   : > { %v3650_v2 = vsel %vm2149_vm13, %v8578_v7, %v3490_v55  ;;  %v2089_v55 = vsel %vm2068_vm15, %v2087_v37, %v2088_v23  ;;  %v3385_v23 = vrot.slane %v3383_v44, 1  ;;  %v3416_v44 = vrot.slane %v3414_v43, 1 }
 0x263   : > { %2004 = vrot.lane.b32.xlu0 %v1903_v17, %s7625_s16  ;;  %v3682_v7 = vsel %vm2182_vm1, %v3650_v2, %v8799_v19  ;;  %v7331_v19 = vor.u32 %v8850_v30, %v8843_v36  ;;  %2129 = vrot.lane.b32.xlu1 %v2089_v55, %s7624_s15  ;;  %v7496_v2 = vld [vmem:[#allocation2 + $0x54] sm:$0xe]  ;;  %v3267_v17 = vunpack.c.l.b16 %v3139_v52  ;;  %v3381_v37 = vor.u32 %v3380_v6, %v3376_v59  ;;  %v3766_v6 = vpop.f32.mrf.mxu2 }
 0x264   : > { %v3018_v0 = vpop.f32.mrf.mxu1  ;;  %6967 = vmatmul.msk.bf16.gmra.mxu2 %vm2839_vm5, %v3682_v7  ;;  %v2769_v7 = vsel %vm2149_vm13, %v8506_v38, %v2609_v27  ;;  %v3592_v55 = vsel %vm2068_vm15, %v3590_v32, %v3591_v60  ;;  %v2502_v52 = vshll.u32 %v8790_v22, 16  ;;  %v8881_v38 = vld [vmem:[#allocation2 + $0x84] sm:$0xf0] }
 0x265   : > { %v3019_v10 = vadd.f32 %v3018_v0, %v2885_v31  ;;  %v2737_v0 = vpop.permute.xlu0 %2736  ;;  %v3620_v27 = vpop.permute.xlu2 %3619  ;;  %v3283_v22 = vpack.c.b16 %v3267_v17, %v3267_v17  ;;  %v3386_v59 = vsel %vm1795_vm0, %v3381_v37, %v3385_v23  ;;  %v3421_v17 = vrot.slane %v3419_v58, 1 }
 0x266   : > { %v2887_v36 = vpop.f32.mrf.mxu0  ;;  %v2504_v43 = vrot.slane %v2502_v52, 1 }
 0x267   : > { %v3844_v31 = vadd.f32 %v3764_v1, %v3019_v10  ;;  %v2157_v1 = vsel %vm2149_vm13, %v8453_v28, %v1995_v41  ;;  %v2801_v28 = vsel %vm2182_vm1, %v2769_v7, %v2737_v0  ;;  %v7270_v0 = vld [vmem:[#allocation2 + $0x78] sm:$0xe]  ;;  %v1773_v7 = vunpack.c.l.b16 %v1645_v18 }
 0x269   : > { %v3880_v10 = vmul.f32 %v8839_v33, %v3844_v31  ;;  %v2124_v61 = vpop.permute.xlu1 %2123  ;;  %3625 = vrot.lane.b32.xlu2 %v3586_v40, %s7624_s15  ;;  %v7269_v40 = vld [vmem:[#allocation2 + $0x78] sm:$0xf0] }
 0x26a   : > { %v2190_v41 = vsel %vm2182_vm1, %v2157_v1, %v2124_v61  ;;  %v7271_v18 = vor.u32 %v7270_v0, %v7269_v40 }
 0x26b   : > { %v3916_v31 = vadd.f32 %v8855_v15, %v3880_v10  ;;  %3629 = vrot.lane.b32.xlu0 %v3592_v55, %s7624_s15  ;;  %6924 = vmatmul.msk.bf16.gmra.mxu0 %vm2839_vm5, %v2801_v28  ;;  %v3388_v10 = vshrl.u32 %v8834_v56, 16  ;;  %v3587_v55 = vrot.slane %v7331_v19, 1  ;;  %v3588_v28 = vrot.slane %v3283_v22, 1 }
 0x26c   : > { %v3020_v30 = vpop.f32.mrf.mxu1  ;;  %6944 = vmatmul.msk.bf16.gmra.mxu1 %vm2839_vm5, %v2190_v41  ;;  %3497 = vrot.lane.b32.xlu1 %v3386_v59, %s7625_s16  ;;  %v8900_v41 = vpack.c.b16 %v1773_v7, %v1773_v7  ;;  %v3402_v59 = vshll.u32 %v8825_v35, 16  ;;  %v2091_v7 = vrot.slane %v8757_v54, 1 }
 0x26d   : > { %v3948_v14 = vmax.f32 %v3916_v31, 0.0  ;;  %v3021_v26 = vadd.f32 %v3020_v30, %v2887_v36  ;;  %v7497_v31 = vor.u32 %v7496_v2, %v8748_v16  ;;  %v1646_v36 = vld [vmem:[#allocation2 + $0x8c] sm:$0x1]  ;;  %v8895_v30 = vor.u32 %v3416_v44, %v3412_v24 }
 0x26e   : > { %v1774_v52 = vunpack.c.l.b16 %v1646_v36  ;;  %v2505_v24 = vsel %vm1795_vm0, %v8815_v13, %v2504_v43  ;;  %v10570_v43 = vshll.u32 %v8834_v56, 16  ;;  %v3589_v54 = vsel %vm2068_vm15, %v3587_v55, %v3588_v28  ;;  %v7455_v28 = vld [vmem:[#allocation2 + $0x30] sm:$0xff]  }
 0x26f   : > { %v3980_v32 = vpack.c.bf16 %v3948_v14, %v3948_v14  ;;  %v3845_v60 = vadd.f32 %v3766_v6, %v3021_v26  ;;  %v1997_v14 = vpop.permute.xlu0 %1996  ;;  %v4333_v6 = vld [vmem:[#allocation3 + $0xc] sm:$0xf]  ;;  %v2090_v19 = vrot.slane %v7497_v31, 1  ;;  %v3422_v58 = vsel %vm1795_vm0, %v8895_v30, %v3421_v17 }
 0x270   : > { %v3392_v31 = vrot.slane %v10570_v43, 1  ;;  %v8923_v36 = vpack.c.b16 %v1774_v52, %v1774_v52  ;;  %v1931_v17 = vshll.u32 %v8879_v4, 16 }
 0x271   : > { %v4013_v61 = vshrl.u32 %v3980_v32, 16  ;;  %v3881_v1 = vmul.f32 %v8839_v33, %v3845_v60  ;;  %v4016_v37 = vshll.u32 %v3980_v32, 16  ;;  %v3492_v60 = vpop.permute.xlu1 %3491  ;;  %2616 = vrot.lane.b32.xlu2 %v2505_v24, %s7625_s16  ;;  %v3395_v32 = vshll.u32 %v3283_v22, 16  ;;  %v4337_v24 = vld [vmem:[#allocation3 + $0x14] sm:$0x1] }
 0x272   : > { %v3652_v44 = vsel %vm2149_vm13, %v8611_v53, %v3492_v60  ;;  %v8918_v53 = vld [vmem:[#allocation2 + $0x6c] sm:$0xf0]  ;;  %v2099_v22 = vrot.slane %v7271_v18, 1  ;;  %v3404_v60 = vrot.slane %v3402_v59, 1  ;;  %v1936_v55 = vshll.u32 %v8923_v36, 16 }
 0x273   : > { %v8897_v26 = vrot.slane %v4013_v61, 7  ;;  %v3917_v23 = vadd.f32 %v8855_v15, %v3881_v1  ;;  %3503 = vrot.lane.b32.xlu0 %v3422_v58, %s7625_s16  ;;  %v3684_v13 = vsel %vm2182_vm1, %v3652_v44, %v3620_v27  ;;  %v8916_v61 = vld [vmem:[#allocation2 + $0x6c] sm:$0xff]   ;;  %v2611_v1 = vpop.permute.xlu2 %2610  ;;  %v2092_v27 = vsel %vm2068_vm15, %v2090_v19, %v2091_v7 }
 0x274   : > { %6968 = vmatmul.msk.bf16.gmra.mxu2 %vm2839_vm5, %v3684_v13  ;;  %2131 = vrot.lane.b32.xlu1 %v2092_v27, %s7624_s15  ;;  %v2771_v18 = vsel %vm2149_vm13, %v8512_v47, %v2611_v1  ;;  %v3407_v44 = vshll.u32 %v8832_v51, 16  ;;  %v1929_v19 = vshrl.u32 %v8879_v4, 16  ;;  %v1933_v58 = vrot.slane %v1931_v17, 1  ;;  %v7266_v17 = vld [vmem:[#allocation2 + $0x60] sm:$0xf0] }
 0x275   : > { %v4018_v16 = vor.u32 %v4016_v37, %v8897_v26  ;;  %v3949_v2 = vmax.f32 %v3917_v23, 0.0  ;;  %v2100_v23 = vrot.slane %v8900_v41, 1  ;;  %v4019_v13 = vrot.slane %v8897_v26, 4  ;;  %v7499_v27 = vld [vmem:[#allocation2 + $0x6c] sm:$0xe] }
 0x276   : > { %v8944_v1 = vor.u32 %v3392_v31, %v3388_v10  ;;  %v1644_v31 = vld [vmem:[#allocation2 + $0x74] sm:$0x1] }
 0x277   : > { %v4334_v40 = vsel %vm7756_vm8, %v4018_v16, %v4333_v6  ;;  %v3981_v0 = vpack.c.bf16 %v3949_v2, %v3949_v2  ;;  %v3397_v6 = vrot.slane %v3395_v32, 1  ;;  %v3400_v16 = vshrl.u32 %v8825_v35, 16  ;;  %v2739_v32 = vpop.permute.xlu0 %2738 }
 0x278   : > { %4335 = vst [vmem:[#allocation3 + $0xc] sm:$0xf] %v4334_v40  ;;  %v2159_v40 = vsel %vm2149_vm13, %v7455_v28, %v1997_v14  ;;  %v2101_v51 = vsel %vm2068_vm15, %v2099_v22, %v2100_v23  ;;  %v2803_v59 = vsel %vm2182_vm1, %v2771_v18, %v2739_v32  ;;  %v7267_v14 = vld [vmem:[#allocation2 + $0x60] sm:$0xe]  ;;  %v3143_v22 = vld [vmem:[#allocation2 + $0xb0] sm:$0x1] }
 0x279   : > { %v4021_v37 = vshrl.u32 %v3981_v0, 16  ;;  %v4024_v52 = vshll.u32 %v3981_v0, 16  ;;  %v2126_v47 = vpop.permute.xlu1 %2125  ;;  %3627 = vrot.lane.b32.xlu2 %v3589_v54, %s7624_s15  ;;  %v8952_v54 = vld [vmem:[#allocation2 + $0xb4] sm:$0xff]   ;;  %v3398_v56 = vsel %vm1795_vm0, %v8944_v1, %v3397_v6  ;;  %v3405_v10 = vor.u32 %v3404_v60, %v3400_v16  ;;  %v7335_v32 = vld [vmem:[#allocation2 + $0xa8] sm:$0xf0] }
 0x27a   : > { %v2192_v0 = vsel %vm2182_vm1, %v2159_v40, %v2126_v47  ;;  %v8954_v23 = vld [vmem:[#allocation2 + $0xb4] sm:$0xf0]  ;;  %v3409_v18 = vrot.slane %v3407_v44, 1  ;;  %v3271_v28 = vunpack.c.l.b16 %v3143_v22  ;;  %v1772_v40 = vunpack.c.l.b16 %v1644_v31 }
 0x27b   : > { %v4023_v2 = vrot.slane %v4021_v37, 7  ;;  %2137 = vrot.lane.b32.xlu0 %v2101_v51, %s7624_s15  ;;  %6925 = vmatmul.msk.bf16.gmra.mxu0 %vm2839_vm5, %v2803_v59  ;;  %v1907_v47 = vshll.u32 %v8916_v61, 16  ;;  %v2094_v44 = vrot.slane %v8807_v48, 1  ;;  %v3450_v48 = vshll.u32 %v8952_v54, 16 }
 0x27c   : > { %6945 = vmatmul.msk.bf16.gmra.mxu1 %vm2839_vm5, %v2192_v0  ;;  %3499 = vrot.lane.b32.xlu1 %v3398_v56, %s7625_s16  ;;  %v3410_v6 = vsel %vm1795_vm0, %v3405_v10, %v3409_v18  ;;  %v1788_v0 = vpack.c.b16 %v1772_v40, %v1772_v40  ;;  %v1905_v56 = vshrl.u32 %v8916_v61, 16  ;;  %v1924_v31 = vshll.u32 %v8900_v41, 16  ;;  %v7332_v18 = vld [vmem:[#allocation2 + $0x90] sm:$0xf0]  ;;  %v7502_v40 = vld [vmem:[#allocation2 + $0x9c] sm:$0xe] }
 0x27d   : > { %v4026_v7 = vor.u32 %v4024_v52, %v4023_v2  ;;  %v4028_v43 = vrot.slane %v4023_v2, 4  ;;  %v1934_v2 = vor.u32 %v1933_v58, %v1929_v19  ;;  %v1938_v52 = vrot.slane %v1936_v55, 1 }
 0x27e   : > { %v8967_v19 = vpack.c.b16 %v3271_v28, %v3271_v28  ;;  %v1909_v59 = vrot.slane %v1907_v47, 1  ;;  %v2097_v22 = vrot.slane %v1788_v0, 1  ;;  %v1912_v10 = vshll.u32 %v1788_v0, 16  ;;  %v3142_v28 = vld [vmem:[#allocation2 + $0xa4] sm:$0x1] }
 0x27f   : > { %v4027_v26 = vsel %vm7699_vm2, %v4019_v13, %v4026_v7  ;;  %v4338_v37 = vsel %vm7767_vm10, %v4028_v43, %v4337_v24  ;;  %v7268_v24 = vor.u32 %v7267_v14, %v7266_v17  ;;  %v7336_v13 = vld [vmem:[#allocation2 + $0xa8] sm:$0xe]  ;;  %v3144_v7 = vld [vmem:[#allocation2 + $0xbc] sm:$0x1]  ;;  %v7500_v43 = vor.u32 %v7499_v27, %v8918_v53  ;;  %v7501_v27 = vld [vmem:[#allocation2 + $0x9c] sm:$0xf0] }
 0x280   : > { %4336 = vst.msk [vmem:[#allocation3 + $0x10] sm:$0xf] %vm449_vm7, %v4027_v26  ;;  %v1939_v16 = vsel %vm1795_vm0, %v1934_v2, %v1938_v52  ;;  %v7337_v58 = vor.u32 %v7336_v13, %v7335_v32  ;;  %v3272_v55 = vunpack.c.l.b16 %v3144_v7  ;;  %v3600_v14 = vrot.slane %v8967_v19, 1  ;;  %v7333_v2 = vld [vmem:[#allocation2 + $0x90] sm:$0xe] }
 0x281   : > { %4339 = vst [vmem:[#allocation3 + $0x14] sm:$0x1] %v4338_v37  ;;  %v2093_v60 = vrot.slane %v7268_v24, 1  ;;  %3501 = vrot.lane.b32.xlu2 %v3410_v6, %s7625_s16  ;;  %v2096_v51 = vrot.slane %v7500_v43, 1  ;;  %v8976_v37 = vld [vmem:[#allocation2 + $0x9c] sm:$0xff]   ;;  %v1910_v24 = vor.u32 %v1909_v59, %v1905_v56  ;;  %v3448_v13 = vshrl.u32 %v8952_v54, 16 }
 0x282   : > { %v3599_v17 = vrot.slane %v7337_v58, 1  ;;  %v8973_v26 = vpack.c.b16 %v3272_v55, %v3272_v55  ;;  %v3452_v7 = vrot.slane %v3450_v48, 1  ;;  %v1914_v47 = vrot.slane %v1912_v10, 1  ;;  %v1648_v6 = vld [vmem:[#allocation2 + $0xa4] sm:$0x1]  ;;  %v8987_v55 = vld [vmem:[#allocation2 + $0x9c] sm:$0xff]  }
 0x283   : > { %2010 = vrot.lane.b32.xlu0 %v1939_v16, %s7625_s16  ;;  %v2095_v53 = vsel %vm2068_vm15, %v2093_v60, %v2094_v44  ;;  %v2098_v52 = vsel %vm2068_vm15, %v2096_v51, %v2097_v22  ;;  %v7334_v41 = vor.u32 %v7333_v2, %v7332_v18  ;;  %v7587_v16 = vld [vmem:[#allocation2 + $0x9c] sm:$0xe]  ;;  %v3270_v60 = vunpack.c.l.b16 %v3142_v28  ;;  %v7586_v0 = vld [vmem:[#allocation2 + $0x9c] sm:$0xf0] }
 0x284   : > { %2133 = vrot.lane.b32.xlu1 %v2095_v53, %s7624_s15  ;;  %v3601_v32 = vsel %vm2068_vm15, %v3599_v17, %v3600_v14  ;;  %v3455_v43 = vshll.u32 %v8973_v26, 16  ;;  %v1915_v44 = vsel %vm1795_vm0, %v1910_v24, %v1914_v47  ;;  %v1926_v58 = vrot.slane %v1924_v31, 1  ;;  %v1649_v14 = vld [vmem:[#allocation2 + $0xb0] sm:$0x1]  ;;  %v8998_v24 = vld [vmem:[#allocation2 + $0xa8] sm:$0xff]  }
 0x285   : > { %v3453_v53 = vor.u32 %v3452_v7, %v3448_v13  ;;  %v1776_v59 = vunpack.c.l.b16 %v1648_v6  ;;  %v3593_v17 = vrot.slane %v7334_v41, 1  ;;  %v3594_v48 = vrot.slane %v8870_v57, 1 }
 0x286   : > { %v3457_v51 = vrot.slane %v3455_v43, 1  ;;  %v3286_v22 = vpack.c.b16 %v3270_v60, %v3270_v60  ;;  %v7503_v56 = vor.u32 %v7502_v40, %v7501_v27  ;;  %v1927_v10 = vsel %vm1795_vm0, %v8944_v1, %v1926_v58  ;;  %v7505_v43 = vld [vmem:[#allocation2 + $0x84] sm:$0xe] }
 0x287   : > { %v3426_v18 = vshll.u32 %v8976_v37, 16  ;;  %v8996_v2 = vpack.c.b16 %v1776_v59, %v1776_v59  ;;  %v1777_v28 = vunpack.c.l.b16 %v1649_v14  ;;  %v3595_v57 = vsel %vm2068_vm15, %v3593_v17, %v3594_v48 }
 0x288   : > { %v3458_v31 = vsel %vm1795_vm0, %v3453_v53, %v3457_v51  ;;  %v3596_v27 = vrot.slane %v7503_v56, 1  ;;  %v3597_v40 = vrot.slane %v3286_v22, 1  ;;  %v3424_v1 = vshrl.u32 %v8976_v37, 16  ;;  %v1647_v53 = vld [vmem:[#allocation2 + $0x98] sm:$0x1] }
 0x289   : > { %2135 = vrot.lane.b32.xlu2 %v2098_v52, %s7624_s15  ;;  %v7588_v52 = vor.u32 %v7587_v16, %v7586_v0  ;;  %v3431_v13 = vshll.u32 %v3286_v22, 16  ;;  %v3438_v7 = vshll.u32 %v8998_v24, 16  ;;  %v2109_v41 = vrot.slane %v8996_v2, 1 }
 0x28a   : > { %v9006_v6 = vpack.c.b16 %v1777_v28, %v1777_v28  ;;  %v3598_v16 = vsel %vm2068_vm15, %v3596_v27, %v3597_v40  ;;  %v3443_v0 = vshll.u32 %v8967_v19, 16  ;;  %v3436_v17 = vshrl.u32 %v8998_v24, 16 }
 0x28b   : > { %3635 = vrot.lane.b32.xlu0 %v3601_v32, %s7624_s15  ;;  %v3428_v32 = vrot.slane %v3426_v18, 1  ;;  %v2108_v47 = vrot.slane %v7588_v52, 1  ;;  %v3440_v58 = vrot.slane %v3438_v7, 1  ;;  %v7506_v14 = vor.u32 %v7505_v43, %v8881_v38  ;;  %v7272_v18 = vld [vmem:[#allocation2 + $0x90] sm:$0xf0] }
 0x28c   : > { %2006 = vrot.lane.b32.xlu1 %v1915_v44, %s7625_s16  ;;  %v3433_v44 = vrot.slane %v3431_v13, 1  ;;  %v1972_v59 = vshll.u32 %v9006_v6, 16  ;;  %v1775_v48 = vunpack.c.l.b16 %v1647_v53  ;;  %v2103_v40 = vrot.slane %v8923_v36, 1  ;;  %v466_v38 = vld [vmem:[#allocation3 + $0x18] sm:$0x1] }
 0x28d   : > { %v3429_v60 = vor.u32 %v3428_v32, %v3424_v1  ;;  %v2110_v51 = vsel %vm2068_vm15, %v2108_v47, %v2109_v41  ;;  %v3441_v56 = vor.u32 %v3440_v58, %v3436_v17  ;;  %v2102_v52 = vrot.slane %v7506_v14, 1 }
 0x28e   : > { %v1974_v19 = vrot.slane %v1972_v59, 1  ;;  %v1791_v28 = vpack.c.b16 %v1775_v48, %v1775_v48  ;;  %v467_v13 = vsel %vm7767_vm10, 0, %v466_v38  ;;  %v1955_v36 = vshll.u32 %v8987_v55, 16  ;;  %v3145_v59 = vld [vmem:[#allocation2 + $0xc8] sm:$0x1] }
 0x28f   : > { %v3434_v22 = vsel %vm1795_vm0, %v3429_v60, %v3433_v44  ;;  %468 = vst [vmem:[#allocation3 + $0x18] sm:$0x1] %v467_v13  ;;  %v2104_v47 = vsel %vm2068_vm15, %v2102_v52, %v2103_v40  ;;  %v7508_v60 = vld [vmem:[#allocation2 + $0xb4] sm:$0xe]  ;;  %v7338_v52 = vld [vmem:[#allocation2 + $0xc0] sm:$0xf0] }
 0x290   : > { %v1975_v32 = vsel %vm1795_vm0, %v3441_v56, %v1974_v19  ;;  %v1948_v43 = vshll.u32 %v1791_v28, 16  ;;  %v1957_v53 = vrot.slane %v1955_v36, 1  ;;  %v7509_v48 = vor.u32 %v7508_v60, %v8954_v23  ;;  %v390_v13 = vld [vmem:[#allocation2 + $0xcc] sm:$0x1] }
 0x291   : > { %2008 = vrot.lane.b32.xlu2 %v1927_v10, %s7625_s16  ;;  %v3445_v10 = vrot.slane %v3443_v0, 1  ;;  %v1953_v0 = vshrl.u32 %v8987_v55, 16  ;;  %v3603_v40 = vrot.slane %v8973_v26, 1 }
 0x292   : > { %v1950_v44 = vrot.slane %v1948_v43, 1  ;;  %v3602_v23 = vrot.slane %v7509_v48, 1  ;;  %v391_v43 = vsel %vm7708_vm4, 0, %v390_v13  ;;  %v7276_v48 = vld [vmem:[#allocation2 + $0xa8] sm:$0xe]  ;;  %vm5705_vm4 = vcmask 1045504  }
 0x293   : > { %3509 = vrot.lane.b32.xlu0 %v3458_v31, %s7625_s16  ;;  %v7273_v31 = vld [vmem:[#allocation2 + $0x90] sm:$0xe]  ;;  %v3446_v27 = vsel %vm1795_vm0, %v3441_v56, %v3445_v10  ;;  %v9037_v56 = vld [vmem:[#allocation2 + $0x48] sm:$0xff]   ;;  %392 = vst [vmem:[#allocation2 + $0xcc] sm:$0x1] %v391_v43 }
 0x294   : > { %3631 = vrot.lane.b32.xlu1 %v3595_v57, %s7624_s15  ;;  %v9018_v57 = vpop.permute.xlu0 %1998  ;;  %v7274_v1 = vor.u32 %v7273_v31, %v7272_v18  ;;  %v1951_v19 = vsel %vm1795_vm0, %v8895_v30, %v1950_v44  ;;  %v1958_v18 = vor.u32 %v1957_v53, %v1953_v0  ;;  %v3604_v26 = vsel %vm2068_vm15, %v3602_v23, %v3603_v40  ;;  %v446_v44 = vld [vmem:[#allocation2 + $0xd4] sm:$0x1]  ;;  %v7511_v13 = vld [vmem:[#allocation2 + $0xb4] sm:$0xe]  ;;  %v469_v43 = vld [vmem:[#allocation3 + $0x24] sm:$0x1] }
 0x295   : > { %v447_v34 = vsel %vm7747_vm6, 0, %v446_v44 }
 0x296   : > { %v2105_v41 = vrot.slane %v7274_v1, 1  ;;  %448 = vst [vmem:[#allocation2 + $0xd4] sm:$0x1] %v447_v34 }
 0x299   : > { %3633 = vrot.lane.b32.xlu2 %v3598_v16, %s7624_s15  ;;  %v2106_v16 = vrot.slane %v1791_v28, 1  ;;  %v7339_v28 = vld [vmem:[#allocation2 + $0xc0] sm:$0xe] }
 0x29b   : > { %2143 = vrot.lane.b32.xlu0 %v2110_v51, %s7624_s15  ;;  %v2107_v58 = vsel %vm2068_vm15, %v2105_v41, %v2106_v16  ;;  %v1960_v51 = vshll.u32 %v8996_v2, 16  ;;  %v9056_v41 = vld [vmem:[#allocation2 + $0xb4] sm:$0xf0] }
 0x29c   : > { %3505 = vrot.lane.b32.xlu1 %v3434_v22, %s7625_s16  ;;  %v2741_v17 = vpop.permute.xlu0 %2740  ;;  %v3273_v22 = vunpack.c.l.b16 %v3145_v59  ;;  %v521_v59 = vld [vmem:[#allocation3 + $0x20] sm:$0x1] }
 0x29d   : > { %v1962_v31 = vrot.slane %v1960_v51, 1 }
 0x29e   : > { %v3289_v1 = vpack.c.b16 %v3273_v22, %v3273_v22 }
 0x29f   : > { %v1963_v38 = vsel %vm1795_vm0, %v1958_v18, %v1962_v31  ;;  %v1650_v18 = vld [vmem:[#allocation2 + $0xbc] sm:$0x1]  ;;  %v9071_v31 = vld [vmem:[#allocation2 + $0xcc] sm:$0xff]  }
 0x2a0   : > { %v3606_v36 = vrot.slane %v3289_v1, 1  ;;  %v3467_v51 = vshll.u32 %v3289_v1, 16  ;;  %v3146_v1 = vld [vmem:[#allocation2 + $0xd4] sm:$0x1] }
 0x2a1   : > { %3507 = vrot.lane.b32.xlu2 %v3446_v27, %s7625_s16  ;;  %v9045_v27 = vld [vmem:[#allocation2 + $0xc0] sm:$0xff]  }
 0x2a2   : > { %v3462_v30 = vshll.u32 %v9045_v27, 16  ;;  %v3460_v60 = vshrl.u32 %v9045_v27, 16 }
 0x2a3   : > { %2016 = vrot.lane.b32.xlu0 %v1975_v32, %s7625_s16  ;;  %v9027_v7 = vpop.permute.xlu2 %3621  ;;  %v7340_v32 = vor.u32 %v7339_v28, %v7338_v52 }
 0x2a4   : > { %2139 = vrot.lane.b32.xlu1 %v2104_v47, %s7624_s15  ;;  %v9054_v47 = vld [vmem:[#allocation2 + $0xb4] sm:$0xff]   ;;  %v3464_v53 = vrot.slane %v3462_v30, 1  ;;  %v3274_v30 = vunpack.c.l.b16 %v3146_v1 }
 0x2a5   : > { %v3605_v0 = vrot.slane %v7340_v32, 1 }
 0x2a6   : > { %v9083_v44 = vpack.c.b16 %v3274_v30, %v3274_v30 }
 0x2a7   : > { %v3607_v22 = vsel %vm2068_vm15, %v3605_v0, %v3606_v36  ;;  %v3472_v0 = vshrl.u32 %v9071_v31, 16 }
 0x2a9   : > { %2141 = vrot.lane.b32.xlu2 %v2107_v58, %s7624_s15  ;;  %v9062_v58 = vpop.permute.xlu0 %2000 }
 0x2ab   : > { %v2613_v14 = vpop.permute.xlu2 %2612 }
 0x2ac   : > { %v2773_v10 = vsel %vm2149_vm13, %v9037_v56, %v2613_v14  ;;  %2012 = vrot.lane.b32.xlu1 %v1951_v19, %s7625_s16  ;;  %v7275_v14 = vld [vmem:[#allocation2 + $0xa8] sm:$0xf0]  ;;  %v3469_v19 = vrot.slane %v3467_v51, 1  ;;  %v2112_v51 = vrot.slane %v9006_v6, 1 }
 0x2ad   : > { %v2805_v2 = vsel %vm2182_vm1, %v2773_v10, %v2741_v17  ;;  %v522_v17 = vsel %vm8782_vm14, 0, %v521_v59  ;;  %v3465_v10 = vor.u32 %v3464_v53, %v3460_v60  ;;  %v470_v60 = vsel %vm7767_vm10, 0, %v469_v43 }
 0x2ae   : > { %6926 = vmatmul.msk.bf16.gmra.mxu0 %vm2839_vm5, %v2805_v2  ;;  %523 = vst [vmem:[#allocation3 + $0x20] sm:$0x1] %v522_v17  ;;  %v7277_v2 = vor.u32 %v7276_v48, %v7275_v14  ;;  %v3474_v53 = vshll.u32 %v9071_v31, 16  ;;  %v1979_v48 = vshll.u32 %v9054_v47, 16  ;;  %v2161_v43 = vsel %vm2149_vm13, %v8517_v11, %v9018_v57  ;;  %v524_v11 = vld [vmem:[#allocation3 + $0x2c] sm:$0x1] }
 0x2af   : > { %v3470_v40 = vsel %vm1795_vm0, %v3465_v10, %v3469_v19  ;;  %471 = vst [vmem:[#allocation3 + $0x24] sm:$0x1] %v470_v60  ;;  %v3479_v19 = vshll.u32 %v9083_v44, 16 }
 0x2b0   : > { %v2111_v36 = vrot.slane %v7277_v2, 1  ;;  %v3476_v10 = vrot.slane %v3474_v53, 1  ;;  %v1981_v1 = vrot.slane %v1979_v48, 1 }
 0x2b1   : > { %2014 = vrot.lane.b32.xlu2 %v1963_v38, %s7625_s16  ;;  %v1778_v38 = vunpack.c.l.b16 %v1650_v18 }
 0x2b2   : > { %v3477_v6 = vor.u32 %v3476_v10, %v3472_v0 }
 0x2b3   : > { %v9058_v16 = vpop.permute.xlu2 %3623  ;;  %v1794_v14 = vpack.c.b16 %v1778_v38, %v1778_v38 }
 0x2b4   : > { %3637 = vrot.lane.b32.xlu1 %v3604_v26, %s7624_s15  ;;  %v3023_v26 = vpop.f32.mrf.mxu1 }
 0x2b5   : > { %v1984_v38 = vshll.u32 %v1794_v14, 16  ;;  %v2115_v48 = vrot.slane %v1794_v14, 1 }
 0x2b7   : > { %v3769_v34 = vpop.f32.mrf.mxu2 }
 0x2b9   : > { %3639 = vrot.lane.b32.xlu2 %v3607_v22, %s7624_s15 }
 0x2bb   : > { %v2615_v52 = vpop.permute.xlu2 %2614 }
 0x2bc   : > { %v2775_v28 = vsel %vm2149_vm13, %v8742_v3, %v2615_v52  ;;  %3511 = vrot.lane.b32.xlu1 %v3470_v40, %s7625_s16  ;;  %v3494_v3 = vpop.permute.xlu1 %3493  ;;  %v3481_v52 = vrot.slane %v3479_v19, 1  ;;  %v1977_v40 = vshrl.u32 %v9054_v47, 16  ;;  %v3025_v60 = vpop.f32.mrf.mxu1 }
 0x2bd   : > { %v2743_v23 = vpop.permute.xlu0 %2742  ;;  %v3654_v59 = vsel %vm2149_vm13, %v8740_v29, %v3494_v3  ;;  %v2113_v29 = vsel %vm2068_vm15, %v2111_v36, %v2112_v51  ;;  %v1986_v51 = vrot.slane %v1984_v38, 1 }
 0x2be   : > { %v2807_v32 = vsel %vm2182_vm1, %v2775_v28, %v2743_v23  ;;  %v3686_v18 = vsel %vm2182_vm1, %v3654_v59, %v9027_v7  ;;  %v3482_v30 = vsel %vm1795_vm0, %v3477_v6, %v3481_v52  ;;  %v7512_v7 = vor.u32 %v7511_v13, %v9056_v41 }
 0x2bf   : > { %6927 = vmatmul.msk.bf16.gmra.mxu0 %vm2839_vm5, %v2807_v32  ;;  %6969 = vmatmul.msk.bf16.gmra.mxu2 %vm2839_vm5, %v3686_v18  ;;  %v1982_v53 = vor.u32 %v1981_v1, %v1977_v40  ;;  %v3771_v41 = vpop.f32.mrf.mxu2 }
 0x2c1   : > { %v2890_v17 = vpop.f32.mrf.mxu0  ;;  %3513 = vrot.lane.b32.xlu2 %v3482_v30, %s7625_s16  ;;  %v1987_v18 = vsel %vm1795_vm0, %v1982_v53, %v1986_v51  ;;  %v9124_v30 = vld [vmem:[#allocation2 + $0x60] sm:$0xff]   ;;  %v472_v53 = vld [vmem:[#allocation3 + $0x30] sm:$0x1] }
 0x2c2   : > { %v3024_v22 = vadd.f32 %v3023_v26, %v2890_v17  ;;  %v2114_v17 = vrot.slane %v7512_v7, 1 }
 0x2c3   : > { %v9095_v28 = vpop.permute.xlu2 %3625 }
 0x2c4   : > { %v3846_v2 = vadd.f32 %v3769_v34, %v3024_v22  ;;  %2145 = vrot.lane.b32.xlu1 %v2113_v29, %s7624_s15  ;;  %v2128_v36 = vpop.permute.xlu1 %2127  ;;  %v2116_v14 = vsel %vm2068_vm15, %v2114_v17, %v2115_v48 }
 0x2c5   : > { %v9097_v23 = vpop.permute.xlu0 %2002  ;;  %v2194_v3 = vsel %vm2182_vm1, %v2161_v43, %v2128_v36 }
 0x2c6   : > { %v3882_v32 = vmul.f32 %v8839_v33, %v3846_v2  ;;  %6946 = vmatmul.msk.bf16.gmra.mxu1 %vm2839_vm5, %v2194_v3  ;;  %v525_v2 = vsel %vm8782_vm14, 0, %v524_v11 }
 0x2c7   : > { %526 = vst [vmem:[#allocation3 + $0x2c] sm:$0x1] %v525_v2 }
 0x2c8   : > { %v3918_v26 = vadd.f32 %v8855_v15, %v3882_v32  ;;  %v4340_v32 = vld [vmem:[#allocation3 + $0x18] sm:$0xf] }
 0x2c9   : > { %v2892_v0 = vpop.f32.mrf.mxu0  ;;  %2147 = vrot.lane.b32.xlu2 %v2116_v14, %s7624_s15  ;;  %v527_v14 = vld [vmem:[#allocation3 + $0x38] sm:$0x1] }
 0x2ca   : > { %v3950_v34 = vmax.f32 %v3918_v26, 0.0  ;;  %v3026_v59 = vadd.f32 %v3025_v60, %v2892_v0 }
 0x2cb   : > { %v2617_v10 = vpop.permute.xlu2 %2616 }
 0x2cc   : > { %v3982_v13 = vpack.c.bf16 %v3950_v34, %v3950_v34  ;;  %v3847_v22 = vadd.f32 %v3771_v41, %v3026_v59  ;;  %v2777_v57 = vsel %vm2149_vm13, %v8773_v8, %v2617_v10  ;;  %2018 = vrot.lane.b32.xlu1 %v1987_v18, %s7625_s16  ;;  %v3496_v38 = vpop.permute.xlu1 %3495  ;;  %v473_v59 = vsel %vm7767_vm10, 0, %v472_v53 }
 0x2cd   : > { %v2745_v19 = vpop.permute.xlu0 %2744  ;;  %v3656_v7 = vsel %vm2149_vm13, %v9124_v30, %v3496_v38  ;;  %474 = vst [vmem:[#allocation3 + $0x30] sm:$0x1] %v473_v59  ;;  %v475_v59 = vld [vmem:[#allocation3 + $0x3c] sm:$0x1] }
 0x2ce   : > { %v4030_v6 = vshrl.u32 %v3982_v13, 16  ;;  %v3883_v52 = vmul.f32 %v8839_v33, %v3847_v22  ;;  %v2809_v29 = vsel %vm2182_vm1, %v2777_v57, %v2745_v19  ;;  %v4033_v40 = vshll.u32 %v3982_v13, 16  ;;  %v4344_v13 = vld [vmem:[#allocation3 + $0x20] sm:$0x1] }
 0x2cf   : > { %6928 = vmatmul.msk.bf16.gmra.mxu0 %vm2839_vm5, %v2809_v29  ;;  %v3688_v36 = vsel %vm2182_vm1, %v3656_v7, %v9058_v16  ;;  %v3774_v0 = vpop.f32.mrf.mxu2  ;;  %v2163_v16 = vsel %vm2149_vm13, %v9037_v56, %v9062_v58  ;;  %v7514_v58 = vld [vmem:[#allocation2 + $0xcc] sm:$0xe]  ;;  %v3609_v7 = vrot.slane %v9083_v44, 1 }
 0x2d0   : > { %v4032_v8 = vrot.slane %v4030_v6, 7  ;;  %v3919_v1 = vadd.f32 %v8855_v15, %v3883_v52  ;;  %6970 = vmatmul.msk.bf16.gmra.mxu2 %vm2839_vm5, %v3688_v36  ;;  %v3028_v34 = vpop.f32.mrf.mxu1 }
 0x2d2   : > { %v4035_v43 = vor.u32 %v4033_v40, %v4032_v8  ;;  %v3951_v26 = vmax.f32 %v3919_v1, 0.0  ;;  %v4036_v11 = vrot.slane %v4032_v8, 4  ;;  %v528_v40 = vsel %vm8782_vm14, 0, %v527_v14 }
 0x2d3   : > { %529 = vst [vmem:[#allocation3 + $0x38] sm:$0x1] %v528_v40  ;;  %v4351_v40 = vld [vmem:[#allocation3 + $0x2c] sm:$0x1] }
 0x2d4   : > { %v4341_v60 = vsel %vm7756_vm8, %v4035_v43, %v4340_v32  ;;  %v3983_v3 = vpack.c.bf16 %v3951_v26, %v3951_v26  ;;  %v7515_v32 = vor.u32 %v7514_v58, %v9073_v5 }
 0x2d5   : > { %4342 = vst [vmem:[#allocation3 + $0x18] sm:$0xf] %v4341_v60  ;;  %v2130_v10 = vpop.permute.xlu1 %2129 }
 0x2d6   : > { %v4038_v51 = vshrl.u32 %v3983_v3, 16  ;;  %v4041_v48 = vshll.u32 %v3983_v3, 16  ;;  %v2196_v18 = vsel %vm2182_vm1, %v2163_v16, %v2130_v10  ;;  %v3608_v3 = vrot.slane %v7515_v32, 1 }
 0x2d7   : > { %6947 = vmatmul.msk.bf16.gmra.mxu1 %vm2839_vm5, %v2196_v18  ;;  %v3776_v29 = vpop.f32.mrf.mxu2  ;;  %v476_v16 = vsel %vm7767_vm10, 0, %v475_v59 }
 0x2d8   : > { %v4040_v17 = vrot.slane %v4038_v51, 7  ;;  %v2895_v41 = vpop.f32.mrf.mxu0  ;;  %v3030_v1 = vpop.f32.mrf.mxu1  ;;  %477 = vst [vmem:[#allocation3 + $0x3c] sm:$0x1] %v476_v16 }
 0x2d9   : > { %v3029_v22 = vadd.f32 %v3028_v34, %v2895_v41  ;;  %v3610_v34 = vsel %vm2068_vm15, %v3608_v3, %v3609_v7  ;;  %v3628_v3 = vpop.permute.xlu2 %3627 }
 0x2da   : > { %v4043_v57 = vor.u32 %v4041_v48, %v4040_v17  ;;  %v4045_v19 = vrot.slane %v4040_v17, 4  ;;  %3641 = vrot.lane.b32.xlu0 %v3610_v34, %s7624_s15 }
 0x2db   : > { %v3848_v2 = vadd.f32 %v3774_v0, %v3029_v22  ;;  %v2165_v22 = vsel %vm2149_vm13, %v8746_v50, %v9097_v23  ;;  %v9172_v50 = vld [vmem:[%s10530_s3] ss:$0 sm:$0xff] }
 0x2dc   : > { %v4044_v6 = vsel %vm7699_vm2, %v4036_v11, %v4043_v57  ;;  %v4345_v52 = vsel %vm7767_vm10, %v4045_v19, %v4344_v13  ;;  %v4347_v13 = vld [vmem:[#allocation3 + $0x24] sm:$0xf] }
 0x2dd   : > { %4343 = vst.msk [vmem:[#allocation3 + $0x1c] sm:$0xf] %vm449_vm7, %v4044_v6  ;;  %v3884_v56 = vmul.f32 %v8839_v33, %v3848_v2 }
 0x2de   : > { %4346 = vst [vmem:[#allocation3 + $0x20] sm:$0x1] %v4345_v52  ;;  %v3498_v36 = vpop.permute.xlu1 %3497 }
 0x2df   : > { %v3920_v8 = vadd.f32 %v8855_v15, %v3884_v56  ;;  %v3658_v60 = vsel %vm2149_vm13, %v8795_v42, %v3498_v36  ;;  %v530_v56 = vld [vmem:[#allocation3 + $0x44] sm:$0x1] }
 0x2e0   : > { %v2897_v38 = vpop.f32.mrf.mxu0  ;;  %v3690_v51 = vsel %vm2182_vm1, %v3658_v60, %v9095_v28 }
 0x2e1   : > { %v3952_v43 = vmax.f32 %v3920_v8, 0.0  ;;  %v3031_v26 = vadd.f32 %v3030_v1, %v2897_v38  ;;  %6971 = vmatmul.msk.bf16.gmra.mxu2 %vm2839_vm5, %v3690_v51  ;;  %v531_v8 = vsel %vm8782_vm14, 0, %v530_v56  ;;  %v9180_v1 = vld [vmem:[%s10531_s4] ss:$0 sm:$0xff] }
 0x2e2   : > { %532 = vst [vmem:[#allocation3 + $0x44] sm:$0x1] %v531_v8 }
 0x2e3   : > { %v3984_v0 = vpack.c.bf16 %v3952_v43, %v3952_v43  ;;  %v3849_v53 = vadd.f32 %v3776_v29, %v3031_v26 }
 0x2e5   : > { %v4047_v5 = vshrl.u32 %v3984_v0, 16  ;;  %v3885_v44 = vmul.f32 %v8839_v33, %v3849_v53  ;;  %v4050_v48 = vshll.u32 %v3984_v0, 16  ;;  %v9183_v53 = vld [vmem:[#allocation2 + $0x78] sm:$0xff]  }
 0x2e6   : > { %v2132_v11 = vpop.permute.xlu1 %2131 }
 0x2e7   : > { %v4049_v17 = vrot.slane %v4047_v5, 7  ;;  %v3921_v42 = vadd.f32 %v8855_v15, %v3885_v44  ;;  %v3779_v41 = vpop.f32.mrf.mxu2  ;;  %v2198_v19 = vsel %vm2182_vm1, %v2165_v22, %v2132_v11 }
 0x2e8   : > { %v2900_v28 = vpop.f32.mrf.mxu0  ;;  %6948 = vmatmul.msk.bf16.gmra.mxu1 %vm2839_vm5, %v2198_v19 }
 0x2e9   : > { %v4052_v10 = vor.u32 %v4050_v48, %v4049_v17  ;;  %v3953_v33 = vmax.f32 %v3921_v42, 0.0  ;;  %v3033_v57 = vpop.f32.mrf.mxu1  ;;  %v4053_v7 = vrot.slane %v4049_v17, 4  ;;  %v2005_v42 = vpop.permute.xlu0 %2004 }
 0x2ea   : > { %v3034_v18 = vadd.f32 %v3033_v57, %v2900_v28  ;;  %v2167_v11 = vsel %vm2149_vm13, %v9124_v30, %v2005_v42  ;;  %v4354_v57 = vld [vmem:[#allocation3 + $0x30] sm:$0xf] }
 0x2eb   : > { %v4348_v15 = vsel %vm7756_vm8, %v4052_v10, %v4347_v13  ;;  %v3985_v2 = vpack.c.bf16 %v3953_v33, %v3953_v33 }
 0x2ec   : > { %4349 = vst [vmem:[#allocation3 + $0x24] sm:$0xf] %v4348_v15  ;;  %v3850_v6 = vadd.f32 %v3779_v41, %v3034_v18 }
 0x2ed   : > { %v4055_v52 = vshrl.u32 %v3985_v2, 16  ;;  %v4058_v14 = vshll.u32 %v3985_v2, 16 }
 0x2ee   : > { %v3886_v23 = vmul.f32 %v9172_v50, %v3850_v6  ;;  %v3500_v36 = vpop.permute.xlu1 %3499 }
 0x2ef   : > { %v4057_v58 = vrot.slane %v4055_v52, 7  ;;  %v3781_v29 = vpop.f32.mrf.mxu2  ;;  %v3660_v51 = vsel %vm2149_vm13, %v9183_v53, %v3500_v36 }
 0x2f0   : > { %v3922_v38 = vadd.f32 %v9180_v1, %v3886_v23  ;;  %v2902_v32 = vpop.f32.mrf.mxu0  ;;  %v3692_v59 = vsel %vm2182_vm1, %v3660_v51, %v3628_v3 }
 0x2f1   : > { %v4060_v43 = vor.u32 %v4058_v14, %v4057_v58  ;;  %v4062_v26 = vrot.slane %v4057_v58, 4  ;;  %v3035_v60 = vpop.f32.mrf.mxu1  ;;  %6972 = vmatmul.msk.bf16.gmra.mxu2 %vm2839_vm5, %v3692_v59  ;;  %v3502_v58 = vpop.permute.xlu2 %3501 }
 0x2f2   : > { %v3954_v0 = vmax.f32 %v3922_v38, 0.0  ;;  %v3036_v34 = vadd.f32 %v3035_v60, %v2902_v32  ;;  %v3662_v8 = vsel %vm2149_vm13, %v8825_v35, %v3502_v58  ;;  %v4365_v58 = vld [vmem:[#allocation3 + $0x44] sm:$0x1] }
 0x2f3   : > { %v4061_v5 = vsel %vm7699_vm2, %v4053_v7, %v4060_v43  ;;  %v4352_v44 = vsel %vm7767_vm10, %v4062_v26, %v4351_v40  ;;  %v3630_v40 = vpop.permute.xlu0 %3629  ;;  %v4358_v43 = vld [vmem:[#allocation3 + $0x38] sm:$0x1] }
 0x2f4   : > { %4350 = vst.msk [vmem:[#allocation3 + $0x28] sm:$0xf] %vm449_vm7, %v4061_v5  ;;  %v3986_v17 = vpack.c.bf16 %v3954_v0, %v3954_v0  ;;  %v3851_v48 = vadd.f32 %v3781_v29, %v3036_v34 }
 0x2f5   : > { %4353 = vst [vmem:[#allocation3 + $0x2c] sm:$0x1] %v4352_v44  ;;  %v3694_v44 = vsel %vm2182_vm1, %v3662_v8, %v3630_v40 }
 0x2f6   : > { %v4064_v41 = vshrl.u32 %v3986_v17, 16  ;;  %v3887_v16 = vmul.f32 %v9172_v50, %v3851_v48  ;;  %v4067_v28 = vshll.u32 %v3986_v17, 16  ;;  %v2134_v19 = vpop.permute.xlu1 %2133 }
 0x2f7   : > { %v3784_v10 = vpop.f32.mrf.mxu2  ;;  %v2200_v6 = vsel %vm2182_vm1, %v2167_v11, %v2134_v19  ;;  %v4361_v11 = vld [vmem:[#allocation3 + $0x3c] sm:$0xf] }
 0x2f8   : > { %v4066_v13 = vrot.slane %v4064_v41, 7  ;;  %v3923_v22 = vadd.f32 %v9180_v1, %v3887_v16  ;;  %v2905_v33 = vpop.f32.mrf.mxu0  ;;  %6949 = vmatmul.msk.bf16.gmra.mxu1 %vm2839_vm5, %v2200_v6 }
 0x2f9   : > { %v3038_v18 = vpop.f32.mrf.mxu1 }
 0x2fa   : > { %v4069_v15 = vor.u32 %v4067_v28, %v4066_v13  ;;  %v3955_v2 = vmax.f32 %v3923_v22, 0.0  ;;  %v3039_v52 = vadd.f32 %v3038_v18, %v2905_v33  ;;  %v4070_v60 = vrot.slane %v4066_v13, 4  ;;  %v2136_v22 = vpop.permute.xlu2 %2135 }
 0x2fc   : > { %v4355_v23 = vsel %vm7756_vm8, %v4069_v15, %v4354_v57  ;;  %v3987_v56 = vpack.c.bf16 %v3955_v2, %v3955_v2  ;;  %v3852_v14 = vadd.f32 %v3784_v10, %v3039_v52  ;;  %v3504_v2 = vpop.permute.xlu0 %3503 }
 0x2fd   : > { %4356 = vst [vmem:[#allocation3 + $0x30] sm:$0xf] %v4355_v23 }
 0x2fe   : > { %v4072_v29 = vshrl.u32 %v3987_v56, 16  ;;  %v3888_v30 = vmul.f32 %v9172_v50, %v3852_v14  ;;  %v4075_v32 = vshll.u32 %v3987_v56, 16  ;;  %v2007_v17 = vpop.permute.xlu1 %2006  ;;  %v7461_v14 = vld [vmem:[#allocation2 + $0x90] sm:$0xff]  }
 0x2ff   : > { %v3786_v5 = vpop.f32.mrf.mxu2  ;;  %v2169_v13 = vsel %vm2149_vm13, %v8916_v61, %v2007_v17 }
 0x300   : > { %v4074_v38 = vrot.slane %v4072_v29, 7  ;;  %v2907_v7 = vpop.f32.mrf.mxu0  ;;  %v3924_v26 = vadd.f32 %v9180_v1, %v3888_v30  ;;  %v2202_v19 = vsel %vm2182_vm1, %v2169_v13, %v2136_v22  ;;  %v3664_v29 = vsel %vm2149_vm13, %v7461_v14, %v3504_v2  ;;  %v481_v2 = vld [vmem:[#allocation3 + $0x54] sm:$0x1] }
 0x301   : > { %v3040_v36 = vpop.f32.mrf.mxu1  ;;  %6973 = vmatmul.msk.bf16.gmra.mxu2 %vm2839_vm5, %v3694_v44  ;;  %v478_v44 = vld [vmem:[#allocation3 + $0x48] sm:$0x1] }
 0x302   : > { %v4077_v3 = vor.u32 %v4075_v32, %v4074_v38  ;;  %v4079_v0 = vrot.slane %v4074_v38, 4  ;;  %v3041_v51 = vadd.f32 %v3040_v36, %v2907_v7  ;;  %v3956_v34 = vmax.f32 %v3924_v26, 0.0  ;;  %v2009_v32 = vpop.permute.xlu2 %2008 }
 0x303   : > { %v2171_v26 = vsel %vm2149_vm13, %v9183_v53, %v2009_v32  ;;  %v479_v53 = vsel %vm7767_vm10, 0, %v478_v44 }
 0x304   : > { %v4078_v59 = vsel %vm7699_vm2, %v4070_v60, %v4077_v3  ;;  %v4359_v35 = vsel %vm7767_vm10, %v4079_v0, %v4358_v43  ;;  %v3853_v48 = vadd.f32 %v3786_v5, %v3041_v51  ;;  %v3988_v42 = vpack.c.bf16 %v3956_v34, %v3956_v34  ;;  %v2138_v36 = vpop.permute.xlu0 %2137  ;;  %480 = vst [vmem:[#allocation3 + $0x48] sm:$0x1] %v479_v53 }
 0x305   : > { %4357 = vst.msk [vmem:[#allocation3 + $0x34] sm:$0xf] %vm449_vm7, %v4078_v59  ;;  %v2204_v60 = vsel %vm2182_vm1, %v2171_v26, %v2138_v36 }
 0x306   : > { %4360 = vst [vmem:[#allocation3 + $0x38] sm:$0x1] %v4359_v35  ;;  %v3889_v41 = vmul.f32 %v9172_v50, %v3853_v48  ;;  %v4081_v16 = vshrl.u32 %v3988_v42, 16  ;;  %v4084_v33 = vshll.u32 %v3988_v42, 16  ;;  %v3632_v56 = vpop.permute.xlu1 %3631 }
 0x307   : > { %v3696_v38 = vsel %vm2182_vm1, %v3664_v29, %v3632_v56 }
 0x308   : > { %v3925_v28 = vadd.f32 %v9180_v1, %v3889_v41  ;;  %v4083_v10 = vrot.slane %v4081_v16, 7  ;;  %6950 = vmatmul.msk.bf16.gmra.mxu1 %vm2839_vm5, %v2202_v19 }
 0x30a   : > { %v3957_v57 = vmax.f32 %v3925_v28, 0.0  ;;  %v4086_v18 = vor.u32 %v4084_v33, %v4083_v10  ;;  %v4087_v30 = vrot.slane %v4083_v10, 4  ;;  %v3634_v51 = vpop.permute.xlu2 %3633 }
 0x30c   : > { %v3989_v15 = vpack.c.bf16 %v3957_v57, %v3957_v57  ;;  %v4362_v6 = vsel %vm7756_vm8, %v4086_v18, %v4361_v11  ;;  %v2011_v5 = vpop.permute.xlu0 %2010 }
 0x30d   : > { %4363 = vst [vmem:[#allocation3 + $0x3c] sm:$0xf] %v4362_v6  ;;  %v2173_v35 = vsel %vm2149_vm13, %v8879_v4, %v2011_v5  ;;  %v533_v4 = vld [vmem:[#allocation3 + $0x50] sm:$0x1]  ;;  %v482_v6 = vsel %vm7767_vm10, 0, %v481_v2 }
 0x30e   : > { %v4089_v52 = vshrl.u32 %v3989_v15, 16  ;;  %v4092_v23 = vshll.u32 %v3989_v15, 16  ;;  %v3506_v3 = vpop.permute.xlu1 %3505  ;;  %v534_v10 = vsel %vm8782_vm14, 0, %v533_v4  ;;  %483 = vst [vmem:[#allocation3 + $0x54] sm:$0x1] %v482_v6 }
 0x30f   : > { %v3666_v0 = vsel %vm2149_vm13, %v8976_v37, %v3506_v3  ;;  %535 = vst [vmem:[#allocation3 + $0x50] sm:$0x1] %v534_v10 }
 0x310   : > { %v4091_v61 = vrot.slane %v4089_v52, 7  ;;  %v3698_v34 = vsel %vm2182_vm1, %v3666_v0, %v3634_v51 }
 0x311   : > { %6974 = vmatmul.msk.bf16.gmra.mxu2 %vm2839_vm5, %v3696_v38 }
 0x312   : > { %v4094_v8 = vor.u32 %v4092_v23, %v4091_v61  ;;  %v4096_v40 = vrot.slane %v4091_v61, 4  ;;  %v3508_v37 = vpop.permute.xlu2 %3507 }
 0x313   : > { %v3668_v48 = vsel %vm2149_vm13, %v8998_v24, %v3508_v37 }
 0x314   : > { %v4095_v7 = vsel %vm7699_vm2, %v4087_v30, %v4094_v8  ;;  %v4366_v43 = vsel %vm7767_vm10, %v4096_v40, %v4365_v58  ;;  %v3636_v42 = vpop.permute.xlu0 %3635  ;;  %v536_v8 = vld [vmem:[#allocation3 + $0x5c] sm:$0x1] }
 0x315   : > { %4364 = vst.msk [vmem:[#allocation3 + $0x40] sm:$0xf] %vm449_vm7, %v4095_v7  ;;  %v3700_v41 = vsel %vm2182_vm1, %v3668_v48, %v3636_v42  ;;  %v537_v38 = vsel %vm8782_vm14, 0, %v536_v8 }
 0x316   : > { %4367 = vst [vmem:[#allocation3 + $0x44] sm:$0x1] %v4366_v43  ;;  %v2140_v59 = vpop.permute.xlu1 %2139 }
 0x317   : > { %v2206_v17 = vsel %vm2182_vm1, %v2173_v35, %v2140_v59  ;;  %538 = vst [vmem:[#allocation3 + $0x5c] sm:$0x1] %v537_v38  ;;  %v484_v59 = vld [vmem:[#allocation3 + $0x60] sm:$0x1] }
 0x318   : > { %6951 = vmatmul.msk.bf16.gmra.mxu1 %vm2839_vm5, %v2204_v60  ;;  %v485_v48 = vsel %vm7767_vm10, 0, %v484_v59 }
 0x319   : > { %486 = vst [vmem:[#allocation3 + $0x60] sm:$0x1] %v485_v48 }
 0x31a   : > { %v2142_v28 = vpop.permute.xlu2 %2141 }
 0x31c   : > { %v3510_v33 = vpop.permute.xlu0 %3509 }
 0x31d   : > { %v3670_v19 = vsel %vm2149_vm13, %v8952_v54, %v3510_v33 }
 0x31e   : > { %v2013_v16 = vpop.permute.xlu1 %2012 }
 0x31f   : > { %v2175_v13 = vsel %vm2149_vm13, %v7461_v14, %v2013_v16 }
 0x320   : > { %v2208_v22 = vsel %vm2182_vm1, %v2175_v13, %v2142_v28 }
 0x321   : > { %6975 = vmatmul.msk.bf16.gmra.mxu2 %vm2839_vm5, %v3698_v34 }
 0x322   : > { %v2015_v15 = vpop.permute.xlu2 %2014 }
 0x323   : > { %v2177_v61 = vsel %vm2149_vm13, %v8987_v55, %v2015_v15  ;;  %v539_v15 = vld [vmem:[#allocation3 + $0x68] sm:$0x1] }
 0x324   : > { %v2144_v23 = vpop.permute.xlu0 %2143 }
 0x325   : > { %v2210_v54 = vsel %vm2182_vm1, %v2177_v61, %v2144_v23 }
 0x326   : > { %v3638_v57 = vpop.permute.xlu1 %3637 }
 0x327   : > { %v3702_v18 = vsel %vm2182_vm1, %v3670_v19, %v3638_v57 }
 0x328   : > { %6952 = vmatmul.msk.bf16.gmra.mxu1 %vm2839_vm5, %v2206_v17 }
 0x32a   : > { %v3640_v60 = vpop.permute.xlu2 %3639 }
 0x32b   : > { %v2910_v11 = vpop.f32.mrf.mxu0 }
 0x32c   : > { %v2017_v53 = vpop.permute.xlu0 %2016 }
 0x32e   : > { %v3512_v40 = vpop.permute.xlu1 %3511 }
 0x32f   : > { %v3672_v43 = vsel %vm2149_vm13, %v9045_v27, %v3512_v40 }
 0x330   : > { %v3704_v34 = vsel %vm2182_vm1, %v3672_v43, %v3640_v60 }
 0x331   : > { %6976 = vmatmul.msk.bf16.gmra.mxu2 %vm2839_vm5, %v3700_v41  ;;  %v4368_v41 = vld [vmem:[#allocation3 + $0x48] sm:$0xf] }
 0x332   : > { %v3514_v2 = vpop.permute.xlu2 %3513 }
 0x333   : > { %v2912_v58 = vpop.f32.mrf.mxu0 }
 0x336   : > { %v2146_v42 = vpop.permute.xlu1 %2145 }
 0x338   : > { %6953 = vmatmul.msk.bf16.gmra.mxu1 %vm2839_vm5, %v2208_v22  ;;  %v2179_v22 = vsel %vm2149_vm13, %v8998_v24, %v2017_v53  ;;  %v540_v24 = vsel %vm8782_vm14, 0, %v539_v15 }
 0x339   : > { %v2212_v10 = vsel %vm2182_vm1, %v2179_v22, %v2146_v42  ;;  %541 = vst [vmem:[#allocation3 + $0x68] sm:$0x1] %v540_v24 }
 0x33c   : > { %v2915_v3 = vpop.f32.mrf.mxu0 }
 0x341   : > { %6977 = vmatmul.msk.bf16.gmra.mxu2 %vm2839_vm5, %v3702_v18 }
 0x342   : > { %v3789_v52 = vpop.f32.mrf.mxu2 }
 0x343   : > { %v3043_v56 = vpop.f32.mrf.mxu1 }
 0x344   : > { %v3044_v14 = vadd.f32 %v3043_v56, %v2910_v11  ;;  %v2917_v19 = vpop.f32.mrf.mxu0 }
 0x346   : > { %v3854_v29 = vadd.f32 %v3789_v52, %v3044_v14  ;;  %v3674_v52 = vsel %vm2149_vm13, %v9071_v31, %v3514_v2  ;;  %v4372_v14 = vld [vmem:[#allocation3 + $0x50] sm:$0x1] }
 0x348   : > { %6954 = vmatmul.msk.bf16.gmra.mxu1 %vm2839_vm5, %v2210_v54  ;;  %v3890_v30 = vmul.f32 %v9172_v50, %v3854_v29 }
 0x34a   : > { %v3926_v32 = vadd.f32 %v9180_v1, %v3890_v30  ;;  %v3791_v7 = vpop.f32.mrf.mxu2 }
 0x34b   : > { %v3045_v55 = vpop.f32.mrf.mxu1 }
 0x34c   : > { %v3958_v26 = vmax.f32 %v3926_v32, 0.0  ;;  %v3046_v36 = vadd.f32 %v3045_v55, %v2912_v58  ;;  %v3642_v58 = vpop.permute.xlu0 %3641 }
 0x34e   : > { %v3990_v0 = vpack.c.bf16 %v3958_v26, %v3958_v26  ;;  %v3855_v51 = vadd.f32 %v3791_v7, %v3046_v36  ;;  %v3706_v7 = vsel %vm2182_vm1, %v3674_v52, %v3642_v58  ;;  %v2019_v36 = vpop.permute.xlu1 %2018 }
 0x350   : > { %v4098_v5 = vshrl.u32 %v3990_v0, 16  ;;  %v3891_v44 = vmul.f32 %v9172_v50, %v3855_v51  ;;  %v4101_v17 = vshll.u32 %v3990_v0, 16  ;;  %v487_v0 = vld [vmem:[#allocation3 + $0x6c] sm:$0x1]  ;;  %v2920_v51 = vpop.f32.mrf.mxu0 }
 0x351   : > { %6978 = vmatmul.msk.bf16.gmra.mxu2 %vm2839_vm5, %v3704_v34  ;;  %v488_v34 = vsel %vm7767_vm10, 0, %v487_v0 }
 0x352   : > { %v4100_v35 = vrot.slane %v4098_v5, 7  ;;  %v3927_v37 = vadd.f32 %v9180_v1, %v3891_v44  ;;  %v2181_v5 = vsel %vm2149_vm13, %v9054_v47, %v2019_v36  ;;  %489 = vst [vmem:[#allocation3 + $0x6c] sm:$0x1] %v488_v34  ;;  %v542_v47 = vld [vmem:[#allocation3 + $0x74] sm:$0x1] }
 0x353   : > { %v3794_v27 = vpop.f32.mrf.mxu2 }
 0x354   : > { %v4103_v16 = vor.u32 %v4101_v17, %v4100_v35  ;;  %v3959_v13 = vmax.f32 %v3927_v37, 0.0  ;;  %v3048_v28 = vpop.f32.mrf.mxu1  ;;  %v4104_v29 = vrot.slane %v4100_v35, 4  ;;  %v4375_v17 = vld [vmem:[#allocation3 + $0x54] sm:$0xf] }
 0x355   : > { %v3049_v4 = vadd.f32 %v3048_v28, %v2915_v3 }
 0x356   : > { %v4369_v33 = vsel %vm7756_vm8, %v4103_v16, %v4368_v41  ;;  %v3991_v11 = vpack.c.bf16 %v3959_v13, %v3959_v13 }
 0x357   : > { %4370 = vst [vmem:[#allocation3 + $0x48] sm:$0xf] %v4369_v33  ;;  %v3856_v57 = vadd.f32 %v3794_v27, %v3049_v4  ;;  %v2148_v27 = vpop.permute.xlu2 %2147  ;;  %v543_v33 = vsel %vm8782_vm14, 0, %v542_v47 }
 0x358   : > { %6955 = vmatmul.msk.bf16.gmra.mxu1 %vm2839_vm5, %v2212_v10  ;;  %v4106_v18 = vshrl.u32 %v3991_v11, 16  ;;  %v4109_v23 = vshll.u32 %v3991_v11, 16  ;;  %v2214_v16 = vsel %vm2182_vm1, %v2181_v5, %v2148_v27  ;;  %544 = vst [vmem:[#allocation3 + $0x74] sm:$0x1] %v543_v33  ;;  %v2922_v15 = vpop.f32.mrf.mxu0  ;;  %v545_v5 = vld [vmem:[#allocation3 + $0x80] sm:$0x1] }
 0x359   : > { %v3892_v6 = vmul.f32 %v9172_v50, %v3856_v57 }
 0x35a   : > { %v4108_v61 = vrot.slane %v4106_v18, 7 }
 0x35b   : > { %v3796_v56 = vpop.f32.mrf.mxu2  ;;  %v3928_v54 = vadd.f32 %v9180_v1, %v3892_v6  ;;  %v4379_v6 = vld [vmem:[#allocation3 + $0x5c] sm:$0x1] }
 0x35c   : > { %v4111_v30 = vor.u32 %v4109_v23, %v4108_v61  ;;  %v4113_v8 = vrot.slane %v4108_v61, 4  ;;  %v3050_v40 = vpop.f32.mrf.mxu1 }
 0x35d   : > { %v3960_v38 = vmax.f32 %v3928_v54, 0.0  ;;  %v3051_v32 = vadd.f32 %v3050_v40, %v2917_v19  ;;  %v490_v40 = vld [vmem:[#allocation3 + $0x78] sm:$0x1] }
 0x35e   : > { %v4112_v55 = vsel %vm7699_vm2, %v4104_v29, %v4111_v30  ;;  %v4373_v31 = vsel %vm7767_vm10, %v4113_v8, %v4372_v14 }
 0x35f   : > { %4371 = vst.msk [vmem:[#allocation3 + $0x4c] sm:$0xf] %vm449_vm7, %v4112_v55  ;;  %v3992_v43 = vpack.c.bf16 %v3960_v38, %v3960_v38  ;;  %v3857_v26 = vadd.f32 %v3796_v56, %v3051_v32 }
 0x360   : > { %4374 = vst [vmem:[#allocation3 + $0x50] sm:$0x1] %v4373_v31  ;;  %v491_v31 = vsel %vm7767_vm10, 0, %v490_v40 }
 0x361   : > { %6979 = vmatmul.msk.bf16.gmra.mxu2 %vm2839_vm5, %v3706_v7  ;;  %v4115_v60 = vshrl.u32 %v3992_v43, 16  ;;  %v3893_v3 = vmul.f32 %v9172_v50, %v3857_v26  ;;  %v4118_v59 = vshll.u32 %v3992_v43, 16  ;;  %v4382_v43 = vld [vmem:[#allocation3 + $0x60] sm:$0xf]  ;;  %492 = vst [vmem:[#allocation3 + $0x78] sm:$0x1] %v491_v31 }
 0x363   : > { %v4117_v44 = vrot.slane %v4115_v60, 7  ;;  %v3929_v53 = vadd.f32 %v9180_v1, %v3893_v3 }
 0x364   : > { %v3799_v35 = vpop.f32.mrf.mxu2 }
 0x365   : > { %v3053_v37 = vpop.f32.mrf.mxu1  ;;  %v4120_v48 = vor.u32 %v4118_v59, %v4117_v44  ;;  %v3961_v42 = vmax.f32 %v3929_v53, 0.0  ;;  %v4121_v2 = vrot.slane %v4117_v44, 4  ;;  %v546_v53 = vsel %vm8782_vm14, 0, %v545_v5 }
 0x366   : > { %v3054_v41 = vadd.f32 %v3053_v37, %v2920_v51  ;;  %547 = vst [vmem:[#allocation3 + $0x80] sm:$0x1] %v546_v53 }
 0x367   : > { %v4376_v13 = vsel %vm7756_vm8, %v4120_v48, %v4375_v17  ;;  %v3993_v28 = vpack.c.bf16 %v3961_v42, %v3961_v42  ;;  %v4386_v48 = vld [vmem:[#allocation3 + $0x68] sm:$0x1] }
 0x368   : > { %v3858_v22 = vadd.f32 %v3799_v35, %v3054_v41  ;;  %6956 = vmatmul.msk.bf16.gmra.mxu1 %vm2839_vm5, %v2214_v16  ;;  %4377 = vst [vmem:[#allocation3 + $0x54] sm:$0xf] %v4376_v13  ;;  %vm5672_vm5 = vcmask 97280  }
 0x369   : > { %v4123_v4 = vshrl.u32 %v3993_v28, 16  ;;  %v4126_v57 = vshll.u32 %v3993_v28, 16 }
 0x36a   : > { %v3894_v10 = vmul.f32 %v9172_v50, %v3858_v22 }
 0x36b   : > { %v4125_v11 = vrot.slane %v4123_v4, 7 }
 0x36c   : > { %v3930_v19 = vadd.f32 %v9180_v1, %v3894_v10  ;;  %v3801_v18 = vpop.f32.mrf.mxu2 }
 0x36d   : > { %v3055_v24 = vpop.f32.mrf.mxu1  ;;  %v4128_v52 = vor.u32 %v4126_v57, %v4125_v11  ;;  %v4130_v61 = vrot.slane %v4125_v11, 4  ;;  %v493_v57 = vld [vmem:[#allocation3 + $0x84] sm:$0x1] }
 0x36e   : > { %v3962_v23 = vmax.f32 %v3930_v19, 0.0  ;;  %v3056_v56 = vadd.f32 %v3055_v24, %v2922_v15 }
 0x36f   : > { %v4129_v58 = vsel %vm7699_vm2, %v4121_v2, %v4128_v52  ;;  %v4380_v14 = vsel %vm7767_vm10, %v4130_v61, %v4379_v6  ;;  %v494_v2 = vsel %vm7767_vm10, 0, %v493_v57  ;;  %v4389_v6 = vld [vmem:[#allocation3 + $0x6c] sm:$0xf] }
 0x370   : > { %v3994_v54 = vpack.c.bf16 %v3962_v23, %v3962_v23  ;;  %v3859_v29 = vadd.f32 %v3801_v18, %v3056_v56  ;;  %4378 = vst.msk [vmem:[#allocation3 + $0x58] sm:$0xf] %vm449_vm7, %v4129_v58 }
 0x371   : > { %4381 = vst [vmem:[#allocation3 + $0x5c] sm:$0x1] %v4380_v14 }
 0x372   : > { %v4132_v30 = vshrl.u32 %v3994_v54, 16  ;;  %v3895_v8 = vmul.f32 %v9172_v50, %v3859_v29  ;;  %v4135_v32 = vshll.u32 %v3994_v54, 16  ;;  %495 = vst [vmem:[#allocation3 + $0x84] sm:$0x1] %v494_v2 }
 0x374   : > { %v4134_v38 = vrot.slane %v4132_v30, 7  ;;  %v3931_v7 = vadd.f32 %v9180_v1, %v3895_v8  ;;  %v3804_v55 = vpop.f32.mrf.mxu2 }
 0x375   : > { %v3058_v26 = vpop.f32.mrf.mxu1 }
 0x376   : > { %v4137_v36 = vor.u32 %v4135_v32, %v4134_v38  ;;  %v3963_v60 = vmax.f32 %v3931_v7, 0.0  ;;  %v3059_v3 = vadd.f32 %v3058_v26, %v8538_v20  ;;  %v4138_v20 = vrot.slane %v4134_v38, 4 }
 0x378   : > { %v4383_v0 = vsel %vm7756_vm8, %v4137_v36, %v4382_v43  ;;  %v3995_v51 = vpack.c.bf16 %v3963_v60, %v3963_v60  ;;  %v3860_v34 = vadd.f32 %v3804_v55, %v3059_v3  ;;  %v548_v55 = vld [vmem:[#allocation3 + $0x8c] sm:$0x1] }
 0x379   : > { %4384 = vst [vmem:[#allocation3 + $0x60] sm:$0xf] %v4383_v0 }
 0x37a   : > { %v4140_v44 = vshrl.u32 %v3995_v51, 16  ;;  %v3896_v59 = vmul.f32 %v9172_v50, %v3860_v34  ;;  %v4143_v17 = vshll.u32 %v3995_v51, 16  ;;  %v4393_v51 = vld [vmem:[#allocation3 + $0x74] sm:$0x1] }
 0x37c   : > { %v4142_v35 = vrot.slane %v4140_v44, 7  ;;  %v3932_v37 = vadd.f32 %v9180_v1, %v3896_v59  ;;  %v3806_v27 = vpop.f32.mrf.mxu2 }
 0x37d   : > { %v3060_v42 = vpop.f32.mrf.mxu1 }
 0x37e   : > { %v4145_v41 = vor.u32 %v4143_v17, %v4142_v35  ;;  %v4147_v16 = vrot.slane %v4142_v35, 4  ;;  %v3964_v13 = vmax.f32 %v3932_v37, 0.0  ;;  %v3061_v28 = vadd.f32 %v3060_v42, %v8580_v39 }
 0x380   : > { %v4146_v22 = vsel %vm7699_vm2, %v4138_v20, %v4145_v41  ;;  %v4387_v47 = vsel %vm7767_vm10, %v4147_v16, %v4386_v48  ;;  %v3996_v4 = vpack.c.bf16 %v3964_v13, %v3964_v13  ;;  %v3861_v10 = vadd.f32 %v3806_v27, %v3061_v28  ;;  %v7390_v32 = vld [vmem:[#allocation3 + $0x60] sm:$0xe] }
 0x381   : > { %4385 = vst.msk [vmem:[#allocation3 + $0x64] sm:$0xf] %vm449_vm7, %v4146_v22 }
 0x382   : > { %4388 = vst [vmem:[#allocation3 + $0x68] sm:$0x1] %v4387_v47  ;;  %v4149_v33 = vshrl.u32 %v3996_v4, 16  ;;  %v3897_v11 = vmul.f32 %v9172_v50, %v3861_v10  ;;  %v4152_v18 = vshll.u32 %v3996_v4, 16  ;;  %v496_v10 = vld [vmem:[#allocation3 + $0x90] sm:$0x1] }
 0x384   : > { %v4151_v19 = vrot.slane %v4149_v33, 7  ;;  %v3933_v15 = vadd.f32 %v9180_v1, %v3897_v11  ;;  %v3809_v39 = vpop.f32.mrf.mxu2 }
 0x385   : > { %v3063_v24 = vpop.f32.mrf.mxu1 }
 0x386   : > { %v4154_v52 = vor.u32 %v4152_v18, %v4151_v19  ;;  %v3965_v61 = vmax.f32 %v3933_v15, 0.0  ;;  %v3064_v23 = vadd.f32 %v3063_v24, %v8605_v63  ;;  %v549_v63 = vsel %vm8782_vm14, 0, %v548_v55  ;;  %v4396_v15 = vld [vmem:[#allocation3 + $0x78] sm:$0xf] }
 0x387   : > { %550 = vst [vmem:[#allocation3 + $0x8c] sm:$0x1] %v549_v63  ;;  %v4155_v0 = vrot.slane %v4151_v19, 4  ;;  %v497_v18 = vsel %vm7767_vm10, 0, %v496_v10 }
 0x388   : > { %v4390_v56 = vsel %vm7756_vm8, %v4154_v52, %v4389_v6  ;;  %v3997_v58 = vpack.c.bf16 %v3965_v61, %v3965_v61  ;;  %v3862_v14 = vadd.f32 %v3809_v39, %v3064_v23  ;;  %v7389_v54 = vld [vmem:[#allocation3 + $0x60] sm:$0xf0]  ;;  %498 = vst [vmem:[#allocation3 + $0x90] sm:$0x1] %v497_v18 }
 0x389   : > { %v9336_v29 = vld [vmem:[#allocation3 + $0x60] sm:$0xff]   ;;  %4391 = vst [vmem:[#allocation3 + $0x6c] sm:$0xf] %v4390_v56  ;;  %v5095_v30 = vld [vmem:[#allocation3 + $0x68] sm:$0x1]  ;;  %v7391_v31 = vor.u32 %v7390_v32, %v7389_v54 }
 0x38a   : > { %v5335_v8 = vshll.u32 %v9336_v29, 16  ;;  %v4157_v40 = vshrl.u32 %v3997_v58, 16  ;;  %v3898_v38 = vmul.f32 %v9172_v50, %v3862_v14  ;;  %v5223_v7 = vunpack.c.l.b16 %v5095_v30  ;;  %v551_v30 = vld [vmem:[#allocation3 + $0x98] sm:$0x1] }
 0x38b   : > { %v4160_v26 = vshll.u32 %v3997_v58, 16  ;;  %v5541_v17 = vrot.slane %v7391_v31, 1  ;;  %v5333_v27 = vshrl.u32 %v9336_v29, 16 }
 0x38c   : > { %v4159_v43 = vrot.slane %v4157_v40, 7  ;;  %v3934_v36 = vadd.f32 %v9180_v1, %v3898_v38  ;;  %v3811_v60 = vpop.f32.mrf.mxu2  ;;  %v5239_v3 = vpack.c.b16 %v5223_v7, %v5223_v7  ;;  %v5337_v5 = vrot.slane %v5335_v8, 1 }
 0x38d   : > { %v3065_v34 = vpop.f32.mrf.mxu1 }
 0x38e   : > { %v4162_v44 = vor.u32 %v4160_v26, %v4159_v43  ;;  %v4164_v59 = vrot.slane %v4159_v43, 4  ;;  %v3966_v53 = vmax.f32 %v3934_v36, 0.0  ;;  %v3066_v35 = vadd.f32 %v3065_v34, %v8631_v45  ;;  %v4400_v36 = vld [vmem:[#allocation3 + $0x80] sm:$0x1] }
 0x38f   : > { %v5542_v37 = vrot.slane %v5239_v3, 1  ;;  %v5340_v20 = vshll.u32 %v5239_v3, 16  ;;  %v5338_v28 = vor.u32 %v5337_v5, %v5333_v27 }
 0x390   : > { %v4163_v48 = vsel %vm7699_vm2, %v4155_v0, %v4162_v44  ;;  %v4394_v42 = vsel %vm7767_vm10, %v4164_v59, %v4393_v51  ;;  %v3998_v41 = vpack.c.bf16 %v3966_v53, %v3966_v53  ;;  %v3863_v16 = vadd.f32 %v3811_v60, %v3066_v35  ;;  %v7590_v52 = vld [vmem:[#allocation3 + $0x6c] sm:$0xe] }
 0x391   : > { %4392 = vst.msk [vmem:[#allocation3 + $0x70] sm:$0xf] %vm449_vm7, %v4163_v48  ;;  %v5543_v13 = vsel %vm2068_vm15, %v5541_v17, %v5542_v37  ;;  %v5342_v22 = vrot.slane %v5340_v20, 1 }
 0x392   : > { %4395 = vst [vmem:[#allocation3 + $0x74] sm:$0x1] %v4394_v42  ;;  %v4166_v45 = vshrl.u32 %v3998_v41, 16  ;;  %v3899_v47 = vmul.f32 %v9172_v50, %v3863_v16  ;;  %5582 = vrot.lane.b32.xlu1 %v5543_v13, %s7625_s16  ;;  %v4169_v11 = vshll.u32 %v3998_v41, 16 }
 0x393   : > { %v5343_v4 = vsel %vm1795_vm0, %v5338_v28, %v5342_v22  ;;  %v499_v22 = vld [vmem:[#allocation3 + $0x9c] sm:$0x1] }
 0x394   : > { %v4168_v33 = vrot.slane %v4166_v45, 7  ;;  %v3935_v57 = vadd.f32 %v9180_v1, %v3899_v47  ;;  %5454 = vrot.lane.b32.xlu0 %v5343_v4, %s7623_s11  ;;  %v3814_v19 = vpop.f32.mrf.mxu2 }
 0x395   : > { %v3068_v39 = vpop.f32.mrf.mxu1 }
 0x396   : > { %v4171_v2 = vor.u32 %v4169_v11, %v4168_v33  ;;  %v3967_v6 = vmax.f32 %v3935_v57, 0.0  ;;  %v3069_v24 = vadd.f32 %v3068_v39, %v8654_v46  ;;  %v552_v46 = vsel %vm8782_vm14, 0, %v551_v30  ;;  %v4403_v11 = vld [vmem:[#allocation3 + $0x84] sm:$0xf] }
 0x397   : > { %553 = vst [vmem:[#allocation3 + $0x98] sm:$0x1] %v552_v46  ;;  %v4172_v26 = vrot.slane %v4168_v33, 4  ;;  %v500_v33 = vsel %vm7767_vm10, 0, %v499_v22 }
 0x398   : > { %v4397_v61 = vsel %vm7756_vm8, %v4171_v2, %v4396_v15  ;;  %v3999_v23 = vpack.c.bf16 %v3967_v6, %v3967_v6  ;;  %v3864_v56 = vadd.f32 %v3814_v19, %v3069_v24  ;;  %v9361_v58 = vld [vmem:[#allocation3 + $0x6c] sm:$0xff]   ;;  %501 = vst [vmem:[#allocation3 + $0x9c] sm:$0x1] %v500_v33 }
 0x399   : > { %v7589_v14 = vld [vmem:[#allocation3 + $0x6c] sm:$0xf0]  ;;  %4398 = vst [vmem:[#allocation3 + $0x78] sm:$0xf] %v4397_v61  ;;  %v5096_v54 = vld [vmem:[#allocation3 + $0x74] sm:$0x1] }
 0x39a   : > { %v4174_v8 = vshrl.u32 %v3999_v23, 16  ;;  %v3900_v40 = vmul.f32 %v9172_v50, %v3864_v56  ;;  %v5224_v38 = vunpack.c.l.b16 %v5096_v54  ;;  %v7591_v32 = vor.u32 %v7590_v52, %v7589_v14 }
 0x39b   : > { %v4177_v55 = vshll.u32 %v3999_v23, 16  ;;  %v5347_v0 = vshll.u32 %v9361_v58, 16  ;;  %v5345_v53 = vshrl.u32 %v9361_v58, 16 }
 0x39c   : > { %v4176_v7 = vrot.slane %v4174_v8, 7  ;;  %v3936_v31 = vadd.f32 %v9180_v1, %v3900_v40  ;;  %v3816_v63 = vpop.f32.mrf.mxu2  ;;  %v5240_v43 = vpack.c.b16 %v5224_v38, %v5224_v38  ;;  %v5544_v3 = vrot.slane %v7591_v32, 1  ;;  %v554_v8 = vld [vmem:[#allocation3 + $0xa4] sm:$0x1] }
 0x39d   : > { %v3070_v60 = vpop.f32.mrf.mxu1  ;;  %v5349_v35 = vrot.slane %v5347_v0, 1  ;;  %v10571_v0 = vld [vmem:[#allocation4_spill] sm:$0xff] }
 0x39e   : > { %v4179_v51 = vor.u32 %v4177_v55, %v4176_v7  ;;  %v4181_v34 = vrot.slane %v4176_v7, 4  ;;  %v3968_v5 = vmax.f32 %v3936_v31, 0.0  ;;  %v3071_v44 = vadd.f32 %v3070_v60, %v8667_v62 }
 0x39f   : > { %v5545_v59 = vrot.slane %v5240_v43, 1  ;;  %v5352_v17 = vshll.u32 %v5240_v43, 16  ;;  %v5350_v41 = vor.u32 %v5349_v35, %v5345_v53 }
 0x3a0   : > { %v4180_v37 = vsel %vm7699_vm2, %v4172_v26, %v4179_v51  ;;  %v4401_v27 = vsel %vm7767_vm10, %v4181_v34, %v4400_v36  ;;  %v4000_v20 = vpack.c.bf16 %v3968_v5, %v3968_v5  ;;  %v3865_v48 = vadd.f32 %v3816_v63, %v3071_v44  ;;  %v7393_v54 = vld [vmem:[#allocation3 + $0x78] sm:$0xe]  ;;  %v4407_v63 = vld [vmem:[#allocation3 + $0x8c] sm:$0x1] }
 0x3a1   : > { %4399 = vst.msk [vmem:[#allocation3 + $0x7c] sm:$0xf] %vm449_vm7, %v4180_v37  ;;  %v5546_v42 = vsel %vm2068_vm15, %v5544_v3, %v5545_v59  ;;  %v5354_v16 = vrot.slane %v5352_v17, 1 }
 0x3a2   : > { %4402 = vst [vmem:[#allocation3 + $0x80] sm:$0x1] %v4401_v27  ;;  %v4183_v62 = vshrl.u32 %v4000_v20, 16  ;;  %v3901_v13 = vmul.f32 %v9172_v50, %v3865_v48  ;;  %5584 = vrot.lane.b32.xlu0 %v5546_v42, %s7625_s16  ;;  %v4186_v47 = vshll.u32 %v4000_v20, 16 }
 0x3a3   : > { %v5355_v28 = vsel %vm1795_vm0, %v5350_v41, %v5354_v16 }
 0x3a4   : > { %v4185_v45 = vrot.slane %v4183_v62, 7  ;;  %v3937_v4 = vadd.f32 %v9180_v1, %v3901_v13  ;;  %5456 = vrot.lane.b32.xlu2 %v5355_v28, %s7623_s11  ;;  %v3819_v10 = vpop.f32.mrf.mxu2  ;;  %v502_v62 = vld [vmem:[#allocation3 + $0xa8] sm:$0x1] }
 0x3a5   : > { %v3073_v57 = vpop.f32.mrf.mxu1 }
 0x3a6   : > { %v4188_v19 = vor.u32 %v4186_v47, %v4185_v45  ;;  %v3969_v18 = vmax.f32 %v3937_v4, 0.0  ;;  %v3074_v15 = vadd.f32 %v3073_v57, %v8681_v49  ;;  %v555_v49 = vsel %vm8782_vm14, 0, %v554_v8  ;;  %v4410_v4 = vld [vmem:[#allocation3 + $0x90] sm:$0xf] }
 0x3a7   : > { %556 = vst [vmem:[#allocation3 + $0xa4] sm:$0x1] %v555_v49  ;;  %v4189_v31 = vrot.slane %v4185_v45, 4  ;;  %v503_v47 = vsel %vm7767_vm10, 0, %v502_v62  ;;  %v9424_v49 = vld [vmem:[%s10531_s4] ss:$0 sm:$0xff] }
 0x3a8   : > { %v4404_v39 = vsel %vm7756_vm8, %v4188_v19, %v4403_v11  ;;  %v4001_v2 = vpack.c.bf16 %v3969_v18, %v3969_v18  ;;  %v3866_v6 = vadd.f32 %v3819_v10, %v3074_v15  ;;  %v7392_v24 = vld [vmem:[#allocation3 + $0x78] sm:$0xf0]  ;;  %504 = vst [vmem:[#allocation3 + $0xa8] sm:$0x1] %v503_v47  ;;  %v10572_v11 = vld [vmem:[#allocation5_spill] sm:$0xff] }
 0x3a9   : > { %v9386_v52 = vld [vmem:[#allocation3 + $0x78] sm:$0xff]   ;;  %4405 = vst [vmem:[#allocation3 + $0x84] sm:$0xf] %v4404_v39  ;;  %v5097_v61 = vld [vmem:[#allocation3 + $0x80] sm:$0x1]  ;;  %v7394_v40 = vor.u32 %v7393_v54, %v7392_v24 }
 0x3aa   : > { %v5359_v23 = vshll.u32 %v9386_v52, 16  ;;  %v4191_v56 = vshrl.u32 %v4001_v2, 16  ;;  %v3902_v14 = vmul.f32 %v9172_v50, %v3866_v6  ;;  %v5225_v30 = vunpack.c.l.b16 %v5097_v61  ;;  %v557_v24 = vld [vmem:[#allocation3 + $0xb0] sm:$0x1]  ;;  %v4417_v47 = vld [vmem:[#allocation3 + $0x9c] sm:$0xf] }
 0x3ab   : > { %v4194_v32 = vshll.u32 %v4001_v2, 16  ;;  %v5547_v34 = vrot.slane %v7394_v40, 1  ;;  %v5357_v44 = vshrl.u32 %v9386_v52, 16 }
 0x3ac   : > { %v4193_v38 = vrot.slane %v4191_v56, 7  ;;  %v3938_v46 = vadd.f32 %v9180_v1, %v3902_v14  ;;  %v3821_v7 = vpop.f32.mrf.mxu2  ;;  %v5241_v55 = vpack.c.b16 %v5225_v30, %v5225_v30  ;;  %v5361_v26 = vrot.slane %v5359_v23, 1  ;;  %v9416_v23 = vld [vmem:[%s10530_s3] ss:$0 sm:$0xff] }
 0x3ad   : > { %v3075_v43 = vpop.f32.mrf.mxu1  ;;  %v558_v30 = vsel %vm8782_vm14, 0, %v557_v24 }
 0x3ae   : > { %v4196_v36 = vor.u32 %v4194_v32, %v4193_v38  ;;  %v4198_v60 = vrot.slane %v4193_v38, 4  ;;  %v3970_v3 = vmax.f32 %v3938_v46, 0.0  ;;  %v3076_v51 = vadd.f32 %v3075_v43, %v10571_v0  ;;  %559 = vst [vmem:[#allocation3 + $0xb0] sm:$0x1] %v558_v30 }
 0x3af   : > { %v5548_v5 = vrot.slane %v5241_v55, 1  ;;  %v5364_v59 = vshll.u32 %v5241_v55, 16  ;;  %v5362_v20 = vor.u32 %v5361_v26, %v5357_v44  ;;  %v4414_v55 = vld [vmem:[#allocation3 + $0x98] sm:$0x1] }
 0x3b0   : > { %v4197_v53 = vsel %vm7699_vm2, %v4189_v31, %v4196_v36  ;;  %v4408_v35 = vsel %vm7767_vm10, %v4198_v60, %v4407_v63  ;;  %v4002_v17 = vpack.c.bf16 %v3970_v3, %v3970_v3  ;;  %v3867_v37 = vadd.f32 %v3821_v7, %v3076_v51  ;;  %v7593_v19 = vld [vmem:[#allocation3 + $0x84] sm:$0xe]  ;;  %v10573_v3 = vld [vmem:[#allocation6_spill] sm:$0xff] }
 0x3b1   : > { %4406 = vst.msk [vmem:[#allocation3 + $0x88] sm:$0xf] %vm449_vm7, %v4197_v53  ;;  %v5549_v27 = vsel %vm2068_vm15, %v5547_v34, %v5548_v5  ;;  %v5366_v48 = vrot.slane %v5364_v59, 1 }
 0x3b2   : > { %4409 = vst [vmem:[#allocation3 + $0x8c] sm:$0x1] %v4408_v35  ;;  %v4200_v42 = vshrl.u32 %v4002_v17, 16  ;;  %v3903_v41 = vmul.f32 %v9172_v50, %v3867_v37  ;;  %5586 = vrot.lane.b32.xlu2 %v5549_v27, %s7625_s16  ;;  %v4203_v28 = vshll.u32 %v4002_v17, 16 }
 0x3b3   : > { %v5367_v16 = vsel %vm1795_vm0, %v5362_v20, %v5366_v48 }
 0x3b4   : > { %v4202_v13 = vrot.slane %v4200_v42, 7  ;;  %v3939_v22 = vadd.f32 %v9180_v1, %v3903_v41  ;;  %5458 = vrot.lane.b32.xlu1 %v5367_v16, %s7623_s11  ;;  %v3824_v45 = vpop.f32.mrf.mxu2  ;;  %v505_v16 = vld [vmem:[#allocation3 + $0xb4] sm:$0x1] }
 0x3b5   : > { %v3078_v10 = vpop.f32.mrf.mxu1 }
 0x3b6   : > { %v4205_v33 = vor.u32 %v4203_v28, %v4202_v13  ;;  %v3971_v50 = vmax.f32 %v3939_v22, 0.0  ;;  %v3079_v57 = vadd.f32 %v3078_v10, %v10572_v11  ;;  %v4206_v7 = vrot.slane %v4202_v13, 4 }
 0x3b8   : > { %v4411_v18 = vsel %vm7756_vm8, %v4205_v33, %v4410_v4  ;;  %v4003_v15 = vpack.c.bf16 %v3971_v50, %v3971_v50  ;;  %v3868_v39 = vadd.f32 %v3824_v45, %v3079_v57  ;;  %v9411_v1 = vld [vmem:[#allocation3 + $0x84] sm:$0xff]   ;;  %v506_v45 = vsel %vm7767_vm10, 0, %v505_v16  ;;  %v10574_v50 = vld [vmem:[#allocation7_spill] sm:$0xff]  ;;  %v508_v16 = vld [vmem:[#allocation3 + $0xc0] sm:$0x1] }
 0x3b9   : > { %v7592_v2 = vld [vmem:[#allocation3 + $0x84] sm:$0xf0]  ;;  %4412 = vst [vmem:[#allocation3 + $0x90] sm:$0xf] %v4411_v18  ;;  %v5098_v6 = vld [vmem:[#allocation3 + $0x8c] sm:$0x1] }
 0x3ba   : > { %v4208_v61 = vshrl.u32 %v4003_v15, 16  ;;  %v3904_v56 = vmul.f32 %v9416_v23, %v3868_v39  ;;  %v5226_v14 = vunpack.c.l.b16 %v5098_v6  ;;  %v7594_v54 = vor.u32 %v7593_v19, %v7592_v2  ;;  %507 = vst [vmem:[#allocation3 + $0xb4] sm:$0x1] %v506_v45 }
 0x3bb   : > { %v4211_v40 = vshll.u32 %v4003_v15, 16  ;;  %v5371_v43 = vshll.u32 %v9411_v1, 16  ;;  %v5369_v34 = vshrl.u32 %v9411_v1, 16  ;;  %v509_v45 = vsel %vm7767_vm10, 0, %v508_v16 }
 0x3bc   : > { %v4210_v8 = vrot.slane %v4208_v61, 7  ;;  %v3940_v38 = vadd.f32 %v9424_v49, %v3904_v56  ;;  %v3826_v32 = vpop.f32.mrf.mxu2  ;;  %v5242_v46 = vpack.c.b16 %v5226_v14, %v5226_v14  ;;  %v5550_v63 = vrot.slane %v7594_v54, 1  ;;  %v560_v54 = vld [vmem:[#allocation3 + $0xbc] sm:$0x1]  ;;  %510 = vst [vmem:[#allocation3 + $0xc0] sm:$0x1] %v509_v45 }
 0x3bd   : > { %v3080_v31 = vpop.f32.mrf.mxu1  ;;  %v5373_v5 = vrot.slane %v5371_v43, 1  ;;  %v7053_v45 = vld [vmem:[%s10532_s5 + $0x8] sm:$0x30] }
 0x3be   : > { %v4213_v26 = vor.u32 %v4211_v40, %v4210_v8  ;;  %v4215_v36 = vrot.slane %v4210_v8, 4  ;;  %v3972_v60 = vmax.f32 %v3940_v38, 0.0  ;;  %v3081_v0 = vadd.f32 %v3080_v31, %v10573_v3  ;;  %v4421_v31 = vld [vmem:[#allocation3 + $0xa4] sm:$0x1]  ;;  %v10575_v3 = vld [vmem:[#allocation8_spill] sm:$0xff] }
 0x3bf   : > { %v5551_v51 = vrot.slane %v5242_v46, 1  ;;  %v5376_v44 = vshll.u32 %v5242_v46, 16  ;;  %v5374_v27 = vor.u32 %v5373_v5, %v5369_v34  ;;  %v561_v8 = vsel %vm8782_vm14, 0, %v560_v54 }
 0x3c0   : > { %v4214_v59 = vsel %vm7699_vm2, %v4206_v7, %v4213_v26  ;;  %v4415_v53 = vsel %vm7767_vm10, %v4215_v36, %v4414_v55  ;;  %v4004_v35 = vpack.c.bf16 %v3972_v60, %v3972_v60  ;;  %v3869_v17 = vadd.f32 %v3826_v32, %v3081_v0  ;;  %v7396_v56 = vld [vmem:[#allocation3 + $0x90] sm:$0xe]  ;;  %562 = vst [vmem:[#allocation3 + $0xbc] sm:$0x1] %v561_v8 }
 0x3c1   : > { %4413 = vst.msk [vmem:[#allocation3 + $0x94] sm:$0xf] %vm449_vm7, %v4214_v59  ;;  %v5552_v37 = vsel %vm2068_vm15, %v5550_v63, %v5551_v51  ;;  %v5378_v20 = vrot.slane %v5376_v44, 1 }
 0x3c2   : > { %4416 = vst [vmem:[#allocation3 + $0x98] sm:$0x1] %v4415_v53  ;;  %v4217_v48 = vshrl.u32 %v4004_v35, 16  ;;  %v3905_v42 = vmul.f32 %v9416_v23, %v3869_v17  ;;  %5588 = vrot.lane.b32.xlu1 %v5552_v37, %s7625_s16  ;;  %v4220_v13 = vshll.u32 %v4004_v35, 16 }
 0x3c3   : > { %v5379_v41 = vsel %vm1795_vm0, %v5374_v27, %v5378_v20 }
 0x3c4   : > { %v4219_v62 = vrot.slane %v4217_v48, 7  ;;  %v3941_v28 = vadd.f32 %v9424_v49, %v3905_v42  ;;  %5460 = vrot.lane.b32.xlu0 %v5379_v41, %s7623_s11  ;;  %v3829_v22 = vpop.f32.mrf.mxu2 }
 0x3c5   : > { %v3083_v4 = vpop.f32.mrf.mxu1 }
 0x3c6   : > { %v4222_v10 = vor.u32 %v4220_v13, %v4219_v62  ;;  %v3973_v33 = vmax.f32 %v3941_v28, 0.0  ;;  %v3084_v11 = vadd.f32 %v3083_v4, %v10574_v50  ;;  %v4223_v55 = vrot.slane %v4219_v62, 4  ;;  %v10576_v50 = vld [vmem:[#allocation9_spill] sm:$0xff] }
 0x3c8   : > { %v4418_v57 = vsel %vm7756_vm8, %v4222_v10, %v4417_v47  ;;  %v4005_v19 = vpack.c.bf16 %v3973_v33, %v3973_v33  ;;  %v3870_v18 = vadd.f32 %v3829_v22, %v3084_v11  ;;  %v7395_v15 = vld [vmem:[#allocation3 + $0x90] sm:$0xf0]  ;;  %v4424_v47 = vld [vmem:[#allocation3 + $0xa8] sm:$0xf] }
 0x3c9   : > { %v9446_v39 = vld [vmem:[#allocation3 + $0x90] sm:$0xff]   ;;  %4419 = vst [vmem:[#allocation3 + $0x9c] sm:$0xf] %v4418_v57  ;;  %v5099_v2 = vld [vmem:[#allocation3 + $0x98] sm:$0x1]  ;;  %v7397_v30 = vor.u32 %v7396_v56, %v7395_v15 }
 0x3ca   : > { %v5383_v6 = vshll.u32 %v9446_v39, 16  ;;  %v4225_v24 = vshrl.u32 %v4005_v19, 16  ;;  %v3906_v61 = vmul.f32 %v9416_v23, %v3870_v18  ;;  %v5227_v14 = vunpack.c.l.b16 %v5099_v2 }
 0x3cb   : > { %v4228_v38 = vshll.u32 %v4005_v19, 16  ;;  %v5553_v51 = vrot.slane %v7397_v30, 1  ;;  %v5381_v5 = vshrl.u32 %v9446_v39, 16 }
 0x3cc   : > { %v4227_v40 = vrot.slane %v4225_v24, 7  ;;  %v3942_v32 = vadd.f32 %v9424_v49, %v3906_v61  ;;  %v3831_v46 = vpop.f32.mrf.mxu2  ;;  %v5243_v7 = vpack.c.b16 %v5227_v14, %v5227_v14  ;;  %v5385_v43 = vrot.slane %v5383_v6, 1  ;;  %v563_v61 = vld [vmem:[#allocation3 + $0xc8] sm:$0x1] }
 0x3cd   : > { %v3085_v63 = vpop.f32.mrf.mxu1  ;;  %v564_v8 = vsel %vm8782_vm14, 0, %v563_v61 }
 0x3ce   : > { %v4230_v26 = vor.u32 %v4228_v38, %v4227_v40  ;;  %v4232_v36 = vrot.slane %v4227_v40, 4  ;;  %v3974_v60 = vmax.f32 %v3942_v32, 0.0  ;;  %v3086_v0 = vadd.f32 %v3085_v63, %v10575_v3  ;;  %565 = vst [vmem:[#allocation3 + $0xc8] sm:$0x1] %v564_v8 }
 0x3cf   : > { %v5554_v34 = vrot.slane %v5243_v7, 1  ;;  %v5388_v44 = vshll.u32 %v5243_v7, 16  ;;  %v5386_v27 = vor.u32 %v5385_v43, %v5381_v5 }
 0x3d0   : > { %v4231_v59 = vsel %vm7699_vm2, %v4223_v55, %v4230_v26  ;;  %v4422_v53 = vsel %vm7767_vm10, %v4232_v36, %v4421_v31  ;;  %v4006_v35 = vpack.c.bf16 %v3974_v60, %v3974_v60  ;;  %v3871_v17 = vadd.f32 %v3831_v46, %v3086_v0  ;;  %v7596_v57 = vld [vmem:[#allocation3 + $0x9c] sm:$0xe]  ;;  %v4428_v31 = vld [vmem:[#allocation3 + $0xb0] sm:$0x1]  ;;  %v10577_v0 = vld [vmem:[#allocation10_spill] sm:$0xff] }
 0x3d1   : > { %4420 = vst.msk [vmem:[#allocation3 + $0xa0] sm:$0xf] %vm449_vm7, %v4231_v59  ;;  %v5555_v37 = vsel %vm2068_vm15, %v5553_v51, %v5554_v34  ;;  %v5390_v20 = vrot.slane %v5388_v44, 1 }
 0x3d2   : > { %4423 = vst [vmem:[#allocation3 + $0xa4] sm:$0x1] %v4422_v53  ;;  %v4234_v48 = vshrl.u32 %v4006_v35, 16  ;;  %v3907_v42 = vmul.f32 %v9416_v23, %v3871_v17  ;;  %5590 = vrot.lane.b32.xlu0 %v5555_v37, %s7625_s16  ;;  %v4237_v13 = vshll.u32 %v4006_v35, 16 }
 0x3d3   : > { %v5391_v41 = vsel %vm1795_vm0, %v5386_v27, %v5390_v20 }
 0x3d4   : > { %v4236_v62 = vrot.slane %v4234_v48, 7  ;;  %v3943_v28 = vadd.f32 %v9424_v49, %v3907_v42  ;;  %5462 = vrot.lane.b32.xlu2 %v5391_v41, %s7623_s11  ;;  %v3834_v22 = vpop.f32.mrf.mxu2 }
 0x3d5   : > { %v3088_v4 = vpop.f32.mrf.mxu1 }
 0x3d6   : > { %v4239_v10 = vor.u32 %v4237_v13, %v4236_v62  ;;  %v3975_v33 = vmax.f32 %v3943_v28, 0.0  ;;  %v3089_v11 = vadd.f32 %v3088_v4, %v10576_v50  ;;  %v4240_v55 = vrot.slane %v4236_v62, 4 }
 0x3d8   : > { %v4425_v19 = vsel %vm7756_vm8, %v4239_v10, %v4424_v47  ;;  %v4007_v18 = vpack.c.bf16 %v3975_v33, %v3975_v33  ;;  %v3872_v15 = vadd.f32 %v3834_v22, %v3089_v11  ;;  %v9471_v2 = vld [vmem:[#allocation3 + $0x9c] sm:$0xff]   ;;  %v6984_v22 = vld [vmem:[%s10532_s5 + $0x8] sm:$0xf]  ;;  %v4431_v47 = vld [vmem:[#allocation3 + $0xb4] sm:$0xf] }
 0x3d9   : > { %v7595_v6 = vld [vmem:[#allocation3 + $0x9c] sm:$0xf0]  ;;  %4426 = vst [vmem:[#allocation3 + $0xa8] sm:$0xf] %v4425_v19  ;;  %v5100_v24 = vld [vmem:[#allocation3 + $0xa4] sm:$0x1]  ;;  %v6985_v33 = vor.u32 %v7053_v45, %v6984_v22 }
 0x3da   : > { %v4242_v56 = vshrl.u32 %v4007_v18, 16  ;;  %v3908_v14 = vmul.f32 %v9416_v23, %v3872_v15  ;;  %v5228_v54 = vunpack.c.l.b16 %v5100_v24  ;;  %v7597_v30 = vor.u32 %v7596_v57, %v7595_v6  ;;  %v10578_v57 = vld [vmem:[#allocation11_spill] sm:$0xff] }
 0x3db   : > { %v4245_v38 = vshll.u32 %v4007_v18, 16  ;;  %v5395_v26 = vshll.u32 %v9471_v2, 16  ;;  %v5393_v5 = vshrl.u32 %v9471_v2, 16  ;;  %v5707_v18 = vsel %vm5705_vm4, %v6985_v33, 0 }
 0x3dc   : > { %v4244_v40 = vrot.slane %v4242_v56, 7  ;;  %v3944_v32 = vadd.f32 %v9424_v49, %v3908_v14  ;;  %v3836_v46 = vpop.f32.mrf.mxu2  ;;  %v5244_v7 = vpack.c.b16 %v5228_v54, %v5228_v54  ;;  %v5556_v43 = vrot.slane %v7597_v30, 1  ;;  %7437 = vmatpush.bf16.msra.mxu3 %v5707_v18  ;;  %5716 = vmatpush.bf16.msrb.mxu2 %v5707_v18 }
 0x3dd   : > { %v3090_v63 = vpop.f32.mrf.mxu1  ;;  %v5397_v44 = vrot.slane %v5395_v26, 1 }
 0x3de   : > { %v4247_v36 = vor.u32 %v4245_v38, %v4244_v40  ;;  %v4249_v60 = vrot.slane %v4244_v40, 4  ;;  %v3976_v3 = vmax.f32 %v3944_v32, 0.0  ;;  %v3091_v51 = vadd.f32 %v3090_v63, %v10577_v0  ;;  %v460_v32 = vld [vmem:[#allocation3] sm:$0x1]  ;;  %v7052_v0 = vld [vmem:[%s10532_s5] sm:$0x30] }
 0x3df   : > { %v5557_v34 = vrot.slane %v5244_v7, 1  ;;  %v5400_v59 = vshll.u32 %v5244_v7, 16  ;;  %v5398_v20 = vor.u32 %v5397_v44, %v5393_v5  ;;  %v4435_v7 = vld [vmem:[#allocation3 + $0xbc] sm:$0x1] }
 0x3e0   : > { %v4248_v53 = vsel %vm7699_vm2, %v4240_v55, %v4247_v36  ;;  %v4429_v35 = vsel %vm7767_vm10, %v4249_v60, %v4428_v31  ;;  %v4008_v17 = vpack.c.bf16 %v3976_v3, %v3976_v3  ;;  %v3873_v37 = vadd.f32 %v3836_v46, %v3091_v51  ;;  %v7399_v56 = vld [vmem:[#allocation3 + $0xa8] sm:$0xe]  ;;  %v515_v46 = vld [vmem:[#allocation3 + $0x8] sm:$0x1] }
 0x3e1   : > { %4427 = vst.msk [vmem:[#allocation3 + $0xac] sm:$0xf] %vm449_vm7, %v4248_v53  ;;  %v5558_v27 = vsel %vm2068_vm15, %v5556_v43, %v5557_v34  ;;  %v5402_v48 = vrot.slane %v5400_v59, 1  ;;  %v461_v31 = vsel %vm7767_vm10, 0, %v460_v32  ;;  %v516_v63 = vsel %vm8782_vm14, 0, %v515_v46 }
 0x3e2   : > { %4430 = vst [vmem:[#allocation3 + $0xb0] sm:$0x1] %v4429_v35  ;;  %v4251_v42 = vshrl.u32 %v4008_v17, 16  ;;  %v3909_v41 = vmul.f32 %v9416_v23, %v3873_v37  ;;  %5592 = vrot.lane.b32.xlu2 %v5558_v27, %s7625_s16  ;;  %v4254_v16 = vshll.u32 %v4008_v17, 16  ;;  %v7004_v43 = vld [vmem:[%s10532_s5] sm:$0xf] }
 0x3e3   : > { %v5403_v62 = vsel %vm1795_vm0, %v5398_v20, %v5402_v48  ;;  %462 = vst [vmem:[#allocation3] sm:$0x1] %v461_v31  ;;  %v7005_v59 = vor.u32 %v7052_v0, %v7004_v43  ;;  %v10579_v37 = vld [vmem:[#allocation12_spill] sm:$0xff] }
 0x3e4   : > { %v4253_v13 = vrot.slane %v4251_v42, 7  ;;  %v3945_v28 = vadd.f32 %v9424_v49, %v3909_v41  ;;  %5464 = vrot.lane.b32.xlu1 %v5403_v62, %s7623_s11  ;;  %v3839_v4 = vpop.f32.mrf.mxu2  ;;  %517 = vst [vmem:[#allocation3 + $0x8] sm:$0x1] %v516_v63 }
 0x3e5   : > { %v3093_v10 = vpop.f32.mrf.mxu1 }
 0x3e6   : > { %v4256_v50 = vor.u32 %v4254_v16, %v4253_v13  ;;  %v3977_v11 = vmax.f32 %v3945_v28, 0.0  ;;  %v3094_v19 = vadd.f32 %v3093_v10, %v10578_v57  ;;  %v4257_v51 = vrot.slane %v4253_v13, 4 }
 0x3e7   : > { %v5836_v16 = vsel %vm5705_vm4, %v7005_v59, 0 }
 0x3e8   : > { %v4432_v15 = vsel %vm7756_vm8, %v4256_v50, %v4431_v47  ;;  %v4009_v6 = vpack.c.bf16 %v3977_v11, %v3977_v11  ;;  %v3874_v24 = vadd.f32 %v3839_v4, %v3094_v19  ;;  %v7398_v61 = vld [vmem:[#allocation3 + $0xa8] sm:$0xf0]  ;;  %5845 = vmatpush.bf16.msrb.mxu3 %v5836_v16 }
 0x3e9   : > { %v9501_v14 = vld [vmem:[#allocation3 + $0xa8] sm:$0xff]   ;;  %4433 = vst [vmem:[#allocation3 + $0xb4] sm:$0xf] %v4432_v15  ;;  %v5101_v54 = vld [vmem:[#allocation3 + $0xb0] sm:$0x1]  ;;  %v7400_v55 = vor.u32 %v7399_v56, %v7398_v61 }
 0x3ea   : > { %v5407_v30 = vshll.u32 %v9501_v14, 16  ;;  %v4259_v8 = vshrl.u32 %v4009_v6, 16  ;;  %v3910_v40 = vmul.f32 %v9416_v23, %v3874_v24  ;;  %v5229_v38 = vunpack.c.l.b16 %v5101_v54  ;;  %v4438_v15 = vld [vmem:[#allocation3 + $0xc0] sm:$0xf] }
 0x3eb   : > { %v4262_v36 = vshll.u32 %v4009_v6, 16  ;;  %v5405_v5 = vshrl.u32 %v9501_v14, 16  ;;  %v5559_v48 = vrot.slane %v7400_v55, 1  ;;  %v4477_v18 = vld [vmem:[#allocation3 + $0x8] sm:$0x1]  ;;  %v7152_v54 = vld [vmem:[#allocation3] sm:$0xff]  }
 0x3ec   : > { %v4261_v26 = vrot.slane %v4259_v8, 7  ;;  %v3946_v60 = vadd.f32 %v9424_v49, %v3910_v40  ;;  %v5245_v3 = vpack.c.b16 %v5229_v38, %v5229_v38  ;;  %v5409_v44 = vrot.slane %v5407_v30, 1  ;;  %v3841_v20 = vpop.f32.mrf.mxu2 }
 0x3ed   : > { %v3095_v34 = vpop.f32.mrf.mxu1  ;;  %v4605_v24 = vunpack.c.l.b16 %v4477_v18  ;;  %v4638_v31 = vshrl.u32 %v7152_v54, 16 }
 0x3ee   : > { %v4264_v53 = vor.u32 %v4262_v36, %v4261_v26  ;;  %v4266_v35 = vrot.slane %v4261_v26, 4  ;;  %v3978_v17 = vmax.f32 %v3946_v60, 0.0  ;;  %v3096_v27 = vadd.f32 %v3095_v34, %v10579_v37  ;;  %v4442_v60 = vld [vmem:[#allocation3 + $0xc8] sm:$0x1] }
 0x3ef   : > { %v5560_v42 = vrot.slane %v5245_v3, 1  ;;  %v5412_v41 = vshll.u32 %v5245_v3, 16  ;;  %v5410_v47 = vor.u32 %v5409_v44, %v5405_v5  ;;  %v9534_v32 = vpack.c.b16 %v4605_v24, %v4605_v24 }
 0x3f0   : > { %v4265_v62 = vsel %vm7699_vm2, %v4257_v51, %v4264_v53  ;;  %v4436_v13 = vsel %vm7767_vm10, %v4266_v35, %v4435_v7  ;;  %v4010_v28 = vpack.c.bf16 %v3978_v17, %v3978_v17  ;;  %v3875_v22 = vadd.f32 %v3841_v20, %v3096_v27  ;;  %v7599_v6 = vld [vmem:[#allocation3 + $0xb4] sm:$0xe]  ;;  %v5960_v17 = vld [vmem:[#allocation3 + $0x20] sm:$0x1] }
 0x3f1   : > { %4434 = vst.msk [vmem:[#allocation3 + $0xb8] sm:$0xf] %vm449_vm7, %v4265_v62  ;;  %v5561_v45 = vsel %vm2068_vm15, %v5559_v48, %v5560_v42  ;;  %v5414_v4 = vrot.slane %v5412_v41, 1  ;;  %v4645_v51 = vshll.u32 %v9534_v32, 16  ;;  %v9544_v48 = vld [vmem:[#allocation3 + $0x24] sm:$0xff]   ;;  %v6088_v25 = vunpack.c.l.b16 %v5960_v17 }
 0x3f2   : > { %4437 = vst [vmem:[#allocation3 + $0xbc] sm:$0x1] %v4436_v13  ;;  %v4268_v10 = vshrl.u32 %v4010_v28, 16  ;;  %v3911_v33 = vmul.f32 %v9416_v23, %v3875_v22  ;;  %5594 = vrot.lane.b32.xlu1 %v5561_v45, %s7625_s16  ;;  %v4271_v57 = vshll.u32 %v4010_v28, 16  ;;  %v9546_v42 = vld [vmem:[#allocation3 + $0x24] sm:$0xf0] }
 0x3f3   : > { %v5415_v50 = vsel %vm1795_vm0, %v5410_v47, %v5414_v4  ;;  %v4647_v62 = vrot.slane %v4645_v51, 1  ;;  %v7026_v28 = vld [vmem:[%s10532_s5 + $0x10] sm:$0xf]  ;;  %v7054_v22 = vld [vmem:[%s10532_s5 + $0x10] sm:$0x30]  ;;  %v6104_v18 = vpack.c.b16 %v6088_v25, %v6088_v25  ;;  %v6133_v25 = vshrl.u32 %v9544_v48, 16 }
 0x3f4   : > { %v4270_v11 = vrot.slane %v4268_v10, 7  ;;  %v3947_v19 = vadd.f32 %v9424_v49, %v3911_v33  ;;  %5466 = vrot.lane.b32.xlu0 %v5415_v50, %s7623_s11  ;;  %v4640_v49 = vshll.u32 %v7152_v54, 16  ;;  %v7027_v47 = vor.u32 %v7054_v22, %v7026_v28  ;;  %v7411_v50 = vld [vmem:[#allocation3 + $0x18] sm:$0xf0] }
 0x3f6   : > { %v4273_v61 = vor.u32 %v4271_v57, %v4270_v11  ;;  %v3979_v56 = vmax.f32 %v3947_v19, 0.0  ;;  %v4274_v63 = vrot.slane %v4270_v11, 4  ;;  %v4642_v0 = vrot.slane %v4640_v49, 1  ;;  %v5961_v11 = vld [vmem:[#allocation3 + $0x2c] sm:$0x1] }
 0x3f7   : > { %v6577_v4 = vsel %vm5705_vm4, %v7027_v47, 0 }
 0x3f8   : > { %v4439_v23 = vsel %vm7756_vm8, %v4273_v61, %v4438_v15  ;;  %v4011_v30 = vpack.c.bf16 %v3979_v56, %v3979_v56  ;;  %v9532_v8 = vld [vmem:[#allocation3 + $0xb4] sm:$0xff]   ;;  %v4643_v13 = vor.u32 %v4642_v0, %v4638_v31  ;;  %6586 = vmatpush.bf16.msrb.mxu0 %v6577_v4 }
 0x3f9   : > { %v7598_v40 = vld [vmem:[#allocation3 + $0xb4] sm:$0xf0]  ;;  %4440 = vst [vmem:[#allocation3 + $0xc0] sm:$0xf] %v4439_v23  ;;  %v5102_v38 = vld [vmem:[#allocation3 + $0xbc] sm:$0x1] }
 0x3fa   : > { %v4276_v46 = vshrl.u32 %v4011_v30, 16  ;;  %v5230_v7 = vunpack.c.l.b16 %v5102_v38  ;;  %v7600_v55 = vor.u32 %v7599_v6, %v7598_v40  ;;  %v4279_v26 = vshll.u32 %v4011_v30, 16  ;;  %v7412_v6 = vld [vmem:[#allocation3 + $0x18] sm:$0xe] }
 0x3fb   : > { %v5419_v3 = vshll.u32 %v9532_v8, 16  ;;  %v5417_v53 = vshrl.u32 %v9532_v8, 16  ;;  %v4648_v33 = vsel %vm1795_vm0, %v4643_v13, %v4647_v62  ;;  %v7413_v56 = vor.u32 %v7412_v6, %v7411_v50  ;;  %v4479_v62 = vld [vmem:[#allocation3 + $0x20] sm:$0x1] }
 0x3fc   : > { %v4278_v43 = vrot.slane %v4276_v46, 7  ;;  %v5246_v36 = vpack.c.b16 %v5230_v7, %v5230_v7  ;;  %v5562_v12 = vrot.slane %v7600_v55, 1  ;;  %v6089_v40 = vunpack.c.l.b16 %v5961_v11  ;;  %v9570_v46 = vld [vmem:[#allocation3 + $0xc] sm:$0xf0] }
 0x3fd   : > { %v5421_v35 = vrot.slane %v5419_v3, 1  ;;  %v6393_v7 = vrot.slane %v6104_v18, 1  ;;  %v6135_v55 = vshll.u32 %v9544_v48, 16  ;;  %v4910_v50 = vrot.slane %v9534_v32, 1 }
 0x3fe   : > { %v4281_v34 = vor.u32 %v4279_v26, %v4278_v43  ;;  %v4283_v5 = vrot.slane %v4278_v43, 4  ;;  %v5563_v44 = vrot.slane %v5246_v36, 1  ;;  %v5424_v59 = vshll.u32 %v5246_v36, 16  ;;  %v9573_v43 = vld [vmem:[#allocation3 + $0x18] sm:$0xff]   ;;  %v5457_v4 = vpop.permute.xlu2 %5456 }
 0x3ff   : > { %v5422_v41 = vor.u32 %v5421_v35, %v5417_v53  ;;  %v6392_v26 = vrot.slane %v7413_v56, 1  ;;  %v9575_v36 = vpack.c.b16 %v6089_v40, %v6089_v40  ;;  %v4607_v11 = vunpack.c.l.b16 %v4479_v62 }
 0x400   : > { %v4282_v37 = vsel %vm7699_vm2, %v4274_v63, %v4281_v34  ;;  %v4443_v27 = vsel %vm7767_vm10, %v4283_v5, %v4442_v60  ;;  %v5564_v20 = vsel %vm2068_vm15, %v5562_v12, %v5563_v44  ;;  %v5426_v16 = vrot.slane %v5424_v59, 1  ;;  %v7402_v23 = vld [vmem:[#allocation3 + $0xc0] sm:$0xe]  ;;  %v7348_v60 = vld [vmem:[#allocation3] sm:$0xf0] }
 0x401   : > { %4441 = vst.msk [vmem:[#allocation3 + $0xc4] sm:$0xf] %vm449_vm7, %v4282_v37  ;;  %5596 = vrot.lane.b32.xlu0 %v5564_v20, %s7625_s16  ;;  %vm4989_vm2 = vcmask 31744   ;;  %v7349_v12 = vld [vmem:[#allocation3] sm:$0xe]  ;;  %v6394_v5 = vsel %vm2068_vm15, %v6392_v26, %v6393_v7  ;;  %v6137_v44 = vrot.slane %v6135_v55, 1 }
 0x402   : > { %4444 = vst [vmem:[#allocation3 + $0xc8] sm:$0x1] %v4443_v27  ;;  %v5427_v45 = vsel %vm1795_vm0, %v5422_v41, %v5426_v16  ;;  %v6123_v59 = vshll.u32 %v9573_v43, 16  ;;  %v7350_v37 = vor.u32 %v7349_v12, %v7348_v60  ;;  %v4478_v27 = vld [vmem:[#allocation3 + $0x14] sm:$0x1]  ;;  %v9581_v20 = vld [vmem:[#allocation3 + $0x24] sm:$0xff]   ;;  %v5617_v56 = vsel %vm4989_vm2, %v9361_v58, %v5457_v4 }
 0x403   : > { %5468 = vrot.lane.b32.xlu2 %v5427_v45, %s7623_s11  ;;  %v9583_v41 = vld [vmem:[#allocation3 + $0x24] sm:$0xf0]  ;;  %v6128_v16 = vshll.u32 %v6104_v18, 16  ;;  %v6140_v28 = vshll.u32 %v9575_v36, 16  ;;  %v7517_v45 = vld [vmem:[#allocation3 + $0xc] sm:$0xe]  ;;  %v4606_v47 = vunpack.c.l.b16 %v4478_v27 }
 0x404   : > { %v5583_v57 = vpop.permute.xlu1 %5582  ;;  %v6125_v22 = vrot.slane %v6123_v59, 1  ;;  %v7352_v55 = vld [vmem:[#allocation3 + $0x18] sm:$0xe]  ;;  %v7518_v58 = vor.u32 %v7517_v45, %v9570_v46  ;;  %v4676_v60 = vshll.u32 %v9581_v20, 16 }
 0x405   : > { %v6130_v18 = vrot.slane %v6128_v16, 1  ;;  %v4674_v16 = vshrl.u32 %v9581_v20, 16 }
 0x406   : > { %v5455_v10 = vpop.permute.xlu0 %5454 }
 0x407   : > { %v5615_v19 = vsel %vm4989_vm2, %v9336_v29, %v5455_v10  ;;  %v9568_v29 = vld [vmem:[#allocation3 + $0xc] sm:$0xff]   ;;  %v6138_v10 = vor.u32 %v6137_v44, %v6133_v25  ;;  %v7520_v44 = vld [vmem:[#allocation3 + $0x24] sm:$0xe]  ;;  %v9617_v25 = vld [vmem:[#allocation3 + $0x3c] sm:$0xff]  }
 0x408   : > { %v5647_v15 = vsel %vm2149_vm13, %v5615_v19, %v5583_v57  ;;  %v7401_v24 = vld [vmem:[#allocation3 + $0xc0] sm:$0xf0]  ;;  %v6121_v19 = vshrl.u32 %v9573_v43, 16  ;;  %v4652_v6 = vshll.u32 %v9568_v29, 16 }
 0x409   : > { %v9563_v61 = vld [vmem:[#allocation3 + $0xc0] sm:$0xff]   ;;  %6993 = vmatmul.msk.bf16.vlgmr.msra.gmra.mxu3 %vm5672_vm5, %v5647_v15  ;;  %4829 = vrot.lane.b32.xlu0 %v4648_v33, %s7623_s11  ;;  %v5103_v54 = vld [vmem:[#allocation3 + $0xc8] sm:$0x1]  ;;  %v7403_v49 = vor.u32 %v7402_v23, %v7401_v24  ;;  %v4909_v33 = vrot.slane %v7350_v37, 1  ;;  %v6142_v15 = vrot.slane %v6140_v28, 1 }
 0x40a   : > { %v5431_v30 = vshll.u32 %v9563_v61, 16  ;;  %v5231_v38 = vunpack.c.l.b16 %v5103_v54  ;;  %v5429_v51 = vshrl.u32 %v9563_v61, 16  ;;  %v4480_v24 = vld [vmem:[#allocation3 + $0x2c] sm:$0x1]  ;;  %v9596_v54 = vor.u32 %v6125_v22, %v6121_v19  ;;  %v7351_v23 = vld [vmem:[#allocation3 + $0x18] sm:$0xf0] }
 0x40b   : > { %v5565_v3 = vrot.slane %v7403_v49, 1  ;;  %v6143_v32 = vsel %vm1795_vm0, %v6138_v10, %v6142_v15  ;;  %v4623_v49 = vpack.c.b16 %v4607_v11, %v4607_v11  ;;  %v4654_v26 = vrot.slane %v4652_v6, 1  ;;  %v7601_v28 = vld [vmem:[#allocation3 + $0x3c] sm:$0xf0]  ;;  %v5963_v22 = vld [vmem:[#allocation3 + $0x44] sm:$0x1] }
 0x40c   : > { %v5247_v31 = vpack.c.b16 %v5231_v38, %v5231_v38  ;;  %v5433_v63 = vrot.slane %v5431_v30, 1  ;;  %v4622_v30 = vpack.c.b16 %v4606_v47, %v4606_v47  ;;  %v4911_v38 = vsel %vm2068_vm15, %v4909_v33, %v4910_v50  ;;  %v7602_v33 = vld [vmem:[#allocation3 + $0x3c] sm:$0xe]  ;;  %v7404_v11 = vld [vmem:[#allocation3 + $0x30] sm:$0xff]  }
 0x40d   : > { %v6131_v7 = vsel %vm1795_vm0, %v9596_v54, %v6130_v18  ;;  %v4916_v12 = vrot.slane %v4623_v49, 1  ;;  %v7521_v47 = vor.u32 %v7520_v44, %v9546_v42  ;;  %v6091_v50 = vunpack.c.l.b16 %v5963_v22  ;;  %v5964_v18 = vld [vmem:[#allocation3 + $0x50] sm:$0x1]  ;;  %v9645_v22 = vld [vmem:[#allocation3 + $0x3c] sm:$0xff]  }
 0x40e   : > { %v5566_v0 = vrot.slane %v5247_v31, 1  ;;  %v5436_v34 = vshll.u32 %v5247_v31, 16  ;;  %v5434_v35 = vor.u32 %v5433_v63, %v5429_v51  ;;  %v4608_v31 = vunpack.c.l.b16 %v4480_v24 }
 0x40f   : > { %v7353_v63 = vor.u32 %v7352_v55, %v7351_v23  ;;  %v4912_v51 = vrot.slane %v7518_v58, 1  ;;  %v6395_v6 = vrot.slane %v7521_v47, 1  ;;  %v6396_v24 = vrot.slane %v9575_v36, 1  ;;  %v5587_v23 = vpop.permute.xlu2 %5586  ;;  %v7415_v58 = vld [vmem:[#allocation3 + $0x30] sm:$0xe] }
 0x410   : > { %v5567_v53 = vsel %vm2068_vm15, %v5565_v3, %v5566_v0  ;;  %v5438_v17 = vrot.slane %v5436_v34, 1  ;;  %v4650_v3 = vshrl.u32 %v9568_v29, 16  ;;  %v4657_v0 = vshll.u32 %v4622_v30, 16  ;;  %v4482_v47 = vld [vmem:[#allocation3 + $0x44] sm:$0x1] }
 0x411   : > { %6440 = vrot.lane.b32.xlu0 %v6394_v5, %s7625_s16  ;;  %5598 = vrot.lane.b32.xlu2 %v5567_v53, %s7625_s16  ;;  %v4913_v34 = vrot.slane %v4622_v30, 1  ;;  %v9610_v5 = vpack.c.b16 %v4608_v31, %v4608_v31  ;;  %v4915_v59 = vrot.slane %v7353_v63, 1  ;;  %v4678_v53 = vrot.slane %v4676_v60, 1 }
 0x412   : > { %v5439_v13 = vsel %vm1795_vm0, %v5434_v35, %v5438_v17  ;;  %v4655_v46 = vor.u32 %v4654_v26, %v4650_v3  ;;  %v5962_v35 = vld [vmem:[#allocation3 + $0x38] sm:$0x1]  ;;  %v4659_v37 = vrot.slane %v4657_v0, 1  ;;  %v6092_v55 = vunpack.c.l.b16 %v5964_v18  ;;  %v7405_v26 = vld [vmem:[#allocation3 + $0x48] sm:$0xff]  }
 0x413   : > { %5470 = vrot.lane.b32.xlu1 %v5439_v13, %s7623_s11  ;;  %v4917_v17 = vsel %vm2068_vm15, %v4915_v59, %v4916_v12  ;;  %v4914_v27 = vsel %vm2068_vm15, %v4912_v51, %v4913_v34  ;;  %v4681_v62 = vshll.u32 %v9610_v5, 16  ;;  %v4669_v13 = vshll.u32 %v4623_v49, 16  ;;  %v7523_v51 = vld [vmem:[#allocation3 + $0x24] sm:$0xe] }
 0x414   : > { %v5585_v57 = vpop.permute.xlu0 %5584  ;;  %v4660_v45 = vsel %vm1795_vm0, %v4655_v46, %v4659_v37  ;;  %v6090_v4 = vunpack.c.l.b16 %v5962_v35  ;;  %v4679_v10 = vor.u32 %v4678_v53, %v4674_v16  ;;  %v7603_v49 = vor.u32 %v7602_v33, %v7601_v28 }
 0x415   : > { %v5649_v40 = vsel %vm2149_vm13, %v5617_v56, %v5585_v57  ;;  %v4683_v57 = vrot.slane %v4681_v62, 1  ;;  %v4671_v19 = vrot.slane %v4669_v13, 1  ;;  %v9635_v0 = vpack.c.b16 %v6092_v55, %v6092_v55 }
 0x416   : > { %v6106_v56 = vpack.c.b16 %v6090_v4, %v6090_v4  ;;  %v6401_v60 = vrot.slane %v7603_v49, 1  ;;  %v6159_v44 = vshll.u32 %v9617_v25, 16  ;;  %v6145_v59 = vshrl.u32 %v7404_v11, 16 }
 0x417   : > { %v4684_v42 = vsel %vm1795_vm0, %v4679_v10, %v4683_v57  ;;  %v4672_v36 = vsel %vm1795_vm0, %v9596_v54, %v4671_v19  ;;  %v6171_v53 = vshll.u32 %v7405_v26, 16  ;;  %v6176_v16 = vshll.u32 %v9635_v0, 16  ;;  %v7605_v57 = vld [vmem:[#allocation3 + $0x3c] sm:$0xe] }
 0x418   : > { %v6152_v31 = vshll.u32 %v6106_v56, 16  ;;  %v6399_v34 = vrot.slane %v6106_v56, 1  ;;  %v6161_v13 = vrot.slane %v6159_v44, 1  ;;  %v7524_v28 = vor.u32 %v7523_v51, %v9583_v41 }
 0x419   : > { %6994 = vmatmul.msk.bf16.gmra.mxu3 %vm5672_vm5, %v5649_v40  ;;  %6314 = vrot.lane.b32.xlu0 %v6143_v32, %s7623_s11  ;;  %v6147_v40 = vshll.u32 %v7404_v11, 16  ;;  %v6173_v10 = vrot.slane %v6171_v53, 1  ;;  %v6169_v19 = vshrl.u32 %v7405_v26, 16  ;;  %v6178_v18 = vrot.slane %v6176_v16, 1 }
 0x41a   : > { %6312 = vrot.lane.b32.xlu2 %v6131_v7, %s7623_s11  ;;  %v7414_v7 = vld [vmem:[#allocation3 + $0x30] sm:$0xf0]  ;;  %v6154_v46 = vrot.slane %v6152_v31, 1  ;;  %v4610_v41 = vunpack.c.l.b16 %v4482_v47  ;;  %v9674_v47 = vld [vmem:[#allocation3 + $0x6c] sm:$0xf0] }
 0x41b   : > { %4957 = vrot.lane.b32.xlu1 %v4911_v38, %s7625_s16  ;;  %v6107_v38 = vpack.c.b16 %v6091_v50, %v6091_v50  ;;  %v7416_v63 = vor.u32 %v7415_v58, %v7414_v7  ;;  %v6149_v3 = vrot.slane %v6147_v40, 1  ;;  %v6157_v50 = vshrl.u32 %v9617_v25, 16  ;;  %v7354_v58 = vld [vmem:[#allocation3 + $0x30] sm:$0xf0] }
 0x41d   : > { %v6402_v12 = vrot.slane %v6107_v38, 1  ;;  %v6398_v35 = vrot.slane %v7416_v63, 1  ;;  %v6164_v11 = vshll.u32 %v6107_v38, 16 }
 0x41f   : > { %v6403_v37 = vsel %vm2068_vm15, %v6401_v60, %v6402_v12  ;;  %v6400_v62 = vsel %vm2068_vm15, %v6398_v35, %v6399_v34  ;;  %v6166_v49 = vrot.slane %v6164_v11, 1  ;;  %v9665_v12 = vld [vmem:[#allocation3 + $0x54] sm:$0xff]   ;;  %v4698_v11 = vshrl.u32 %v9645_v22, 16 }
 0x421   : > { %4961 = vrot.lane.b32.xlu0 %v4917_v17, %s7625_s16  ;;  %v4481_v17 = vld [vmem:[#allocation3 + $0x38] sm:$0x1] }
 0x422   : > { %4959 = vrot.lane.b32.xlu2 %v4914_v27, %s7625_s16  ;;  %v9639_v27 = vor.u32 %v6149_v3, %v6145_v59  ;;  %v4609_v33 = vunpack.c.l.b16 %v4481_v17  ;;  %v7525_v3 = vld [vmem:[#allocation3 + $0x54] sm:$0xf0]  ;;  %v4700_v59 = vshll.u32 %v9645_v22, 16 }
 0x423   : > { %4831 = vrot.lane.b32.xlu1 %v4660_v45, %s7623_s11  ;;  %v7604_v45 = vld [vmem:[#allocation3 + $0x3c] sm:$0xf0] }
 0x424   : > { %v6155_v4 = vsel %vm1795_vm0, %v9639_v27, %v6154_v46 }
 0x426   : > { %v5459_v15 = vpop.permute.xlu1 %5458 }
 0x427   : > { %v5619_v30 = vsel %vm4989_vm2, %v9386_v52, %v5459_v15  ;;  %v6397_v52 = vsel %vm2068_vm15, %v6395_v6, %v6396_v24  ;;  %v4483_v15 = vld [vmem:[#allocation3 + $0x50] sm:$0x1]  ;;  %v6162_v6 = vor.u32 %v6161_v13, %v6157_v50  ;;  %v4918_v24 = vrot.slane %v7524_v28, 1  ;;  %v5966_v13 = vld [vmem:[#allocation3 + $0x68] sm:$0x1] }
 0x428   : > { %v5651_v32 = vsel %vm2149_vm13, %v5619_v30, %v5587_v23  ;;  %v6174_v23 = vor.u32 %v6173_v10, %v6169_v19  ;;  %v4919_v30 = vrot.slane %v9610_v5, 1  ;;  %v4611_v7 = vunpack.c.l.b16 %v4483_v15  ;;  %v5965_v28 = vld [vmem:[#allocation3 + $0x5c] sm:$0x1] }
 0x429   : > { %6995 = vmatmul.msk.bf16.gmra.mxu3 %vm5672_vm5, %v5651_v32  ;;  %4835 = vrot.lane.b32.xlu0 %v4684_v42, %s7623_s11  ;;  %v4625_v42 = vpack.c.b16 %v4609_v33, %v4609_v33  ;;  %v6167_v31 = vsel %vm1795_vm0, %v6162_v6, %v6166_v49  ;;  %v7418_v33 = vld [vmem:[#allocation3 + $0x48] sm:$0xe]  ;;  %v6093_v15 = vunpack.c.l.b16 %v5965_v28  ;;  %v7420_v49 = vld [vmem:[#allocation3 + $0x60] sm:$0xf0] }
 0x42a   : > { %4833 = vrot.lane.b32.xlu2 %v4672_v36, %s7623_s11  ;;  %v6179_v38 = vsel %vm1795_vm0, %v6174_v23, %v6178_v18  ;;  %v4626_v36 = vpack.c.b16 %v4610_v41, %v4610_v41  ;;  %v4920_v5 = vsel %vm2068_vm15, %v4918_v24, %v4919_v30  ;;  %v9663_v60 = vpack.c.b16 %v4611_v7, %v4611_v7  ;;  %v7526_v41 = vld [vmem:[#allocation3 + $0x54] sm:$0xe]  ;;  %v5967_v7 = vld [vmem:[#allocation3 + $0x74] sm:$0x1] }
 0x42b   : > { %6442 = vrot.lane.b32.xlu1 %v6397_v52, %s7625_s16  ;;  %v7606_v52 = vor.u32 %v7605_v57, %v7604_v45  ;;  %v4693_v63 = vshll.u32 %v4625_v42, 16  ;;  %v4922_v44 = vrot.slane %v4625_v42, 1  ;;  %v9672_v45 = vld [vmem:[#allocation3 + $0x6c] sm:$0xff]   ;;  %v6094_v18 = vunpack.c.l.b16 %v5966_v13 }
 0x42c   : > { %v4925_v34 = vrot.slane %v4626_v36, 1  ;;  %v4717_v35 = vshll.u32 %v9663_v60, 16  ;;  %v4705_v10 = vshll.u32 %v4626_v36, 16  ;;  %v6405_v30 = vrot.slane %v9635_v0, 1  ;;  %v7421_v0 = vld [vmem:[#allocation3 + $0x60] sm:$0xe] }
 0x42d   : > { %v4924_v51 = vrot.slane %v7606_v52, 1  ;;  %v4695_v46 = vrot.slane %v4693_v63, 1  ;;  %v6183_v42 = vshll.u32 %v9665_v12, 16  ;;  %v6109_v36 = vpack.c.b16 %v6093_v15, %v6093_v15  ;;  %v9694_v63 = vld [vmem:[#allocation3 + $0x54] sm:$0xf0] }
 0x42e   : > { %v4719_v50 = vrot.slane %v4717_v35, 1  ;;  %v5463_v19 = vpop.permute.xlu2 %5462 }
 0x42f   : > { %v4926_v17 = vsel %vm2068_vm15, %v4924_v51, %v4925_v34  ;;  %v6181_v51 = vshrl.u32 %v9665_v12, 16  ;;  %v6188_v34 = vshll.u32 %v6109_v36, 16 }
 0x431   : > { %6446 = vrot.lane.b32.xlu0 %v6403_v37, %s7625_s16  ;;  %v7417_v37 = vld [vmem:[#allocation3 + $0x48] sm:$0xf0]  ;;  %v6190_v13 = vrot.slane %v6188_v34, 1 }
 0x432   : > { %6444 = vrot.lane.b32.xlu2 %v6400_v62, %s7625_s16  ;;  %v4702_v62 = vrot.slane %v4700_v59, 1  ;;  %v7419_v57 = vor.u32 %v7418_v33, %v7417_v37 }
 0x433   : > { %6316 = vrot.lane.b32.xlu1 %v6155_v4, %s7623_s11  ;;  %v4696_v4 = vsel %vm1795_vm0, %v9639_v27, %v4695_v46  ;;  %v5623_v27 = vsel %vm4989_vm2, %v9446_v39, %v5463_v19  ;;  %v6408_v46 = vrot.slane %v6109_v36, 1  ;;  %v9706_v19 = vld [vmem:[#allocation3 + $0x6c] sm:$0xf0]  ;;  %v4928_v36 = vrot.slane %v9663_v60, 1  ;;  %v7361_v60 = vld [vmem:[#allocation3 + $0x60] sm:$0xe] }
 0x434   : > { %v5589_v40 = vpop.permute.xlu1 %5588  ;;  %v4703_v24 = vor.u32 %v4702_v62, %v4698_v11  ;;  %v4485_v11 = vld [vmem:[#allocation3 + $0x68] sm:$0x1] }
 0x436   : > { %v5461_v56 = vpop.permute.xlu0 %5460 }
 0x437   : > { %v5621_v32 = vsel %vm4989_vm2, %v9411_v1, %v5461_v56  ;;  %v7355_v1 = vld [vmem:[#allocation3 + $0x30] sm:$0xe]  ;;  %v4707_v56 = vrot.slane %v4705_v10, 1 }
 0x438   : > { %v5653_v55 = vsel %vm2149_vm13, %v5621_v32, %v5589_v40  ;;  %v7356_v26 = vor.u32 %v7355_v1, %v7354_v58  ;;  %v4720_v40 = vsel %vm1795_vm0, %v6174_v23, %v4719_v50  ;;  %v6404_v32 = vrot.slane %v7419_v57, 1  ;;  %v9692_v1 = vld [vmem:[#allocation3 + $0x54] sm:$0xff]   ;;  %v7358_v50 = vld [vmem:[#allocation3 + $0x48] sm:$0xe]  ;;  %v9704_v57 = vld [vmem:[#allocation3 + $0x6c] sm:$0xff]  }
 0x439   : > { %6320 = vrot.lane.b32.xlu0 %v6179_v38, %s7623_s11  ;;  %6996 = vmatmul.msk.bf16.gmra.mxu3 %vm5672_vm5, %v5653_v55  ;;  %v6110_v55 = vpack.c.b16 %v6094_v18, %v6094_v18  ;;  %v4708_v52 = vsel %vm1795_vm0, %v4703_v24, %v4707_v56  ;;  %v7527_v58 = vor.u32 %v7526_v41, %v7525_v3  ;;  %v7406_v3 = vld [vmem:[#allocation3 + $0x60] sm:$0xff]   ;;  %v6205_v41 = vshrl.u32 %v9672_v45, 16 }
 0x43a   : > { %6318 = vrot.lane.b32.xlu2 %v6167_v31, %s7623_s11  ;;  %v4921_v53 = vrot.slane %v7356_v26, 1  ;;  %v6406_v39 = vsel %vm2068_vm15, %v6404_v32, %v6405_v30  ;;  %v7422_v23 = vor.u32 %v7421_v0, %v7420_v49  ;;  %v6185_v31 = vrot.slane %v6183_v42, 1 }
 0x43b   : > { %4963 = vrot.lane.b32.xlu1 %v4920_v5, %s7625_s16  ;;  %v6095_v5 = vunpack.c.l.b16 %v5967_v7  ;;  %v6411_v26 = vrot.slane %v6110_v55, 1  ;;  %v6407_v59 = vrot.slane %v7527_v58, 1  ;;  %v6195_v37 = vshll.u32 %v7406_v3, 16 }
 0x43c   : > { %v4923_v16 = vsel %vm2068_vm15, %v4921_v53, %v4922_v44  ;;  %v6207_v44 = vshll.u32 %v9672_v45, 16  ;;  %v6410_v53 = vrot.slane %v7422_v23, 1  ;;  %v6186_v35 = vor.u32 %v6185_v31, %v6181_v51  ;;  %v4486_v31 = vld [vmem:[#allocation3 + $0x74] sm:$0x1] }
 0x43d   : > { %v6409_v10 = vsel %vm2068_vm15, %v6407_v59, %v6408_v46  ;;  %v6200_v33 = vshll.u32 %v6110_v55, 16  ;;  %v6197_v24 = vrot.slane %v6195_v37, 1  ;;  %v4613_v42 = vunpack.c.l.b16 %v4485_v11 }
 0x43e   : > { %v6412_v62 = vsel %vm2068_vm15, %v6410_v53, %v6411_v26  ;;  %v6209_v28 = vrot.slane %v6207_v44, 1  ;;  %v6191_v18 = vsel %vm1795_vm0, %v6186_v35, %v6190_v13  ;;  %v4724_v49 = vshll.u32 %v9692_v1, 16 }
 0x43f   : > { %v6202_v32 = vrot.slane %v6200_v33, 1  ;;  %v4629_v51 = vpack.c.b16 %v4613_v42, %v4613_v42  ;;  %v4614_v46 = vunpack.c.l.b16 %v4486_v31  ;;  %v4722_v53 = vshrl.u32 %v9692_v1, 16 }
 0x440   : > { %v6210_v30 = vor.u32 %v6209_v28, %v6205_v41  ;;  %v4726_v44 = vrot.slane %v4724_v49, 1  ;;  %v9734_v41 = vld [vmem:[#allocation3 + $0xc] sm:$0xff]   ;;  %v4746_v42 = vshrl.u32 %v9704_v57, 16 }
 0x441   : > { %4967 = vrot.lane.b32.xlu0 %v4926_v17, %s7625_s16  ;;  %v9699_v17 = vpack.c.b16 %v6095_v5, %v6095_v5  ;;  %v4934_v37 = vrot.slane %v4629_v51, 1 }
 0x442   : > { %4965 = vrot.lane.b32.xlu2 %v4923_v16, %s7625_s16  ;;  %v7357_v16 = vld [vmem:[#allocation3 + $0x48] sm:$0xf0]  ;;  %v4727_v28 = vor.u32 %v4726_v44, %v4722_v53  ;;  %v7423_v44 = vld [vmem:[#allocation3 + $0x78] sm:$0xf0] }
 0x443   : > { %4837 = vrot.lane.b32.xlu1 %v4696_v4, %s7623_s11  ;;  %v4484_v4 = vld [vmem:[#allocation3 + $0x5c] sm:$0x1]  ;;  %v6212_v15 = vshll.u32 %v9699_v17, 16  ;;  %v6414_v31 = vrot.slane %v9699_v17, 1  ;;  %v7424_v17 = vld [vmem:[#allocation3 + $0x78] sm:$0xe] }
 0x444   : > { %v5591_v6 = vpop.permute.xlu0 %5590  ;;  %v4612_v56 = vunpack.c.l.b16 %v4484_v4  ;;  %v7532_v4 = vld [vmem:[#allocation3 + $0x6c] sm:$0xe] }
 0x445   : > { %v5655_v38 = vsel %vm2149_vm13, %v5623_v27, %v5591_v6  ;;  %v7359_v6 = vor.u32 %v7358_v50, %v7357_v16  ;;  %v7529_v27 = vld [vmem:[#allocation3 + $0x54] sm:$0xe]  ;;  %v4748_v16 = vshll.u32 %v9704_v57, 16  ;;  %v5968_v50 = vld [vmem:[#allocation3 + $0x80] sm:$0x1] }
 0x446   : > { %v4628_v23 = vpack.c.b16 %v4612_v56, %v4612_v56  ;;  %v6096_v49 = vunpack.c.l.b16 %v5968_v50 }
 0x447   : > { %v4927_v55 = vrot.slane %v7359_v6, 1  ;;  %v5088_v6 = vld [vmem:[#allocation3 + $0x14] sm:$0x1] }
 0x448   : > { %v4729_v35 = vshll.u32 %v4628_v23, 16  ;;  %v4931_v13 = vrot.slane %v4628_v23, 1 }
 0x449   : > { %4841 = vrot.lane.b32.xlu0 %v4720_v40, %s7623_s11  ;;  %6997 = vmatmul.msk.bf16.gmra.mxu3 %vm5672_vm5, %v5655_v38  ;;  %v6193_v40 = vshrl.u32 %v7406_v3, 16  ;;  %v6214_v38 = vrot.slane %v6212_v15, 1  ;;  %v4929_v3 = vsel %vm2068_vm15, %v4927_v55, %v4928_v36  ;;  %v7607_v15 = vld [vmem:[#allocation3 + $0xc] sm:$0xf0]  ;;  %v7407_v36 = vld [vmem:[#allocation3 + $0x78] sm:$0xff]  }
 0x44a   : > { %4839 = vrot.lane.b32.xlu2 %v4708_v52, %s7623_s11  ;;  %v5593_v52 = vpop.permute.xlu2 %5592  ;;  %v4731_v33 = vrot.slane %v4729_v35, 1  ;;  %v7425_v35 = vor.u32 %v7424_v17, %v7423_v44  ;;  %v7380_v44 = vld [vmem:[#allocation3 + $0x18] sm:$0xf0]  ;;  %v7381_v17 = vld [vmem:[#allocation3 + $0x18] sm:$0xe] }
 0x44b   : > { %6448 = vrot.lane.b32.xlu1 %v6406_v39, %s7625_s16  ;;  %v9717_v58 = vor.u32 %v6197_v24, %v6193_v40  ;;  %v7360_v39 = vld [vmem:[#allocation3 + $0x60] sm:$0xf0]  ;;  %v6215_v5 = vsel %vm1795_vm0, %v6210_v30, %v6214_v38  ;;  %v4741_v30 = vshll.u32 %v4629_v51, 16  ;;  %v7533_v40 = vor.u32 %v7532_v4, %v9674_v47 }
 0x44c   : > { %v7362_v59 = vor.u32 %v7361_v60, %v7360_v39  ;;  %v4732_v56 = vsel %vm1795_vm0, %v4727_v28, %v4731_v33  ;;  %v5251_v33 = vshll.u32 %v9734_v41, 16 }
 0x44d   : > { %v6203_v34 = vsel %vm1795_vm0, %v9717_v58, %v6202_v32  ;;  %v7608_v32 = vld [vmem:[#allocation3 + $0xc] sm:$0xe]  ;;  %v4743_v55 = vrot.slane %v4741_v30, 1  ;;  %v6413_v23 = vrot.slane %v7533_v40, 1  ;;  %v5089_v30 = vld [vmem:[#allocation3 + $0x20] sm:$0x1] }
 0x44e   : > { %v5969_v40 = vld [vmem:[#allocation3 + $0x8c] sm:$0x1] }
 0x451   : > { %6452 = vrot.lane.b32.xlu0 %v6412_v62, %s7625_s16 }
 0x452   : > { %6450 = vrot.lane.b32.xlu2 %v6409_v10, %s7625_s16  ;;  %v9731_v10 = vpack.c.b16 %v4614_v46, %v4614_v46  ;;  %v4744_v46 = vsel %vm1795_vm0, %v9717_v58, %v4743_v55  ;;  %v7535_v58 = vld [vmem:[#allocation3 + $0x6c] sm:$0xe] }
 0x453   : > { %6322 = vrot.lane.b32.xlu1 %v6191_v18, %s7623_s11  ;;  %v4750_v18 = vrot.slane %v4748_v16, 1  ;;  %v7537_v16 = vld [vmem:[#allocation3 + $0x84] sm:$0xf0] }
 0x455   : > { %v4751_v38 = vor.u32 %v4750_v18, %v4746_v42 }
 0x456   : > { %v5465_v7 = vpop.permute.xlu1 %5464 }
 0x457   : > { %v5625_v0 = vsel %vm4989_vm2, %v9471_v2, %v5465_v7  ;;  %v7530_v2 = vor.u32 %v7529_v27, %v9694_v63  ;;  %v4933_v63 = vrot.slane %v7362_v59, 1  ;;  %v4753_v27 = vshll.u32 %v9731_v10, 16 }
 0x458   : > { %v5657_v26 = vsel %vm2149_vm13, %v5625_v0, %v5593_v52  ;;  %v5216_v7 = vunpack.c.l.b16 %v5088_v6  ;;  %v4487_v52 = vld [vmem:[#allocation3 + $0x80] sm:$0x1] }
 0x459   : > { %6326 = vrot.lane.b32.xlu0 %v6215_v5, %s7623_s11  ;;  %6998 = vmatmul.msk.bf16.gmra.mxu3 %vm5672_vm5, %v5657_v26  ;;  %v4930_v62 = vrot.slane %v7530_v2, 1  ;;  %v4935_v11 = vsel %vm2068_vm15, %v4933_v63, %v4934_v37  ;;  %v4755_v39 = vrot.slane %v4753_v27, 1  ;;  %v6112_v5 = vpack.c.b16 %v6096_v49, %v6096_v49  ;;  %v9756_v37 = vld [vmem:[#allocation3 + $0x84] sm:$0xff]  }
 0x45a   : > { %6324 = vrot.lane.b32.xlu2 %v6203_v34, %s7623_s11  ;;  %v5232_v47 = vpack.c.b16 %v5216_v7, %v5216_v7  ;;  %v7609_v34 = vor.u32 %v7608_v32, %v7607_v15  ;;  %v4615_v59 = vunpack.c.l.b16 %v4487_v52  ;;  %v6416_v15 = vrot.slane %v7425_v35, 1  ;;  %v9766_v32 = vld [vmem:[#allocation3 + $0x84] sm:$0xff]  }
 0x45b   : > { %4969 = vrot.lane.b32.xlu1 %v4929_v3, %s7625_s16  ;;  %v4932_v24 = vsel %vm2068_vm15, %v4930_v62, %v4931_v13  ;;  %v4756_v60 = vsel %vm1795_vm0, %v4751_v38, %v4755_v39  ;;  %v6219_v3 = vshll.u32 %v7407_v36, 16  ;;  %v6224_v53 = vshll.u32 %v6112_v5, 16  ;;  %v9768_v49 = vld [vmem:[#allocation3 + $0x84] sm:$0xf0] }
 0x45c   : > { %v5520_v62 = vrot.slane %v7609_v34, 1  ;;  %v5521_v13 = vrot.slane %v5232_v47, 1  ;;  %v9758_v4 = vpack.c.b16 %v4615_v59, %v4615_v59  ;;  %v6417_v63 = vrot.slane %v6112_v5, 1  ;;  %v4488_v59 = vld [vmem:[#allocation3 + $0x8c] sm:$0x1] }
 0x45d   : > { %v6221_v28 = vrot.slane %v6219_v3, 1  ;;  %v5469_v50 = vpop.permute.xlu2 %5468  ;;  %v6226_v18 = vrot.slane %v6224_v53, 1  ;;  %v7536_v27 = vor.u32 %v7535_v58, %v9706_v19  ;;  %v5253_v38 = vrot.slane %v5251_v33, 1 }
 0x45e   : > { %v5522_v6 = vsel %vm2068_vm15, %v5520_v62, %v5521_v13  ;;  %v6418_v42 = vsel %vm2068_vm15, %v6416_v15, %v6417_v63  ;;  %v5256_v52 = vshll.u32 %v5232_v47, 16  ;;  %v6097_v19 = vunpack.c.l.b16 %v5969_v40 }
 0x45f   : > { %v4937_v5 = vrot.slane %v9731_v10, 1  ;;  %v6231_v34 = vshll.u32 %v9756_v37, 16  ;;  %v7382_v35 = vor.u32 %v7381_v17, %v7380_v44  ;;  %v4616_v13 = vunpack.c.l.b16 %v4488_v59 }
 0x460   : > { %v6229_v63 = vshrl.u32 %v9756_v37, 16 }
 0x461   : > { %4973 = vrot.lane.b32.xlu0 %v4935_v11, %s7625_s16  ;;  %v6217_v11 = vshrl.u32 %v7407_v36, 16  ;;  %v5249_v36 = vshrl.u32 %v9734_v41, 16  ;;  %v6233_v62 = vrot.slane %v6231_v34, 1 }
 0x462   : > { %4971 = vrot.lane.b32.xlu2 %v4932_v24, %s7625_s16 }
 0x463   : > { %4843 = vrot.lane.b32.xlu1 %v4732_v56, %s7623_s11  ;;  %v6222_v24 = vor.u32 %v6221_v28, %v6217_v11  ;;  %v4765_v56 = vshll.u32 %v9758_v4, 16  ;;  %v6234_v15 = vor.u32 %v6233_v62, %v6229_v63  ;;  %v7426_v63 = vld [vmem:[#allocation3 + $0x90] sm:$0xf0] }
 0x464   : > { %v5595_v26 = vpop.permute.xlu1 %5594 }
 0x465   : > { %v6227_v7 = vsel %vm1795_vm0, %v6222_v24, %v6226_v18  ;;  %v4767_v39 = vrot.slane %v4765_v56, 1  ;;  %v7610_v56 = vld [vmem:[#allocation3 + $0x24] sm:$0xf0] }
 0x466   : > { %v5467_v0 = vpop.permute.xlu0 %5466 }
 0x467   : > { %v5627_v51 = vsel %vm4989_vm2, %v9501_v14, %v5467_v0  ;;  %v6415_v14 = vsel %vm2068_vm15, %v6413_v23, %v6414_v31  ;;  %v5217_v0 = vunpack.c.l.b16 %v5089_v30  ;;  %v7538_v23 = vld [vmem:[#allocation3 + $0x84] sm:$0xe]  ;;  %v4936_v31 = vrot.slane %v7536_v27, 1  ;;  %v5970_v30 = vld [vmem:[#allocation3 + $0x98] sm:$0x1] }
 0x468   : > { %v5659_v2 = vsel %vm2149_vm13, %v5627_v51, %v5595_v26  ;;  %v5254_v51 = vor.u32 %v5253_v38, %v5249_v36  ;;  %v4768_v47 = vsel %vm1795_vm0, %v6222_v24, %v4767_v39  ;;  %v7539_v53 = vor.u32 %v7538_v23, %v7537_v16  ;;  %v9794_v24 = vld [vmem:[#allocation3 + $0x24] sm:$0xff]   ;;  %v7363_v38 = vld [vmem:[#allocation3 + $0x78] sm:$0xf0] }
 0x469   : > { %4847 = vrot.lane.b32.xlu0 %v4756_v60, %s7623_s11  ;;  %6999 = vmatmul.msk.bf16.gmra.mxu3 %vm5672_vm5, %v5659_v2  ;;  %v5629_v60 = vsel %vm4989_vm2, %v9532_v8, %v5469_v50  ;;  %v5258_v2 = vrot.slane %v5256_v52, 1  ;;  %v5233_v3 = vpack.c.b16 %v5217_v0, %v5217_v0  ;;  %v4938_v10 = vsel %vm2068_vm15, %v4936_v31, %v4937_v5  ;;  %v7611_v31 = vld [vmem:[#allocation3 + $0x24] sm:$0xe] }
 0x46a   : > { %4845 = vrot.lane.b32.xlu2 %v4744_v46, %s7623_s11  ;;  %v4772_v50 = vshll.u32 %v9766_v32, 16  ;;  %v6419_v11 = vrot.slane %v7539_v53, 1  ;;  %v5523_v16 = vrot.slane %v7382_v35, 1  ;;  %v4770_v39 = vshrl.u32 %v9766_v32, 16 }
 0x46b   : > { %6454 = vrot.lane.b32.xlu1 %v6415_v14, %s7625_s16  ;;  %v9775_v26 = vpop.permute.xlu2 %5598  ;;  %v6113_v14 = vpack.c.b16 %v6097_v19, %v6097_v19  ;;  %v5259_v8 = vsel %vm1795_vm0, %v5254_v51, %v5258_v2  ;;  %v5524_v58 = vrot.slane %v5233_v3, 1  ;;  %v5268_v52 = vshll.u32 %v5233_v3, 16  ;;  %v7364_v19 = vld [vmem:[#allocation3 + $0x78] sm:$0xe] }
 0x46c   : > { %v6098_v5 = vunpack.c.l.b16 %v5970_v30  ;;  %v7612_v62 = vor.u32 %v7611_v31, %v7610_v56  ;;  %v9830_v56 = vld [vmem:[#allocation3 + $0x9c] sm:$0xf0] }
 0x46d   : > { %v6236_v33 = vshll.u32 %v6113_v14, 16  ;;  %v6420_v18 = vrot.slane %v6113_v14, 1  ;;  %v5525_v27 = vsel %vm2068_vm15, %v5523_v16, %v5524_v58  ;;  %v4489_v14 = vld [vmem:[#allocation3 + $0x98] sm:$0x1]  ;;  %v5270_v17 = vrot.slane %v5268_v52, 1 }
 0x46e   : > { %v6114_v53 = vpack.c.b16 %v6098_v5, %v6098_v5  ;;  %v5275_v52 = vshll.u32 %v9794_v24, 16 }
 0x46f   : > { %v6238_v40 = vrot.slane %v6236_v33, 1  ;;  %v6421_v36 = vsel %vm2068_vm15, %v6419_v11, %v6420_v18  ;;  %v4617_v33 = vunpack.c.l.b16 %v4489_v14  ;;  %v7427_v11 = vld [vmem:[#allocation3 + $0x90] sm:$0xe]  ;;  %v7464_v14 = vld [vmem:[#allocation3] sm:$0xff]  }
 0x470   : > { %v6248_v18 = vshll.u32 %v6114_v53, 16  ;;  %v7428_v16 = vor.u32 %v7427_v11, %v7426_v63 }
 0x471   : > { %5568 = vrot.lane.b32.xlu0 %v5522_v6, %s7625_s16  ;;  %v9792_v6 = vpack.c.b16 %v4616_v13, %v4616_v13  ;;  %v6239_v0 = vsel %vm1795_vm0, %v6234_v15, %v6238_v40  ;;  %v9828_v15 = vld [vmem:[#allocation3 + $0x9c] sm:$0xff]  }
 0x472   : > { %6456 = vrot.lane.b32.xlu2 %v6418_v42, %s7625_s16  ;;  %v6255_v11 = vshll.u32 %v9828_v15, 16 }
 0x473   : > { %6328 = vrot.lane.b32.xlu1 %v6227_v7, %s7623_s11  ;;  %v5597_v55 = vpop.permute.xlu0 %5596  ;;  %v4774_v7 = vrot.slane %v4772_v50, 1  ;;  %v4777_v23 = vshll.u32 %v9792_v6, 16  ;;  %v5271_v50 = vsel %vm1795_vm0, %v9596_v54, %v5270_v17  ;;  %v9837_v54 = vpack.c.b16 %v4617_v33, %v4617_v33 }
 0x474   : > { %v5661_v46 = vsel %vm2149_vm13, %v5629_v60, %v5597_v55  ;;  %v6313_v42 = vpop.permute.xlu2 %6312  ;;  %v5090_v55 = vld [vmem:[#allocation3 + $0x2c] sm:$0x1]  ;;  %v7365_v60 = vor.u32 %v7364_v19, %v7363_v38  ;;  %v7541_v38 = vld [vmem:[#allocation3 + $0x84] sm:$0xe]  ;;  %v4943_v33 = vrot.slane %v9792_v6, 1 }
 0x475   : > { %v6473_v51 = vsel %vm4989_vm2, %v9573_v43, %v6313_v42  ;;  %v5218_v2 = vunpack.c.l.b16 %v5090_v55  ;;  %v4775_v3 = vor.u32 %v4774_v7, %v4770_v39  ;;  %v4779_v43 = vrot.slane %v4777_v23, 1  ;;  %v7384_v6 = vld [vmem:[#allocation3 + $0x30] sm:$0xe] }
 0x476   : > { %v6250_v39 = vrot.slane %v6248_v18, 1  ;;  %v6422_v23 = vrot.slane %v7428_v16, 1  ;;  %v4789_v5 = vshll.u32 %v9837_v54, 16  ;;  %v4490_v16 = vld [vmem:[#allocation3 + $0xa4] sm:$0x1] }
 0x477   : > { %v9813_v35 = vpack.c.b16 %v5218_v2, %v5218_v2  ;;  %v4780_v13 = vsel %vm1795_vm0, %v4775_v3, %v4779_v43  ;;  %v5971_v2 = vld [vmem:[#allocation3 + $0xa4] sm:$0x1]  ;;  %v9848_v3 = vld [vmem:[#allocation3 + $0x9c] sm:$0xf0] }
 0x479   : > { %4849 = vrot.lane.b32.xlu0 %v4768_v47, %s7623_s11  ;;  %7000 = vmatmul.msk.bf16.gmra.mxu3 %vm5672_vm5, %v5661_v46  ;;  %v4940_v47 = vrot.slane %v9758_v4, 1  ;;  %v9809_v46 = vld [vmem:[#allocation3 + $0x90] sm:$0xff]   ;;  %v5527_v40 = vrot.slane %v9813_v35, 1  ;;  %v5280_v17 = vshll.u32 %v9813_v35, 16 }
 0x47a   : > { %4975 = vrot.lane.b32.xlu2 %v4938_v10, %s7625_s16  ;;  %v6243_v4 = vshll.u32 %v9809_v46, 16  ;;  %v7383_v35 = vld [vmem:[#allocation3 + $0x30] sm:$0xf0] }
 0x47b   : > { %5440 = vrot.lane.b32.xlu1 %v5259_v8, %s7623_s11  ;;  %v9788_v28 = vpop.permute.xlu0 %4829  ;;  %v4939_v8 = vrot.slane %v7365_v60, 1  ;;  %v7542_v60 = vor.u32 %v7541_v38, %v9768_v49  ;;  %v5273_v49 = vshrl.u32 %v9794_v24, 16  ;;  %v5282_v18 = vrot.slane %v5280_v17, 1 }
 0x47c   : > { %v9832_v30 = vpop.permute.xlu2 %4959  ;;  %v6245_v7 = vrot.slane %v6243_v4, 1 }
 0x47d   : > { %v4942_v4 = vrot.slane %v7542_v60, 1 }
 0x47f   : > { %v4944_v38 = vsel %vm2068_vm15, %v4942_v4, %v4943_v33 }
 0x481   : > { %5570 = vrot.lane.b32.xlu0 %v5525_v27, %s7625_s16  ;;  %v5526_v27 = vrot.slane %v7612_v62, 1  ;;  %v4791_v62 = vrot.slane %v4789_v5, 1  ;;  %v6253_v5 = vshrl.u32 %v9828_v15, 16 }
 0x482   : > { %6458 = vrot.lane.b32.xlu2 %v6421_v36, %s7625_s16  ;;  %v6423_v36 = vrot.slane %v6114_v53, 1 }
 0x483   : > { %6330 = vrot.lane.b32.xlu1 %v6239_v0, %s7623_s11  ;;  %v6441_v34 = vpop.permute.xlu0 %6440  ;;  %v6241_v0 = vshrl.u32 %v9809_v46, 16  ;;  %v5528_v19 = vsel %vm2068_vm15, %v5526_v27, %v5527_v40 }
 0x484   : > { %v6505_v44 = vsel %vm2149_vm13, %v6473_v51, %v6441_v34  ;;  %v5091_v51 = vld [vmem:[#allocation3 + $0x38] sm:$0x1]  ;;  %v6424_v34 = vsel %vm2068_vm15, %v6422_v23, %v6423_v36 }
 0x485   : > { %v5471_v59 = vpop.permute.xlu1 %5470  ;;  %7028 = vmatmul.msk.bf16.vlgmr.msrb.gmra.mxu0 %vm5672_vm5, %v6505_v44  ;;  %v6246_v31 = vor.u32 %v6245_v7, %v6241_v0  ;;  %v9846_v44 = vld [vmem:[#allocation3 + $0x9c] sm:$0xff]   ;;  %v5219_v53 = vunpack.c.l.b16 %v5091_v51  ;;  %v6257_v0 = vrot.slane %v6255_v11, 1 }
 0x486   : > { %v5631_v10 = vsel %vm4989_vm2, %v9563_v61, %v5471_v59  ;;  %v4941_v61 = vsel %vm2068_vm15, %v4939_v8, %v4940_v47  ;;  %v5277_v47 = vrot.slane %v5275_v52, 1  ;;  %v7385_v52 = vor.u32 %v7384_v6, %v7383_v35 }
 0x487   : > { %v5663_v58 = vsel %vm2149_vm13, %v5631_v10, %v9775_v26  ;;  %v6251_v59 = vsel %vm1795_vm0, %v6246_v31, %v6250_v39  ;;  %v4991_v10 = vsel %vm4989_vm2, %v7464_v14, %v9788_v28  ;;  %v9864_v28 = vpop.permute.xlu2 %4833  ;;  %v4792_v27 = vsel %vm1795_vm0, %v6246_v31, %v4791_v62  ;;  %v9895_v62 = vld [vmem:[#allocation3 + $0x3c] sm:$0xff]  }
 0x488   : > { %v9869_v40 = vpack.c.b16 %v5219_v53, %v5219_v53  ;;  %v4618_v39 = vunpack.c.l.b16 %v4490_v16  ;;  %v4794_v16 = vshrl.u32 %v9846_v44, 16 }
 0x489   : > { %4851 = vrot.lane.b32.xlu0 %v4780_v13, %s7623_s11  ;;  %7001 = vmatmul.msk.bf16.gmra.mxu3 %vm5672_vm5, %v5663_v58  ;;  %v7544_v13 = vld [vmem:[#allocation3 + $0x9c] sm:$0xe]  ;;  %v6099_v58 = vunpack.c.l.b16 %v5971_v2 }
 0x48a   : > { %4977 = vrot.lane.b32.xlu2 %v4941_v61, %s7625_s16  ;;  %v5530_v31 = vrot.slane %v9869_v40, 1  ;;  %v9891_v17 = vpack.c.b16 %v4618_v39, %v4618_v39 }
 0x48b   : > { %5442 = vrot.lane.b32.xlu1 %v5271_v50, %s7623_s11  ;;  %v9826_v26 = vpop.permute.xlu0 %6314  ;;  %v5278_v50 = vor.u32 %v5277_v47, %v5273_v49  ;;  %v6115_v7 = vpack.c.b16 %v6099_v58, %v6099_v58  ;;  %v6258_v49 = vor.u32 %v6257_v0, %v6253_v5  ;;  %v5972_v58 = vld [vmem:[#allocation3 + $0xb0] sm:$0x1] }
 0x48c   : > { %v9834_v42 = vpop.f32.mrf.mxu3  ;;  %v6475_v60 = vsel %vm4989_vm2, %v9544_v48, %v9826_v26  ;;  %v6100_v6 = vunpack.c.l.b16 %v5972_v58 }
 0x48d   : > { %v4958_v55 = vpop.permute.xlu1 %4957  ;;  %v5283_v36 = vsel %vm1795_vm0, %v5278_v50, %v5282_v18  ;;  %v6260_v51 = vshll.u32 %v6115_v7, 16  ;;  %v6426_v47 = vrot.slane %v6115_v7, 1  ;;  %v5092_v50 = vld [vmem:[#allocation3 + $0x44] sm:$0x1]  ;;  %v5292_v18 = vshll.u32 %v9869_v40, 16 }
 0x48e   : > { %v5023_v61 = vsel %vm2149_vm13, %v4991_v10, %v4958_v55  ;;  %v7545_v55 = vor.u32 %v7544_v13, %v9830_v56  ;;  %v4796_v56 = vshll.u32 %v9846_v44, 16  ;;  %v5529_v10 = vrot.slane %v7385_v52, 1  ;;  %v7613_v13 = vld [vmem:[#allocation3 + $0x3c] sm:$0xf0]  ;;  %v7367_v7 = vld [vmem:[#allocation3 + $0x90] sm:$0xe] }
 0x48f   : > { %v9897_v4 = vpop.permute.xlu2 %6444  ;;  %v6262_v26 = vrot.slane %v6260_v51, 1  ;;  %v5220_v0 = vunpack.c.l.b16 %v5092_v50  ;;  %v7430_v50 = vld [vmem:[#allocation3 + $0xa8] sm:$0xe] }
 0x490   : > { %v5531_v48 = vsel %vm2068_vm15, %v5529_v10, %v5530_v31  ;;  %v4798_v33 = vrot.slane %v4796_v56, 1  ;;  %v4946_v56 = vrot.slane %v9837_v54, 1 }
 0x491   : > { %5572 = vrot.lane.b32.xlu0 %v5528_v19, %s7625_s16  ;;  %v6263_v35 = vsel %vm1795_vm0, %v6258_v49, %v6262_v26 }
 0x492   : > { %6460 = vrot.lane.b32.xlu2 %v6424_v34, %s7625_s16  ;;  %v9885_v34 = vld [vmem:[#allocation3 + $0x30] sm:$0xff]   ;;  %v4799_v40 = vor.u32 %v4798_v33, %v4794_v16 }
 0x493   : > { %6332 = vrot.lane.b32.xlu1 %v6251_v59, %s7623_s11  ;;  %v9855_v43 = vpop.permute.xlu0 %4961  ;;  %v6425_v59 = vrot.slane %v7545_v55, 1  ;;  %v5287_v53 = vshll.u32 %v9885_v34, 16  ;;  %v5285_v31 = vshrl.u32 %v9885_v34, 16 }
 0x494   : > { %v9859_v8 = vpop.f32.mrf.mxu3 }
 0x495   : > { %v9861_v63 = vpop.permute.xlu1 %4831  ;;  %v6427_v11 = vsel %vm2068_vm15, %v6425_v59, %v6426_v47  ;;  %v5289_v52 = vrot.slane %v5287_v53, 1  ;;  %v5294_v47 = vrot.slane %v5292_v18, 1  ;;  %v9919_v53 = vpack.c.b16 %v5220_v0, %v5220_v0  ;;  %v9932_v18 = vld [vmem:[#allocation3 + $0x30] sm:$0xff]  }
 0x496   : > { %v4993_v5 = vsel %vm4989_vm2, %v9568_v29, %v9861_v63  ;;  %v7429_v29 = vld [vmem:[#allocation3 + $0xa8] sm:$0xf0] }
 0x497   : > { %v5290_v49 = vor.u32 %v5289_v52, %v5285_v31  ;;  %v5025_v26 = vsel %vm2149_vm13, %v4993_v5, %v9832_v30  ;;  %v7431_v16 = vor.u32 %v7430_v50, %v7429_v29  ;;  %v5973_v29 = vld [vmem:[#allocation3 + $0xbc] sm:$0x1]  ;;  %v5297_v50 = vshrl.u32 %v9895_v62, 16 }
 0x499   : > { %4853 = vrot.lane.b32.xlu0 %v4792_v27, %s7623_s11  ;;  %7006 = vmatmul.msk.bf16.vlgmr.msrb.gmra.mxu3 %vm5672_vm5, %v5023_v61  ;;  %v7366_v61 = vld [vmem:[#allocation3 + $0x90] sm:$0xf0]  ;;  %v4801_v27 = vshll.u32 %v9891_v17, 16 }
 0x49a   : > { %4979 = vrot.lane.b32.xlu2 %v4944_v38, %s7625_s16  ;;  %v7614_v38 = vld [vmem:[#allocation3 + $0x3c] sm:$0xe] }
 0x49b   : > { %5444 = vrot.lane.b32.xlu1 %v5283_v36, %s7623_s11  ;;  %v9878_v23 = vpop.permute.xlu0 %4835  ;;  %v7368_v36 = vor.u32 %v7367_v7, %v7366_v61  ;;  %v4803_v59 = vrot.slane %v4801_v27, 1  ;;  %v7615_v58 = vor.u32 %v7614_v38, %v7613_v13  ;;  %v9928_v61 = vpop.permute.xlu2 %6318  ;;  %v5295_v13 = vsel %vm1795_vm0, %v5290_v49, %v5294_v47  ;;  %v9939_v27 = vld [vmem:[#allocation3 + $0xb4] sm:$0xff]  }
 0x49c   : > { %v9880_v19 = vpop.f32.mrf.mxu3  ;;  %v9941_v7 = vld [vmem:[#allocation3 + $0xb4] sm:$0xf0]  ;;  %v6428_v47 = vrot.slane %v7431_v16, 1 }
 0x49d   : > { %v6443_v2 = vpop.permute.xlu1 %6442  ;;  %v4945_v10 = vrot.slane %v7368_v36, 1  ;;  %v5533_v36 = vrot.slane %v9919_v53, 1 }
 0x49e   : > { %v6507_v14 = vsel %vm2149_vm13, %v6475_v60, %v6443_v2  ;;  %v9917_v60 = vld [vmem:[#allocation3 + $0xa8] sm:$0xff]   ;;  %v4491_v2 = vld [vmem:[#allocation3 + $0xb0] sm:$0x1] }
 0x49f   : > { %7029 = vmatmul.msk.bf16.gmra.mxu0 %vm5672_vm5, %v6507_v14  ;;  %v6116_v14 = vpack.c.b16 %v6100_v6, %v6100_v6  ;;  %v6267_v63 = vshll.u32 %v9917_v60, 16  ;;  %v4619_v54 = vunpack.c.l.b16 %v4491_v2  ;;  %v4947_v33 = vsel %vm2068_vm15, %v4945_v10, %v4946_v56 }
 0x4a0   : > { %v5532_v6 = vrot.slane %v7615_v58, 1  ;;  %v5299_v56 = vshll.u32 %v9895_v62, 16 }
 0x4a1   : > { %5574 = vrot.lane.b32.xlu0 %v5531_v48, %s7625_s16  ;;  %v4804_v48 = vsel %vm1795_vm0, %v4799_v40, %v4803_v59  ;;  %v6269_v52 = vrot.slane %v6267_v63, 1  ;;  %v9946_v0 = vpack.c.b16 %v4619_v54, %v4619_v54  ;;  %v7547_v40 = vld [vmem:[#allocation3 + $0x9c] sm:$0xe]  ;;  %v6429_v5 = vrot.slane %v6116_v14, 1  ;;  %v9960_v63 = vld [vmem:[#allocation3 + $0xb4] sm:$0xff]  }
 0x4a2   : > { %6462 = vrot.lane.b32.xlu2 %v6427_v11, %s7625_s16  ;;  %v6272_v11 = vshll.u32 %v6116_v14, 16  ;;  %v5534_v10 = vsel %vm2068_vm15, %v5532_v6, %v5533_v36  ;;  %v7550_v36 = vld [vmem:[#allocation3 + $0xb4] sm:$0xe] }
 0x4a3   : > { %6334 = vrot.lane.b32.xlu1 %v6263_v35, %s7623_s11  ;;  %v9908_v55 = vpop.permute.xlu0 %6446  ;;  %v4813_v58 = vshll.u32 %v9946_v0, 16  ;;  %v6430_v14 = vsel %vm2068_vm15, %v6428_v47, %v6429_v5 }
 0x4a4   : > { %v9910_v39 = vpop.f32.mrf.mxu3  ;;  %v6274_v59 = vrot.slane %v6272_v11, 1  ;;  %v5304_v11 = vshll.u32 %v9919_v53, 16 }
 0x4a5   : > { %10580 = vst [vmem:[#allocation4_spill] sm:$0xff] %v9910_v39  ;;  %v6317_v51 = vpop.permute.xlu1 %6316  ;;  %v4815_v6 = vrot.slane %v4813_v58, 1  ;;  %v4492_v58 = vld [vmem:[#allocation3 + $0xbc] sm:$0x1]  ;;  %v7432_v39 = vld [vmem:[#allocation3 + $0xc0] sm:$0xf0] }
 0x4a6   : > { %v6477_v30 = vsel %vm4989_vm2, %v9932_v18, %v6317_v51  ;;  %v6265_v51 = vshrl.u32 %v9917_v60, 16  ;;  %v5306_v47 = vrot.slane %v5304_v11, 1 }
 0x4a7   : > { %v6509_v2 = vsel %vm2149_vm13, %v6477_v30, %v9897_v4  ;;  %v9962_v4 = vld [vmem:[#allocation3 + $0xb4] sm:$0xf0] }
 0x4a8   : > { %v6270_v49 = vor.u32 %v6269_v52, %v6265_v51  ;;  %v6101_v52 = vunpack.c.l.b16 %v5973_v29  ;;  %v4949_v51 = vrot.slane %v9891_v17, 1 }
 0x4a9   : > { %4855 = vrot.lane.b32.xlu0 %v4804_v48, %s7623_s11  ;;  %7007 = vmatmul.msk.bf16.gmra.mxu3 %vm5672_vm5, %v5025_v26  ;;  %v5093_v48 = vld [vmem:[#allocation3 + $0x50] sm:$0x1]  ;;  %v7548_v26 = vor.u32 %v7547_v40, %v9848_v3  ;;  %v9971_v3 = vpop.permute.xlu2 %4965 }
 0x4aa   : > { %4981 = vrot.lane.b32.xlu2 %v4947_v33, %s7625_s16  ;;  %v6275_v54 = vsel %vm1795_vm0, %v6270_v49, %v6274_v59  ;;  %v5301_v33 = vrot.slane %v5299_v56, 1  ;;  %v5221_v30 = vunpack.c.l.b16 %v5093_v48  ;;  %v9979_v59 = vld [vmem:[#allocation3 + $0x18] sm:$0xff]   ;;  %v6117_v17 = vpack.c.b16 %v6101_v52, %v6101_v52 }
 0x4ab   : > { %5446 = vrot.lane.b32.xlu1 %v5295_v13, %s7623_s11  ;;  %v9937_v35 = vpop.permute.xlu0 %6320  ;;  %v4948_v5 = vrot.slane %v7548_v26, 1  ;;  %v4995_v53 = vsel %vm4989_vm2, %v9979_v59, %v9864_v28  ;;  %v7551_v28 = vor.u32 %v7550_v36, %v9941_v7  ;;  %v6277_v52 = vshrl.u32 %v9939_v27, 16  ;;  %v10003_v36 = vld [vmem:[#allocation3 + $0x48] sm:$0xff]  }
 0x4ac   : > { %v9943_v38 = vpop.f32.mrf.mxu3  ;;  %v5302_v56 = vor.u32 %v5301_v33, %v5297_v50  ;;  %v9984_v48 = vpack.c.b16 %v5221_v30, %v5221_v30  ;;  %v5027_v26 = vsel %vm2149_vm13, %v4995_v53, %v9855_v43  ;;  %v4820_v7 = vshll.u32 %v9960_v63, 16 }
 0x4ad   : > { %10581 = vst [vmem:[#allocation5_spill] sm:$0xff] %v9943_v38  ;;  %v9948_v31 = vpop.permute.xlu1 %4963  ;;  %v4950_v29 = vsel %vm2068_vm15, %v4948_v5, %v4949_v51  ;;  %v6284_v5 = vshll.u32 %v6117_v17, 16  ;;  %v6479_v51 = vsel %vm4989_vm2, %v9617_v25, %v9928_v61  ;;  %v6432_v53 = vrot.slane %v6117_v17, 1  ;;  %v5094_v17 = vld [vmem:[#allocation3 + $0x5c] sm:$0x1] }
 0x4ae   : > { %v5307_v33 = vsel %vm1795_vm0, %v5302_v56, %v5306_v47 }
 0x4af   : > { %7030 = vmatmul.msk.bf16.gmra.mxu0 %vm5672_vm5, %v6509_v2  ;;  %v6279_v2 = vshll.u32 %v9939_v27, 16  ;;  %v6286_v61 = vrot.slane %v6284_v5, 1  ;;  %v7370_v5 = vld [vmem:[#allocation3 + $0xa8] sm:$0xe] }
 0x4b1   : > { %5576 = vrot.lane.b32.xlu0 %v5534_v10, %s7625_s16  ;;  %v7386_v10 = vld [vmem:[#allocation3 + $0x48] sm:$0xf0]  ;;  %v6281_v11 = vrot.slane %v6279_v2, 1  ;;  %v6431_v2 = vrot.slane %v7551_v28, 1  ;;  %v10010_v47 = vpop.permute.xlu2 %4839 }
 0x4b2   : > { %6464 = vrot.lane.b32.xlu2 %v6430_v14, %s7625_s16  ;;  %v4816_v14 = vsel %vm1795_vm0, %v6270_v49, %v4815_v6  ;;  %v4620_v49 = vunpack.c.l.b16 %v4492_v58  ;;  %v5536_v6 = vrot.slane %v9984_v48, 1  ;;  %v7369_v28 = vld [vmem:[#allocation3 + $0xa8] sm:$0xf0] }
 0x4b3   : > { %6336 = vrot.lane.b32.xlu1 %v6275_v54, %s7623_s11  ;;  %v9967_v13 = vpop.permute.xlu0 %4967  ;;  %v7387_v54 = vld [vmem:[#allocation3 + $0x48] sm:$0xe] }
 0x4b4   : > { %v9973_v16 = vpop.f32.mrf.mxu3  ;;  %v7388_v50 = vor.u32 %v7387_v54, %v7386_v10  ;;  %v6511_v10 = vsel %vm2149_vm13, %v6479_v51, %v9908_v55  ;;  %v5974_v54 = vld [vmem:[#allocation3 + $0xc8] sm:$0x1]  ;;  %v5316_v55 = vshll.u32 %v9984_v48, 16  ;;  %v7617_v48 = vld [vmem:[#allocation3 + $0x54] sm:$0xe] }
 0x4b5   : > { %10582 = vst [vmem:[#allocation6_spill] sm:$0xff] %v9973_v16  ;;  %v9975_v40 = vpop.permute.xlu1 %4837  ;;  %v10037_v16 = vld [vmem:[#allocation3 + $0xc0] sm:$0xff]  }
 0x4b6   : > { %v5535_v58 = vrot.slane %v7388_v50, 1  ;;  %v10022_v50 = vld [vmem:[#allocation3 + $0x54] sm:$0xff]   ;;  %v5318_v38 = vrot.slane %v5316_v55, 1 }
 0x4b8   : > { %v5537_v25 = vsel %vm2068_vm15, %v5535_v58, %v5536_v6 }
 0x4b9   : > { %4857 = vrot.lane.b32.xlu0 %v4816_v14, %s7623_s11  ;;  %7008 = vmatmul.msk.bf16.gmra.mxu3 %vm5672_vm5, %v5027_v26  ;;  %v6282_v14 = vor.u32 %v6281_v11, %v6277_v52  ;;  %v10014_v26 = vpack.c.b16 %v4620_v49, %v4620_v49  ;;  %v7616_v11 = vld [vmem:[#allocation3 + $0x54] sm:$0xf0]  ;;  %v4818_v52 = vshrl.u32 %v9960_v63, 16 }
 0x4ba   : > { %4983 = vrot.lane.b32.xlu2 %v4950_v29, %s7625_s16  ;;  %v5311_v29 = vshll.u32 %v10003_v36, 16 }
 0x4bb   : > { %5448 = vrot.lane.b32.xlu1 %v5307_v33, %s7623_s11  ;;  %v9996_v43 = vpop.permute.xlu0 %4841  ;;  %v4822_v33 = vrot.slane %v4820_v7, 1  ;;  %v6287_v49 = vsel %vm1795_vm0, %v6282_v14, %v6286_v61  ;;  %v4825_v6 = vshll.u32 %v10014_v26, 16  ;;  %v6102_v7 = vunpack.c.l.b16 %v5974_v54 }
 0x4bc   : > { %v9998_v30 = vpop.f32.mrf.mxu3  ;;  %v4952_v14 = vrot.slane %v9946_v0, 1  ;;  %v5309_v61 = vshrl.u32 %v10003_v36, 16 }
 0x4bd   : > { %10583 = vst [vmem:[#allocation7_spill] sm:$0xff] %v9998_v30  ;;  %v10008_v56 = vpop.permute.xlu1 %6448  ;;  %v6433_v30 = vsel %vm2068_vm15, %v6431_v2, %v6432_v53  ;;  %v7371_v2 = vor.u32 %v7370_v5, %v7369_v28  ;;  %v5313_v53 = vrot.slane %v5311_v29, 1  ;;  %v4827_v54 = vrot.slane %v4825_v6, 1 }
 0x4be   : > { %v4997_v29 = vsel %vm4989_vm2, %v9581_v20, %v9878_v23  ;;  %v6291_v6 = vshll.u32 %v10037_v16, 16  ;;  %v7433_v23 = vld [vmem:[#allocation3 + $0xc0] sm:$0xe] }
 0x4bf   : > { %7031 = vmatmul.msk.bf16.gmra.mxu0 %vm5672_vm5, %v6511_v10  ;;  %v5222_v10 = vunpack.c.l.b16 %v5094_v17  ;;  %v4951_v28 = vrot.slane %v7371_v2, 1  ;;  %v5314_v17 = vor.u32 %v5313_v53, %v5309_v61 }
 0x4c1   : > { %5578 = vrot.lane.b32.xlu0 %v5537_v25, %s7625_s16  ;;  %v4823_v25 = vor.u32 %v4822_v33, %v4818_v52  ;;  %v5238_v5 = vpack.c.b16 %v5222_v10, %v5222_v10  ;;  %v5029_v33 = vsel %vm2149_vm13, %v4997_v29, %v9948_v31  ;;  %v7618_v52 = vor.u32 %v7617_v48, %v7616_v11 }
 0x4c2   : > { %6466 = vrot.lane.b32.xlu2 %v6433_v30, %s7625_s16  ;;  %v4953_v55 = vsel %vm2068_vm15, %v4951_v28, %v4952_v14  ;;  %v5319_v20 = vsel %vm1795_vm0, %v5314_v17, %v5318_v38  ;;  %v7434_v11 = vor.u32 %v7433_v23, %v7432_v39  ;;  %v6293_v10 = vrot.slane %v6291_v6, 1  ;;  %v10058_v14 = vld [vmem:[#allocation3 + $0x48] sm:$0xff]  }
 0x4c3   : > { %6338 = vrot.lane.b32.xlu1 %v6287_v49, %s7623_s11  ;;  %v10029_v51 = vpop.permute.xlu0 %6452  ;;  %v6118_v49 = vpack.c.b16 %v6102_v7, %v6102_v7  ;;  %v4828_v0 = vsel %vm1795_vm0, %v4823_v25, %v4827_v54  ;;  %v5538_v53 = vrot.slane %v7618_v52, 1  ;;  %v5539_v48 = vrot.slane %v5238_v5, 1  ;;  %v7553_v25 = vld [vmem:[#allocation3 + $0xb4] sm:$0xe] }
 0x4c4   : > { %v10031_v58 = vpop.f32.mrf.mxu3  ;;  %v6481_v61 = vsel %vm4989_vm2, %v10058_v14, %v9937_v35  ;;  %v6289_v39 = vshrl.u32 %v10037_v16, 16  ;;  %v5323_v17 = vshll.u32 %v10022_v50, 16 }
 0x4c5   : > { %10584 = vst [vmem:[#allocation8_spill] sm:$0xff] %v10031_v58  ;;  %v10033_v30 = vpop.permute.xlu1 %6322  ;;  %v10042_v58 = vpop.permute.xlu2 %6450  ;;  %v6296_v7 = vshll.u32 %v6118_v49, 16  ;;  %v6435_v54 = vrot.slane %v6118_v49, 1  ;;  %v6513_v29 = vsel %vm2149_vm13, %v6481_v61, %v10008_v56  ;;  %v7554_v49 = vor.u32 %v7553_v25, %v9962_v4 }
 0x4c6   : > { %v6294_v52 = vor.u32 %v6293_v10, %v6289_v39  ;;  %v4955_v10 = vrot.slane %v10014_v26, 1 }
 0x4c7   : > { %v6298_v28 = vrot.slane %v6296_v7, 1  ;;  %v5321_v7 = vshrl.u32 %v10022_v50, 16 }
 0x4c9   : > { %4859 = vrot.lane.b32.xlu0 %v4828_v0, %s7623_s11  ;;  %7009 = vmatmul.msk.bf16.gmra.mxu3 %vm5672_vm5, %v5029_v33  ;;  %v6434_v33 = vrot.slane %v7434_v11, 1  ;;  %v5540_v0 = vsel %vm2068_vm15, %v5538_v53, %v5539_v48  ;;  %v6299_v56 = vsel %vm1795_vm0, %v6294_v52, %v6298_v28  ;;  %v5328_v11 = vshll.u32 %v5238_v5, 16 }
 0x4ca   : > { %4985 = vrot.lane.b32.xlu2 %v4953_v55, %s7625_s16  ;;  %v5325_v55 = vrot.slane %v5323_v17, 1  ;;  %v4999_v53 = vsel %vm4989_vm2, %v9932_v18, %v9975_v40  ;;  %v4954_v48 = vrot.slane %v7554_v49, 1  ;;  %v6483_v18 = vsel %vm4989_vm2, %v9665_v12, %v10033_v30  ;;  %v10119_v49 = vld [vmem:[#allocation3 + $0x60] sm:$0xff]  }
 0x4cb   : > { %5450 = vrot.lane.b32.xlu1 %v5319_v20, %s7623_s11  ;;  %v10054_v31 = vpop.permute.xlu0 %6326  ;;  %v6436_v35 = vsel %vm2068_vm15, %v6434_v33, %v6435_v54  ;;  %v5031_v61 = vsel %vm2149_vm13, %v4999_v53, %v9971_v3  ;;  %v5330_v54 = vrot.slane %v5328_v11, 1  ;;  %v6515_v28 = vsel %vm2149_vm13, %v6483_v18, %v10042_v58 }
 0x4cc   : > { %v10056_v2 = vpop.f32.mrf.mxu3  ;;  %v5326_v25 = vor.u32 %v5325_v55, %v5321_v7  ;;  %v5001_v12 = vsel %vm4989_vm2, %v9645_v22, %v10010_v47  ;;  %v6487_v9 = vsel %vm4989_vm2, %v9672_v45, %v10054_v31 }
 0x4cd   : > { %v10063_v38 = vpop.permute.xlu1 %4969  ;;  %v6325_v6 = vpop.permute.xlu2 %6324  ;;  %v5033_v30 = vsel %vm2149_vm13, %v5001_v12, %v9967_v13 }
 0x4ce   : > { %v5331_v5 = vsel %vm1795_vm0, %v5326_v25, %v5330_v54  ;;  %v5003_v25 = vsel %vm4989_vm2, %v10058_v14, %v9996_v43  ;;  %v7555_v43 = vld [vmem:[#allocation3 + $0xcc] sm:$0xf0] }
 0x4cf   : > { %7032 = vmatmul.msk.bf16.gmra.mxu0 %vm5672_vm5, %v6513_v29  ;;  %v4956_v29 = vsel %vm2068_vm15, %v4954_v48, %v4955_v10  ;;  %v511_v48 = vld [vmem:[#allocation3 + $0xcc] sm:$0x1]  ;;  %v566_v10 = vld [vmem:[#allocation3 + $0xd4] sm:$0x1] }
 0x4d1   : > { %5580 = vrot.lane.b32.xlu0 %v5540_v0, %s7625_s16 }
 0x4d2   : > { %6468 = vrot.lane.b32.xlu2 %v6436_v35, %s7625_s16 }
 0x4d3   : > { %6340 = vrot.lane.b32.xlu1 %v6299_v56, %s7623_s11  ;;  %v10077_v20 = vpop.permute.xlu0 %4973  ;;  %v6485_v56 = vsel %vm4989_vm2, %v10119_v49, %v6325_v6 }
 0x4d4   : > { %v10079_v23 = vpop.f32.mrf.mxu3  ;;  %v6517_v7 = vsel %vm2149_vm13, %v6485_v56, %v10029_v51  ;;  %v512_v51 = vsel %vm7767_vm10, 0, %v511_v48 }
 0x4d5   : > { %v10085_v4 = vpop.permute.xlu1 %4843  ;;  %v4972_v26 = vpop.permute.xlu2 %4971  ;;  %513 = vst [vmem:[#allocation3 + $0xcc] sm:$0x1] %v512_v51 }
 0x4d9   : > { %7010 = vmatmul.msk.bf16.gmra.mxu3 %vm5672_vm5, %v5031_v61  ;;  %v5035_v61 = vsel %vm2149_vm13, %v5003_v25, %v10063_v38  ;;  %v7469_v25 = vld [vmem:[#allocation3 + $0x78] sm:$0xff]  }
 0x4da   : > { %4987 = vrot.lane.b32.xlu2 %v4956_v29, %s7625_s16 }
 0x4db   : > { %5452 = vrot.lane.b32.xlu1 %v5331_v5, %s7623_s11  ;;  %v10098_v40 = vpop.permute.xlu0 %4847 }
 0x4dc   : > { %v10100_v39 = vpop.f32.mrf.mxu3  ;;  %v10153_v18 = vld [vmem:[#allocation3 + $0xcc] sm:$0xff]  }
 0x4dd   : > { %v6455_v3 = vpop.permute.xlu1 %6454  ;;  %v10107_v52 = vpop.permute.xlu2 %4845  ;;  %v6301_v45 = vshrl.u32 %v10153_v18, 16  ;;  %v6303_v31 = vshll.u32 %v10153_v18, 16 }
 0x4de   : > { %v6519_v14 = vsel %vm2149_vm13, %v6487_v9, %v6455_v3 }
 0x4df   : > { %7033 = vmatmul.msk.bf16.gmra.mxu0 %vm5672_vm5, %v6515_v28 }
 0x4e3   : > { %v5569_v17 = vpop.permute.xlu0 %5568 }
 0x4e4   : > { %v10105_v33 = vpop.f32.mrf.mxu3 }
 0x4e5   : > { %v6329_v0 = vpop.permute.xlu1 %6328  ;;  %v6457_v47 = vpop.permute.xlu2 %6456 }
 0x4e9   : > { %7011 = vmatmul.msk.bf16.gmra.mxu3 %vm5672_vm5, %v5033_v30 }
 0x4eb   : > { %v10115_v35 = vpop.permute.xlu0 %4849 }
 0x4ec   : > { %v10117_v58 = vpop.f32.mrf.mxu3 }
 0x4ed   : > { %v5441_v55 = vpop.permute.xlu1 %5440  ;;  %v10144_v54 = vpop.permute.xlu2 %4975 }
 0x4ee   : > { %v5601_v22 = vsel %vm4989_vm2, %v9734_v41, %v5441_v55  ;;  %v567_v41 = vsel %vm8782_vm14, 0, %v566_v10 }
 0x4ef   : > { %v5633_v13 = vsel %vm2149_vm13, %v5601_v22, %v5569_v17  ;;  %7034 = vmatmul.msk.bf16.gmra.mxu0 %vm5672_vm5, %v6517_v7  ;;  %568 = vst [vmem:[#allocation3 + $0xd4] sm:$0x1] %v567_v41  ;;  %v6305_v22 = vrot.slane %v6303_v31, 1 }
 0x4f0   : > { %6986 = vmatmul.msk.bf16.vlgmr.msrb.gmra.mxu2 %vm5672_vm5, %v5633_v13 }
 0x4f1   : > { %v6306_v48 = vor.u32 %v6305_v22, %v6301_v45 }
 0x4f3   : > { %v5571_v11 = vpop.permute.xlu0 %5570 }
 0x4f4   : > { %v10130_v53 = vpop.f32.mrf.mxu3 }
 0x4f5   : > { %v10132_v6 = vpop.permute.xlu1 %6330  ;;  %v6459_v7 = vpop.permute.xlu2 %6458 }
 0x4f6   : > { %v5975_v28 = vld [vmem:[#allocation3 + $0xd4] sm:$0x1] }
 0x4f7   : > { %v6103_v12 = vunpack.c.l.b16 %v5975_v28 }
 0x4f9   : > { %7012 = vmatmul.msk.bf16.gmra.mxu3 %vm5672_vm5, %v5035_v61  ;;  %v6119_v30 = vpack.c.b16 %v6103_v12, %v6103_v12  ;;  %v6489_v61 = vsel %vm4989_vm2, %v7469_v25, %v6329_v0 }
 0x4fb   : > { %v10146_v29 = vpop.permute.xlu0 %4851  ;;  %v6308_v55 = vshll.u32 %v6119_v30, 16  ;;  %v6438_v0 = vrot.slane %v6119_v30, 1  ;;  %v6491_v30 = vsel %vm4989_vm2, %v9756_v37, %v10132_v6  ;;  %v5009_v6 = vsel %vm4989_vm2, %v9704_v57, %v10098_v40 }
 0x4fc   : > { %v10148_v21 = vpop.f32.mrf.mxu3 }
 0x4fd   : > { %v5443_v5 = vpop.permute.xlu1 %5442 }
 0x4fe   : > { %v5603_v38 = vsel %vm4989_vm2, %v9979_v59, %v5443_v5  ;;  %v5005_v59 = vsel %vm4989_vm2, %v9692_v1, %v10085_v4  ;;  %v4978_v4 = vpop.permute.xlu2 %4977 }
 0x4ff   : > { %7035 = vmatmul.msk.bf16.gmra.mxu0 %vm5672_vm5, %v6519_v14  ;;  %v5635_v17 = vsel %vm2149_vm13, %v5603_v38, %v5571_v11  ;;  %v6310_v11 = vrot.slane %v6308_v55, 1  ;;  %v5037_v10 = vsel %vm2149_vm13, %v5005_v59, %v4972_v26  ;;  %v6521_v14 = vsel %vm2149_vm13, %v6489_v61, %v6457_v47  ;;  %v7556_v38 = vld [vmem:[#allocation3 + $0xcc] sm:$0xe] }
 0x500   : > { %6987 = vmatmul.msk.bf16.gmra.mxu2 %vm5672_vm5, %v5635_v17  ;;  %v7557_v17 = vor.u32 %v7556_v38, %v7555_v43  ;;  %v5007_v47 = vsel %vm4989_vm2, %v10119_v49, %v10107_v52  ;;  %v6523_v49 = vsel %vm2149_vm13, %v6491_v30, %v6459_v7 }
 0x501   : > { %v6311_v51 = vsel %vm1795_vm0, %v6306_v48, %v6310_v11 }
 0x502   : > { %6342 = vrot.lane.b32.xlu1 %v6311_v51, %s7623_s11  ;;  %v10172_v41 = vpop.f32.mrf.mxu0  ;;  %v6437_v45 = vrot.slane %v7557_v17, 1 }
 0x503   : > { %v5573_v56 = vpop.permute.xlu0 %5572 }
 0x504   : > { %v10163_v3 = vpop.f32.mrf.mxu3 }
 0x505   : > { %v6333_v13 = vpop.permute.xlu1 %6332 }
 0x506   : > { %v6461_v43 = vpop.permute.xlu2 %6460  ;;  %v6493_v7 = vsel %vm4989_vm2, %v9809_v46, %v6333_v13  ;;  %v5011_v13 = vsel %vm4989_vm2, %v7469_v25, %v10115_v35 }
 0x507   : > { %v6525_v40 = vsel %vm2149_vm13, %v6493_v7, %v6461_v43 }
 0x509   : > { %7013 = vmatmul.msk.bf16.gmra.mxu3 %vm5672_vm5, %v5037_v10 }
 0x50a   : > { %v10185_v31 = vpop.f32.mrf.mxu0 }
 0x50b   : > { %v10175_v9 = vpop.permute.xlu0 %4853 }
 0x50c   : > { %v10177_v5 = vpop.f32.mrf.mxu3 }
 0x50d   : > { %v5445_v1 = vpop.permute.xlu1 %5444 }
 0x50e   : > { %v5605_v26 = vsel %vm4989_vm2, %v9794_v24, %v5445_v1  ;;  %v6439_v24 = vsel %vm2068_vm15, %v6437_v45, %v6438_v0  ;;  %v4980_v51 = vpop.permute.xlu2 %4979 }
 0x50f   : > { %7036 = vmatmul.msk.bf16.gmra.mxu0 %vm5672_vm5, %v6521_v14  ;;  %v5637_v28 = vsel %vm2149_vm13, %v5605_v26, %v5573_v56  ;;  %6470 = vrot.lane.b32.xlu2 %v6439_v24, %s7625_s16  ;;  %v5039_v56 = vsel %vm2149_vm13, %v5007_v47, %v10077_v20 }
 0x510   : > { %6988 = vmatmul.msk.bf16.gmra.mxu2 %vm5672_vm5, %v5637_v28 }
 0x513   : > { %v5575_v12 = vpop.permute.xlu0 %5574 }
 0x514   : > { %v10187_v55 = vpop.f32.mrf.mxu3 }
 0x515   : > { %v6335_v22 = vpop.permute.xlu1 %6334 }
 0x516   : > { %v6463_v14 = vpop.permute.xlu2 %6462 }
 0x519   : > { %7014 = vmatmul.msk.bf16.gmra.mxu3 %vm5672_vm5, %v5039_v56  ;;  %v6495_v56 = vsel %vm4989_vm2, %v9828_v15, %v6335_v22  ;;  %v5013_v22 = vsel %vm4989_vm2, %v9766_v32, %v10146_v29 }
 0x51a   : > { %v6527_v25 = vsel %vm2149_vm13, %v6495_v56, %v6463_v14 }
 0x51b   : > { %v10200_v59 = vpop.permute.xlu0 %4855 }
 0x51c   : > { %v10202_v11 = vpop.f32.mrf.mxu0  ;;  %v10204_v10 = vpop.f32.mrf.mxu3 }
 0x51d   : > { %v5447_v48 = vpop.permute.xlu1 %5446 }
 0x51e   : > { %v5607_v52 = vsel %vm4989_vm2, %v9885_v34, %v5447_v48  ;;  %v5041_v34 = vsel %vm2149_vm13, %v5009_v6, %v10144_v54  ;;  %v4982_v24 = vpop.permute.xlu2 %4981 }
 0x51f   : > { %7037 = vmatmul.msk.bf16.gmra.mxu0 %vm5672_vm5, %v6523_v49  ;;  %v5639_v20 = vsel %vm2149_vm13, %v5607_v52, %v5575_v12 }
 0x520   : > { %6989 = vmatmul.msk.bf16.gmra.mxu2 %vm5672_vm5, %v5639_v20 }
 0x523   : > { %v5577_v26 = vpop.permute.xlu0 %5576 }
 0x524   : > { %v10212_v37 = vpop.f32.mrf.mxu0  ;;  %v10217_v1 = vpop.f32.mrf.mxu3 }
 0x525   : > { %v6337_v61 = vpop.permute.xlu1 %6336 }
 0x526   : > { %v6465_v52 = vpop.permute.xlu2 %6464 }
 0x529   : > { %7015 = vmatmul.msk.bf16.gmra.mxu3 %vm5672_vm5, %v5041_v34  ;;  %v6497_v34 = vsel %vm4989_vm2, %v9917_v60, %v6337_v61  ;;  %v7470_v61 = vld [vmem:[#allocation3 + $0x90] sm:$0xff]  }
 0x52a   : > { %v6529_v29 = vsel %vm2149_vm13, %v6497_v34, %v6465_v52 }
 0x52b   : > { %v10233_v0 = vpop.permute.xlu0 %4857 }
 0x52c   : > { %v10224_v38 = vpop.f32.mrf.mxu0  ;;  %v10226_v17 = vpop.f32.mrf.mxu3 }
 0x52d   : > { %v5449_v28 = vpop.permute.xlu1 %5448 }
 0x52e   : > { %v5609_v57 = vsel %vm4989_vm2, %v9895_v62, %v5449_v28  ;;  %v5043_v62 = vsel %vm2149_vm13, %v5011_v13, %v4978_v4  ;;  %v5015_v13 = vsel %vm4989_vm2, %v7470_v61, %v10175_v9  ;;  %v5017_v9 = vsel %vm4989_vm2, %v9846_v44, %v10200_v59 }
 0x52f   : > { %7038 = vmatmul.msk.bf16.gmra.mxu0 %vm5672_vm5, %v6525_v40  ;;  %v5641_v54 = vsel %vm2149_vm13, %v5609_v57, %v5577_v26  ;;  %v4984_v26 = vpop.permute.xlu2 %4983 }
 0x530   : > { %6990 = vmatmul.msk.bf16.gmra.mxu2 %vm5672_vm5, %v5641_v54 }
 0x533   : > { %v5579_v47 = vpop.permute.xlu0 %5578 }
 0x534   : > { %v10236_v46 = vpop.f32.mrf.mxu0  ;;  %v10240_v45 = vpop.f32.mrf.mxu3 }
 0x535   : > { %v6339_v12 = vpop.permute.xlu1 %6338 }
 0x537   : > { %v6467_v40 = vpop.permute.xlu2 %6466 }
 0x539   : > { %7016 = vmatmul.msk.bf16.gmra.mxu3 %vm5672_vm5, %v5043_v62 }
 0x53b   : > { %v10256_v49 = vpop.permute.xlu0 %4859 }
 0x53c   : > { %v10246_v43 = vpop.f32.mrf.mxu0  ;;  %v10248_v48 = vpop.f32.mrf.mxu3 }
 0x53d   : > { %v5451_v30 = vpop.permute.xlu1 %5450 }
 0x53e   : > { %v5611_v35 = vsel %vm4989_vm2, %v10003_v36, %v5451_v30  ;;  %v5045_v36 = vsel %vm2149_vm13, %v5013_v22, %v4980_v51 }
 0x53f   : > { %7039 = vmatmul.msk.bf16.gmra.mxu0 %vm5672_vm5, %v6527_v25  ;;  %v5643_v4 = vsel %vm2149_vm13, %v5611_v35, %v5579_v47  ;;  %v5047_v47 = vsel %vm2149_vm13, %v5015_v13, %v4982_v24  ;;  %v4986_v35 = vpop.permute.xlu2 %4985 }
 0x540   : > { %6991 = vmatmul.msk.bf16.gmra.mxu2 %vm5672_vm5, %v5643_v4 }
 0x543   : > { %v5581_v57 = vpop.permute.xlu0 %5580 }
 0x544   : > { %v10258_v15 = vpop.f32.mrf.mxu0  ;;  %v10263_v6 = vpop.f32.mrf.mxu3 }
 0x545   : > { %v6341_v20 = vpop.permute.xlu1 %6340 }
 0x547   : > { %v6469_v52 = vpop.permute.xlu2 %6468 }
 0x549   : > { %7017 = vmatmul.msk.bf16.gmra.mxu3 %vm5672_vm5, %v5045_v36 }
 0x54c   : > { %v10269_v7 = vpop.f32.mrf.mxu0  ;;  %v10271_v28 = vpop.f32.mrf.mxu3 }
 0x54d   : > { %v5453_v14 = vpop.permute.xlu1 %5452 }
 0x54e   : > { %v5613_v32 = vsel %vm4989_vm2, %v10022_v50, %v5453_v14  ;;  %v6499_v50 = vsel %vm4989_vm2, %v9939_v27, %v6339_v12  ;;  %v5049_v27 = vsel %vm2149_vm13, %v5017_v9, %v4984_v26  ;;  %v6501_v12 = vsel %vm4989_vm2, %v10037_v16, %v6341_v20  ;;  %v10316_v26 = vld [vmem:[%s10533_s6] ss:$0 sm:$0xff] }
 0x54f   : > { %7040 = vmatmul.msk.bf16.gmra.mxu0 %vm5672_vm5, %v6529_v29  ;;  %v5645_v51 = vsel %vm2149_vm13, %v5613_v32, %v5581_v57  ;;  %v6531_v25 = vsel %vm2149_vm13, %v6499_v50, %v6467_v40  ;;  %v6533_v34 = vsel %vm2149_vm13, %v6501_v12, %v6469_v52  ;;  %v4988_v44 = vpop.permute.xlu2 %4987  ;;  %v5019_v16 = vsel %vm4989_vm2, %v9917_v60, %v10233_v0  ;;  %v10329_v29 = vld [vmem:[%s10534_s7] ss:$0 sm:$0xff] }
 0x550   : > { %6992 = vmatmul.msk.bf16.gmra.mxu2 %vm5672_vm5, %v5645_v51  ;;  %v5051_v51 = vsel %vm2149_vm13, %v5019_v16, %v4986_v35 }
 0x554   : > { %v10279_v54 = vpop.f32.mrf.mxu0  ;;  %v10283_v62 = vpop.f32.mrf.mxu3 }
 0x559   : > { %7018 = vmatmul.msk.bf16.gmra.mxu3 %vm5672_vm5, %v5047_v47 }
 0x55c   : > { %v10289_v56 = vpop.f32.mrf.mxu0  ;;  %v10291_v30 = vpop.f32.mrf.mxu3 }
 0x55f   : > { %7041 = vmatmul.msk.bf16.gmra.mxu0 %vm5672_vm5, %v6531_v25 }
 0x564   : > { %v10295_v4 = vpop.f32.mrf.mxu0  ;;  %v10300_v24 = vpop.f32.mrf.mxu3 }
 0x569   : > { %7019 = vmatmul.msk.bf16.gmra.mxu3 %vm5672_vm5, %v5049_v27  ;;  %v6471_v61 = vpop.permute.xlu2 %6470 }
 0x56c   : > { %v10306_v22 = vpop.f32.mrf.mxu0  ;;  %v10308_v36 = vpop.f32.mrf.mxu3 }
 0x56f   : > { %7042 = vmatmul.msk.bf16.gmra.mxu0 %vm5672_vm5, %v6533_v34 }
 0x573   : > { %v5718_v59 = vpop.f32.mrf.mxu2 }
 0x574   : > { %v5848_v14 = vadd.f32 %v10204_v10, %v5718_v59  ;;  %v10318_v57 = vpop.f32.mrf.mxu0  ;;  %v10323_v20 = vpop.f32.mrf.mxu3  ;;  %v5021_v59 = vsel %vm4989_vm2, %v9960_v63, %v10256_v49 }
 0x576   : > { %v6668_v32 = vadd.f32 %v10172_v41, %v5848_v14  ;;  %v6343_v41 = vpop.permute.xlu1 %6342 }
 0x577   : > { %v6503_v50 = vsel %vm4989_vm2, %v10153_v18, %v6343_v41 }
 0x578   : > { %v6704_v10 = vmul.f32 %v10316_v26, %v6668_v32  ;;  %v6535_v25 = vsel %vm2149_vm13, %v6503_v50, %v6471_v61  ;;  %v5053_v32 = vsel %vm2149_vm13, %v5021_v59, %v4988_v44 }
 0x579   : > { %7020 = vmatmul.msk.bf16.gmra.mxu3 %vm5672_vm5, %v5051_v51 }
 0x57a   : > { %v6740_v40 = vadd.f32 %v10329_v29, %v6704_v10 }
 0x57b   : > { %v5720_v60 = vpop.f32.mrf.mxu2 }
 0x57c   : > { %v6772_v0 = vmax.f32 %v6740_v40, 0.0  ;;  %v5850_v13 = vadd.f32 %v10217_v1, %v5720_v60  ;;  %v6623_v47 = vpop.f32.mrf.mxu0  ;;  %v10344_v35 = vpop.f32.mrf.mxu3 }
 0x57e   : > { %6804 = vst.msk [vmem:[%s10339_s22] sm:$0xff] %vm4989_vm2, %v6772_v0  ;;  %v6669_v9 = vadd.f32 %v10185_v31, %v5850_v13 }
 0x57f   : > { %7043 = vmatmul.msk.bf16.gmra.mxu0 %vm5672_vm5, %v6535_v25 }
 0x580   : > { %v6705_v52 = vmul.f32 %v10316_v26, %v6669_v9 }
 0x582   : > { %v6741_v27 = vadd.f32 %v10329_v29, %v6705_v52 }
 0x583   : > { %v5723_v1 = vpop.f32.mrf.mxu2 }
 0x584   : > { %v6773_v12 = vmax.f32 %v6741_v27, 0.0  ;;  %v5853_v34 = vadd.f32 %v10226_v17, %v5723_v1  ;;  %v6625_v18 = vpop.f32.mrf.mxu0  ;;  %v10357_v14 = vpop.f32.mrf.mxu3 }
 0x586   : > { %6805 = vst.msk [vmem:[%s10339_s22 + $0x8] sm:$0xff] %vm4989_vm2, %v6773_v12  ;;  %v6670_v31 = vadd.f32 %v10202_v11, %v5853_v34 }
 0x588   : > { %v6706_v16 = vmul.f32 %v10316_v26, %v6670_v31 }
 0x589   : > { %7021 = vmatmul.msk.bf16.gmra.mxu3 %vm5672_vm5, %v5053_v32 }
 0x58a   : > { %v6742_v10 = vadd.f32 %v10329_v29, %v6706_v16 }
 0x58b   : > { %v5725_v17 = vpop.f32.mrf.mxu2 }
 0x58c   : > { %v6774_v51 = vmax.f32 %v6742_v10, 0.0  ;;  %v5855_v40 = vadd.f32 %v10240_v45, %v5725_v17  ;;  %v6628_v63 = vpop.f32.mrf.mxu0  ;;  %v5882_v49 = vpop.f32.mrf.mxu3 }
 0x58d   : > { %v5883_v11 = vadd.f32 %v5882_v49, %v9834_v42 }
 0x58e   : > { %6806 = vst.msk [vmem:[%s10339_s22 + $0x10] sm:$0xff] %vm4989_vm2, %v6774_v51  ;;  %v6671_v61 = vadd.f32 %v10212_v37, %v5855_v40 }
 0x58f   : > { %v6682_v60 = vadd.f32 %v6623_v47, %v5883_v11 }
 0x590   : > { %v6707_v44 = vmul.f32 %v10316_v26, %v6671_v61 }
 0x591   : > { %v6718_v0 = vmul.f32 %v10316_v26, %v6682_v60 }
 0x592   : > { %v6743_v41 = vadd.f32 %v10329_v29, %v6707_v44 }
 0x593   : > { %v5728_v13 = vpop.f32.mrf.mxu2  ;;  %v6754_v45 = vadd.f32 %v10329_v29, %v6718_v0  ;;  %v10585_v0 = vld [vmem:[#allocation4_spill] sm:$0xff] }
 0x594   : > { %v6775_v50 = vmax.f32 %v6743_v41, 0.0  ;;  %v5858_v25 = vadd.f32 %v10248_v48, %v5728_v13  ;;  %v6630_v9 = vpop.f32.mrf.mxu0  ;;  %v5884_v52 = vpop.f32.mrf.mxu3 }
 0x595   : > { %v6786_v37 = vmax.f32 %v6754_v45, 0.0  ;;  %v5885_v47 = vadd.f32 %v5884_v52, %v9859_v8 }
 0x596   : > { %6807 = vst.msk [vmem:[%s10339_s22 + $0x18] sm:$0xff] %vm4989_vm2, %v6775_v50  ;;  %v6672_v42 = vadd.f32 %v10224_v38, %v5858_v25 }
 0x597   : > { %6818 = vst.msk [vmem:[%s10339_s22 + $0x70] sm:$0xff] %vm4989_vm2, %v6786_v37  ;;  %v6683_v1 = vadd.f32 %v6625_v18, %v5885_v47 }
 0x598   : > { %v6708_v27 = vmul.f32 %v10316_v26, %v6672_v42 }
 0x599   : > { %v6719_v48 = vmul.f32 %v10316_v26, %v6683_v1 }
 0x59a   : > { %v6744_v12 = vadd.f32 %v10329_v29, %v6708_v27 }
 0x59b   : > { %v5730_v34 = vpop.f32.mrf.mxu2  ;;  %v6755_v31 = vadd.f32 %v10329_v29, %v6719_v48 }
 0x59c   : > { %v6776_v59 = vmax.f32 %v6744_v12, 0.0  ;;  %v5860_v16 = vadd.f32 %v10263_v6, %v5730_v34  ;;  %v6633_v32 = vpop.f32.mrf.mxu0  ;;  %v5887_v38 = vpop.f32.mrf.mxu3  ;;  %v10586_v12 = vld [vmem:[#allocation5_spill] sm:$0xff] }
 0x59d   : > { %v6787_v8 = vmax.f32 %v6755_v31, 0.0  ;;  %v5888_v18 = vadd.f32 %v5887_v38, %v9880_v19 }
 0x59e   : > { %6808 = vst.msk [vmem:[%s10339_s22 + $0x20] sm:$0xff] %vm4989_vm2, %v6776_v59  ;;  %v6673_v10 = vadd.f32 %v10236_v46, %v5860_v16 }
 0x59f   : > { %6819 = vst.msk [vmem:[%s10339_s22 + $0x78] sm:$0xff] %vm4989_vm2, %v6787_v8  ;;  %v6684_v51 = vadd.f32 %v6628_v63, %v5888_v18 }
 0x5a0   : > { %v6709_v17 = vmul.f32 %v10316_v26, %v6673_v10 }
 0x5a1   : > { %v6720_v6 = vmul.f32 %v10316_v26, %v6684_v51  ;;  %v10587_v51 = vld [vmem:[#allocation6_spill] sm:$0xff] }
 0x5a2   : > { %v6745_v40 = vadd.f32 %v10329_v29, %v6709_v17 }
 0x5a3   : > { %v5733_v49 = vpop.f32.mrf.mxu2  ;;  %v6756_v11 = vadd.f32 %v10329_v29, %v6720_v6 }
 0x5a4   : > { %v6777_v61 = vmax.f32 %v6745_v40, 0.0  ;;  %v5863_v44 = vadd.f32 %v10271_v28, %v5733_v49  ;;  %v6635_v60 = vpop.f32.mrf.mxu0  ;;  %v5889_v46 = vpop.f32.mrf.mxu3 }
 0x5a5   : > { %v6788_v19 = vmax.f32 %v6756_v11, 0.0  ;;  %v5890_v63 = vadd.f32 %v5889_v46, %v10585_v0  ;;  %v10588_v0 = vld [vmem:[#allocation7_spill] sm:$0xff] }
 0x5a6   : > { %6809 = vst.msk [vmem:[%s10339_s22 + $0x28] sm:$0xff] %vm4989_vm2, %v6777_v61  ;;  %v6674_v41 = vadd.f32 %v10246_v43, %v5863_v44 }
 0x5a7   : > { %6820 = vst.msk [vmem:[%s10339_s22 + $0x80] sm:$0xff] %vm4989_vm2, %v6788_v19  ;;  %v6685_v50 = vadd.f32 %v6630_v9, %v5890_v63 }
 0x5a8   : > { %v6710_v13 = vmul.f32 %v10316_v26, %v6674_v41 }
 0x5a9   : > { %v6721_v28 = vmul.f32 %v10316_v26, %v6685_v50 }
 0x5aa   : > { %v6746_v45 = vadd.f32 %v10329_v29, %v6710_v13 }
 0x5ab   : > { %v5735_v25 = vpop.f32.mrf.mxu2  ;;  %v6757_v37 = vadd.f32 %v10329_v29, %v6721_v28 }
 0x5ac   : > { %v6778_v52 = vmax.f32 %v6746_v45, 0.0  ;;  %v5865_v42 = vadd.f32 %v10283_v62, %v5735_v25  ;;  %v6638_v47 = vpop.f32.mrf.mxu0  ;;  %v5892_v43 = vpop.f32.mrf.mxu3 }
 0x5ad   : > { %v6789_v27 = vmax.f32 %v6757_v37, 0.0  ;;  %v5893_v9 = vadd.f32 %v5892_v43, %v10586_v12 }
 0x5ae   : > { %6810 = vst.msk [vmem:[%s10339_s22 + $0x30] sm:$0xff] %vm4989_vm2, %v6778_v52  ;;  %v6675_v1 = vadd.f32 %v10258_v15, %v5865_v42 }
 0x5af   : > { %6821 = vst.msk [vmem:[%s10339_s22 + $0x88] sm:$0xff] %vm4989_vm2, %v6789_v27  ;;  %v6686_v34 = vadd.f32 %v6633_v32, %v5893_v9  ;;  %v10589_v27 = vld [vmem:[#allocation8_spill] sm:$0xff] }
 0x5b0   : > { %v6711_v48 = vmul.f32 %v10316_v26, %v6675_v1 }
 0x5b1   : > { %v6722_v62 = vmul.f32 %v10316_v26, %v6686_v34 }
 0x5b2   : > { %v6747_v59 = vadd.f32 %v10329_v29, %v6711_v48 }
 0x5b3   : > { %v5738_v31 = vpop.f32.mrf.mxu2  ;;  %v6758_v38 = vadd.f32 %v10329_v29, %v6722_v62 }
 0x5b4   : > { %v6779_v16 = vmax.f32 %v6747_v59, 0.0  ;;  %v5868_v8 = vadd.f32 %v10291_v30, %v5738_v31  ;;  %v6640_v10 = vpop.f32.mrf.mxu0  ;;  %v5894_v15 = vpop.f32.mrf.mxu3 }
 0x5b5   : > { %v6790_v18 = vmax.f32 %v6758_v38, 0.0  ;;  %v5895_v32 = vadd.f32 %v5894_v15, %v10587_v51 }
 0x5b6   : > { %6811 = vst.msk [vmem:[%s10339_s22 + $0x38] sm:$0xff] %vm4989_vm2, %v6779_v16  ;;  %v6676_v17 = vadd.f32 %v10269_v7, %v5868_v8 }
 0x5b7   : > { %6822 = vst.msk [vmem:[%s10339_s22 + $0x90] sm:$0xff] %vm4989_vm2, %v6790_v18  ;;  %v6687_v6 = vadd.f32 %v6635_v60, %v5895_v32 }
 0x5b8   : > { %v6712_v40 = vmul.f32 %v10316_v26, %v6676_v17 }
 0x5b9   : > { %v6723_v30 = vmul.f32 %v10316_v26, %v6687_v6 }
 0x5ba   : > { %v6748_v49 = vadd.f32 %v10329_v29, %v6712_v40 }
 0x5bb   : > { %v5740_v61 = vpop.f32.mrf.mxu2  ;;  %v6759_v44 = vadd.f32 %v10329_v29, %v6723_v30 }
 0x5bc   : > { %v6780_v11 = vmax.f32 %v6748_v49, 0.0  ;;  %v5870_v46 = vadd.f32 %v10300_v24, %v5740_v61  ;;  %v5897_v19 = vpop.f32.mrf.mxu3  ;;  %v6643_v60 = vpop.f32.mrf.mxu0 }
 0x5bd   : > { %v6791_v7 = vmax.f32 %v6759_v44, 0.0  ;;  %v5898_v63 = vadd.f32 %v5897_v19, %v10588_v0 }
 0x5be   : > { %6812 = vst.msk [vmem:[%s10339_s22 + $0x40] sm:$0xff] %vm4989_vm2, %v6780_v11  ;;  %v6677_v41 = vadd.f32 %v10279_v54, %v5870_v46 }
 0x5bf   : > { %6823 = vst.msk [vmem:[%s10339_s22 + $0x98] sm:$0xff] %vm4989_vm2, %v6791_v7  ;;  %v6688_v50 = vadd.f32 %v6638_v47, %v5898_v63 }
 0x5c0   : > { %v6713_v13 = vmul.f32 %v10316_v26, %v6677_v41 }
 0x5c1   : > { %v6724_v24 = vmul.f32 %v10316_v26, %v6688_v50 }
 0x5c2   : > { %v6749_v45 = vadd.f32 %v10329_v29, %v6713_v13 }
 0x5c3   : > { %v5743_v28 = vpop.f32.mrf.mxu2  ;;  %v6760_v52 = vadd.f32 %v10329_v29, %v6724_v24 }
 0x5c4   : > { %v6781_v25 = vmax.f32 %v6749_v45, 0.0  ;;  %v5873_v37 = vadd.f32 %v10308_v36, %v5743_v28  ;;  %v5899_v54 = vpop.f32.mrf.mxu3  ;;  %v6645_v9 = vpop.f32.mrf.mxu0 }
 0x5c5   : > { %v6792_v42 = vmax.f32 %v6760_v52, 0.0  ;;  %v5900_v1 = vadd.f32 %v5899_v54, %v10589_v27 }
 0x5c6   : > { %6813 = vst.msk [vmem:[%s10339_s22 + $0x48] sm:$0xff] %vm4989_vm2, %v6781_v25  ;;  %v6678_v43 = vadd.f32 %v10289_v56, %v5873_v37 }
 0x5c7   : > { %6824 = vst.msk [vmem:[%s10339_s22 + $0xa0] sm:$0xff] %vm4989_vm2, %v6792_v42  ;;  %v6689_v12 = vadd.f32 %v6640_v10, %v5900_v1 }
 0x5c8   : > { %v6714_v47 = vmul.f32 %v10316_v26, %v6678_v43 }
 0x5c9   : > { %v6725_v36 = vmul.f32 %v10316_v26, %v6689_v12 }
 0x5ca   : > { %v6750_v48 = vadd.f32 %v10329_v29, %v6714_v47 }
 0x5cb   : > { %v5745_v34 = vpop.f32.mrf.mxu2  ;;  %v6761_v62 = vadd.f32 %v10329_v29, %v6725_v36 }
 0x5cc   : > { %v6782_v59 = vmax.f32 %v6750_v48, 0.0  ;;  %v5875_v31 = vadd.f32 %v10323_v20, %v5745_v34  ;;  %v5902_v56 = vpop.f32.mrf.mxu3  ;;  %v6648_v20 = vpop.f32.mrf.mxu0 }
 0x5cd   : > { %v6793_v16 = vmax.f32 %v6761_v62, 0.0  ;;  %v5903_v8 = vadd.f32 %v5902_v56, %v10056_v2 }
 0x5ce   : > { %6814 = vst.msk [vmem:[%s10339_s22 + $0x50] sm:$0xff] %vm4989_vm2, %v6782_v59  ;;  %v6679_v38 = vadd.f32 %v10295_v4, %v5875_v31 }
 0x5cf   : > { %6825 = vst.msk [vmem:[%s10339_s22 + $0xa8] sm:$0xff] %vm4989_vm2, %v6793_v16  ;;  %v6690_v15 = vadd.f32 %v6643_v60, %v5903_v8 }
 0x5d0   : > { %v6715_v10 = vmul.f32 %v10316_v26, %v6679_v38 }
 0x5d1   : > { %v6726_v17 = vmul.f32 %v10316_v26, %v6690_v15 }
 0x5d2   : > { %v6751_v18 = vadd.f32 %v10329_v29, %v6715_v10 }
 0x5d3   : > { %v5748_v51 = vpop.f32.mrf.mxu2  ;;  %v6762_v40 = vadd.f32 %v10329_v29, %v6726_v17 }
 0x5d4   : > { %v6783_v32 = vmax.f32 %v6751_v18, 0.0  ;;  %v5878_v6 = vadd.f32 %v10344_v35, %v5748_v51  ;;  %v5904_v4 = vpop.f32.mrf.mxu3 }
 0x5d5   : > { %v6794_v2 = vmax.f32 %v6762_v40, 0.0  ;;  %v5905_v30 = vadd.f32 %v5904_v4, %v10079_v23 }
 0x5d6   : > { %6815 = vst.msk [vmem:[%s10339_s22 + $0x58] sm:$0xff] %vm4989_vm2, %v6783_v32  ;;  %v6680_v49 = vadd.f32 %v10306_v22, %v5878_v6  ;;  %v6650_v22 = vpop.f32.mrf.mxu0 }
 0x5d7   : > { %6826 = vst.msk [vmem:[%s10339_s22 + $0xb0] sm:$0xff] %vm4989_vm2, %v6794_v2  ;;  %v6691_v11 = vadd.f32 %v6645_v9, %v5905_v30 }
 0x5d8   : > { %v6716_v61 = vmul.f32 %v10316_v26, %v6680_v49 }
 0x5d9   : > { %v6727_v46 = vmul.f32 %v10316_v26, %v6691_v11 }
 0x5da   : > { %v6752_v44 = vadd.f32 %v10329_v29, %v6716_v61 }
 0x5db   : > { %v5750_v35 = vpop.f32.mrf.mxu2  ;;  %v6763_v7 = vadd.f32 %v10329_v29, %v6727_v46 }
 0x5dc   : > { %v6784_v19 = vmax.f32 %v6752_v44, 0.0  ;;  %v5880_v41 = vadd.f32 %v10357_v14, %v5750_v35  ;;  %v5907_v0 = vpop.f32.mrf.mxu3 }
 0x5dd   : > { %v6795_v23 = vmax.f32 %v6763_v7, 0.0  ;;  %v5908_v60 = vadd.f32 %v5907_v0, %v10100_v39 }
 0x5de   : > { %6816 = vst.msk [vmem:[%s10339_s22 + $0x60] sm:$0xff] %vm4989_vm2, %v6784_v19  ;;  %v6681_v63 = vadd.f32 %v10318_v57, %v5880_v41  ;;  %v6653_v39 = vpop.f32.mrf.mxu0 }
 0x5df   : > { %6827 = vst.msk [vmem:[%s10339_s22 + $0xb8] sm:$0xff] %vm4989_vm2, %v6795_v23  ;;  %v6692_v50 = vadd.f32 %v6648_v20, %v5908_v60 }
 0x5e0   : > { %v6717_v13 = vmul.f32 %v10316_v26, %v6681_v63 }
 0x5e1   : > { %v6728_v14 = vmul.f32 %v10316_v26, %v6692_v50 }
 0x5e2   : > { %v6753_v45 = vadd.f32 %v10329_v29, %v6717_v13 }
 0x5e3   : > { %v6764_v28 = vadd.f32 %v10329_v29, %v6728_v14 }
 0x5e4   : > { %v6785_v24 = vmax.f32 %v6753_v45, 0.0  ;;  %v5909_v25 = vpop.f32.mrf.mxu3 }
 0x5e5   : > { %v6796_v52 = vmax.f32 %v6764_v28, 0.0  ;;  %v5910_v57 = vadd.f32 %v5909_v25, %v10105_v33 }
 0x5e6   : > { %6817 = vst.msk [vmem:[%s10339_s22 + $0x68] sm:$0xff] %vm4989_vm2, %v6785_v24  ;;  %v6655_v12 = vpop.f32.mrf.mxu0 }
 0x5e7   : > { %6828 = vst.msk [vmem:[%s10339_s22 + $0xc0] sm:$0xff] %vm4989_vm2, %v6796_v52  ;;  %v6693_v37 = vadd.f32 %v6650_v22, %v5910_v57 }
 0x5e9   : > { %v6729_v54 = vmul.f32 %v10316_v26, %v6693_v37 }
 0x5eb   : > { %v6765_v42 = vadd.f32 %v10329_v29, %v6729_v54 }
 0x5ec   : > { %v5912_v43 = vpop.f32.mrf.mxu3 }
 0x5ed   : > { %v6797_v27 = vmax.f32 %v6765_v42, 0.0  ;;  %v5913_v1 = vadd.f32 %v5912_v43, %v10117_v58 }
 0x5ee   : > { %v6658_v58 = vpop.f32.mrf.mxu0 }
 0x5ef   : > { %6829 = vst.msk [vmem:[%s10339_s22 + $0xc8] sm:$0xff] %vm4989_vm2, %v6797_v27  ;;  %v6694_v47 = vadd.f32 %v6653_v39, %v5913_v1 }
 0x5f1   : > { %v6730_v33 = vmul.f32 %v10316_v26, %v6694_v47 }
 0x5f3   : > { %v6766_v9 = vadd.f32 %v10329_v29, %v6730_v33 }
 0x5f4   : > { %v5914_v48 = vpop.f32.mrf.mxu3 }
 0x5f5   : > { %v6798_v36 = vmax.f32 %v6766_v9, 0.0  ;;  %v5915_v34 = vadd.f32 %v5914_v48, %v10130_v53 }
 0x5f6   : > { %v6660_v15 = vpop.f32.mrf.mxu0 }
 0x5f7   : > { %6830 = vst.msk [vmem:[%s10339_s22 + $0xd0] sm:$0xff] %vm4989_vm2, %v6798_v36  ;;  %v6695_v59 = vadd.f32 %v6655_v12, %v5915_v34 }
 0x5f9   : > { %v6731_v62 = vmul.f32 %v10316_v26, %v6695_v59 }
 0x5fb   : > { %v6767_v31 = vadd.f32 %v10329_v29, %v6731_v62 }
 0x5fc   : > { %v5917_v56 = vpop.f32.mrf.mxu3 }
 0x5fd   : > { %v6799_v16 = vmax.f32 %v6767_v31, 0.0  ;;  %v5918_v38 = vadd.f32 %v5917_v56, %v10148_v21 }
 0x5fe   : > { %v6663_v40 = vpop.f32.mrf.mxu0 }
 0x5ff   : > { %6831 = vst.msk [vmem:[%s10339_s22 + $0xd8] sm:$0xff] %vm4989_vm2, %v6799_v16  ;;  %v6696_v8 = vadd.f32 %v6658_v58, %v5918_v38 }
 0x601   : > { %v6732_v10 = vmul.f32 %v10316_v26, %v6696_v8 }
 0x603   : > { %v6768_v53 = vadd.f32 %v10329_v29, %v6732_v10 }
 0x604   : > { %v5919_v18 = vpop.f32.mrf.mxu3 }
 0x605   : > { %v6800_v17 = vmax.f32 %v6768_v53, 0.0  ;;  %v5920_v20 = vadd.f32 %v5919_v18, %v10163_v3 }
 0x606   : > { %v6665_v46 = vpop.f32.mrf.mxu0 }
 0x607   : > { %6832 = vst.msk [vmem:[%s10339_s22 + $0xe0] sm:$0xff] %vm4989_vm2, %v6800_v17  ;;  %v6697_v51 = vadd.f32 %v6660_v15, %v5920_v20 }
 0x609   : > { %v6733_v32 = vmul.f32 %v10316_v26, %v6697_v51 }
 0x60b   : > { %v6769_v21 = vadd.f32 %v10329_v29, %v6733_v32 }
 0x60c   : > { %v5922_v6 = vpop.f32.mrf.mxu3 }
 0x60d   : > { %v6801_v4 = vmax.f32 %v6769_v21, 0.0  ;;  %v5923_v2 = vadd.f32 %v5922_v6, %v10177_v5 }
 0x60f   : > { %6833 = vst.msk [vmem:[%s10339_s22 + $0xe8] sm:$0xff] %vm4989_vm2, %v6801_v4  ;;  %v6698_v49 = vadd.f32 %v6663_v40, %v5923_v2 }
 0x611   : > { %v6734_v30 = vmul.f32 %v10316_v26, %v6698_v49 }
 0x613   : > { %v6770_v3 = vadd.f32 %v10329_v29, %v6734_v30 }
 0x614   : > { %v5924_v61 = vpop.f32.mrf.mxu3 }
 0x615   : > { %v6802_v11 = vmax.f32 %v6770_v3, 0.0  ;;  %v5925_v44 = vadd.f32 %v5924_v61, %v10187_v55 }
 0x617   : > { %6834 = vst.msk [vmem:[%s10339_s22 + $0xf0] sm:$0xff] %vm4989_vm2, %v6802_v11  ;;  %v6699_v35 = vadd.f32 %v6665_v46, %v5925_v44 }
 0x619   : > { %v6735_v19 = vmul.f32 %v10316_v26, %v6699_v35 }
 0x61b   : > { %v6771_v7 = vadd.f32 %v10329_v29, %v6735_v19 }
 0x61d   : > { %v6803_v5 = vmax.f32 %v6771_v7, 0.0 }
 0x61f   : > { %6835 = vst.msk [vmem:[%s10339_s22 + $0xf8] sm:$0xff] %vm4989_vm2, %v6803_v5 }
 0x620 PF: > { %s18_s27 = sadd.s32 1, %s7621_s27  }
 0x621   : > { %p15_p4 = scmp.ge.s32.totalorder %s18_s27, 4  }
 0x623   :  { %17 = sbr.rel (!%p15_p4) target bundleno = 1 (0x1), region = 95 }

</bundles_post_ra>
